<compile_context>
chip_gen: v7x
topology: tpu7x:2x2x1
jax: 0.10.0
libtpu: 0.0.40
codegen_flags: <defaults>
</compile_context>

<pallas_src>
import functools

import jax
import jax.numpy as jnp
from jax.experimental import pallas as pl
from jax.experimental.pallas import tpu as pltpu

_BN_EPS = 1e-5


def _round_up(x, m):
    return (x + m - 1) // m * m


# ----------------------------------------------------------------------------
# Pallas kernel: grouped fused matmul + bias + optional ReLU (K fully resident)
#   out[g] = act( A[ga] @ W[g] + b[g] )
#   A: (Ga, M, K) bf16, W: (G, K, N) bf16, b: (G, N) f32, Ga in {1, G}
# ----------------------------------------------------------------------------
def _mm_bias_act_kernel(a_ref, w_ref, b_ref, o_ref, *, apply_relu):
    acc = jnp.dot(a_ref[0], w_ref[0], preferred_element_type=jnp.float32)
    acc = acc + b_ref[0]
    if apply_relu:
        acc = jnp.maximum(acc, 0.0)
    o_ref[0] = acc.astype(o_ref.dtype)


def grouped_matmul_bias_act(a, w, b, *, apply_relu, out_dtype=jnp.bfloat16,
                            tm_max=256, tn_max=256):
    """Fused act(A @ W + b), grouped over a leading (parallel) branch axis.

    a: (Ga, M, K)  -- Ga == 1 means the A operand is shared by all groups.
    w: (G, K, N)   b: (G, N)
    """
    Ga, M, K = a.shape
    G, K2, N = w.shape
    assert K == K2 and Ga in (1, G)

    Kp = _round_up(K, 128)                      # single K block (K <= 2304 here)
    tn = min(tn_max, _round_up(N, 128))
    Np = _round_up(N, tn)
    if M <= tm_max:
        tm = _round_up(M, 8)
        Mp = tm
    else:
        tm = tm_max
        Mp = _round_up(M, tm)

    a_p = jnp.pad(a.astype(jnp.bfloat16), ((0, 0), (0, Mp - M), (0, Kp - K)))
    w_p = jnp.pad(w.astype(jnp.bfloat16), ((0, 0), (0, Kp - K), (0, Np - N)))
    b_p = jnp.pad(b.astype(jnp.float32), ((0, 0), (0, Np - N))).reshape(G, 1, Np)

    if Ga == 1:
        a_map = lambda g, i, j: (0, i, 0)       # shared A across branches
    else:
        a_map = lambda g, i, j: (g, i, 0)

    out = pl.pallas_call(
        functools.partial(_mm_bias_act_kernel, apply_relu=apply_relu),
        out_shape=jax.ShapeDtypeStruct((G, Mp, Np), out_dtype),
        grid_spec=pltpu.PrefetchScalarGridSpec(
            num_scalar_prefetch=0,
            grid=(G, Mp // tm, Np // tn),
            in_specs=[
                pl.BlockSpec((1, tm, Kp), a_map),
                pl.BlockSpec((1, Kp, tn), lambda g, i, j: (g, 0, j)),
                pl.BlockSpec((1, 1, tn), lambda g, i, j: (g, 0, j)),
            ],
            out_specs=pl.BlockSpec((1, tm, tn), lambda g, i, j: (g, i, j)),
        ),
        compiler_params=pltpu.CompilerParams(
            dimension_semantics=("parallel", "parallel", "parallel")
        ),
    )(a_p, w_p, b_p)
    return out[:, :M, :N]


# ----------------------------------------------------------------------------
# Glue ops (plain JAX, fused under jit): im2col, max-pool, global-avg-pool
# ----------------------------------------------------------------------------
def im2col(x, kh, kw, stride=1, pad=0):
    """x: (N,H,W,C) -> (N*OH*OW, kh*kw*C), pos-major / (kh,kw,C)-minor."""
    if pad:
        x = jnp.pad(x, ((0, 0), (pad, pad), (pad, pad), (0, 0)))
    N, H, W, C = x.shape
    OH = (H - kh) // stride + 1
    OW = (W - kw) // stride + 1
    cols = []
    for i in range(kh):
        for j in range(kw):
            cols.append(
                x[:, i: i + OH * stride: stride, j: j + OW * stride: stride, :]
            )
    patches = jnp.stack(cols, axis=3)           # (N, OH, OW, kh*kw, C)
    return patches.reshape(N * OH * OW, kh * kw * C), (OH, OW)


def maxpool2(x):
    """nn.MaxPool2d(2,2), floor semantics. x: (G,B,H,W,C)."""
    G, B, H, W, C = x.shape
    H2, W2 = H // 2, W // 2
    x = x[:, :, : H2 * 2, : W2 * 2, :]
    return x.reshape(G, B, H2, 2, W2, 2, C).max(axis=(3, 5))


# ----------------------------------------------------------------------------
# Conv + BN(eval, folded) + ReLU via the grouped Pallas matmul
# ----------------------------------------------------------------------------
def conv_bn_relu(x, w_g, b_g, *, kh, kw, pad=0, relu=True):
    """x: (Ga,B,H,W,C) bf16; w_g: (G, kh*kw*C, Cout); b_g: (G, Cout).
    Returns (G, B, OH, OW, Cout) bf16."""
    Ga, B, H, W, C = x.shape
    G, _, cout = w_g.shape
    patches, (OH, OW) = im2col(x.reshape(Ga * B, H, W, C), kh, kw, pad=pad)
    patches = patches.reshape(Ga, B * OH * OW, kh * kw * C)
    out = grouped_matmul_bias_act(patches, w_g, b_g, apply_relu=relu)
    return out.reshape(G, B, OH, OW, cout)


# ----------------------------------------------------------------------------
# Parameter construction (deterministic, synthetic) + BN folding
# ----------------------------------------------------------------------------
def make_conv_bn_params(key, cin, cout, k):
    k1, k2, k3, k4, k5, k6 = jax.random.split(key, 6)
    return dict(
        w=0.05 * jax.random.normal(k1, (cout, cin, k, k), jnp.float32),
        b=0.05 * jax.random.normal(k2, (cout,), jnp.float32),
        gamma=1.0 + 0.1 * jax.random.normal(k3, (cout,), jnp.float32),
        beta=0.1 * jax.random.normal(k4, (cout,), jnp.float32),
        mean=0.1 * jax.random.normal(k5, (cout,), jnp.float32),
        var=0.9 + 0.1 * jnp.abs(jax.random.normal(k6, (cout,), jnp.float32)),
    )


def make_base_params(key):
    ks = jax.random.split(key, 4)
    return dict(
        conv1=make_conv_bn_params(ks[0], 3, 64, 5),
        conv2=make_conv_bn_params(ks[1], 64, 128, 3),
        conv3=make_conv_bn_params(ks[2], 128, 128, 3),
        conv4=make_conv_bn_params(ks[3], 128, 128, 3),
    )


def make_branch_params(key):
    ks = jax.random.split(key, 6)
    return dict(
        conv1=make_conv_bn_params(ks[0], 128, 128, 3),
        conv2=make_conv_bn_params(ks[1], 128, 256, 3),
        conv3=make_conv_bn_params(ks[2], 256, 256, 3),
        conv4=make_conv_bn_params(ks[3], 256, 512, 3),
        fc_w=0.05 * jax.random.normal(ks[4], (8, 512), jnp.float32),
        fc_b=0.05 * jax.random.normal(ks[5], (8,), jnp.float32),
    )


def fold_conv_bn(p):
    """Fold eval-mode BN into conv; weight -> (kh*kw*Cin, Cout) bf16, bias f32."""
    cout = p["w"].shape[0]
    w_mat = jnp.transpose(p["w"], (2, 3, 1, 0)).reshape(-1, cout)  # (kh,kw,Cin,Cout)
    scale = p["gamma"] / jnp.sqrt(p["var"] + _BN_EPS)
    w_folded = (w_mat * scale[None, :]).astype(jnp.bfloat16)
    b_folded = ((p["b"] - p["mean"]) * scale + p["beta"]).astype(jnp.float32)
    return w_folded, b_folded


def fold_base_params(base_params):
    out = {}
    for name in ("conv1", "conv2", "conv3", "conv4"):
        w, b = fold_conv_bn(base_params[name])
        out[name] = (w[None], b[None])          # add G=1 leading dim
    return out


def fold_branch_params(branch_params_list):
    """Stack folded per-branch params along a leading branch (G) axis."""
    fps = {}
    for name in ("conv1", "conv2", "conv3", "conv4"):
        ws, bs = zip(*(fold_conv_bn(bp[name]) for bp in branch_params_list))
        fps[name + "_w"] = jnp.stack(ws)
        fps[name + "_b"] = jnp.stack(bs)
    fps["fc_w"] = jnp.stack([bp["fc_w"].T.astype(jnp.float32)
                             for bp in branch_params_list])       # (G, 512, 8)
    fps["fc_b"] = jnp.stack([bp["fc_b"].astype(jnp.float32)
                             for bp in branch_params_list])       # (G, 8)
    return fps


# ----------------------------------------------------------------------------
# Forward passes (mirror PyTorch Base / Branch / Ensemble)
# ----------------------------------------------------------------------------
def base_forward(fp, x):
    # x: (1, B, H, W, 3) bf16
    x = conv_bn_relu(x, *fp["conv1"], kh=5, kw=5)           # relu(bn1(conv1))
    x = maxpool2(conv_bn_relu(x, *fp["conv2"], kh=3, kw=3))  # pool(relu(bn2(conv2)))
    x = conv_bn_relu(x, *fp["conv3"], kh=3, kw=3)            # relu(bn3(conv3))
    x = maxpool2(conv_bn_relu(x, *fp["conv4"], kh=3, kw=3))  # pool(relu(bn4(conv4)))
    return x                                                 # (1, B, h, w, 128)


def branches_forward(fps, x_shared):
    # All branches processed together; branch index = leading parallel grid dim.
    x = conv_bn_relu(x_shared, fps["conv1_w"], fps["conv1_b"], kh=3, kw=3)  # shared A
    x = maxpool2(conv_bn_relu(x, fps["conv2_w"], fps["conv2_b"], kh=3, kw=3))
    x = conv_bn_relu(x, fps["conv3_w"], fps["conv3_b"], kh=3, kw=3)
    x = conv_bn_relu(x, fps["conv4_w"], fps["conv4_b"], kh=3, kw=3, pad=1)
    x = x.astype(jnp.float32).mean(axis=(2, 3))              # AdaptiveAvgPool2d(1) -> (G,B,512)
    # Tiny FC (2x512x8): plain jnp — padding to MXU tiles would be >100x waste.
    y = jnp.einsum("gbk,gkn->gbn", x, fps["fc_w"]) + fps["fc_b"][:, None, :]
    return y                                                 # (G, B, 8) f32


@jax.jit
def ensemble_forward(folded_base, folded_branches, x_nchw):
    x = jnp.transpose(x_nchw, (0, 2, 3, 1)).astype(jnp.bfloat16)[None]  # (1,B,H,W,3)
    x_shared = base_forward(folded_base, x)
    y = branches_forward(folded_branches, x_shared)          # (G, B, 8)
    return [y[g] for g in range(y.shape[0])]


# ----------------------------------------------------------------------------
if __name__ == "__main__":
    key = jax.random.PRNGKey(0)
    k_in, k_base, k_b0, k_b1 = jax.random.split(key, 4)

    # Smallest spatial size that survives the full conv stack is ~54; use 64.
    B, C, H, W = 2, 3, 64, 64
    x = jax.random.normal(k_in, (B, C, H, W), jnp.float32)

    base_params = make_base_params(k_base)
    branch_params = [make_branch_params(k_b0), make_branch_params(k_b1)]  # 2 branches

    folded_base = fold_base_params(base_params)        # BN folded + bf16, done once
    folded_branches = fold_branch_params(branch_params)

    outs = ensemble_forward(folded_base, folded_branches, x)
    outs = [jax.block_until_ready(o) for o in outs]

    assert len(outs) == 2
    for o in outs:
        assert o.shape == (B, 8), o.shape
        assert o.dtype == jnp.float32
        assert bool(jnp.all(jnp.isfinite(o)))

    print("KERNEL_OK")
</pallas_src>

<mosaic_0001>
module attributes {stable_mosaic.version = 11 : i64} {
  func.func @_mm_bias_act_kernel(%arg0: i32, %arg1: i32, %arg2: i32, %arg3: memref<1x256x128xbf16, #tpu.memory_space<vmem>>, %arg4: memref<1x128x128xbf16, #tpu.memory_space<vmem>>, %arg5: memref<1x1x128xf32, #tpu.memory_space<vmem>>, %arg6: memref<1x256x128xbf16, #tpu.memory_space<vmem>>) attributes {dimension_semantics = [#tpu.dimension_semantics<parallel>, #tpu.dimension_semantics<parallel>, #tpu.dimension_semantics<parallel>], iteration_bounds = array<i64: 1, 29, 1>, scalar_prefetch = 0 : i64, scratch_operands = 0 : i64, tpu.core_type = #tpu.core_type<tc>, window_params = [{transform_indices = @transform_0, window_bounds = array<i64: 1, 256, 128>}, {transform_indices = @transform_1, window_bounds = array<i64: 1, 128, 128>}, {transform_indices = @transform_2, window_bounds = array<i64: 1, 1, 128>}, {transform_indices = @transform_3, window_bounds = array<i64: 1, 256, 128>}]} {
    %c0 = arith.constant 0 : index
    %c0_0 = arith.constant 0 : index
    %c0_1 = arith.constant 0 : index
    %0 = vector.load %arg3[%c0, %c0_0, %c0_1] : memref<1x256x128xbf16, #tpu.memory_space<vmem>>, vector<1x256x128xbf16>
    %1 = vector.shape_cast %0 : vector<1x256x128xbf16> to vector<256x128xbf16>
    %c0_2 = arith.constant 0 : index
    %c0_3 = arith.constant 0 : index
    %c0_4 = arith.constant 0 : index
    %2 = vector.load %arg4[%c0_2, %c0_3, %c0_4] : memref<1x128x128xbf16, #tpu.memory_space<vmem>>, vector<1x128x128xbf16>
    %3 = vector.shape_cast %2 : vector<1x128x128xbf16> to vector<128x128xbf16>
    %cst = arith.constant dense<0.000000e+00> : vector<256x128xf32>
    %4 = tpu.matmul %1, %3, %cst {dimension_numbers = #tpu.dot_dimension_numbers<[1], [0], [0], [1], [0, 0, 1, 1], [], []>} : vector<256x128xbf16>, vector<128x128xbf16>, vector<256x128xf32> -> vector<256x128xf32>
    %c0_5 = arith.constant 0 : index
    %c0_6 = arith.constant 0 : index
    %c0_7 = arith.constant 0 : index
    %5 = vector.load %arg5[%c0_5, %c0_6, %c0_7] : memref<1x1x128xf32, #tpu.memory_space<vmem>>, vector<1x1x128xf32>
    %6 = vector.shape_cast %5 : vector<1x1x128xf32> to vector<1x128xf32>
    %7 = vector.broadcast %6 : vector<1x128xf32> to vector<256x128xf32>
    %8 = arith.addf %4, %7 : vector<256x128xf32>
    %cst_8 = arith.constant 0.000000e+00 : f32
    %9 = vector.broadcast %cst_8 : f32 to vector<256x128xf32>
    %10 = arith.maximumf %8, %9 : vector<256x128xf32>
    %11 = arith.truncf %10 : vector<256x128xf32> to vector<256x128xbf16>
    %c0_9 = arith.constant 0 : index
    %c0_10 = arith.constant 0 : index
    %c0_11 = arith.constant 0 : index
    %12 = vector.load %arg6[%c0_9, %c0_10, %c0_11] : memref<1x256x128xbf16, #tpu.memory_space<vmem>>, vector<1x256x128xbf16>
    %13 = vector.shape_cast %12 : vector<1x256x128xbf16> to vector<256x128xbf16>
    %14 = vector.shape_cast %11 : vector<256x128xbf16> to vector<1x256x128xbf16>
    tpu.vector_store %arg6[%c0_9, %c0_10, %c0_11], %14 {strides = array<i32>} : memref<1x256x128xbf16, #tpu.memory_space<vmem>>, vector<1x256x128xbf16>,
    return
  }
  func.func @transform_0(%arg0: i32, %arg1: i32, %arg2: i32) -> (i32, i32, i32) {
    %c0_i32 = arith.constant 0 : i32
    %c0_i32_0 = arith.constant 0 : i32
    %c0_i32_1 = arith.constant 0 : i32
    return %c0_i32, %arg1, %c0_i32_0 : i32, i32, i32
  }
  func.func @transform_1(%arg0: i32, %arg1: i32, %arg2: i32) -> (i32, i32, i32) {
    %c0_i32 = arith.constant 0 : i32
    %c0_i32_0 = arith.constant 0 : i32
    return %arg0, %c0_i32, %arg2 : i32, i32, i32
  }
  func.func @transform_2(%arg0: i32, %arg1: i32, %arg2: i32) -> (i32, i32, i32) {
    %c0_i32 = arith.constant 0 : i32
    %c0_i32_0 = arith.constant 0 : i32
    return %arg0, %c0_i32, %arg2 : i32, i32, i32
  }
  func.func @transform_3(%arg0: i32, %arg1: i32, %arg2: i32) -> (i32, i32, i32) {
    %c0_i32 = arith.constant 0 : i32
    return %arg0, %arg1, %arg2 : i32, i32, i32
  }
}

module attributes {stable_mosaic.version = 11 : i64} {
  func.func @_mm_bias_act_kernel(%arg0: i32, %arg1: i32, %arg2: i32, %arg3: memref<1x256x640xbf16, #tpu.memory_space<vmem>>, %arg4: memref<1x640x128xbf16, #tpu.memory_space<vmem>>, %arg5: memref<1x1x128xf32, #tpu.memory_space<vmem>>, %arg6: memref<1x256x128xbf16, #tpu.memory_space<vmem>>) attributes {dimension_semantics = [#tpu.dimension_semantics<parallel>, #tpu.dimension_semantics<parallel>, #tpu.dimension_semantics<parallel>], iteration_bounds = array<i64: 1, 27, 1>, scalar_prefetch = 0 : i64, scratch_operands = 0 : i64, tpu.core_type = #tpu.core_type<tc>, window_params = [{transform_indices = @transform_0, window_bounds = array<i64: 1, 256, 640>}, {transform_indices = @transform_1, window_bounds = array<i64: 1, 640, 128>}, {transform_indices = @transform_2, window_bounds = array<i64: 1, 1, 128>}, {transform_indices = @transform_3, window_bounds = array<i64: 1, 256, 128>}]} {
    %c0 = arith.constant 0 : index
    %c0_0 = arith.constant 0 : index
    %c0_1 = arith.constant 0 : index
    %0 = vector.load %arg3[%c0, %c0_0, %c0_1] : memref<1x256x640xbf16, #tpu.memory_space<vmem>>, vector<1x256x640xbf16>
    %1 = vector.shape_cast %0 : vector<1x256x640xbf16> to vector<256x640xbf16>
    %c0_2 = arith.constant 0 : index
    %c0_3 = arith.constant 0 : index
    %c0_4 = arith.constant 0 : index
    %2 = vector.load %arg4[%c0_2, %c0_3, %c0_4] : memref<1x640x128xbf16, #tpu.memory_space<vmem>>, vector<1x640x128xbf16>
    %3 = vector.shape_cast %2 : vector<1x640x128xbf16> to vector<640x128xbf16>
    %cst = arith.constant dense<0.000000e+00> : vector<256x128xf32>
    %4 = tpu.matmul %1, %3, %cst {dimension_numbers = #tpu.dot_dimension_numbers<[1], [0], [0], [1], [0, 0, 1, 1], [], []>} : vector<256x640xbf16>, vector<640x128xbf16>, vector<256x128xf32> -> vector<256x128xf32>
    %c0_5 = arith.constant 0 : index
    %c0_6 = arith.constant 0 : index
    %c0_7 = arith.constant 0 : index
    %5 = vector.load %arg5[%c0_5, %c0_6, %c0_7] : memref<1x1x128xf32, #tpu.memory_space<vmem>>, vector<1x1x128xf32>
    %6 = vector.shape_cast %5 : vector<1x1x128xf32> to vector<1x128xf32>
    %7 = vector.broadcast %6 : vector<1x128xf32> to vector<256x128xf32>
    %8 = arith.addf %4, %7 : vector<256x128xf32>
    %cst_8 = arith.constant 0.000000e+00 : f32
    %9 = vector.broadcast %cst_8 : f32 to vector<256x128xf32>
    %10 = arith.maximumf %8, %9 : vector<256x128xf32>
    %11 = arith.truncf %10 : vector<256x128xf32> to vector<256x128xbf16>
    %c0_9 = arith.constant 0 : index
    %c0_10 = arith.constant 0 : index
    %c0_11 = arith.constant 0 : index
    %12 = vector.load %arg6[%c0_9, %c0_10, %c0_11] : memref<1x256x128xbf16, #tpu.memory_space<vmem>>, vector<1x256x128xbf16>
    %13 = vector.shape_cast %12 : vector<1x256x128xbf16> to vector<256x128xbf16>
    %14 = vector.shape_cast %11 : vector<256x128xbf16> to vector<1x256x128xbf16>
    tpu.vector_store %arg6[%c0_9, %c0_10, %c0_11], %14 {strides = array<i32>} : memref<1x256x128xbf16, #tpu.memory_space<vmem>>, vector<1x256x128xbf16>,
    return
  }
  func.func @transform_0(%arg0: i32, %arg1: i32, %arg2: i32) -> (i32, i32, i32) {
    %c0_i32 = arith.constant 0 : i32
    %c0_i32_0 = arith.constant 0 : i32
    %c0_i32_1 = arith.constant 0 : i32
    return %c0_i32, %arg1, %c0_i32_0 : i32, i32, i32
  }
  func.func @transform_1(%arg0: i32, %arg1: i32, %arg2: i32) -> (i32, i32, i32) {
    %c0_i32 = arith.constant 0 : i32
    %c0_i32_0 = arith.constant 0 : i32
    return %arg0, %c0_i32, %arg2 : i32, i32, i32
  }
  func.func @transform_2(%arg0: i32, %arg1: i32, %arg2: i32) -> (i32, i32, i32) {
    %c0_i32 = arith.constant 0 : i32
    %c0_i32_0 = arith.constant 0 : i32
    return %arg0, %c0_i32, %arg2 : i32, i32, i32
  }
  func.func @transform_3(%arg0: i32, %arg1: i32, %arg2: i32) -> (i32, i32, i32) {
    %c0_i32 = arith.constant 0 : i32
    return %arg0, %arg1, %arg2 : i32, i32, i32
  }
}

module attributes {stable_mosaic.version = 11 : i64} {
  func.func @_mm_bias_act_kernel(%arg0: i32, %arg1: i32, %arg2: i32, %arg3: memref<1x256x1152xbf16, #tpu.memory_space<vmem>>, %arg4: memref<1x1152x128xbf16, #tpu.memory_space<vmem>>, %arg5: memref<1x1x128xf32, #tpu.memory_space<vmem>>, %arg6: memref<1x256x128xbf16, #tpu.memory_space<vmem>>) attributes {dimension_semantics = [#tpu.dimension_semantics<parallel>, #tpu.dimension_semantics<parallel>, #tpu.dimension_semantics<parallel>], iteration_bounds = array<i64: 1, 6, 1>, scalar_prefetch = 0 : i64, scratch_operands = 0 : i64, tpu.core_type = #tpu.core_type<tc>, window_params = [{transform_indices = @transform_0, window_bounds = array<i64: 1, 256, 1152>}, {transform_indices = @transform_1, window_bounds = array<i64: 1, 1152, 128>}, {transform_indices = @transform_2, window_bounds = array<i64: 1, 1, 128>}, {transform_indices = @transform_3, window_bounds = array<i64: 1, 256, 128>}]} {
    %c0 = arith.constant 0 : index
    %c0_0 = arith.constant 0 : index
    %c0_1 = arith.constant 0 : index
    %0 = vector.load %arg3[%c0, %c0_0, %c0_1] : memref<1x256x1152xbf16, #tpu.memory_space<vmem>>, vector<1x256x1152xbf16>
    %1 = vector.shape_cast %0 : vector<1x256x1152xbf16> to vector<256x1152xbf16>
    %c0_2 = arith.constant 0 : index
    %c0_3 = arith.constant 0 : index
    %c0_4 = arith.constant 0 : index
    %2 = vector.load %arg4[%c0_2, %c0_3, %c0_4] : memref<1x1152x128xbf16, #tpu.memory_space<vmem>>, vector<1x1152x128xbf16>
    %3 = vector.shape_cast %2 : vector<1x1152x128xbf16> to vector<1152x128xbf16>
    %cst = arith.constant dense<0.000000e+00> : vector<256x128xf32>
    %4 = tpu.matmul %1, %3, %cst {dimension_numbers = #tpu.dot_dimension_numbers<[1], [0], [0], [1], [0, 0, 1, 1], [], []>} : vector<256x1152xbf16>, vector<1152x128xbf16>, vector<256x128xf32> -> vector<256x128xf32>
    %c0_5 = arith.constant 0 : index
    %c0_6 = arith.constant 0 : index
    %c0_7 = arith.constant 0 : index
    %5 = vector.load %arg5[%c0_5, %c0_6, %c0_7] : memref<1x1x128xf32, #tpu.memory_space<vmem>>, vector<1x1x128xf32>
    %6 = vector.shape_cast %5 : vector<1x1x128xf32> to vector<1x128xf32>
    %7 = vector.broadcast %6 : vector<1x128xf32> to vector<256x128xf32>
    %8 = arith.addf %4, %7 : vector<256x128xf32>
    %cst_8 = arith.constant 0.000000e+00 : f32
    %9 = vector.broadcast %cst_8 : f32 to vector<256x128xf32>
    %10 = arith.maximumf %8, %9 : vector<256x128xf32>
    %11 = arith.truncf %10 : vector<256x128xf32> to vector<256x128xbf16>
    %c0_9 = arith.constant 0 : index
    %c0_10 = arith.constant 0 : index
    %c0_11 = arith.constant 0 : index
    %12 = vector.load %arg6[%c0_9, %c0_10, %c0_11] : memref<1x256x128xbf16, #tpu.memory_space<vmem>>, vector<1x256x128xbf16>
    %13 = vector.shape_cast %12 : vector<1x256x128xbf16> to vector<256x128xbf16>
    %14 = vector.shape_cast %11 : vector<256x128xbf16> to vector<1x256x128xbf16>
    tpu.vector_store %arg6[%c0_9, %c0_10, %c0_11], %14 {strides = array<i32>} : memref<1x256x128xbf16, #tpu.memory_space<vmem>>, vector<1x256x128xbf16>,
    return
  }
  func.func @transform_0(%arg0: i32, %arg1: i32, %arg2: i32) -> (i32, i32, i32) {
    %c0_i32 = arith.constant 0 : i32
    %c0_i32_0 = arith.constant 0 : i32
    %c0_i32_1 = arith.constant 0 : i32
    return %c0_i32, %arg1, %c0_i32_0 : i32, i32, i32
  }
  func.func @transform_1(%arg0: i32, %arg1: i32, %arg2: i32) -> (i32, i32, i32) {
    %c0_i32 = arith.constant 0 : i32
    %c0_i32_0 = arith.constant 0 : i32
    return %arg0, %c0_i32, %arg2 : i32, i32, i32
  }
  func.func @transform_2(%arg0: i32, %arg1: i32, %arg2: i32) -> (i32, i32, i32) {
    %c0_i32 = arith.constant 0 : i32
    %c0_i32_0 = arith.constant 0 : i32
    return %arg0, %c0_i32, %arg2 : i32, i32, i32
  }
  func.func @transform_3(%arg0: i32, %arg1: i32, %arg2: i32) -> (i32, i32, i32) {
    %c0_i32 = arith.constant 0 : i32
    return %arg0, %arg1, %arg2 : i32, i32, i32
  }
}

module attributes {stable_mosaic.version = 11 : i64} {
  func.func @_mm_bias_act_kernel(%arg0: i32, %arg1: i32, %arg2: i32, %arg3: memref<1x256x1152xbf16, #tpu.memory_space<vmem>>, %arg4: memref<1x1152x128xbf16, #tpu.memory_space<vmem>>, %arg5: memref<1x1x128xf32, #tpu.memory_space<vmem>>, %arg6: memref<1x256x128xbf16, #tpu.memory_space<vmem>>) attributes {dimension_semantics = [#tpu.dimension_semantics<parallel>, #tpu.dimension_semantics<parallel>, #tpu.dimension_semantics<parallel>], iteration_bounds = array<i64: 1, 5, 1>, scalar_prefetch = 0 : i64, scratch_operands = 0 : i64, tpu.core_type = #tpu.core_type<tc>, window_params = [{transform_indices = @transform_0, window_bounds = array<i64: 1, 256, 1152>}, {transform_indices = @transform_1, window_bounds = array<i64: 1, 1152, 128>}, {transform_indices = @transform_2, window_bounds = array<i64: 1, 1, 128>}, {transform_indices = @transform_3, window_bounds = array<i64: 1, 256, 128>}]} {
    %c0 = arith.constant 0 : index
    %c0_0 = arith.constant 0 : index
    %c0_1 = arith.constant 0 : index
    %0 = vector.load %arg3[%c0, %c0_0, %c0_1] : memref<1x256x1152xbf16, #tpu.memory_space<vmem>>, vector<1x256x1152xbf16>
    %1 = vector.shape_cast %0 : vector<1x256x1152xbf16> to vector<256x1152xbf16>
    %c0_2 = arith.constant 0 : index
    %c0_3 = arith.constant 0 : index
    %c0_4 = arith.constant 0 : index
    %2 = vector.load %arg4[%c0_2, %c0_3, %c0_4] : memref<1x1152x128xbf16, #tpu.memory_space<vmem>>, vector<1x1152x128xbf16>
    %3 = vector.shape_cast %2 : vector<1x1152x128xbf16> to vector<1152x128xbf16>
    %cst = arith.constant dense<0.000000e+00> : vector<256x128xf32>
    %4 = tpu.matmul %1, %3, %cst {dimension_numbers = #tpu.dot_dimension_numbers<[1], [0], [0], [1], [0, 0, 1, 1], [], []>} : vector<256x1152xbf16>, vector<1152x128xbf16>, vector<256x128xf32> -> vector<256x128xf32>
    %c0_5 = arith.constant 0 : index
    %c0_6 = arith.constant 0 : index
    %c0_7 = arith.constant 0 : index
    %5 = vector.load %arg5[%c0_5, %c0_6, %c0_7] : memref<1x1x128xf32, #tpu.memory_space<vmem>>, vector<1x1x128xf32>
    %6 = vector.shape_cast %5 : vector<1x1x128xf32> to vector<1x128xf32>
    %7 = vector.broadcast %6 : vector<1x128xf32> to vector<256x128xf32>
    %8 = arith.addf %4, %7 : vector<256x128xf32>
    %cst_8 = arith.constant 0.000000e+00 : f32
    %9 = vector.broadcast %cst_8 : f32 to vector<256x128xf32>
    %10 = arith.maximumf %8, %9 : vector<256x128xf32>
    %11 = arith.truncf %10 : vector<256x128xf32> to vector<256x128xbf16>
    %c0_9 = arith.constant 0 : index
    %c0_10 = arith.constant 0 : index
    %c0_11 = arith.constant 0 : index
    %12 = vector.load %arg6[%c0_9, %c0_10, %c0_11] : memref<1x256x128xbf16, #tpu.memory_space<vmem>>, vector<1x256x128xbf16>
    %13 = vector.shape_cast %12 : vector<1x256x128xbf16> to vector<256x128xbf16>
    %14 = vector.shape_cast %11 : vector<256x128xbf16> to vector<1x256x128xbf16>
    tpu.vector_store %arg6[%c0_9, %c0_10, %c0_11], %14 {strides = array<i32>} : memref<1x256x128xbf16, #tpu.memory_space<vmem>>, vector<1x256x128xbf16>,
    return
  }
  func.func @transform_0(%arg0: i32, %arg1: i32, %arg2: i32) -> (i32, i32, i32) {
    %c0_i32 = arith.constant 0 : i32
    %c0_i32_0 = arith.constant 0 : i32
    %c0_i32_1 = arith.constant 0 : i32
    return %c0_i32, %arg1, %c0_i32_0 : i32, i32, i32
  }
  func.func @transform_1(%arg0: i32, %arg1: i32, %arg2: i32) -> (i32, i32, i32) {
    %c0_i32 = arith.constant 0 : i32
    %c0_i32_0 = arith.constant 0 : i32
    return %arg0, %c0_i32, %arg2 : i32, i32, i32
  }
  func.func @transform_2(%arg0: i32, %arg1: i32, %arg2: i32) -> (i32, i32, i32) {
    %c0_i32 = arith.constant 0 : i32
    %c0_i32_0 = arith.constant 0 : i32
    return %arg0, %c0_i32, %arg2 : i32, i32, i32
  }
  func.func @transform_3(%arg0: i32, %arg1: i32, %arg2: i32) -> (i32, i32, i32) {
    %c0_i32 = arith.constant 0 : i32
    return %arg0, %arg1, %arg2 : i32, i32, i32
  }
}

module attributes {stable_mosaic.version = 11 : i64} {
  func.func @_mm_bias_act_kernel(%arg0: i32, %arg1: i32, %arg2: i32, %arg3: memref<1x200x1152xbf16, #tpu.memory_space<vmem>>, %arg4: memref<1x1152x128xbf16, #tpu.memory_space<vmem>>, %arg5: memref<1x1x128xf32, #tpu.memory_space<vmem>>, %arg6: memref<1x200x128xbf16, #tpu.memory_space<vmem>>) attributes {dimension_semantics = [#tpu.dimension_semantics<parallel>, #tpu.dimension_semantics<parallel>, #tpu.dimension_semantics<parallel>], iteration_bounds = array<i64: 2, 1, 1>, scalar_prefetch = 0 : i64, scratch_operands = 0 : i64, tpu.core_type = #tpu.core_type<tc>, window_params = [{transform_indices = @transform_0, window_bounds = array<i64: 1, 200, 1152>}, {transform_indices = @transform_1, window_bounds = array<i64: 1, 1152, 128>}, {transform_indices = @transform_2, window_bounds = array<i64: 1, 1, 128>}, {transform_indices = @transform_3, window_bounds = array<i64: 1, 200, 128>}]} {
    %c0 = arith.constant 0 : index
    %c0_0 = arith.constant 0 : index
    %c0_1 = arith.constant 0 : index
    %0 = vector.load %arg3[%c0, %c0_0, %c0_1] : memref<1x200x1152xbf16, #tpu.memory_space<vmem>>, vector<1x200x1152xbf16>
    %1 = vector.shape_cast %0 : vector<1x200x1152xbf16> to vector<200x1152xbf16>
    %c0_2 = arith.constant 0 : index
    %c0_3 = arith.constant 0 : index
    %c0_4 = arith.constant 0 : index
    %2 = vector.load %arg4[%c0_2, %c0_3, %c0_4] : memref<1x1152x128xbf16, #tpu.memory_space<vmem>>, vector<1x1152x128xbf16>
    %3 = vector.shape_cast %2 : vector<1x1152x128xbf16> to vector<1152x128xbf16>
    %cst = arith.constant dense<0.000000e+00> : vector<200x128xf32>
    %4 = tpu.matmul %1, %3, %cst {dimension_numbers = #tpu.dot_dimension_numbers<[1], [0], [0], [1], [0, 0, 1, 1], [], []>} : vector<200x1152xbf16>, vector<1152x128xbf16>, vector<200x128xf32> -> vector<200x128xf32>
    %c0_5 = arith.constant 0 : index
    %c0_6 = arith.constant 0 : index
    %c0_7 = arith.constant 0 : index
    %5 = vector.load %arg5[%c0_5, %c0_6, %c0_7] : memref<1x1x128xf32, #tpu.memory_space<vmem>>, vector<1x1x128xf32>
    %6 = vector.shape_cast %5 : vector<1x1x128xf32> to vector<1x128xf32>
    %7 = vector.broadcast %6 : vector<1x128xf32> to vector<200x128xf32>
    %8 = arith.addf %4, %7 : vector<200x128xf32>
    %cst_8 = arith.constant 0.000000e+00 : f32
    %9 = vector.broadcast %cst_8 : f32 to vector<200x128xf32>
    %10 = arith.maximumf %8, %9 : vector<200x128xf32>
    %11 = arith.truncf %10 : vector<200x128xf32> to vector<200x128xbf16>
    %c0_9 = arith.constant 0 : index
    %c0_10 = arith.constant 0 : index
    %c0_11 = arith.constant 0 : index
    %12 = vector.load %arg6[%c0_9, %c0_10, %c0_11] : memref<1x200x128xbf16, #tpu.memory_space<vmem>>, vector<1x200x128xbf16>
    %13 = vector.shape_cast %12 : vector<1x200x128xbf16> to vector<200x128xbf16>
    %14 = vector.shape_cast %11 : vector<200x128xbf16> to vector<1x200x128xbf16>
    tpu.vector_store %arg6[%c0_9, %c0_10, %c0_11], %14 {strides = array<i32>} : memref<1x200x128xbf16, #tpu.memory_space<vmem>>, vector<1x200x128xbf16>,
    return
  }
  func.func @transform_0(%arg0: i32, %arg1: i32, %arg2: i32) -> (i32, i32, i32) {
    %c0_i32 = arith.constant 0 : i32
    %c0_i32_0 = arith.constant 0 : i32
    %c0_i32_1 = arith.constant 0 : i32
    return %c0_i32, %arg1, %c0_i32_0 : i32, i32, i32
  }
  func.func @transform_1(%arg0: i32, %arg1: i32, %arg2: i32) -> (i32, i32, i32) {
    %c0_i32 = arith.constant 0 : i32
    %c0_i32_0 = arith.constant 0 : i32
    return %arg0, %c0_i32, %arg2 : i32, i32, i32
  }
  func.func @transform_2(%arg0: i32, %arg1: i32, %arg2: i32) -> (i32, i32, i32) {
    %c0_i32 = arith.constant 0 : i32
    %c0_i32_0 = arith.constant 0 : i32
    return %arg0, %c0_i32, %arg2 : i32, i32, i32
  }
  func.func @transform_3(%arg0: i32, %arg1: i32, %arg2: i32) -> (i32, i32, i32) {
    %c0_i32 = arith.constant 0 : i32
    return %arg0, %arg1, %arg2 : i32, i32, i32
  }
}

module attributes {stable_mosaic.version = 11 : i64} {
  func.func @_mm_bias_act_kernel(%arg0: i32, %arg1: i32, %arg2: i32, %arg3: memref<1x128x1152xbf16, #tpu.memory_space<vmem>>, %arg4: memref<1x1152x256xbf16, #tpu.memory_space<vmem>>, %arg5: memref<1x1x256xf32, #tpu.memory_space<vmem>>, %arg6: memref<1x128x256xbf16, #tpu.memory_space<vmem>>) attributes {dimension_semantics = [#tpu.dimension_semantics<parallel>, #tpu.dimension_semantics<parallel>, #tpu.dimension_semantics<parallel>], iteration_bounds = array<i64: 2, 1, 1>, scalar_prefetch = 0 : i64, scratch_operands = 0 : i64, tpu.core_type = #tpu.core_type<tc>, window_params = [{transform_indices = @transform_0, window_bounds = array<i64: 1, 128, 1152>}, {transform_indices = @transform_1, window_bounds = array<i64: 1, 1152, 256>}, {transform_indices = @transform_2, window_bounds = array<i64: 1, 1, 256>}, {transform_indices = @transform_3, window_bounds = array<i64: 1, 128, 256>}]} {
    %c0 = arith.constant 0 : index
    %c0_0 = arith.constant 0 : index
    %c0_1 = arith.constant 0 : index
    %0 = vector.load %arg3[%c0, %c0_0, %c0_1] : memref<1x128x1152xbf16, #tpu.memory_space<vmem>>, vector<1x128x1152xbf16>
    %1 = vector.shape_cast %0 : vector<1x128x1152xbf16> to vector<128x1152xbf16>
    %c0_2 = arith.constant 0 : index
    %c0_3 = arith.constant 0 : index
    %c0_4 = arith.constant 0 : index
    %2 = vector.load %arg4[%c0_2, %c0_3, %c0_4] : memref<1x1152x256xbf16, #tpu.memory_space<vmem>>, vector<1x1152x256xbf16>
    %3 = vector.shape_cast %2 : vector<1x1152x256xbf16> to vector<1152x256xbf16>
    %cst = arith.constant dense<0.000000e+00> : vector<128x256xf32>
    %4 = tpu.matmul %1, %3, %cst {dimension_numbers = #tpu.dot_dimension_numbers<[1], [0], [0], [1], [0, 0, 1, 1], [], []>} : vector<128x1152xbf16>, vector<1152x256xbf16>, vector<128x256xf32> -> vector<128x256xf32>
    %c0_5 = arith.constant 0 : index
    %c0_6 = arith.constant 0 : index
    %c0_7 = arith.constant 0 : index
    %5 = vector.load %arg5[%c0_5, %c0_6, %c0_7] : memref<1x1x256xf32, #tpu.memory_space<vmem>>, vector<1x1x256xf32>
    %6 = vector.shape_cast %5 : vector<1x1x256xf32> to vector<1x256xf32>
    %7 = vector.broadcast %6 : vector<1x256xf32> to vector<128x256xf32>
    %8 = arith.addf %4, %7 : vector<128x256xf32>
    %cst_8 = arith.constant 0.000000e+00 : f32
    %9 = vector.broadcast %cst_8 : f32 to vector<128x256xf32>
    %10 = arith.maximumf %8, %9 : vector<128x256xf32>
    %11 = arith.truncf %10 : vector<128x256xf32> to vector<128x256xbf16>
    %c0_9 = arith.constant 0 : index
    %c0_10 = arith.constant 0 : index
    %c0_11 = arith.constant 0 : index
    %12 = vector.load %arg6[%c0_9, %c0_10, %c0_11] : memref<1x128x256xbf16, #tpu.memory_space<vmem>>, vector<1x128x256xbf16>
    %13 = vector.shape_cast %12 : vector<1x128x256xbf16> to vector<128x256xbf16>
    %14 = vector.shape_cast %11 : vector<128x256xbf16> to vector<1x128x256xbf16>
    tpu.vector_store %arg6[%c0_9, %c0_10, %c0_11], %14 {strides = array<i32>} : memref<1x128x256xbf16, #tpu.memory_space<vmem>>, vector<1x128x256xbf16>,
    return
  }
  func.func @transform_0(%arg0: i32, %arg1: i32, %arg2: i32) -> (i32, i32, i32) {
    %c0_i32 = arith.constant 0 : i32
    %c0_i32_0 = arith.constant 0 : i32
    return %arg0, %arg1, %c0_i32 : i32, i32, i32
  }
  func.func @transform_1(%arg0: i32, %arg1: i32, %arg2: i32) -> (i32, i32, i32) {
    %c0_i32 = arith.constant 0 : i32
    %c0_i32_0 = arith.constant 0 : i32
    return %arg0, %c0_i32, %arg2 : i32, i32, i32
  }
  func.func @transform_2(%arg0: i32, %arg1: i32, %arg2: i32) -> (i32, i32, i32) {
    %c0_i32 = arith.constant 0 : i32
    %c0_i32_0 = arith.constant 0 : i32
    return %arg0, %c0_i32, %arg2 : i32, i32, i32
  }
  func.func @transform_3(%arg0: i32, %arg1: i32, %arg2: i32) -> (i32, i32, i32) {
    %c0_i32 = arith.constant 0 : i32
    return %arg0, %arg1, %arg2 : i32, i32, i32
  }
}

module attributes {stable_mosaic.version = 11 : i64} {
  func.func @_mm_bias_act_kernel(%arg0: i32, %arg1: i32, %arg2: i32, %arg3: memref<1x8x2304xbf16, #tpu.memory_space<vmem>>, %arg4: memref<1x2304x256xbf16, #tpu.memory_space<vmem>>, %arg5: memref<1x1x256xf32, #tpu.memory_space<vmem>>, %arg6: memref<1x8x256xbf16, #tpu.memory_space<vmem>>) attributes {dimension_semantics = [#tpu.dimension_semantics<parallel>, #tpu.dimension_semantics<parallel>, #tpu.dimension_semantics<parallel>], iteration_bounds = array<i64: 2, 1, 1>, scalar_prefetch = 0 : i64, scratch_operands = 0 : i64, tpu.core_type = #tpu.core_type<tc>, window_params = [{transform_indices = @transform_0, window_bounds = array<i64: 1, 8, 2304>}, {transform_indices = @transform_1, window_bounds = array<i64: 1, 2304, 256>}, {transform_indices = @transform_2, window_bounds = array<i64: 1, 1, 256>}, {transform_indices = @transform_3, window_bounds = array<i64: 1, 8, 256>}]} {
    %c0 = arith.constant 0 : index
    %c0_0 = arith.constant 0 : index
    %c0_1 = arith.constant 0 : index
    %0 = vector.load %arg3[%c0, %c0_0, %c0_1] : memref<1x8x2304xbf16, #tpu.memory_space<vmem>>, vector<1x8x2304xbf16>
    %1 = vector.shape_cast %0 : vector<1x8x2304xbf16> to vector<8x2304xbf16>
    %c0_2 = arith.constant 0 : index
    %c0_3 = arith.constant 0 : index
    %c0_4 = arith.constant 0 : index
    %2 = vector.load %arg4[%c0_2, %c0_3, %c0_4] : memref<1x2304x256xbf16, #tpu.memory_space<vmem>>, vector<1x2304x256xbf16>
    %3 = vector.shape_cast %2 : vector<1x2304x256xbf16> to vector<2304x256xbf16>
    %cst = arith.constant dense<0.000000e+00> : vector<8x256xf32>
    %4 = tpu.matmul %1, %3, %cst {dimension_numbers = #tpu.dot_dimension_numbers<[1], [0], [0], [1], [0, 0, 1, 1], [], []>} : vector<8x2304xbf16>, vector<2304x256xbf16>, vector<8x256xf32> -> vector<8x256xf32>
    %c0_5 = arith.constant 0 : index
    %c0_6 = arith.constant 0 : index
    %c0_7 = arith.constant 0 : index
    %5 = vector.load %arg5[%c0_5, %c0_6, %c0_7] : memref<1x1x256xf32, #tpu.memory_space<vmem>>, vector<1x1x256xf32>
    %6 = vector.shape_cast %5 : vector<1x1x256xf32> to vector<1x256xf32>
    %7 = vector.broadcast %6 : vector<1x256xf32> to vector<8x256xf32>
    %8 = arith.addf %4, %7 : vector<8x256xf32>
    %cst_8 = arith.constant 0.000000e+00 : f32
    %9 = vector.broadcast %cst_8 : f32 to vector<8x256xf32>
    %10 = arith.maximumf %8, %9 : vector<8x256xf32>
    %11 = arith.truncf %10 : vector<8x256xf32> to vector<8x256xbf16>
    %c0_9 = arith.constant 0 : index
    %c0_10 = arith.constant 0 : index
    %c0_11 = arith.constant 0 : index
    %12 = vector.load %arg6[%c0_9, %c0_10, %c0_11] : memref<1x8x256xbf16, #tpu.memory_space<vmem>>, vector<1x8x256xbf16>
    %13 = vector.shape_cast %12 : vector<1x8x256xbf16> to vector<8x256xbf16>
    %14 = vector.shape_cast %11 : vector<8x256xbf16> to vector<1x8x256xbf16>
    tpu.vector_store %arg6[%c0_9, %c0_10, %c0_11], %14 {strides = array<i32>} : memref<1x8x256xbf16, #tpu.memory_space<vmem>>, vector<1x8x256xbf16>,
    return
  }
  func.func @transform_0(%arg0: i32, %arg1: i32, %arg2: i32) -> (i32, i32, i32) {
    %c0_i32 = arith.constant 0 : i32
    %c0_i32_0 = arith.constant 0 : i32
    return %arg0, %arg1, %c0_i32 : i32, i32, i32
  }
  func.func @transform_1(%arg0: i32, %arg1: i32, %arg2: i32) -> (i32, i32, i32) {
    %c0_i32 = arith.constant 0 : i32
    %c0_i32_0 = arith.constant 0 : i32
    return %arg0, %c0_i32, %arg2 : i32, i32, i32
  }
  func.func @transform_2(%arg0: i32, %arg1: i32, %arg2: i32) -> (i32, i32, i32) {
    %c0_i32 = arith.constant 0 : i32
    %c0_i32_0 = arith.constant 0 : i32
    return %arg0, %c0_i32, %arg2 : i32, i32, i32
  }
  func.func @transform_3(%arg0: i32, %arg1: i32, %arg2: i32) -> (i32, i32, i32) {
    %c0_i32 = arith.constant 0 : i32
    return %arg0, %arg1, %arg2 : i32, i32, i32
  }
}

module attributes {stable_mosaic.version = 11 : i64} {
  func.func @_mm_bias_act_kernel(%arg0: i32, %arg1: i32, %arg2: i32, %arg3: memref<1x8x2304xbf16, #tpu.memory_space<vmem>>, %arg4: memref<1x2304x256xbf16, #tpu.memory_space<vmem>>, %arg5: memref<1x1x256xf32, #tpu.memory_space<vmem>>, %arg6: memref<1x8x256xbf16, #tpu.memory_space<vmem>>) attributes {dimension_semantics = [#tpu.dimension_semantics<parallel>, #tpu.dimension_semantics<parallel>, #tpu.dimension_semantics<parallel>], iteration_bounds = array<i64: 2, 1, 2>, scalar_prefetch = 0 : i64, scratch_operands = 0 : i64, tpu.core_type = #tpu.core_type<tc>, window_params = [{transform_indices = @transform_0, window_bounds = array<i64: 1, 8, 2304>}, {transform_indices = @transform_1, window_bounds = array<i64: 1, 2304, 256>}, {transform_indices = @transform_2, window_bounds = array<i64: 1, 1, 256>}, {transform_indices = @transform_3, window_bounds = array<i64: 1, 8, 256>}]} {
    %c0 = arith.constant 0 : index
    %c0_0 = arith.constant 0 : index
    %c0_1 = arith.constant 0 : index
    %0 = vector.load %arg3[%c0, %c0_0, %c0_1] : memref<1x8x2304xbf16, #tpu.memory_space<vmem>>, vector<1x8x2304xbf16>
    %1 = vector.shape_cast %0 : vector<1x8x2304xbf16> to vector<8x2304xbf16>
    %c0_2 = arith.constant 0 : index
    %c0_3 = arith.constant 0 : index
    %c0_4 = arith.constant 0 : index
    %2 = vector.load %arg4[%c0_2, %c0_3, %c0_4] : memref<1x2304x256xbf16, #tpu.memory_space<vmem>>, vector<1x2304x256xbf16>
    %3 = vector.shape_cast %2 : vector<1x2304x256xbf16> to vector<2304x256xbf16>
    %cst = arith.constant dense<0.000000e+00> : vector<8x256xf32>
    %4 = tpu.matmul %1, %3, %cst {dimension_numbers = #tpu.dot_dimension_numbers<[1], [0], [0], [1], [0, 0, 1, 1], [], []>} : vector<8x2304xbf16>, vector<2304x256xbf16>, vector<8x256xf32> -> vector<8x256xf32>
    %c0_5 = arith.constant 0 : index
    %c0_6 = arith.constant 0 : index
    %c0_7 = arith.constant 0 : index
    %5 = vector.load %arg5[%c0_5, %c0_6, %c0_7] : memref<1x1x256xf32, #tpu.memory_space<vmem>>, vector<1x1x256xf32>
    %6 = vector.shape_cast %5 : vector<1x1x256xf32> to vector<1x256xf32>
    %7 = vector.broadcast %6 : vector<1x256xf32> to vector<8x256xf32>
    %8 = arith.addf %4, %7 : vector<8x256xf32>
    %cst_8 = arith.constant 0.000000e+00 : f32
    %9 = vector.broadcast %cst_8 : f32 to vector<8x256xf32>
    %10 = arith.maximumf %8, %9 : vector<8x256xf32>
    %11 = arith.truncf %10 : vector<8x256xf32> to vector<8x256xbf16>
    %c0_9 = arith.constant 0 : index
    %c0_10 = arith.constant 0 : index
    %c0_11 = arith.constant 0 : index
    %12 = vector.load %arg6[%c0_9, %c0_10, %c0_11] : memref<1x8x256xbf16, #tpu.memory_space<vmem>>, vector<1x8x256xbf16>
    %13 = vector.shape_cast %12 : vector<1x8x256xbf16> to vector<8x256xbf16>
    %14 = vector.shape_cast %11 : vector<8x256xbf16> to vector<1x8x256xbf16>
    tpu.vector_store %arg6[%c0_9, %c0_10, %c0_11], %14 {strides = array<i32>} : memref<1x8x256xbf16, #tpu.memory_space<vmem>>, vector<1x8x256xbf16>,
    return
  }
  func.func @transform_0(%arg0: i32, %arg1: i32, %arg2: i32) -> (i32, i32, i32) {
    %c0_i32 = arith.constant 0 : i32
    %c0_i32_0 = arith.constant 0 : i32
    return %arg0, %arg1, %c0_i32 : i32, i32, i32
  }
  func.func @transform_1(%arg0: i32, %arg1: i32, %arg2: i32) -> (i32, i32, i32) {
    %c0_i32 = arith.constant 0 : i32
    %c0_i32_0 = arith.constant 0 : i32
    return %arg0, %c0_i32, %arg2 : i32, i32, i32
  }
  func.func @transform_2(%arg0: i32, %arg1: i32, %arg2: i32) -> (i32, i32, i32) {
    %c0_i32 = arith.constant 0 : i32
    %c0_i32_0 = arith.constant 0 : i32
    return %arg0, %c0_i32, %arg2 : i32, i32, i32
  }
  func.func @transform_3(%arg0: i32, %arg1: i32, %arg2: i32) -> (i32, i32, i32) {
    %c0_i32 = arith.constant 0 : i32
    return %arg0, %arg1, %arg2 : i32, i32, i32
  }
}

</mosaic_0001>

<bundles_post_ra>
// kernel: ensemble_forward.8
= control target key start
LH: loop header
LB: loop body
LE: loop exit
PB: predicated region body
PF: predicated region fallthrough
CT: control target
= control target key end

     0   :  { %s1327_s12 = smov 0   ;;  %s1329_s13 = smov 0   ;;  %s1464_s0 = inlined_call_operand.vmem [shape: bf16[1,7424,128], index: 0, kind: input, shape index: {}]   ;;  %s1465_s1 = inlined_call_operand.vmem [shape: bf16[1,128,128], index: 1, kind: input, shape index: {}]   ;;  %s1466_s2 = inlined_call_operand.vmem [shape: f32[1,1,128], index: 2, kind: input, shape index: {}]   ;;  %s1467_s3 = inlined_call_operand.vmem [shape: bf16[1,7424,128], index: 3, kind: output, shape index: {}]  }
   0x1   :  { %s1331_s14 = smov 0  }
   0x2 LB: > { %s28_s15 = sadd.s32 1, %s1301_s13  ;;  %p956_p0 = scmp.ge.s32.totalorder %s1305_s14, 1  ;;  %s1305_s14 = sphi %s1331_s14, %s13_s14   ;;  %s1301_s13 = sphi %s1329_s13, %s1469_s13   ;;  %s1297_s12 = sphi %s1327_s12, %s1468_s12  }
   0x3   : > { %p30_p1 = scmp.ge.s32.totalorder %s28_s15, 29  ;;  %p189_p2 = scmp.lt.s32.totalorder %s1305_s14, 30 }
   0x5   : > { %s1471_s15 = smov (%p30_p1, %s28_s15), 0  ;;  %p190_p3 = pnand %p956_p0, %p189_p2 }
   0x6   : > { %v1259_v0 = vld [vmem:[%s1465_s1] sm:$0xff] (!%p190_p3)   ;;  %s957_s18 = sshll.u32 (!%p190_p3), %s1297_s12, 5  ;;  %v1260_v1 = vld [vmem:[%s1465_s1 + $0x8] sm:$0xff] (!%p190_p3)   ;;  %v1261_v2 = vld [vmem:[%s1465_s1 + $0x10] sm:$0xff] (!%p190_p3)  }
   0x7   : > { %193 = sbr.rel (%p190_p3) target bundleno = 285 (0x11d), region = 32  ;;  %p235_p4 = scmp.lt.s32.totalorder (!%p190_p3), %s957_s18, 927  ;;  %1171 = vmatprep.subr.bf16.mxu0 (!%p190_p3), %v1259_v0  ;;  %1219 = vmatprep.subr.bf16.mxu1 (!%p190_p3), %v1259_v0  ;;  %v1262_v3 = vld [vmem:[%s1465_s1 + $0x18] sm:$0xff] (!%p190_p3)   ;;  %v1263_v6 = vld [vmem:[%s1465_s1 + $0x20] sm:$0xff] (!%p190_p3)   ;;  %v1264_v7 = vld [vmem:[%s1465_s1 + $0x28] sm:$0xff] (!%p190_p3)  }
   0x8   : > { %1172 = vmatpush3.bf16.msra.mxu0 (!%p190_p3), %v1259_v0  ;;  %1227 = vmatpush3.bf16.msra.mxu1 (!%p190_p3), %v1259_v0  ;;  %v1265_v8 = vld [vmem:[%s1465_s1 + $0x30] sm:$0xff] (!%p190_p3)   ;;  %v1266_v9 = vld [vmem:[%s1465_s1 + $0x38] sm:$0xff] (!%p190_p3)   ;;  %v1398_v24 = vld [vmem:[%s1466_s2] ss:$0 sm:$0xff] (!%p190_p3) }
   0x9   : > { %1173 = vmatprep.subr.bf16.mxu0 (!%p190_p3), %v1260_v1  ;;  %1220 = vmatprep.subr.bf16.mxu1 (!%p190_p3), %v1260_v1 }
   0xc   : > { %1174 = vmatpush3.bf16.msra.mxu0 (!%p190_p3), %v1260_v1  ;;  %1228 = vmatpush3.bf16.msra.mxu1 (!%p190_p3), %v1260_v1 }
   0xd   : > { %1175 = vmatprep.subr.bf16.mxu0 (!%p190_p3), %v1261_v2  ;;  %1221 = vmatprep.subr.bf16.mxu1 (!%p190_p3), %v1261_v2 }
   0xe   : > { %s1473_s18 = smov (!%p235_p4, %s957_s18), 927 }
   0xf   : > { %s958_s23 = sshll.u32 %s1473_s18, 2 }
  0x10   : > { %s1362_s26 = scalar_lea.vmem %s1464_s0, %s958_s23  ;;  %1176 = vmatpush3.bf16.msra.mxu0 %v1261_v2  ;;  %1229 = vmatpush3.bf16.msra.mxu1 %v1261_v2  ;;  %s1413_s17 = scalar_lea.vmem %s1467_s3, %s958_s23 }
  0x11   : > { %v1267_v4 = vld [vmem:[%s1362_s26] sm:$0xff]   ;;  %1177 = vmatprep.subr.bf16.mxu0 %v1262_v3  ;;  %1222 = vmatprep.subr.bf16.mxu1 %v1262_v3  ;;  %v1269_v10 = vld [vmem:[%s1362_s26 + $0x8] sm:$0xff]   ;;  %v1271_v12 = vld [vmem:[%s1362_s26 + $0x10] sm:$0xff]  }
  0x12   : > { %v1268_v5 = vld [vmem:[%s1362_s26 + $0x40] sm:$0xff]   ;;  %1187 = vmatprep.mubr.bf16.mxu0 %v1267_v4  ;;  %v1270_v11 = vld [vmem:[%s1362_s26 + $0x48] sm:$0xff]   ;;  %v1272_v13 = vld [vmem:[%s1362_s26 + $0x50] sm:$0xff]  }
  0x13   : > { %1203 = vmatprep.mubr.bf16.mxu1 %v1268_v5  ;;  %v1273_v14 = vld [vmem:[%s1362_s26 + $0x18] sm:$0xff]   ;;  %v1275_v16 = vld [vmem:[%s1362_s26 + $0x20] sm:$0xff]   ;;  %v1277_v18 = vld [vmem:[%s1362_s26 + $0x28] sm:$0xff]  }
  0x14   : > { %1178 = vmatpush3.bf16.msra.mxu0 %v1262_v3  ;;  %1230 = vmatpush3.bf16.msra.mxu1 %v1262_v3  ;;  %v1274_v15 = vld [vmem:[%s1362_s26 + $0x58] sm:$0xff]   ;;  %v1276_v17 = vld [vmem:[%s1362_s26 + $0x60] sm:$0xff]   ;;  %v1278_v19 = vld [vmem:[%s1362_s26 + $0x68] sm:$0xff]  }
  0x15   : > { %1179 = vmatprep.subr.bf16.mxu0 %v1263_v6  ;;  %1223 = vmatprep.subr.bf16.mxu1 %v1263_v6  ;;  %v1279_v20 = vld [vmem:[%s1362_s26 + $0x30] sm:$0xff]   ;;  %v1281_v22 = vld [vmem:[%s1362_s26 + $0x38] sm:$0xff]  }
  0x16   : > { %v1280_v21 = vld [vmem:[%s1362_s26 + $0x70] sm:$0xff]   ;;  %v1282_v23 = vld [vmem:[%s1362_s26 + $0x78] sm:$0xff]  }
  0x18   : > { %1180 = vmatpush3.bf16.msra.mxu0 %v1263_v6  ;;  %1231 = vmatpush3.bf16.msra.mxu1 %v1263_v6 }
  0x19   : > { %1181 = vmatprep.subr.bf16.mxu0 %v1264_v7  ;;  %1224 = vmatprep.subr.bf16.mxu1 %v1264_v7 }
  0x1c   : > { %1182 = vmatpush3.bf16.msra.mxu0 %v1264_v7  ;;  %1232 = vmatpush3.bf16.msra.mxu1 %v1264_v7 }
  0x1d   : > { %1183 = vmatprep.subr.bf16.mxu0 %v1265_v8  ;;  %1225 = vmatprep.subr.bf16.mxu1 %v1265_v8 }
  0x20   : > { %1184 = vmatpush3.bf16.msra.mxu0 %v1265_v8  ;;  %1233 = vmatpush3.bf16.msra.mxu1 %v1265_v8 }
  0x21   : > { %1185 = vmatprep.subr.bf16.mxu0 %v1266_v9  ;;  %1226 = vmatprep.subr.bf16.mxu1 %v1266_v9 }
  0x24   : > { %1186 = vmatpush3.bf16.msra.mxu0 %v1266_v9  ;;  %1234 = vmatpush3.bf16.msra.mxu1 %v1266_v9 }
  0x27   : > { %1188 = vmatmul.mubr.bf16.vlgmr.msra.gmra.mrb[0].mxu0 %v1269_v10  ;;  %1204 = vmatmul.mubr.bf16.vlgmr.msra.gmra.mrb[0].mxu1 %v1270_v11 }
  0x28   : > { %1191 = vmatprep.mubr.bf16.mxu0 %v1271_v12  ;;  %1207 = vmatprep.mubr.bf16.mxu1 %v1272_v13 }
  0x2f   : > { %1192 = vmatmul.mubr.bf16.gmra.mrb[4].mxu0 %v1273_v14  ;;  %1208 = vmatmul.mubr.bf16.gmra.mrb[4].mxu1 %v1274_v15 }
  0x30   : > { %1195 = vmatprep.mubr.bf16.mxu0 %v1275_v16  ;;  %1211 = vmatprep.mubr.bf16.mxu1 %v1276_v17 }
  0x37   : > { %1196 = vmatmul.mubr.bf16.gmra.mrb[8].mxu0 %v1277_v18  ;;  %1212 = vmatmul.mubr.bf16.gmra.mrb[8].mxu1 %v1278_v19 }
  0x38   : > { %1199 = vmatprep.mubr.bf16.mxu0 %v1279_v20  ;;  %1215 = vmatprep.mubr.bf16.mxu1 %v1280_v21 }
  0x3f   : > { %1200 = vmatmul.mubr.bf16.gmra.mrb[12].mxu0 %v1281_v22  ;;  %1216 = vmatmul.mubr.bf16.gmra.mrb[12].mxu1 %v1282_v23 }
  0xfa   : > { %v1189_v25 = vpop.f32.mrb[0].mxu0  ;;  %v1205_v26 = vpop.f32.mrb[0].mxu1 }
  0xfb   : > { %v510_v27 = vadd.f32 %v1189_v25, %v1398_v24  ;;  %v574_v28 = vadd.f32 %v1205_v26, %v1398_v24  ;;  %v501_v29 = vpop.f32.mrb[1].mxu0  ;;  %v565_v30 = vpop.f32.mrb[1].mxu1 }
  0xfc   : > { %v502_v31 = vadd.f32 %v1398_v24, %v501_v29  ;;  %v566_v32 = vadd.f32 %v1398_v24, %v565_v30  ;;  %v1190_v33 = vpop.f32.mrb[2].mxu0  ;;  %v1206_v34 = vpop.f32.mrb[2].mxu1 }
  0xfd   : > { %v513_v35 = vadd.f32 %v1190_v33, %v1398_v24  ;;  %v577_v36 = vadd.f32 %v1206_v34, %v1398_v24  ;;  %v504_v37 = vpop.f32.mrb[3].mxu0  ;;  %v568_v38 = vpop.f32.mrb[3].mxu1  ;;  %v630_v41 = vmax.f32 %v510_v27, 0.0  ;;  %v646_v42 = vmax.f32 %v574_v28, 0.0 }
  0xfe   : > { %v505_v39 = vadd.f32 %v1398_v24, %v504_v37  ;;  %v569_v40 = vadd.f32 %v1398_v24, %v568_v38  ;;  %v628_v45 = vmax.f32 %v502_v31, 0.0  ;;  %v644_v46 = vmax.f32 %v566_v32, 0.0 }
  0xff   : > { %v631_v43 = vmax.f32 %v513_v35, 0.0  ;;  %v647_v44 = vmax.f32 %v577_v36, 0.0 }
 0x100   : > { %v629_v47 = vmax.f32 %v505_v39, 0.0  ;;  %v645_v48 = vmax.f32 %v569_v40, 0.0 }
 0x101   : > { %v1060_v49 = vpack.c.bf16 %v631_v43, %v630_v41  ;;  %v1100_v50 = vpack.c.bf16 %v647_v44, %v646_v42 }
 0x102   : > { %v1055_v51 = vpack.c.bf16 %v629_v47, %v628_v45  ;;  %v1095_v52 = vpack.c.bf16 %v645_v48, %v644_v46  ;;  %v1193_v53 = vpop.f32.mrb[4].mxu0  ;;  %v1209_v54 = vpop.f32.mrb[4].mxu1 }
 0x103   : > { %1132 = vst [vmem:[%s1413_s17 + $0x8] sm:$0xff] %v1060_v49   ;;  %1140 = vst [vmem:[%s1413_s17 + $0x48] sm:$0xff] %v1100_v50   ;;  %v526_v55 = vadd.f32 %v1193_v53, %v1398_v24  ;;  %v590_v56 = vadd.f32 %v1209_v54, %v1398_v24  ;;  %v517_v57 = vpop.f32.mrb[5].mxu0  ;;  %v581_v58 = vpop.f32.mrb[5].mxu1 }
 0x104   : > { %1056 = vst [vmem:[%s1413_s17] sm:$0xff] %v1055_v51   ;;  %1139 = vst [vmem:[%s1413_s17 + $0x40] sm:$0xff] %v1095_v52   ;;  %v518_v59 = vadd.f32 %v1398_v24, %v517_v57  ;;  %v582_v60 = vadd.f32 %v1398_v24, %v581_v58  ;;  %v1194_v61 = vpop.f32.mrb[6].mxu0  ;;  %v1210_v62 = vpop.f32.mrb[6].mxu1 }
 0x105   : > { %v529_v63 = vadd.f32 %v1194_v61, %v1398_v24  ;;  %v593_v0 = vadd.f32 %v1210_v62, %v1398_v24  ;;  %v520_v1 = vpop.f32.mrb[7].mxu0  ;;  %v584_v2 = vpop.f32.mrb[7].mxu1  ;;  %v634_v5 = vmax.f32 %v526_v55, 0.0  ;;  %v650_v6 = vmax.f32 %v590_v56, 0.0 }
 0x106   : > { %v521_v3 = vadd.f32 %v1398_v24, %v520_v1  ;;  %v585_v4 = vadd.f32 %v1398_v24, %v584_v2  ;;  %v632_v9 = vmax.f32 %v518_v59, 0.0  ;;  %v648_v10 = vmax.f32 %v582_v60, 0.0 }
 0x107   : > { %v635_v7 = vmax.f32 %v529_v63, 0.0  ;;  %v651_v8 = vmax.f32 %v593_v0, 0.0 }
 0x108   : > { %v633_v11 = vmax.f32 %v521_v3, 0.0  ;;  %v649_v12 = vmax.f32 %v585_v4, 0.0 }
 0x109   : > { %v1070_v13 = vpack.c.bf16 %v635_v7, %v634_v5  ;;  %v1110_v14 = vpack.c.bf16 %v651_v8, %v650_v6 }
 0x10a   : > { %v1065_v15 = vpack.c.bf16 %v633_v11, %v632_v9  ;;  %v1105_v16 = vpack.c.bf16 %v649_v12, %v648_v10  ;;  %v1197_v17 = vpop.f32.mrb[8].mxu0  ;;  %v1213_v18 = vpop.f32.mrb[8].mxu1 }
 0x10b   : > { %1134 = vst [vmem:[%s1413_s17 + $0x18] sm:$0xff] %v1070_v13   ;;  %1142 = vst [vmem:[%s1413_s17 + $0x58] sm:$0xff] %v1110_v14   ;;  %v542_v19 = vadd.f32 %v1197_v17, %v1398_v24  ;;  %v606_v20 = vadd.f32 %v1213_v18, %v1398_v24  ;;  %v533_v21 = vpop.f32.mrb[9].mxu0  ;;  %v597_v22 = vpop.f32.mrb[9].mxu1 }
 0x10c   : > { %1133 = vst [vmem:[%s1413_s17 + $0x10] sm:$0xff] %v1065_v15   ;;  %1141 = vst [vmem:[%s1413_s17 + $0x50] sm:$0xff] %v1105_v16   ;;  %v534_v23 = vadd.f32 %v1398_v24, %v533_v21  ;;  %v598_v25 = vadd.f32 %v1398_v24, %v597_v22  ;;  %v1198_v26 = vpop.f32.mrb[10].mxu0  ;;  %v1214_v27 = vpop.f32.mrb[10].mxu1 }
 0x10d   : > { %v545_v28 = vadd.f32 %v1198_v26, %v1398_v24  ;;  %v609_v29 = vadd.f32 %v1214_v27, %v1398_v24  ;;  %v536_v30 = vpop.f32.mrb[11].mxu0  ;;  %v600_v31 = vpop.f32.mrb[11].mxu1  ;;  %v638_v34 = vmax.f32 %v542_v19, 0.0  ;;  %v654_v35 = vmax.f32 %v606_v20, 0.0 }
 0x10e   : > { %v537_v32 = vadd.f32 %v1398_v24, %v536_v30  ;;  %v601_v33 = vadd.f32 %v1398_v24, %v600_v31  ;;  %v636_v38 = vmax.f32 %v534_v23, 0.0  ;;  %v652_v39 = vmax.f32 %v598_v25, 0.0 }
 0x10f   : > { %v639_v36 = vmax.f32 %v545_v28, 0.0  ;;  %v655_v37 = vmax.f32 %v609_v29, 0.0 }
 0x110   : > { %v637_v40 = vmax.f32 %v537_v32, 0.0  ;;  %v653_v41 = vmax.f32 %v601_v33, 0.0 }
 0x111   : > { %v1080_v42 = vpack.c.bf16 %v639_v36, %v638_v34  ;;  %v1120_v43 = vpack.c.bf16 %v655_v37, %v654_v35 }
 0x112   : > { %v1075_v44 = vpack.c.bf16 %v637_v40, %v636_v38  ;;  %v1115_v45 = vpack.c.bf16 %v653_v41, %v652_v39  ;;  %v1201_v46 = vpop.f32.mrb[12].mxu0  ;;  %v1217_v47 = vpop.f32.mrb[12].mxu1 }
 0x113   : > { %1136 = vst [vmem:[%s1413_s17 + $0x28] sm:$0xff] %v1080_v42   ;;  %1144 = vst [vmem:[%s1413_s17 + $0x68] sm:$0xff] %v1120_v43   ;;  %v558_v48 = vadd.f32 %v1201_v46, %v1398_v24  ;;  %v622_v49 = vadd.f32 %v1217_v47, %v1398_v24  ;;  %v549_v50 = vpop.f32.mrb[13].mxu0  ;;  %v613_v51 = vpop.f32.mrb[13].mxu1 }
 0x114   : > { %1135 = vst [vmem:[%s1413_s17 + $0x20] sm:$0xff] %v1075_v44   ;;  %1143 = vst [vmem:[%s1413_s17 + $0x60] sm:$0xff] %v1115_v45   ;;  %v550_v52 = vadd.f32 %v1398_v24, %v549_v50  ;;  %v614_v53 = vadd.f32 %v1398_v24, %v613_v51  ;;  %v1202_v54 = vpop.f32.mrb[14].mxu0  ;;  %v1218_v55 = vpop.f32.mrb[14].mxu1 }
 0x115   : > { %v561_v56 = vadd.f32 %v1202_v54, %v1398_v24  ;;  %v625_v57 = vadd.f32 %v1218_v55, %v1398_v24  ;;  %v552_v58 = vpop.f32.mrb[15].mxu0  ;;  %v616_v59 = vpop.f32.mrb[15].mxu1  ;;  %v642_v62 = vmax.f32 %v558_v48, 0.0  ;;  %v658_v63 = vmax.f32 %v622_v49, 0.0 }
 0x116   : > { %v553_v60 = vadd.f32 %v1398_v24, %v552_v58  ;;  %v617_v61 = vadd.f32 %v1398_v24, %v616_v59  ;;  %v640_v2 = vmax.f32 %v550_v52, 0.0  ;;  %v656_v3 = vmax.f32 %v614_v53, 0.0 }
 0x117   : > { %v643_v0 = vmax.f32 %v561_v56, 0.0  ;;  %v659_v1 = vmax.f32 %v625_v57, 0.0 }
 0x118   : > { %v641_v4 = vmax.f32 %v553_v60, 0.0  ;;  %v657_v5 = vmax.f32 %v617_v61, 0.0 }
 0x119   : > { %v1090_v6 = vpack.c.bf16 %v643_v0, %v642_v62  ;;  %v1130_v7 = vpack.c.bf16 %v659_v1, %v658_v63 }
 0x11a   : > { %v1085_v8 = vpack.c.bf16 %v641_v4, %v640_v2  ;;  %v1125_v9 = vpack.c.bf16 %v657_v5, %v656_v3 }
 0x11b   : > { %1138 = vst [vmem:[%s1413_s17 + $0x38] sm:$0xff] %v1090_v6   ;;  %1146 = vst [vmem:[%s1413_s17 + $0x78] sm:$0xff] %v1130_v7  }
 0x11c   : > { %1137 = vst [vmem:[%s1413_s17 + $0x30] sm:$0xff] %v1085_v8   ;;  %1145 = vst [vmem:[%s1413_s17 + $0x70] sm:$0xff] %v1125_v9  }
 0x11d PF: > { %s13_s14 = sadd.s32 1, %s1305_s14   ;;  %s1468_s12 = smov %s1301_s13 }
 0x11e   : > { %p10_p5 = scmp.ge.s32.totalorder %s13_s14, 31   ;;  %s1469_s13 = smov %s1471_s15 }
 0x120   :  { %12 = sbr.rel (!%p10_p5) target bundleno = 2 (0x2), region = 68 }

// kernel: ensemble_forward.9
= control target key start
LH: loop header
LB: loop body
LE: loop exit
PB: predicated region body
PF: predicated region fallthrough
CT: control target
= control target key end

     0   :  { %s2741_s12 = smov 0   ;;  %s2743_s13 = smov 0   ;;  %s3146_s0 = inlined_call_operand.vmem [shape: bf16[1,6912,640], index: 0, kind: input, shape index: {}]   ;;  %s3147_s1 = inlined_call_operand.vmem [shape: bf16[1,640,128], index: 1, kind: input, shape index: {}]   ;;  %s3148_s2 = inlined_call_operand.vmem [shape: f32[1,1,128], index: 2, kind: input, shape index: {}]   ;;  %s3149_s3 = inlined_call_operand.vmem [shape: bf16[1,6912,128], index: 3, kind: output, shape index: {}]  }
   0x1   :  { %s2745_s14 = smov 0  }
   0x2 LB: > { %s28_s15 = sadd.s32 1, %s2715_s13  ;;  %p1921_p0 = scmp.ge.s32.totalorder %s2719_s14, 1  ;;  %s2719_s14 = sphi %s2745_s14, %s13_s14   ;;  %s2715_s13 = sphi %s2743_s13, %s3151_s13   ;;  %s2711_s12 = sphi %s2741_s12, %s3150_s12  }
   0x3   : > { %p30_p1 = scmp.ge.s32.totalorder %s28_s15, 27  ;;  %p190_p2 = scmp.lt.s32.totalorder %s2719_s14, 28 }
   0x5   : > { %s3153_s15 = smov (%p30_p1, %s28_s15), 0  ;;  %p191_p3 = pnand %p1921_p0, %p190_p2 }
   0x6   : > { %v2545_v0 = vld [vmem:[%s3147_s1 + $0x40] sm:$0xff] (!%p191_p3)   ;;  %s1922_s18 = sshll.u32 (!%p191_p3), %s2711_s12, 5  ;;  %v2547_v2 = vld [vmem:[%s3147_s1 + $0x48] sm:$0xff] (!%p191_p3)   ;;  %v2549_v4 = vld [vmem:[%s3147_s1 + $0x50] sm:$0xff] (!%p191_p3)  }
   0x7   : > { %194 = sbr.rel (%p191_p3) target bundleno = 417 (0x1a1), region = 32  ;;  %v2546_v1 = vld [vmem:[%s3147_s1] sm:$0xff] (!%p191_p3)   ;;  %2208 = vmatprep.subr.bf16.mxu0 (!%p191_p3), %v2545_v0  ;;  %2504 = vmatprep.subr.bf16.mxu1 (!%p191_p3), %v2545_v0  ;;  %p237_p4 = scmp.lt.s32.totalorder (!%p191_p3), %s1922_s18, 863  ;;  %v2548_v3 = vld [vmem:[%s3147_s1 + $0x8] sm:$0xff] (!%p191_p3)   ;;  %v2550_v5 = vld [vmem:[%s3147_s1 + $0x10] sm:$0xff] (!%p191_p3)  }
   0x8   : > { %2209 = vmatpush3.bf16.msra.mxu0 (!%p191_p3), %v2546_v1  ;;  %2512 = vmatpush3.bf16.msra.mxu1 (!%p191_p3), %v2546_v1  ;;  %v2551_v6 = vld [vmem:[%s3147_s1 + $0x58] sm:$0xff] (!%p191_p3)   ;;  %v2553_v8 = vld [vmem:[%s3147_s1 + $0x60] sm:$0xff] (!%p191_p3)   ;;  %v2555_v10 = vld [vmem:[%s3147_s1 + $0x68] sm:$0xff] (!%p191_p3)  }
   0x9   : > { %2210 = vmatprep.subr.bf16.mxu0 (!%p191_p3), %v2547_v2  ;;  %2505 = vmatprep.subr.bf16.mxu1 (!%p191_p3), %v2547_v2  ;;  %v2552_v7 = vld [vmem:[%s3147_s1 + $0x18] sm:$0xff] (!%p191_p3)   ;;  %v2554_v9 = vld [vmem:[%s3147_s1 + $0x20] sm:$0xff] (!%p191_p3)   ;;  %v2556_v13 = vld [vmem:[%s3147_s1 + $0x28] sm:$0xff] (!%p191_p3)  }
   0xa   : > { %v2557_v14 = vld [vmem:[%s3147_s1 + $0x70] sm:$0xff] (!%p191_p3)   ;;  %v2559_v16 = vld [vmem:[%s3147_s1 + $0x78] sm:$0xff] (!%p191_p3)   ;;  %v2567_v18 = vld [vmem:[%s3147_s1 + $0xc0] sm:$0xff] (!%p191_p3)  }
   0xb   : > { %v2558_v15 = vld [vmem:[%s3147_s1 + $0x30] sm:$0xff] (!%p191_p3)   ;;  %v2560_v17 = vld [vmem:[%s3147_s1 + $0x38] sm:$0xff] (!%p191_p3)   ;;  %v2570_v19 = vld [vmem:[%s3147_s1 + $0x100] sm:$0xff] (!%p191_p3)  }
   0xc   : > { %2211 = vmatpush3.bf16.msra.mxu0 (!%p191_p3), %v2548_v3  ;;  %2513 = vmatpush3.bf16.msra.mxu1 (!%p191_p3), %v2548_v3  ;;  %v2568_v22 = vld [vmem:[%s3147_s1 + $0x80] sm:$0xff] (!%p191_p3)   ;;  %v2569_v23 = vld [vmem:[%s3147_s1 + $0xc8] sm:$0xff] (!%p191_p3)   ;;  %v2578_v29 = vld [vmem:[%s3147_s1 + $0xd0] sm:$0xff] (!%p191_p3)  }
   0xd   : > { %2212 = vmatprep.subr.bf16.mxu0 (!%p191_p3), %v2549_v4  ;;  %2506 = vmatprep.subr.bf16.mxu1 (!%p191_p3), %v2549_v4  ;;  %v2589_v26 = vld [vmem:[%s3147_s1 + $0x108] sm:$0xff] (!%p191_p3)   ;;  %v2579_v31 = vld [vmem:[%s3147_s1 + $0x90] sm:$0xff] (!%p191_p3)   ;;  %v2580_v33 = vld [vmem:[%s3147_s1 + $0xd8] sm:$0xff] (!%p191_p3)  }
   0xe   : > { %s3155_s18 = smov (!%p237_p4, %s1922_s18), 863  ;;  %v2571_v27 = vld [vmem:[%s3147_s1 + $0x88] sm:$0xff]   ;;  %v2581_v35 = vld [vmem:[%s3147_s1 + $0x98] sm:$0xff]   ;;  %v2588_v36 = vld [vmem:[%s3147_s1 + $0xe0] sm:$0xff]  }
   0xf   : > { %s2520_s4 = smul.u32 20, %s3155_s18  ;;  %v2602_v38 = vld [vmem:[%s3147_s1 + $0x110] sm:$0xff]   ;;  %v2590_v40 = vld [vmem:[%s3147_s1 + $0xa0] sm:$0xff]   ;;  %v2591_v41 = vld [vmem:[%s3147_s1 + $0xe8] sm:$0xff]   ;;  %s1925_s8 = sshll.u32 %s3155_s18, 2 }
  0x10   : > { %2213 = vmatpush3.bf16.msra.mxu0 %v2550_v5  ;;  %2514 = vmatpush3.bf16.msra.mxu1 %v2550_v5  ;;  %v2592_v44 = vld [vmem:[%s3147_s1 + $0xa8] sm:$0xff]   ;;  %v2616_v45 = vld [vmem:[%s3147_s1 + $0x118] sm:$0xff]   ;;  %v2599_v48 = vld [vmem:[%s3147_s1 + $0xf0] sm:$0xff]   ;;  %s3063_s12 = scalar_lea.vmem %s3149_s3, %s1925_s8 }
  0x11   : > { %2214 = vmatprep.subr.bf16.mxu0 %v2551_v6  ;;  %2507 = vmatprep.subr.bf16.mxu1 %v2551_v6  ;;  %s2792_s11 = scalar_lea.vmem %s3146_s0, %s2520_s4  ;;  %v2600_v49 = vld [vmem:[%s3147_s1 + $0xb0] sm:$0xff]   ;;  %v2601_v50 = vld [vmem:[%s3147_s1 + $0xf8] sm:$0xff]   ;;  %v2623_v52 = vld [vmem:[%s3147_s1 + $0x120] sm:$0xff]  }
  0x12   : > { %v2563_v11 = vld [vmem:[%s2792_s11 + $0x4] ss:$20 sps:$4 sm:$0xff]   ;;  %v2561_v20 = vld [vmem:[%s2792_s11] ss:$20 sps:$4 sm:$0xff]   ;;  %v2576_v28 = vld [vmem:[%s2792_s11 + $0x28] ss:$20 sps:$4 sm:$0xff]  }
  0x13   : > { %v2566_v12 = vld [vmem:[%s2792_s11 + $0x1e4] ss:$20 sps:$4 sm:$0xff]   ;;  %1142 = vmatprep.mubr.bf16.mxu0 %v2563_v11  ;;  %v2564_v21 = vld [vmem:[%s2792_s11 + $0x1e0] ss:$20 sps:$4 sm:$0xff]   ;;  %v2577_v30 = vld [vmem:[%s2792_s11 + $0x208] ss:$20 sps:$4 sm:$0xff]  }
  0x14   : > { %2215 = vmatpush3.bf16.msra.mxu0 %v2552_v7  ;;  %2515 = vmatpush3.bf16.msra.mxu1 %v2552_v7  ;;  %v2572_v24 = vld [vmem:[%s2792_s11 + $0x2c] ss:$20 sps:$4 sm:$0xff]   ;;  %v2582_v32 = vld [vmem:[%s2792_s11 + $0x54] ss:$20 sps:$4 sm:$0xff]   ;;  %v2586_v37 = vld [vmem:[%s2792_s11 + $0x50] ss:$20 sps:$4 sm:$0xff]  }
  0x15   : > { %2216 = vmatprep.subr.bf16.mxu0 %v2553_v8  ;;  %2508 = vmatprep.subr.bf16.mxu1 %v2553_v8  ;;  %v2574_v25 = vld [vmem:[%s2792_s11 + $0x20c] ss:$20 sps:$4 sm:$0xff]   ;;  %v2584_v34 = vld [vmem:[%s2792_s11 + $0x234] ss:$20 sps:$4 sm:$0xff]   ;;  %v2587_v39 = vld [vmem:[%s2792_s11 + $0x230] ss:$20 sps:$4 sm:$0xff]  }
  0x16   : > { %1238 = vmatprep.mubr.bf16.mxu1 %v2566_v12  ;;  %v2593_v42 = vld [vmem:[%s2792_s11 + $0x7c] ss:$20 sps:$4 sm:$0xff]   ;;  %v2597_v46 = vld [vmem:[%s2792_s11 + $0x78] ss:$20 sps:$4 sm:$0xff]   ;;  %v2609_v56 = vld [vmem:[%s2792_s11 + $0xa0] ss:$20 sps:$4 sm:$0xff]  }
  0x17   : > { %v2595_v43 = vld [vmem:[%s2792_s11 + $0x25c] ss:$20 sps:$4 sm:$0xff]   ;;  %v2598_v47 = vld [vmem:[%s2792_s11 + $0x258] ss:$20 sps:$4 sm:$0xff]   ;;  %v2612_v59 = vld [vmem:[%s2792_s11 + $0x34] ss:$20 sps:$4 sm:$0xff]  }
  0x18   : > { %2217 = vmatpush3.bf16.msra.mxu0 %v2554_v9  ;;  %2516 = vmatpush3.bf16.msra.mxu1 %v2554_v9  ;;  %v2604_v51 = vld [vmem:[%s2792_s11 + $0xa4] ss:$20 sps:$4 sm:$0xff]   ;;  %v2608_v53 = vld [vmem:[%s2792_s11 + $0xc] ss:$20 sps:$4 sm:$0xff]   ;;  %v2606_v55 = vld [vmem:[%s2792_s11 + $0x8] ss:$20 sps:$4 sm:$0xff]  }
  0x19   : > { %2218 = vmatprep.subr.bf16.mxu0 %v2555_v10  ;;  %2509 = vmatprep.subr.bf16.mxu1 %v2555_v10  ;;  %v2603_v54 = vld [vmem:[%s3147_s1 + $0xb8] sm:$0xff]   ;;  %v2636_v57 = vld [vmem:[%s3147_s1 + $0x128] sm:$0xff]   ;;  %v2643_v60 = vld [vmem:[%s3147_s1 + $0x130] sm:$0xff]  }
  0x1a   : > { %v2610_v58 = vld [vmem:[%s2792_s11 + $0xcc] ss:$20 sps:$4 sm:$0xff]   ;;  %v2614_v61 = vld [vmem:[%s2792_s11 + $0xc8] ss:$20 sps:$4 sm:$0xff]   ;;  %v2615_v62 = vld [vmem:[%s2792_s11 + $0x30] ss:$20 sps:$4 sm:$0xff]  }
  0x1b   : > { %v2617_v63 = vld [vmem:[%s2792_s11 + $0xf4] ss:$20 sps:$4 sm:$0xff]   ;;  %v2619_v0 = vld [vmem:[%s2792_s11 + $0x5c] ss:$20 sps:$4 sm:$0xff]   ;;  %v2622_v3 = vld [vmem:[%s2792_s11 + $0x58] ss:$20 sps:$4 sm:$0xff]  }
  0x1c   : > { %2219 = vmatpush3.bf16.msra.mxu0 %v2556_v13  ;;  %2517 = vmatpush3.bf16.msra.mxu1 %v2556_v13  ;;  %v2656_v1 = vld [vmem:[%s3147_s1 + $0x138] sm:$0xff]   ;;  %v2621_v2 = vld [vmem:[%s2792_s11 + $0xf0] ss:$20 sps:$4 sm:$0xff]   ;;  %v2629_v7 = vld [vmem:[%s2792_s11 + $0x80] ss:$20 sps:$4 sm:$0xff]  }
  0x1d   : > { %2220 = vmatprep.subr.bf16.mxu0 %v2557_v14  ;;  %2510 = vmatprep.subr.bf16.mxu1 %v2557_v14  ;;  %v2624_v4 = vld [vmem:[%s2792_s11 + $0x11c] ss:$20 sps:$4 sm:$0xff]   ;;  %v2626_v5 = vld [vmem:[%s2792_s11 + $0x84] ss:$20 sps:$4 sm:$0xff]   ;;  %v2632_v9 = vld [vmem:[%s2792_s11 + $0xac] ss:$20 sps:$4 sm:$0xff]  }
  0x1e   : > { %v2628_v6 = vld [vmem:[%s2792_s11 + $0x118] ss:$20 sps:$4 sm:$0xff]   ;;  %v2634_v10 = vld [vmem:[%s2792_s11 + $0x140] ss:$20 sps:$4 sm:$0xff]   ;;  %v2635_v11 = vld [vmem:[%s2792_s11 + $0xa8] ss:$20 sps:$4 sm:$0xff]  }
  0x1f   : > { %v2630_v8 = vld [vmem:[%s2792_s11 + $0x144] ss:$20 sps:$4 sm:$0xff]   ;;  %v2637_v12 = vld [vmem:[%s2792_s11 + $0x16c] ss:$20 sps:$4 sm:$0xff]   ;;  %v2639_v13 = vld [vmem:[%s2792_s11 + $0xd4] ss:$20 sps:$4 sm:$0xff]  }
  0x20   : > { %2221 = vmatpush3.bf16.msra.mxu0 %v2558_v15  ;;  %2518 = vmatpush3.bf16.msra.mxu1 %v2558_v15  ;;  %v2641_v14 = vld [vmem:[%s2792_s11 + $0x168] ss:$20 sps:$4 sm:$0xff]   ;;  %v2642_v15 = vld [vmem:[%s2792_s11 + $0xd0] ss:$20 sps:$4 sm:$0xff]  }
  0x21   : > { %2222 = vmatprep.subr.bf16.mxu0 %v2559_v16  ;;  %2511 = vmatprep.subr.bf16.mxu1 %v2559_v16  ;;  %v2644_v16 = vld [vmem:[%s2792_s11 + $0x194] ss:$20 sps:$4 sm:$0xff]  }
  0x24   : > { %2223 = vmatpush3.bf16.msra.mxu0 %v2560_v17  ;;  %2519 = vmatpush3.bf16.msra.mxu1 %v2560_v17  ;;  %v2646_v17 = vld [vmem:[%s2792_s11 + $0xfc] ss:$20 sps:$4 sm:$0xff]  }
  0x25   : > { %2320 = vmatprep.subr.bf16.mxu1 %v2567_v18  ;;  %2456 = vmatprep.subr.bf16.mxu0 %v2570_v19  ;;  %v2648_v18 = vld [vmem:[%s2792_s11 + $0x190] ss:$20 sps:$4 sm:$0xff]  }
  0x27   : > { %1143 = vmatmul.mubr.bf16.vlgmr.msra.gmra.mrb[0].mxu0 %v2561_v20  ;;  %1239 = vmatmul.mubr.bf16.vlgmr.msra.gmra.mrb[0].mxu1 %v2564_v21  ;;  %v2650_v20 = vld [vmem:[%s2792_s11 + $0x1bc] ss:$20 sps:$4 sm:$0xff]   ;;  %v2652_v21 = vld [vmem:[%s2792_s11 + $0x124] ss:$20 sps:$4 sm:$0xff]  }
  0x28   : > { %2321 = vmatpush3.bf16.msra.mxu1 %v2568_v22  ;;  %2457 = vmatpush3.bf16.msra.mxu0 %v2570_v19  ;;  %v2649_v19 = vld [vmem:[%s2792_s11 + $0xf8] ss:$20 sps:$4 sm:$0xff]  }
  0x29   : > { %2322 = vmatprep.subr.bf16.mxu1 %v2569_v23  ;;  %1150 = vmatprep.mubr.bf16.mxu0 %v2572_v24  ;;  %v2654_v22 = vld [vmem:[%s2792_s11 + $0x1b8] ss:$20 sps:$4 sm:$0xff]   ;;  %v2655_v23 = vld [vmem:[%s2792_s11 + $0x120] ss:$20 sps:$4 sm:$0xff]  }
  0x2a   : > { %1246 = vmatprep.mubr.bf16.mxu1 %v2574_v25  ;;  %2458 = vmatprep.subr.bf16.mxu0 %v2589_v26  ;;  %v2657_v24 = vld [vmem:[%s2792_s11 + $0x14c] ss:$20 sps:$4 sm:$0xff]   ;;  %v2659_v25 = vld [vmem:[%s2792_s11 + $0x10] ss:$20 sps:$4 sm:$0xff]  }
  0x2c   : > { %2323 = vmatpush3.bf16.msra.mxu1 %v2571_v27  ;;  %2459 = vmatpush3.bf16.msra.mxu0 %v2589_v26  ;;  %v2660_v26 = vld [vmem:[%s2792_s11 + $0x148] ss:$20 sps:$4 sm:$0xff]   ;;  %v2661_v27 = vld [vmem:[%s2792_s11 + $0x38] ss:$20 sps:$4 sm:$0xff]  }
  0x2d   : > { %2324 = vmatprep.subr.bf16.mxu1 %v2578_v29  ;;  %2460 = vmatprep.subr.bf16.mxu0 %v2602_v38  ;;  %v2664_v29 = vld [vmem:[%s2792_s11 + $0x60] ss:$20 sps:$4 sm:$0xff]  }
  0x2f   : > { %1151 = vmatmul.mubr.bf16.gmra.mrb[4].mxu0 %v2576_v28  ;;  %1247 = vmatmul.mubr.bf16.gmra.mrb[4].mxu1 %v2577_v30  ;;  %v2662_v28 = vld [vmem:[%s2792_s11 + $0x174] ss:$20 sps:$4 sm:$0xff]   ;;  %v2665_v30 = vld [vmem:[%s2792_s11 + $0x170] ss:$20 sps:$4 sm:$0xff]  }
  0x30   : > { %2325 = vmatpush3.bf16.msra.mxu1 %v2579_v31  ;;  %1158 = vmatprep.mubr.bf16.mxu0 %v2582_v32  ;;  %v2666_v31 = vld [vmem:[%s2792_s11 + $0x88] ss:$20 sps:$4 sm:$0xff]  }
  0x31   : > { %2326 = vmatprep.subr.bf16.mxu1 %v2580_v33  ;;  %1254 = vmatprep.mubr.bf16.mxu1 %v2584_v34  ;;  %v2667_v32 = vld [vmem:[%s2792_s11 + $0x19c] ss:$20 sps:$4 sm:$0xff]   ;;  %v2670_v34 = vld [vmem:[%s2792_s11 + $0x198] ss:$20 sps:$4 sm:$0xff]  }
  0x32   : > { %2461 = vmatpush3.bf16.msra.mxu0 %v2602_v38  ;;  %v2669_v33 = vld [vmem:[%s2792_s11 + $0xb0] ss:$20 sps:$4 sm:$0xff]   ;;  %v2675_v38 = vld [vmem:[%s2792_s11 + $0x1c0] ss:$20 sps:$4 sm:$0xff]  }
  0x33   : > { %2462 = vmatprep.subr.bf16.mxu0 %v2616_v45 }
  0x34   : > { %2327 = vmatpush3.bf16.msra.mxu1 %v2581_v35  ;;  %v2671_v35 = vld [vmem:[%s2792_s11 + $0xd8] ss:$20 sps:$4 sm:$0xff]  }
  0x35   : > { %2328 = vmatprep.subr.bf16.mxu1 %v2588_v36  ;;  %v2672_v36 = vld [vmem:[%s2792_s11 + $0x1c4] ss:$20 sps:$4 sm:$0xff]  }
  0x36   : > { %2463 = vmatpush3.bf16.msra.mxu0 %v2616_v45  ;;  %v2684_v45 = vld [vmem:[%s2792_s11 + $0x1a0] ss:$20 sps:$4 sm:$0xff]  }
  0x37   : > { %1159 = vmatmul.mubr.bf16.gmra.mrb[8].mxu0 %v2586_v37  ;;  %1255 = vmatmul.mubr.bf16.gmra.mrb[8].mxu1 %v2587_v39  ;;  %v2674_v37 = vld [vmem:[%s2792_s11 + $0x100] ss:$20 sps:$4 sm:$0xff]   ;;  %v2676_v39 = vld [vmem:[%s2792_s11 + $0x128] ss:$20 sps:$4 sm:$0xff]  }
  0x38   : > { %2329 = vmatpush3.bf16.msra.mxu1 %v2590_v40  ;;  %1166 = vmatprep.mubr.bf16.mxu0 %v2593_v42  ;;  %v2677_v40 = vld [vmem:[%s2792_s11 + $0x1ec] ss:$20 sps:$4 sm:$0xff]   ;;  %v2680_v42 = vld [vmem:[%s2792_s11 + $0x1e8] ss:$20 sps:$4 sm:$0xff]  }
  0x39   : > { %2330 = vmatprep.subr.bf16.mxu1 %v2591_v41  ;;  %1262 = vmatprep.mubr.bf16.mxu1 %v2595_v43  ;;  %v2679_v41 = vld [vmem:[%s2792_s11 + $0x150] ss:$20 sps:$4 sm:$0xff]   ;;  %v2681_v43 = vld [vmem:[%s2792_s11 + $0x178] ss:$20 sps:$4 sm:$0xff]  }
  0x3a   : > { %2464 = vmatprep.subr.bf16.mxu0 %v2623_v52 }
  0x3b   : > { %2465 = vmatpush3.bf16.msra.mxu0 %v2623_v52  ;;  %v2692_v52 = vld [vmem:[%s2792_s11 + $0x264] ss:$20 sps:$4 sm:$0xff]  }
  0x3c   : > { %2331 = vmatpush3.bf16.msra.mxu1 %v2592_v44  ;;  %2466 = vmatprep.subr.bf16.mxu0 %v2636_v57  ;;  %v2682_v44 = vld [vmem:[%s2792_s11 + $0x214] ss:$20 sps:$4 sm:$0xff]  }
  0x3d   : > { %2332 = vmatprep.subr.bf16.mxu1 %v2599_v48  ;;  %v2687_v48 = vld [vmem:[%s2792_s11 + $0x23c] ss:$20 sps:$4 sm:$0xff]  }
  0x3f   : > { %1167 = vmatmul.mubr.bf16.gmra.mrb[12].mxu0 %v2597_v46  ;;  %1263 = vmatmul.mubr.bf16.gmra.mrb[12].mxu1 %v2598_v47  ;;  %v2685_v46 = vld [vmem:[%s2792_s11 + $0x210] ss:$20 sps:$4 sm:$0xff]   ;;  %v2686_v47 = vld [vmem:[%s2792_s11 + $0x1c8] ss:$20 sps:$4 sm:$0xff]  }
  0x40   : > { %2333 = vmatpush3.bf16.msra.mxu1 %v2600_v49  ;;  %1174 = vmatprep.mubr.bf16.mxu0 %v2604_v51  ;;  %v2689_v49 = vld [vmem:[%s2792_s11 + $0x1f0] ss:$20 sps:$4 sm:$0xff]   ;;  %v2691_v51 = vld [vmem:[%s2792_s11 + $0x218] ss:$20 sps:$4 sm:$0xff]  }
  0x41   : > { %2334 = vmatprep.subr.bf16.mxu1 %v2601_v50  ;;  %1303 = vmatprep.mubr.bf16.mxu1 %v2608_v53  ;;  %v2690_v50 = vld [vmem:[%s2792_s11 + $0x238] ss:$20 sps:$4 sm:$0xff]   ;;  %v2694_v53 = vld [vmem:[%s2792_s11 + $0x240] ss:$20 sps:$4 sm:$0xff]  }
  0x42   : > { %2467 = vmatpush3.bf16.msra.mxu0 %v2636_v57 }
  0x43   : > { %2468 = vmatprep.subr.bf16.mxu0 %v2643_v60 }
  0x44   : > { %2335 = vmatpush3.bf16.msra.mxu1 %v2603_v54  ;;  %v2695_v54 = vld [vmem:[%s2792_s11 + $0x260] ss:$20 sps:$4 sm:$0xff]  }
  0x46   : > { %2469 = vmatpush3.bf16.msra.mxu0 %v2643_v60 }
  0x47   : > { %1175 = vmatmul.mubr.bf16.gmra.mrb[16].mxu0 %v2609_v56  ;;  %1304 = vmatmul.mubr.bf16.vlgmr.msra.gmra.mrb[16].mxu1 %v2606_v55  ;;  %v2696_v55 = vld [vmem:[%s2792_s11 + $0x268] ss:$20 sps:$4 sm:$0xff]  }
  0x48   : > { %1182 = vmatprep.mubr.bf16.mxu0 %v2610_v58  ;;  %1311 = vmatprep.mubr.bf16.mxu1 %v2612_v59 }
  0x49   : > { %2470 = vmatprep.subr.bf16.mxu0 %v2656_v1 }
  0x4a   : > { %2471 = vmatpush3.bf16.msra.mxu0 %v2656_v1 }
  0x4f   : > { %1183 = vmatmul.mubr.bf16.gmra.mrb[20].mxu0 %v2614_v61  ;;  %1312 = vmatmul.mubr.bf16.gmra.mrb[20].mxu1 %v2615_v62 }
  0x50   : > { %1190 = vmatprep.mubr.bf16.mxu0 %v2617_v63  ;;  %1319 = vmatprep.mubr.bf16.mxu1 %v2619_v0 }
  0x57   : > { %1191 = vmatmul.mubr.bf16.gmra.mrb[24].mxu0 %v2621_v2  ;;  %1320 = vmatmul.mubr.bf16.gmra.mrb[24].mxu1 %v2622_v3 }
  0x58   : > { %1198 = vmatprep.mubr.bf16.mxu0 %v2624_v4  ;;  %1327 = vmatprep.mubr.bf16.mxu1 %v2626_v5 }
  0x5f   : > { %1199 = vmatmul.mubr.bf16.gmra.mrb[28].mxu0 %v2628_v6  ;;  %1328 = vmatmul.mubr.bf16.gmra.mrb[28].mxu1 %v2629_v7 }
  0x60   : > { %1206 = vmatprep.mubr.bf16.mxu0 %v2630_v8  ;;  %1335 = vmatprep.mubr.bf16.mxu1 %v2632_v9 }
  0x67   : > { %1207 = vmatmul.mubr.bf16.gmra.mrb[32].mxu0 %v2634_v10  ;;  %1336 = vmatmul.mubr.bf16.gmra.mrb[32].mxu1 %v2635_v11 }
  0x68   : > { %1214 = vmatprep.mubr.bf16.mxu0 %v2637_v12  ;;  %1343 = vmatprep.mubr.bf16.mxu1 %v2639_v13 }
  0x6f   : > { %1215 = vmatmul.mubr.bf16.gmra.mrb[36].mxu0 %v2641_v14  ;;  %1344 = vmatmul.mubr.bf16.gmra.mrb[36].mxu1 %v2642_v15 }
  0x70   : > { %1222 = vmatprep.mubr.bf16.mxu0 %v2644_v16  ;;  %1351 = vmatprep.mubr.bf16.mxu1 %v2646_v17 }
  0x77   : > { %1223 = vmatmul.mubr.bf16.gmra.mrb[40].mxu0 %v2648_v18  ;;  %1352 = vmatmul.mubr.bf16.gmra.mrb[40].mxu1 %v2649_v19 }
  0x78   : > { %1230 = vmatprep.mubr.bf16.mxu0 %v2650_v20  ;;  %1359 = vmatprep.mubr.bf16.mxu1 %v2652_v21 }
  0x7f   : > { %1231 = vmatmul.mubr.bf16.gmra.mrb[44].mxu0 %v2654_v22  ;;  %1360 = vmatmul.mubr.bf16.gmra.mrb[44].mxu1 %v2655_v23 }
  0x80   : > { %1367 = vmatprep.mubr.bf16.mxu1 %v2657_v24  ;;  %2472 = vmatprep.mubr.bf16.mxu0 %v2659_v25 }
  0x87   : > { %1368 = vmatmul.mubr.bf16.gmra.mrb[48].mxu1 %v2660_v26  ;;  %2473 = vmatmul.mubr.bf16.vlgmr.msra.gmra.mrb[48].mxu0 %v2661_v27 }
  0x88   : > { %1375 = vmatprep.mubr.bf16.mxu1 %v2662_v28  ;;  %2476 = vmatprep.mubr.bf16.mxu0 %v2664_v29 }
  0x8f   : > { %1376 = vmatmul.mubr.bf16.gmra.mrb[52].mxu1 %v2665_v30  ;;  %2477 = vmatmul.mubr.bf16.gmra.mrb[52].mxu0 %v2666_v31 }
  0x90   : > { %1383 = vmatprep.mubr.bf16.mxu1 %v2667_v32  ;;  %2480 = vmatprep.mubr.bf16.mxu0 %v2669_v33 }
  0x97   : > { %1384 = vmatmul.mubr.bf16.gmra.mrb[56].mxu1 %v2670_v34  ;;  %2481 = vmatmul.mubr.bf16.gmra.mrb[56].mxu0 %v2671_v35 }
  0x98   : > { %1391 = vmatprep.mubr.bf16.mxu1 %v2672_v36  ;;  %2484 = vmatprep.mubr.bf16.mxu0 %v2674_v37 }
  0x9f   : > { %1392 = vmatmul.mubr.bf16.gmra.mrb[60].mxu1 %v2675_v38  ;;  %2485 = vmatmul.mubr.bf16.gmra.mrb[60].mxu0 %v2676_v39 }
  0xa0   : > { %1399 = vmatprep.mubr.bf16.mxu1 %v2677_v40  ;;  %2488 = vmatprep.mubr.bf16.mxu0 %v2679_v41 }
  0xa7   : > { %1400 = vmatmul.mubr.bf16.gmra.mrb[64].mxu1 %v2680_v42  ;;  %2489 = vmatmul.mubr.bf16.gmra.mrb[64].mxu0 %v2681_v43  ;;  %v2986_v42 = vld [vmem:[%s3148_s2] ss:$0 sm:$0xff] }
  0xa8   : > { %1407 = vmatprep.mubr.bf16.mxu1 %v2682_v44  ;;  %2492 = vmatprep.mubr.bf16.mxu0 %v2684_v45 }
  0xaf   : > { %1408 = vmatmul.mubr.bf16.gmra.mrb[68].mxu1 %v2685_v46  ;;  %2493 = vmatmul.mubr.bf16.gmra.mrb[68].mxu0 %v2686_v47 }
  0xb0   : > { %1415 = vmatprep.mubr.bf16.mxu1 %v2687_v48  ;;  %2496 = vmatprep.mubr.bf16.mxu0 %v2689_v49 }
  0xb7   : > { %1416 = vmatmul.mubr.bf16.gmra.mrb[72].mxu1 %v2690_v50  ;;  %2497 = vmatmul.mubr.bf16.gmra.mrb[72].mxu0 %v2691_v51 }
  0xb8   : > { %1423 = vmatprep.mubr.bf16.mxu1 %v2692_v52  ;;  %2500 = vmatprep.mubr.bf16.mxu0 %v2694_v53 }
  0xbf   : > { %1424 = vmatmul.mubr.bf16.gmra.mrb[76].mxu1 %v2695_v54  ;;  %2501 = vmatmul.mubr.bf16.gmra.mrb[76].mxu0 %v2696_v55 }
  0xfa   : > { %v2296_v56 = vpop.f32.mrb[0].mxu1  ;;  %v2224_v57 = vpop.f32.mrb[0].mxu0 }
  0xfb   : > { %v2297_v58 = vpop.f32.mrb[1].mxu1  ;;  %v2225_v59 = vpop.f32.mrb[1].mxu0 }
  0xfc   : > { %v2967_v60 = vadd.f32 %v2297_v58, %v2296_v56  ;;  %v2299_v61 = vpop.f32.mrb[2].mxu1  ;;  %v2226_v62 = vadd.f32 %v2225_v59, %v2224_v57  ;;  %v2227_v63 = vpop.f32.mrb[2].mxu0 }
  0xfd   : > { %v2300_v0 = vpop.f32.mrb[3].mxu1  ;;  %v2228_v1 = vpop.f32.mrb[3].mxu0 }
  0xfe   : > { %v2969_v2 = vadd.f32 %v2300_v0, %v2299_v61  ;;  %v2229_v3 = vadd.f32 %v2228_v1, %v2227_v63  ;;  %v1145_v45 = vadd.f32 %v2226_v62, %v2986_v42 }
 0x100   : > { %v1148_v52 = vadd.f32 %v2229_v3, %v2986_v42 }
 0x102   : > { %v2302_v4 = vpop.f32.mrb[4].mxu1  ;;  %v2230_v5 = vpop.f32.mrb[4].mxu0 }
 0x103   : > { %v2303_v6 = vpop.f32.mrb[5].mxu1  ;;  %v2231_v7 = vpop.f32.mrb[5].mxu0 }
 0x104   : > { %v2971_v8 = vadd.f32 %v2303_v6, %v2302_v4  ;;  %v2305_v9 = vpop.f32.mrb[6].mxu1  ;;  %v2232_v10 = vadd.f32 %v2231_v7, %v2230_v5  ;;  %v2233_v11 = vpop.f32.mrb[6].mxu0 }
 0x105   : > { %v2306_v12 = vpop.f32.mrb[7].mxu1  ;;  %v2234_v13 = vpop.f32.mrb[7].mxu0 }
 0x106   : > { %v2973_v14 = vadd.f32 %v2306_v12, %v2305_v9  ;;  %v2235_v15 = vadd.f32 %v2234_v13, %v2233_v11  ;;  %v1153_v62 = vadd.f32 %v2232_v10, %v2986_v42 }
 0x108   : > { %v1156_v3 = vadd.f32 %v2235_v15, %v2986_v42 }
 0x10a   : > { %v2308_v16 = vpop.f32.mrb[8].mxu1  ;;  %v2236_v17 = vpop.f32.mrb[8].mxu0 }
 0x10b   : > { %v2309_v18 = vpop.f32.mrb[9].mxu1  ;;  %v2237_v19 = vpop.f32.mrb[9].mxu0 }
 0x10c   : > { %v2975_v20 = vadd.f32 %v2309_v18, %v2308_v16  ;;  %v2311_v21 = vpop.f32.mrb[10].mxu1  ;;  %v2238_v22 = vadd.f32 %v2237_v19, %v2236_v17  ;;  %v2239_v23 = vpop.f32.mrb[10].mxu0 }
 0x10d   : > { %v2312_v24 = vpop.f32.mrb[11].mxu1  ;;  %v2240_v25 = vpop.f32.mrb[11].mxu0 }
 0x10e   : > { %v2977_v26 = vadd.f32 %v2312_v24, %v2311_v21  ;;  %v2241_v27 = vadd.f32 %v2240_v25, %v2239_v23  ;;  %v1161_v10 = vadd.f32 %v2238_v22, %v2986_v42 }
 0x110   : > { %v1164_v15 = vadd.f32 %v2241_v27, %v2986_v42 }
 0x112   : > { %v2314_v28 = vpop.f32.mrb[12].mxu1  ;;  %v2242_v29 = vpop.f32.mrb[12].mxu0 }
 0x113   : > { %v2315_v30 = vpop.f32.mrb[13].mxu1  ;;  %v2243_v31 = vpop.f32.mrb[13].mxu0 }
 0x114   : > { %v2979_v32 = vadd.f32 %v2315_v30, %v2314_v28  ;;  %v2317_v33 = vpop.f32.mrb[14].mxu1  ;;  %v2244_v34 = vadd.f32 %v2243_v31, %v2242_v29  ;;  %v2245_v35 = vpop.f32.mrb[14].mxu0 }
 0x115   : > { %v2318_v36 = vpop.f32.mrb[15].mxu1  ;;  %v2246_v37 = vpop.f32.mrb[15].mxu0 }
 0x116   : > { %v2981_v38 = vadd.f32 %v2318_v36, %v2317_v33  ;;  %v2247_v39 = vadd.f32 %v2246_v37, %v2245_v35  ;;  %v1169_v22 = vadd.f32 %v2244_v34, %v2986_v42 }
 0x118   : > { %v1172_v27 = vadd.f32 %v2247_v39, %v2986_v42 }
 0x11a   : > { %v2336_v40 = vpop.f32.mrb[16].mxu1  ;;  %v2248_v41 = vpop.f32.mrb[16].mxu0 }
 0x11b   : > { %v2337_v43 = vpop.f32.mrb[17].mxu1  ;;  %v2249_v44 = vpop.f32.mrb[17].mxu0 }
 0x11c   : > { %v2338_v46 = vadd.f32 %v2337_v43, %v2336_v40  ;;  %v2339_v47 = vpop.f32.mrb[18].mxu1  ;;  %v2250_v48 = vadd.f32 %v2249_v44, %v2248_v41  ;;  %v2251_v49 = vpop.f32.mrb[18].mxu0 }
 0x11d   : > { %v2340_v50 = vpop.f32.mrb[19].mxu1  ;;  %v2252_v51 = vpop.f32.mrb[19].mxu0 }
 0x11e   : > { %v2341_v53 = vadd.f32 %v2340_v50, %v2339_v47  ;;  %v2253_v54 = vadd.f32 %v2252_v51, %v2251_v49  ;;  %v2990_v55 = vadd.f32 %v2338_v46, %v1145_v45  ;;  %v1177_v34 = vadd.f32 %v2250_v48, %v2986_v42 }
 0x120   : > { %v2992_v56 = vadd.f32 %v2341_v53, %v1148_v52  ;;  %v1180_v39 = vadd.f32 %v2253_v54, %v2986_v42 }
 0x122   : > { %v2342_v57 = vpop.f32.mrb[20].mxu1  ;;  %v2254_v58 = vpop.f32.mrb[20].mxu0 }
 0x123   : > { %v2343_v59 = vpop.f32.mrb[21].mxu1  ;;  %v2255_v61 = vpop.f32.mrb[21].mxu0 }
 0x124   : > { %v2344_v63 = vadd.f32 %v2343_v59, %v2342_v57  ;;  %v2345_v0 = vpop.f32.mrb[22].mxu1  ;;  %v2256_v1 = vadd.f32 %v2255_v61, %v2254_v58  ;;  %v2257_v4 = vpop.f32.mrb[22].mxu0 }
 0x125   : > { %v2346_v5 = vpop.f32.mrb[23].mxu1  ;;  %v2258_v6 = vpop.f32.mrb[23].mxu0 }
 0x126   : > { %v2347_v7 = vadd.f32 %v2346_v5, %v2345_v0  ;;  %v2259_v9 = vadd.f32 %v2258_v6, %v2257_v4  ;;  %v2996_v11 = vadd.f32 %v2344_v63, %v1153_v62  ;;  %v1185_v48 = vadd.f32 %v2256_v1, %v2986_v42 }
 0x128   : > { %v2998_v12 = vadd.f32 %v2347_v7, %v1156_v3 }
 0x12a   : > { %v2348_v13 = vpop.f32.mrb[24].mxu1  ;;  %v2260_v16 = vpop.f32.mrb[24].mxu0 }
 0x12b   : > { %v2349_v17 = vpop.f32.mrb[25].mxu1  ;;  %v2261_v18 = vpop.f32.mrb[25].mxu0 }
 0x12c   : > { %v2350_v19 = vadd.f32 %v2349_v17, %v2348_v13  ;;  %v2351_v21 = vpop.f32.mrb[26].mxu1  ;;  %v2262_v23 = vadd.f32 %v2261_v18, %v2260_v16  ;;  %v2263_v24 = vpop.f32.mrb[26].mxu0 }
 0x12d   : > { %v2352_v25 = vpop.f32.mrb[27].mxu1  ;;  %v2264_v28 = vpop.f32.mrb[27].mxu0 }
 0x12e   : > { %v2353_v29 = vadd.f32 %v2352_v25, %v2351_v21  ;;  %v2265_v30 = vadd.f32 %v2264_v28, %v2263_v24  ;;  %v3002_v31 = vadd.f32 %v2350_v19, %v1161_v10 }
 0x130   : > { %v3004_v33 = vadd.f32 %v2353_v29, %v1164_v15  ;;  %v1188_v15 = vadd.f32 %v2259_v9, %v2986_v42 }
 0x132   : > { %v2354_v35 = vpop.f32.mrb[28].mxu1  ;;  %v2266_v36 = vpop.f32.mrb[28].mxu0 }
 0x133   : > { %v2355_v37 = vpop.f32.mrb[29].mxu1  ;;  %v2267_v40 = vpop.f32.mrb[29].mxu0 }
 0x134   : > { %v2356_v41 = vadd.f32 %v2355_v37, %v2354_v35  ;;  %v2357_v43 = vpop.f32.mrb[30].mxu1  ;;  %v2268_v44 = vadd.f32 %v2267_v40, %v2266_v36  ;;  %v2269_v45 = vpop.f32.mrb[30].mxu0 }
 0x135   : > { %v2358_v46 = vpop.f32.mrb[31].mxu1  ;;  %v2270_v47 = vpop.f32.mrb[31].mxu0 }
 0x136   : > { %v2359_v49 = vadd.f32 %v2358_v46, %v2357_v43  ;;  %v2271_v50 = vadd.f32 %v2270_v47, %v2269_v45  ;;  %v3008_v51 = vadd.f32 %v2356_v41, %v1169_v22  ;;  %v1193_v43 = vadd.f32 %v2262_v23, %v2986_v42 }
 0x138   : > { %v3010_v52 = vadd.f32 %v2359_v49, %v1172_v27 }
 0x13a   : > { %v2360_v53 = vpop.f32.mrb[32].mxu1  ;;  %v2272_v57 = vpop.f32.mrb[32].mxu0 }
 0x13b   : > { %v2361_v58 = vpop.f32.mrb[33].mxu1  ;;  %v2273_v59 = vpop.f32.mrb[33].mxu0 }
 0x13c   : > { %v2362_v61 = vadd.f32 %v2361_v58, %v2360_v53  ;;  %v2363_v62 = vpop.f32.mrb[34].mxu1  ;;  %v2274_v63 = vadd.f32 %v2273_v59, %v2272_v57  ;;  %v2275_v0 = vpop.f32.mrb[34].mxu0  ;;  %v1196_v53 = vadd.f32 %v2265_v30, %v2986_v42 }
 0x13d   : > { %v2364_v4 = vpop.f32.mrb[35].mxu1  ;;  %v2276_v5 = vpop.f32.mrb[35].mxu0 }
 0x13e   : > { %v2365_v6 = vadd.f32 %v2364_v4, %v2363_v62  ;;  %v3014_v3 = vadd.f32 %v2276_v5, %v2275_v0  ;;  %v3016_v7 = vadd.f32 %v2362_v61, %v1177_v34  ;;  %v1201_v4 = vadd.f32 %v2268_v44, %v2986_v42 }
 0x140   : > { %v3018_v13 = vadd.f32 %v2365_v6, %v1180_v39 }
 0x142   : > { %v2366_v16 = vpop.f32.mrb[36].mxu1  ;;  %v2278_v17 = vpop.f32.mrb[36].mxu0 }
 0x143   : > { %v2367_v18 = vpop.f32.mrb[37].mxu1  ;;  %v2279_v10 = vpop.f32.mrb[37].mxu0 }
 0x144   : > { %v2368_v19 = vadd.f32 %v2367_v18, %v2366_v16  ;;  %v2369_v21 = vpop.f32.mrb[38].mxu1  ;;  %v3021_v24 = vadd.f32 %v2279_v10, %v2278_v17  ;;  %v2281_v25 = vpop.f32.mrb[38].mxu0  ;;  %v1204_v18 = vadd.f32 %v2271_v50, %v2986_v42 }
 0x145   : > { %v2370_v28 = vpop.f32.mrb[39].mxu1  ;;  %v2282_v54 = vpop.f32.mrb[39].mxu0 }
 0x146   : > { %v2371_v29 = vadd.f32 %v2370_v28, %v2369_v21  ;;  %v3024_v35 = vadd.f32 %v2282_v54, %v2281_v25  ;;  %v3026_v36 = vadd.f32 %v2368_v19, %v1185_v48 }
 0x148   : > { %v3028_v37 = vadd.f32 %v2371_v29, %v1188_v15  ;;  %v1209_v29 = vadd.f32 %v2274_v63, %v2986_v42 }
 0x14a   : > { %v2372_v40 = vpop.f32.mrb[40].mxu1  ;;  %v2284_v22 = vpop.f32.mrb[40].mxu0 }
 0x14b   : > { %v2373_v41 = vpop.f32.mrb[41].mxu1  ;;  %v2285_v1 = vpop.f32.mrb[41].mxu0 }
 0x14c   : > { %v2374_v45 = vadd.f32 %v2373_v41, %v2372_v40  ;;  %v2375_v46 = vpop.f32.mrb[42].mxu1  ;;  %v3031_v47 = vadd.f32 %v2285_v1, %v2284_v22  ;;  %v2287_v27 = vpop.f32.mrb[42].mxu0 }
 0x14d   : > { %v2376_v49 = vpop.f32.mrb[43].mxu1  ;;  %v2288_v9 = vpop.f32.mrb[43].mxu0 }
 0x14e   : > { %v2377_v57 = vadd.f32 %v2376_v49, %v2375_v46  ;;  %v3034_v58 = vadd.f32 %v2288_v9, %v2287_v27  ;;  %v3036_v59 = vadd.f32 %v2374_v45, %v1193_v43  ;;  %v1212_v46 = vadd.f32 %v3014_v3, %v2986_v42 }
 0x150   : > { %v3038_v34 = vadd.f32 %v2377_v57, %v1196_v53 }
 0x152   : > { %v2378_v61 = vpop.f32.mrb[44].mxu1  ;;  %v2290_v62 = vpop.f32.mrb[44].mxu0 }
 0x153   : > { %v2379_v0 = vpop.f32.mrb[45].mxu1  ;;  %v2291_v23 = vpop.f32.mrb[45].mxu0 }
 0x154   : > { %v2380_v5 = vadd.f32 %v2379_v0, %v2378_v61  ;;  %v2381_v39 = vpop.f32.mrb[46].mxu1  ;;  %v3041_v6 = vadd.f32 %v2291_v23, %v2290_v62  ;;  %v2293_v16 = vpop.f32.mrb[46].mxu0 }
 0x155   : > { %v2382_v17 = vpop.f32.mrb[47].mxu1  ;;  %v2294_v30 = vpop.f32.mrb[47].mxu0 }
 0x156   : > { %v2383_v10 = vadd.f32 %v2382_v17, %v2381_v39  ;;  %v3044_v48 = vadd.f32 %v2294_v30, %v2293_v16  ;;  %v3046_v19 = vadd.f32 %v2380_v5, %v1201_v4  ;;  %v1217_v4 = vadd.f32 %v3021_v24, %v2986_v42 }
 0x158   : > { %v3048_v21 = vadd.f32 %v2383_v10, %v1204_v18 }
 0x15a   : > { %v2384_v25 = vpop.f32.mrb[48].mxu1  ;;  %v2474_v28 = vpop.f32.mrb[48].mxu0 }
 0x15b   : > { %v1475_v44 = vadd.f32 %v2474_v28, %v2996_v11  ;;  %v2385_v54 = vpop.f32.mrb[49].mxu1  ;;  %v1466_v15 = vpop.f32.mrb[49].mxu0 }
 0x15c   : > { %v2386_v40 = vadd.f32 %v2385_v54, %v2384_v25  ;;  %v1467_v22 = vadd.f32 %v1466_v15, %v2990_v55  ;;  %v2387_v41 = vpop.f32.mrb[50].mxu1  ;;  %v2475_v50 = vpop.f32.mrb[50].mxu0  ;;  %v1220_v25 = vadd.f32 %v3024_v35, %v2986_v42 }
 0x15d   : > { %v1478_v1 = vadd.f32 %v2475_v50, %v2998_v12  ;;  %v2388_v43 = vpop.f32.mrb[51].mxu1  ;;  %v1469_v45 = vpop.f32.mrb[51].mxu0  ;;  %v1595_v9 = vmax.f32 %v1475_v44, 0.0 }
 0x15e   : > { %v2389_v27 = vadd.f32 %v2388_v43, %v2387_v41  ;;  %v1470_v11 = vadd.f32 %v1469_v45, %v2992_v56  ;;  %v3058_v49 = vadd.f32 %v2386_v40, %v1209_v29  ;;  %v1593_v53 = vmax.f32 %v1467_v22, 0.0 }
 0x15f   : > { %v1596_v63 = vmax.f32 %v1478_v1, 0.0 }
 0x160   : > { %v1594_v55 = vmax.f32 %v1470_v11, 0.0  ;;  %v3065_v12 = vadd.f32 %v2389_v27, %v1212_v46 }
 0x161   : > { %v2121_v57 = vpack.c.bf16 %v1596_v63, %v1595_v9 }
 0x162   : > { %v2116_v3 = vpack.c.bf16 %v1594_v55, %v1593_v53  ;;  %v2390_v61 = vpop.f32.mrb[52].mxu1  ;;  %v2478_v62 = vpop.f32.mrb[52].mxu0  ;;  %v1228_v53 = vadd.f32 %v3034_v58, %v2986_v42 }
 0x163   : > { %2193 = vst [vmem:[%s3063_s12 + $0x8] sm:$0xff] %v2121_v57   ;;  %v1491_v56 = vadd.f32 %v2478_v62, %v3008_v51  ;;  %v2391_v0 = vpop.f32.mrb[53].mxu1  ;;  %v1482_v23 = vpop.f32.mrb[53].mxu0 }
 0x164   : > { %2117 = vst [vmem:[%s3063_s12] sm:$0xff] %v2116_v3   ;;  %v2392_v5 = vadd.f32 %v2391_v0, %v2390_v61  ;;  %v1483_v39 = vadd.f32 %v1482_v23, %v3002_v31  ;;  %v2393_v16 = vpop.f32.mrb[54].mxu1  ;;  %v2479_v17 = vpop.f32.mrb[54].mxu0 }
 0x165   : > { %v1494_v30 = vadd.f32 %v2479_v17, %v3010_v52  ;;  %v2394_v18 = vpop.f32.mrb[55].mxu1  ;;  %v1485_v10 = vpop.f32.mrb[55].mxu0  ;;  %v1599_v24 = vmax.f32 %v1491_v56, 0.0 }
 0x166   : > { %v2395_v51 = vadd.f32 %v2394_v18, %v2393_v16  ;;  %v1486_v28 = vadd.f32 %v1485_v10, %v3004_v33  ;;  %v3077_v44 = vadd.f32 %v2392_v5, %v1217_v4  ;;  %v1597_v15 = vmax.f32 %v1483_v39, 0.0 }
 0x167   : > { %v1600_v54 = vmax.f32 %v1494_v30, 0.0  ;;  %v1225_v33 = vadd.f32 %v3031_v47, %v2986_v42 }
 0x168   : > { %v1598_v31 = vmax.f32 %v1486_v28, 0.0  ;;  %v3079_v29 = vadd.f32 %v2395_v51, %v1220_v25  ;;  %v1236_v51 = vadd.f32 %v3044_v48, %v2986_v42  ;;  %v1241_v48 = vadd.f32 %v2967_v60, %v2986_v42 }
 0x169   : > { %v2131_v40 = vpack.c.bf16 %v1600_v54, %v1599_v24 }
 0x16a   : > { %v2126_v52 = vpack.c.bf16 %v1598_v31, %v1597_v15  ;;  %v2396_v22 = vpop.f32.mrb[56].mxu1  ;;  %v2482_v41 = vpop.f32.mrb[56].mxu0 }
 0x16b   : > { %2195 = vst [vmem:[%s3063_s12 + $0x18] sm:$0xff] %v2131_v40   ;;  %v1507_v50 = vadd.f32 %v2482_v41, %v3026_v36  ;;  %v2397_v35 = vpop.f32.mrb[57].mxu1  ;;  %v1498_v1 = vpop.f32.mrb[57].mxu0 }
 0x16c   : > { %2194 = vst [vmem:[%s3063_s12 + $0x10] sm:$0xff] %v2126_v52   ;;  %v2398_v43 = vadd.f32 %v2397_v35, %v2396_v22  ;;  %v1499_v45 = vadd.f32 %v1498_v1, %v3016_v7  ;;  %v2399_v46 = vpop.f32.mrb[58].mxu1  ;;  %v2483_v27 = vpop.f32.mrb[58].mxu0 }
 0x16d   : > { %v1510_v11 = vadd.f32 %v2483_v27, %v3028_v37  ;;  %v2400_v9 = vpop.f32.mrb[59].mxu1  ;;  %v1501_v63 = vpop.f32.mrb[59].mxu0  ;;  %v1603_v47 = vmax.f32 %v1507_v50, 0.0 }
 0x16e   : > { %v2401_v36 = vadd.f32 %v2400_v9, %v2399_v46  ;;  %v1502_v55 = vadd.f32 %v1501_v63, %v3018_v13  ;;  %v3091_v57 = vadd.f32 %v2398_v43, %v1225_v33  ;;  %v1601_v61 = vmax.f32 %v1499_v45, 0.0 }
 0x16f   : > { %v1604_v3 = vmax.f32 %v1510_v11, 0.0  ;;  %v1233_v13 = vadd.f32 %v3041_v6, %v2986_v42  ;;  %v1244_v11 = vadd.f32 %v2969_v2, %v2986_v42  ;;  %v1249_v2 = vadd.f32 %v2971_v8, %v2986_v42 }
 0x170   : > { %v1602_v7 = vmax.f32 %v1502_v55, 0.0  ;;  %v3093_v62 = vadd.f32 %v2401_v36, %v1228_v53 }
 0x171   : > { %v2141_v56 = vpack.c.bf16 %v1604_v3, %v1603_v47 }
 0x172   : > { %v2136_v37 = vpack.c.bf16 %v1602_v7, %v1601_v61  ;;  %v2402_v0 = vpop.f32.mrb[60].mxu1  ;;  %v2486_v23 = vpop.f32.mrb[60].mxu0 }
 0x173   : > { %2197 = vst [vmem:[%s3063_s12 + $0x28] sm:$0xff] %v2141_v56   ;;  %v1523_v4 = vadd.f32 %v2486_v23, %v3046_v19  ;;  %v2403_v58 = vpop.f32.mrb[61].mxu1  ;;  %v1514_v5 = vpop.f32.mrb[61].mxu0 }
 0x174   : > { %2196 = vst [vmem:[%s3063_s12 + $0x20] sm:$0xff] %v2136_v37   ;;  %v2404_v39 = vadd.f32 %v2403_v58, %v2402_v0  ;;  %v1515_v16 = vadd.f32 %v1514_v5, %v3036_v59  ;;  %v2405_v17 = vpop.f32.mrb[62].mxu1  ;;  %v2487_v30 = vpop.f32.mrb[62].mxu0 }
 0x175   : > { %v1526_v18 = vadd.f32 %v2487_v30, %v3048_v21  ;;  %v2406_v10 = vpop.f32.mrb[63].mxu1  ;;  %v1517_v25 = vpop.f32.mrb[63].mxu0  ;;  %v1607_v6 = vmax.f32 %v1523_v4, 0.0 }
 0x176   : > { %v2407_v19 = vadd.f32 %v2406_v10, %v2405_v17  ;;  %v1518_v28 = vadd.f32 %v1517_v25, %v3038_v34  ;;  %v1394_v24 = vadd.f32 %v2404_v39, %v1233_v13  ;;  %v1605_v15 = vmax.f32 %v1515_v16, 0.0 }
 0x177   : > { %v1608_v54 = vmax.f32 %v1526_v18, 0.0  ;;  %v1252_v39 = vadd.f32 %v2973_v14, %v2986_v42  ;;  %v1257_v14 = vadd.f32 %v2975_v20, %v2986_v42 }
 0x178   : > { %v1606_v31 = vmax.f32 %v1518_v28, 0.0  ;;  %v1397_v59 = vadd.f32 %v2407_v19, %v1236_v51 }
 0x179   : > { %v2151_v40 = vpack.c.bf16 %v1608_v54, %v1607_v6 }
 0x17a   : > { %v2146_v52 = vpack.c.bf16 %v1606_v31, %v1605_v15  ;;  %v2408_v22 = vpop.f32.mrb[64].mxu1  ;;  %v2490_v21 = vpop.f32.mrb[64].mxu0 }
 0x17b   : > { %2199 = vst [vmem:[%s3063_s12 + $0x38] sm:$0xff] %v2151_v40   ;;  %v1539_v41 = vadd.f32 %v2490_v21, %v3077_v44  ;;  %v2409_v50 = vpop.f32.mrb[65].mxu1  ;;  %v1530_v35 = vpop.f32.mrb[65].mxu0 }
 0x17c   : > { %2198 = vst [vmem:[%s3063_s12 + $0x30] sm:$0xff] %v2146_v52   ;;  %v2410_v34 = vadd.f32 %v2409_v50, %v2408_v22  ;;  %v1531_v1 = vadd.f32 %v1530_v35, %v3058_v49  ;;  %v2411_v33 = vpop.f32.mrb[66].mxu1  ;;  %v2491_v43 = vpop.f32.mrb[66].mxu0 }
 0x17d   : > { %v1542_v45 = vadd.f32 %v2491_v43, %v3079_v29  ;;  %v2412_v46 = vpop.f32.mrb[67].mxu1  ;;  %v1533_v27 = vpop.f32.mrb[67].mxu0  ;;  %v1611_v60 = vmax.f32 %v1539_v41, 0.0  ;;  %v1260_v41 = vadd.f32 %v2977_v26, %v2986_v42 }
 0x17e   : > { %v2413_v44 = vadd.f32 %v2412_v46, %v2411_v33  ;;  %v1534_v9 = vadd.f32 %v1533_v27, %v3065_v12  ;;  %v1402_v63 = vadd.f32 %v2410_v34, %v1241_v48  ;;  %v1609_v36 = vmax.f32 %v1531_v1, 0.0 }
 0x17f   : > { %v1612_v53 = vmax.f32 %v1542_v45, 0.0 }
 0x180   : > { %v1610_v55 = vmax.f32 %v1534_v9, 0.0  ;;  %v1405_v49 = vadd.f32 %v2413_v44, %v1244_v11 }
 0x181   : > { %v2161_v47 = vpack.c.bf16 %v1612_v53, %v1611_v60 }
 0x182   : > { %v2156_v3 = vpack.c.bf16 %v1610_v55, %v1609_v36  ;;  %v2414_v61 = vpop.f32.mrb[68].mxu1  ;;  %v2494_v29 = vpop.f32.mrb[68].mxu0 }
 0x183   : > { %2201 = vst [vmem:[%s3063_s12 + $0x48] sm:$0xff] %v2161_v47   ;;  %v1555_v7 = vadd.f32 %v2494_v29, %v1394_v24  ;;  %v2415_v56 = vpop.f32.mrb[69].mxu1  ;;  %v1546_v37 = vpop.f32.mrb[69].mxu0  ;;  %v1268_v47 = vadd.f32 %v2981_v38, %v2986_v42 }
 0x184   : > { %2200 = vst [vmem:[%s3063_s12 + $0x40] sm:$0xff] %v2156_v3   ;;  %v2416_v12 = vadd.f32 %v2415_v56, %v2414_v61  ;;  %v1547_v0 = vadd.f32 %v1546_v37, %v3091_v57  ;;  %v2417_v23 = vpop.f32.mrb[70].mxu1  ;;  %v2495_v4 = vpop.f32.mrb[70].mxu0 }
 0x185   : > { %v1558_v58 = vadd.f32 %v2495_v4, %v1397_v59  ;;  %v2418_v5 = vpop.f32.mrb[71].mxu1  ;;  %v1549_v13 = vpop.f32.mrb[71].mxu0  ;;  %v1615_v18 = vmax.f32 %v1555_v7, 0.0 }
 0x186   : > { %v2419_v16 = vadd.f32 %v2418_v5, %v2417_v23  ;;  %v1550_v17 = vadd.f32 %v1549_v13, %v3093_v62  ;;  %v1410_v30 = vadd.f32 %v2416_v12, %v1249_v2  ;;  %v1613_v10 = vmax.f32 %v1547_v0, 0.0 }
 0x187   : > { %v1616_v8 = vmax.f32 %v1558_v58, 0.0 }
 0x188   : > { %v1614_v25 = vmax.f32 %v1550_v17, 0.0  ;;  %v1413_v51 = vadd.f32 %v2419_v16, %v1252_v39 }
 0x189   : > { %v2171_v57 = vpack.c.bf16 %v1616_v8, %v1615_v18 }
 0x18a   : > { %v2166_v19 = vpack.c.bf16 %v1614_v25, %v1613_v10  ;;  %v2420_v28 = vpop.f32.mrb[72].mxu1  ;;  %v2498_v24 = vpop.f32.mrb[72].mxu0 }
 0x18b   : > { %2203 = vst [vmem:[%s3063_s12 + $0x58] sm:$0xff] %v2171_v57   ;;  %v1571_v6 = vadd.f32 %v2498_v24, %v1410_v30  ;;  %v2421_v54 = vpop.f32.mrb[73].mxu1  ;;  %v1562_v15 = vpop.f32.mrb[73].mxu0 }
 0x18c   : > { %2202 = vst [vmem:[%s3063_s12 + $0x50] sm:$0xff] %v2166_v19   ;;  %v2422_v62 = vadd.f32 %v2421_v54, %v2420_v28  ;;  %v1563_v31 = vadd.f32 %v1562_v15, %v1402_v63  ;;  %v2423_v59 = vpop.f32.mrb[74].mxu1  ;;  %v2499_v40 = vpop.f32.mrb[74].mxu0  ;;  %v1265_v63 = vadd.f32 %v2979_v32, %v2986_v42 }
 0x18d   : > { %v1574_v52 = vadd.f32 %v2499_v40, %v1413_v51  ;;  %v2424_v22 = vpop.f32.mrb[75].mxu1  ;;  %v1565_v21 = vpop.f32.mrb[75].mxu0  ;;  %v1619_v34 = vmax.f32 %v1571_v6, 0.0 }
 0x18e   : > { %v2425_v50 = vadd.f32 %v2424_v22, %v2423_v59  ;;  %v1566_v35 = vadd.f32 %v1565_v21, %v1405_v49  ;;  %v1418_v48 = vadd.f32 %v2422_v62, %v1257_v14  ;;  %v1617_v33 = vmax.f32 %v1563_v31, 0.0 }
 0x18f   : > { %v1620_v1 = vmax.f32 %v1574_v52, 0.0 }
 0x190   : > { %v1618_v20 = vmax.f32 %v1566_v35, 0.0  ;;  %v1421_v43 = vadd.f32 %v2425_v50, %v1260_v41 }
 0x191   : > { %v2181_v45 = vpack.c.bf16 %v1620_v1, %v1619_v34 }
 0x192   : > { %v2176_v46 = vpack.c.bf16 %v1618_v20, %v1617_v33  ;;  %v2426_v27 = vpop.f32.mrb[76].mxu1  ;;  %v2502_v11 = vpop.f32.mrb[76].mxu0 }
 0x193   : > { %2205 = vst [vmem:[%s3063_s12 + $0x68] sm:$0xff] %v2181_v45   ;;  %v2427_v44 = vpop.f32.mrb[77].mxu1  ;;  %v1578_v9 = vpop.f32.mrb[77].mxu0 }
 0x194   : > { %2204 = vst [vmem:[%s3063_s12 + $0x60] sm:$0xff] %v2176_v46   ;;  %v2428_v26 = vadd.f32 %v2427_v44, %v2426_v27  ;;  %v1579_v60 = vadd.f32 %v1578_v9, %v1418_v48  ;;  %v2429_v53 = vpop.f32.mrb[78].mxu1  ;;  %v2503_v36 = vpop.f32.mrb[78].mxu0 }
 0x195   : > { %v2430_v55 = vpop.f32.mrb[79].mxu1  ;;  %v1581_v49 = vpop.f32.mrb[79].mxu0 }
 0x196   : > { %v1426_v3 = vadd.f32 %v2428_v26, %v1265_v63  ;;  %v2431_v61 = vadd.f32 %v2430_v55, %v2429_v53  ;;  %v1582_v29 = vadd.f32 %v1581_v49, %v1421_v43  ;;  %v1621_v56 = vmax.f32 %v1579_v60, 0.0 }
 0x198   : > { %v1587_v7 = vadd.f32 %v2502_v11, %v1426_v3  ;;  %v1429_v37 = vadd.f32 %v2431_v61, %v1268_v47  ;;  %v1622_v2 = vmax.f32 %v1582_v29, 0.0 }
 0x19a   : > { %v1590_v32 = vadd.f32 %v2503_v36, %v1429_v37  ;;  %v2186_v12 = vpack.c.bf16 %v1622_v2, %v1621_v56  ;;  %v1623_v0 = vmax.f32 %v1587_v7, 0.0 }
 0x19c   : > { %v1624_v23 = vmax.f32 %v1590_v32, 0.0  ;;  %2206 = vst [vmem:[%s3063_s12 + $0x70] sm:$0xff] %v2186_v12  }
 0x19e   : > { %v2191_v4 = vpack.c.bf16 %v1624_v23, %v1623_v0 }
 0x1a0   : > { %2207 = vst [vmem:[%s3063_s12 + $0x78] sm:$0xff] %v2191_v4  }
 0x1a1 PF: > { %s13_s14 = sadd.s32 1, %s2719_s14   ;;  %s3150_s12 = smov %s2715_s13 }
 0x1a2   : > { %p10_p5 = scmp.ge.s32.totalorder %s13_s14, 29   ;;  %s3151_s13 = smov %s3153_s15 }
 0x1a4   :  { %12 = sbr.rel (!%p10_p5) target bundleno = 2 (0x2), region = 68 }

// kernel: ensemble_forward.10
= control target key start
LH: loop header
LB: loop body
LE: loop exit
PB: predicated region body
PF: predicated region fallthrough
CT: control target
= control target key end

     0   :  { %s4151_s12 = smov 0   ;;  %s4153_s13 = smov 0   ;;  %s4947_s0 = inlined_call_operand.vmem [shape: bf16[1,1536,1152], index: 0, kind: input, shape index: {}]   ;;  %s4948_s1 = inlined_call_operand.vmem [shape: bf16[1,1152,128], index: 1, kind: input, shape index: {}]   ;;  %s4949_s2 = inlined_call_operand.vmem [shape: f32[1,1,128], index: 2, kind: input, shape index: {}]   ;;  %s4950_s3 = inlined_call_operand.vmem [shape: bf16[1,1536,128], index: 3, kind: output, shape index: {}]  }
   0x1   :  { %s4155_s14 = smov 0  }
   0x2 LB: > { %s28_s15 = sadd.s32 1, %s4125_s13  ;;  %p2883_p0 = scmp.ge.s32.totalorder %s4129_s14, 1  ;;  %s4129_s14 = sphi %s4155_s14, %s13_s14   ;;  %s4125_s13 = sphi %s4153_s13, %s4952_s13   ;;  %s4121_s12 = sphi %s4151_s12, %s4951_s12  }
   0x3   : > { %p30_p1 = scmp.ge.s32.totalorder %s28_s15, 6  ;;  %p190_p2 = scmp.lt.s32.totalorder %s4129_s14, 7 }
   0x5   : > { %s4954_s15 = smov (%p30_p1, %s28_s15), 0  ;;  %p191_p3 = pnand %p2883_p0, %p190_p2 }
   0x6   : > { %v3827_v0 = vld [vmem:[%s4948_s1 + $0x40] sm:$0xff] (!%p191_p3)   ;;  %s2884_s18 = sshll.u32 (!%p191_p3), %s4121_s12, 5  ;;  %v3829_v2 = vld [vmem:[%s4948_s1 + $0x48] sm:$0xff] (!%p191_p3)   ;;  %v3831_v4 = vld [vmem:[%s4948_s1 + $0x50] sm:$0xff] (!%p191_p3)  }
   0x7   : > { %194 = sbr.rel (%p191_p3) target bundleno = 545 (0x221), region = 32  ;;  %v3828_v1 = vld [vmem:[%s4948_s1] sm:$0xff] (!%p191_p3)   ;;  %3266 = vmatprep.subr.bf16.mxu0 (!%p191_p3), %v3827_v0  ;;  %3786 = vmatprep.subr.bf16.mxu1 (!%p191_p3), %v3827_v0  ;;  %p237_p4 = scmp.lt.s32.totalorder (!%p191_p3), %s2884_s18, 191  ;;  %v3830_v3 = vld [vmem:[%s4948_s1 + $0x8] sm:$0xff] (!%p191_p3)   ;;  %v3832_v5 = vld [vmem:[%s4948_s1 + $0x10] sm:$0xff] (!%p191_p3)  }
   0x8   : > { %3267 = vmatpush3.bf16.msra.mxu0 (!%p191_p3), %v3828_v1  ;;  %3794 = vmatpush3.bf16.msra.mxu1 (!%p191_p3), %v3828_v1  ;;  %v3833_v6 = vld [vmem:[%s4948_s1 + $0x58] sm:$0xff] (!%p191_p3)   ;;  %v3835_v8 = vld [vmem:[%s4948_s1 + $0x60] sm:$0xff] (!%p191_p3)   ;;  %v3837_v10 = vld [vmem:[%s4948_s1 + $0x68] sm:$0xff] (!%p191_p3)  }
   0x9   : > { %3268 = vmatprep.subr.bf16.mxu0 (!%p191_p3), %v3829_v2  ;;  %3787 = vmatprep.subr.bf16.mxu1 (!%p191_p3), %v3829_v2  ;;  %v3834_v7 = vld [vmem:[%s4948_s1 + $0x18] sm:$0xff] (!%p191_p3)   ;;  %v3836_v9 = vld [vmem:[%s4948_s1 + $0x20] sm:$0xff] (!%p191_p3)   ;;  %v3838_v13 = vld [vmem:[%s4948_s1 + $0x28] sm:$0xff] (!%p191_p3)  }
   0xa   : > { %v3839_v14 = vld [vmem:[%s4948_s1 + $0x70] sm:$0xff] (!%p191_p3)   ;;  %v3841_v16 = vld [vmem:[%s4948_s1 + $0x78] sm:$0xff] (!%p191_p3)   ;;  %v3849_v18 = vld [vmem:[%s4948_s1 + $0xc0] sm:$0xff] (!%p191_p3)  }
   0xb   : > { %v3840_v15 = vld [vmem:[%s4948_s1 + $0x30] sm:$0xff] (!%p191_p3)   ;;  %v3842_v17 = vld [vmem:[%s4948_s1 + $0x38] sm:$0xff] (!%p191_p3)   ;;  %v3852_v21 = vld [vmem:[%s4948_s1 + $0x140] sm:$0xff] (!%p191_p3)  }
   0xc   : > { %3269 = vmatpush3.bf16.msra.mxu0 (!%p191_p3), %v3830_v3  ;;  %3795 = vmatpush3.bf16.msra.mxu1 (!%p191_p3), %v3830_v3  ;;  %v3850_v22 = vld [vmem:[%s4948_s1 + $0x80] sm:$0xff] (!%p191_p3)   ;;  %v3851_v23 = vld [vmem:[%s4948_s1 + $0xc8] sm:$0xff] (!%p191_p3)   ;;  %v3861_v31 = vld [vmem:[%s4948_s1 + $0xd0] sm:$0xff] (!%p191_p3)  }
   0xd   : > { %3270 = vmatprep.subr.bf16.mxu0 (!%p191_p3), %v3831_v4  ;;  %3788 = vmatprep.subr.bf16.mxu1 (!%p191_p3), %v3831_v4  ;;  %v3854_v24 = vld [vmem:[%s4948_s1 + $0x100] sm:$0xff] (!%p191_p3)   ;;  %v3853_v27 = vld [vmem:[%s4948_s1 + $0x88] sm:$0xff] (!%p191_p3)   ;;  %v3862_v32 = vld [vmem:[%s4948_s1 + $0x90] sm:$0xff] (!%p191_p3)  }
   0xe   : > { %s4956_s18 = smov (!%p237_p4, %s2884_s18), 191  ;;  %v3872_v28 = vld [vmem:[%s4948_s1 + $0x148] sm:$0xff]   ;;  %v3863_v34 = vld [vmem:[%s4948_s1 + $0xd8] sm:$0xff]   ;;  %v3871_v40 = vld [vmem:[%s4948_s1 + $0xe0] sm:$0xff]  }
   0xf   : > { %s3802_s4 = smul.u32 36, %s4956_s18  ;;  %v3874_v33 = vld [vmem:[%s4948_s1 + $0x108] sm:$0xff]   ;;  %v3864_v37 = vld [vmem:[%s4948_s1 + $0x98] sm:$0xff]   ;;  %v3873_v41 = vld [vmem:[%s4948_s1 + $0xa0] sm:$0xff]  }
  0x10   : > { %3271 = vmatpush3.bf16.msra.mxu0 %v3832_v5  ;;  %3796 = vmatpush3.bf16.msra.mxu1 %v3832_v5  ;;  %v3875_v42 = vld [vmem:[%s4948_s1 + $0xe8] sm:$0xff]   ;;  %v3886_v43 = vld [vmem:[%s4948_s1 + $0x150] sm:$0xff]   ;;  %v3885_v52 = vld [vmem:[%s4948_s1 + $0xf8] sm:$0xff]  }
  0x11   : > { %3272 = vmatprep.subr.bf16.mxu0 %v3833_v6  ;;  %3789 = vmatprep.subr.bf16.mxu1 %v3833_v6  ;;  %s4202_s11 = scalar_lea.vmem %s4947_s0, %s3802_s4  ;;  %v3888_v46 = vld [vmem:[%s4948_s1 + $0x110] sm:$0xff]   ;;  %v3876_v47 = vld [vmem:[%s4948_s1 + $0xa8] sm:$0xff]   ;;  %v3903_v55 = vld [vmem:[%s4948_s1 + $0x158] sm:$0xff]  }
  0x12   : > { %v3845_v11 = vld [vmem:[%s4202_s11 + $0x4] ss:$36 sps:$4 sm:$0xff]   ;;  %v3855_v25 = vld [vmem:[%s4202_s11 + $0x4c] ss:$36 sps:$4 sm:$0xff]   ;;  %v3865_v35 = vld [vmem:[%s4202_s11 + $0x94] ss:$36 sps:$4 sm:$0xff]  }
  0x13   : > { %v3848_v12 = vld [vmem:[%s4202_s11 + $0x364] ss:$36 sps:$4 sm:$0xff]   ;;  %1782 = vmatprep.mubr.bf16.mxu0 %v3845_v11  ;;  %v3857_v26 = vld [vmem:[%s4202_s11 + $0x3ac] ss:$36 sps:$4 sm:$0xff]   ;;  %v3867_v36 = vld [vmem:[%s4202_s11 + $0x3f4] ss:$36 sps:$4 sm:$0xff]  }
  0x14   : > { %3273 = vmatpush3.bf16.msra.mxu0 %v3834_v7  ;;  %3797 = vmatpush3.bf16.msra.mxu1 %v3834_v7  ;;  %v3843_v19 = vld [vmem:[%s4202_s11] ss:$36 sps:$4 sm:$0xff]   ;;  %v3859_v29 = vld [vmem:[%s4202_s11 + $0x48] ss:$36 sps:$4 sm:$0xff]   ;;  %v3869_v38 = vld [vmem:[%s4202_s11 + $0x90] ss:$36 sps:$4 sm:$0xff]  }
  0x15   : > { %3274 = vmatprep.subr.bf16.mxu0 %v3835_v8  ;;  %3790 = vmatprep.subr.bf16.mxu1 %v3835_v8  ;;  %v3846_v20 = vld [vmem:[%s4202_s11 + $0x360] ss:$36 sps:$4 sm:$0xff]   ;;  %v3860_v30 = vld [vmem:[%s4202_s11 + $0x3a8] ss:$36 sps:$4 sm:$0xff]   ;;  %v3870_v39 = vld [vmem:[%s4202_s11 + $0x3f0] ss:$36 sps:$4 sm:$0xff]  }
  0x16   : > { %1878 = vmatprep.mubr.bf16.mxu1 %v3848_v12  ;;  %v3877_v44 = vld [vmem:[%s4202_s11 + $0xdc] ss:$36 sps:$4 sm:$0xff]   ;;  %v3883_v48 = vld [vmem:[%s4948_s1 + $0xf0] sm:$0xff]   ;;  %v3889_v53 = vld [vmem:[%s4202_s11 + $0x124] ss:$36 sps:$4 sm:$0xff]  }
  0x17   : > { %v3879_v45 = vld [vmem:[%s4202_s11 + $0x43c] ss:$36 sps:$4 sm:$0xff]   ;;  %v3884_v51 = vld [vmem:[%s4948_s1 + $0xb0] sm:$0xff]   ;;  %v3891_v58 = vld [vmem:[%s4202_s11 + $0x8] ss:$36 sps:$4 sm:$0xff]  }
  0x18   : > { %3275 = vmatpush3.bf16.msra.mxu0 %v3836_v9  ;;  %3798 = vmatpush3.bf16.msra.mxu1 %v3836_v9  ;;  %v3881_v49 = vld [vmem:[%s4202_s11 + $0xd8] ss:$36 sps:$4 sm:$0xff]   ;;  %v3893_v54 = vld [vmem:[%s4202_s11 + $0xc] ss:$36 sps:$4 sm:$0xff]   ;;  %v3894_v59 = vld [vmem:[%s4202_s11 + $0x120] ss:$36 sps:$4 sm:$0xff]  }
  0x19   : > { %3276 = vmatprep.subr.bf16.mxu0 %v3837_v10  ;;  %3791 = vmatprep.subr.bf16.mxu1 %v3837_v10  ;;  %v3882_v50 = vld [vmem:[%s4202_s11 + $0x438] ss:$36 sps:$4 sm:$0xff]   ;;  %v3895_v60 = vld [vmem:[%s4948_s1 + $0x1c0] sm:$0xff]   ;;  %v3897_v62 = vld [vmem:[%s4202_s11 + $0x16c] ss:$36 sps:$4 sm:$0xff]  }
  0x1a   : > { %v3904_v56 = vld [vmem:[%s4948_s1 + $0x118] sm:$0xff]   ;;  %v3896_v61 = vld [vmem:[%s4948_s1 + $0x180] sm:$0xff]   ;;  %v3911_v1 = vld [vmem:[%s4948_s1 + $0x1c8] sm:$0xff]  }
  0x1b   : > { %v3887_v57 = vld [vmem:[%s4948_s1 + $0xb8] sm:$0xff]   ;;  %v3913_v0 = vld [vmem:[%s4948_s1 + $0x160] sm:$0xff]   ;;  %v3912_v3 = vld [vmem:[%s4948_s1 + $0x188] sm:$0xff]  }
  0x1c   : > { %3277 = vmatpush3.bf16.msra.mxu0 %v3838_v13  ;;  %3799 = vmatpush3.bf16.msra.mxu1 %v3838_v13  ;;  %v3899_v63 = vld [vmem:[%s4202_s11 + $0x54] ss:$36 sps:$4 sm:$0xff]   ;;  %v3914_v2 = vld [vmem:[%s4948_s1 + $0x120] sm:$0xff]   ;;  %v3901_v4 = vld [vmem:[%s4202_s11 + $0x168] ss:$36 sps:$4 sm:$0xff]  }
  0x1d   : > { %3278 = vmatprep.subr.bf16.mxu0 %v3839_v14  ;;  %3792 = vmatprep.subr.bf16.mxu1 %v3839_v14  ;;  %v3902_v5 = vld [vmem:[%s4202_s11 + $0x50] ss:$36 sps:$4 sm:$0xff]   ;;  %v3907_v7 = vld [vmem:[%s4202_s11 + $0x9c] ss:$36 sps:$4 sm:$0xff]   ;;  %v3927_v8 = vld [vmem:[%s4948_s1 + $0x168] sm:$0xff]  }
  0x1e   : > { %v3905_v6 = vld [vmem:[%s4202_s11 + $0x1b4] ss:$36 sps:$4 sm:$0xff]   ;;  %v3929_v10 = vld [vmem:[%s4948_s1 + $0x128] sm:$0xff]   ;;  %v3915_v14 = vld [vmem:[%s4202_s11 + $0x1fc] ss:$36 sps:$4 sm:$0xff]  }
  0x1f   : > { %v3928_v9 = vld [vmem:[%s4948_s1 + $0x1d0] sm:$0xff]   ;;  %v3910_v13 = vld [vmem:[%s4202_s11 + $0x98] ss:$36 sps:$4 sm:$0xff]  }
  0x20   : > { %3279 = vmatpush3.bf16.msra.mxu0 %v3840_v15  ;;  %3800 = vmatpush3.bf16.msra.mxu1 %v3840_v15  ;;  %v3930_v11 = vld [vmem:[%s4948_s1 + $0x190] sm:$0xff]  }
  0x21   : > { %3280 = vmatprep.subr.bf16.mxu0 %v3841_v16  ;;  %3793 = vmatprep.subr.bf16.mxu1 %v3841_v16  ;;  %v3909_v12 = vld [vmem:[%s4202_s11 + $0x1b0] ss:$36 sps:$4 sm:$0xff]  }
  0x22   : > { %v3937_v15 = vld [vmem:[%s4948_s1 + $0x170] sm:$0xff]  }
  0x23   : > { %v3938_v16 = vld [vmem:[%s4948_s1 + $0x130] sm:$0xff]  }
  0x24   : > { %3281 = vmatpush3.bf16.msra.mxu0 %v3842_v17  ;;  %3801 = vmatpush3.bf16.msra.mxu1 %v3842_v17  ;;  %v3917_v17 = vld [vmem:[%s4202_s11 + $0xe4] ss:$36 sps:$4 sm:$0xff]  }
  0x25   : > { %3378 = vmatprep.subr.bf16.mxu1 %v3849_v18  ;;  %3490 = vmatprep.subr.bf16.mxu0 %v3852_v21  ;;  %v3945_v18 = vld [vmem:[%s4948_s1 + $0x1d8] sm:$0xff]   ;;  %v3920_v21 = vld [vmem:[%s4202_s11 + $0xe0] ss:$36 sps:$4 sm:$0xff]  }
  0x27   : > { %1783 = vmatmul.mubr.bf16.vlgmr.msra.gmra.mrb[0].mxu0 %v3843_v19  ;;  %1879 = vmatmul.mubr.bf16.vlgmr.msra.gmra.mrb[0].mxu1 %v3846_v20  ;;  %v3946_v19 = vld [vmem:[%s4948_s1 + $0x198] sm:$0xff]  }
  0x28   : > { %3379 = vmatpush3.bf16.msra.mxu1 %v3850_v22  ;;  %3491 = vmatpush3.bf16.msra.mxu0 %v3854_v24  ;;  %v3919_v20 = vld [vmem:[%s4202_s11 + $0x1f8] ss:$36 sps:$4 sm:$0xff]   ;;  %v3921_v22 = vld [vmem:[%s4202_s11 + $0x244] ss:$36 sps:$4 sm:$0xff]  }
  0x29   : > { %3380 = vmatprep.subr.bf16.mxu1 %v3851_v23  ;;  %1790 = vmatprep.mubr.bf16.mxu0 %v3855_v25  ;;  %v3923_v23 = vld [vmem:[%s4202_s11 + $0x12c] ss:$36 sps:$4 sm:$0xff]   ;;  %v3953_v24 = vld [vmem:[%s4948_s1 + $0x178] sm:$0xff]  }
  0x2a   : > { %1886 = vmatprep.mubr.bf16.mxu1 %v3857_v26  ;;  %3492 = vmatprep.subr.bf16.mxu0 %v3872_v28  ;;  %v3954_v25 = vld [vmem:[%s4948_s1 + $0x138] sm:$0xff]   ;;  %v3961_v26 = vld [vmem:[%s4948_s1 + $0x1e0] sm:$0xff]  }
  0x2b   : > { %v3962_v28 = vld [vmem:[%s4948_s1 + $0x1a0] sm:$0xff]  }
  0x2c   : > { %3381 = vmatpush3.bf16.msra.mxu1 %v3853_v27  ;;  %3493 = vmatpush3.bf16.msra.mxu0 %v3874_v33  ;;  %v3925_v27 = vld [vmem:[%s4202_s11 + $0x240] ss:$36 sps:$4 sm:$0xff]   ;;  %v3976_v33 = vld [vmem:[%s4948_s1 + $0x1e8] sm:$0xff]  }
  0x2d   : > { %3382 = vmatprep.subr.bf16.mxu1 %v3861_v31  ;;  %3494 = vmatprep.subr.bf16.mxu0 %v3886_v43  ;;  %v3931_v31 = vld [vmem:[%s4202_s11 + $0x28c] ss:$36 sps:$4 sm:$0xff]   ;;  %v3947_v43 = vld [vmem:[%s4202_s11 + $0x31c] ss:$36 sps:$4 sm:$0xff]  }
  0x2f   : > { %1791 = vmatmul.mubr.bf16.gmra.mrb[4].mxu0 %v3859_v29  ;;  %1887 = vmatmul.mubr.bf16.gmra.mrb[4].mxu1 %v3860_v30  ;;  %v3963_v29 = vld [vmem:[%s4948_s1 + $0x200] sm:$0xff]   ;;  %v3926_v30 = vld [vmem:[%s4202_s11 + $0x128] ss:$36 sps:$4 sm:$0xff]  }
  0x30   : > { %3383 = vmatpush3.bf16.msra.mxu1 %v3862_v32  ;;  %1798 = vmatprep.mubr.bf16.mxu0 %v3865_v35  ;;  %v3933_v32 = vld [vmem:[%s4202_s11 + $0x174] ss:$36 sps:$4 sm:$0xff]   ;;  %v3977_v35 = vld [vmem:[%s4948_s1 + $0x1a8] sm:$0xff]  }
  0x31   : > { %3384 = vmatprep.subr.bf16.mxu1 %v3863_v34  ;;  %1894 = vmatprep.mubr.bf16.mxu1 %v3867_v36  ;;  %v3935_v34 = vld [vmem:[%s4202_s11 + $0x288] ss:$36 sps:$4 sm:$0xff]   ;;  %v3936_v36 = vld [vmem:[%s4202_s11 + $0x170] ss:$36 sps:$4 sm:$0xff]  }
  0x32   : > { %3495 = vmatpush3.bf16.msra.mxu0 %v3888_v46  ;;  %v3952_v46 = vld [vmem:[%s4202_s11 + $0x200] ss:$36 sps:$4 sm:$0xff]  }
  0x33   : > { %3496 = vmatprep.subr.bf16.mxu0 %v3903_v55  ;;  %v3978_v55 = vld [vmem:[%s4948_s1 + $0x208] sm:$0xff]  }
  0x34   : > { %3385 = vmatpush3.bf16.msra.mxu1 %v3864_v37  ;;  %v3939_v37 = vld [vmem:[%s4202_s11 + $0x2d4] ss:$36 sps:$4 sm:$0xff]  }
  0x35   : > { %3386 = vmatprep.subr.bf16.mxu1 %v3871_v40  ;;  %v3944_v40 = vld [vmem:[%s4202_s11 + $0x1b8] ss:$36 sps:$4 sm:$0xff]  }
  0x36   : > { %3497 = vmatpush3.bf16.msra.mxu0 %v3904_v56  ;;  %v3993_v56 = vld [vmem:[%s4948_s1 + $0x210] sm:$0xff]  }
  0x37   : > { %1799 = vmatmul.mubr.bf16.gmra.mrb[8].mxu0 %v3869_v38  ;;  %1895 = vmatmul.mubr.bf16.gmra.mrb[8].mxu1 %v3870_v39  ;;  %v3941_v38 = vld [vmem:[%s4202_s11 + $0x1bc] ss:$36 sps:$4 sm:$0xff]   ;;  %v3943_v39 = vld [vmem:[%s4202_s11 + $0x2d0] ss:$36 sps:$4 sm:$0xff]  }
  0x38   : > { %3387 = vmatpush3.bf16.msra.mxu1 %v3873_v41  ;;  %1806 = vmatprep.mubr.bf16.mxu0 %v3877_v44  ;;  %v3991_v41 = vld [vmem:[%s4948_s1 + $0x1f0] sm:$0xff]   ;;  %v3949_v44 = vld [vmem:[%s4202_s11 + $0x204] ss:$36 sps:$4 sm:$0xff]  }
  0x39   : > { %3388 = vmatprep.subr.bf16.mxu1 %v3875_v42  ;;  %1902 = vmatprep.mubr.bf16.mxu1 %v3879_v45  ;;  %v3992_v42 = vld [vmem:[%s4948_s1 + $0x1b0] sm:$0xff]   ;;  %v3951_v45 = vld [vmem:[%s4202_s11 + $0x318] ss:$36 sps:$4 sm:$0xff]  }
  0x3a   : > { %3498 = vmatprep.subr.bf16.mxu0 %v3913_v0  ;;  %v3975_v0 = vld [vmem:[%s4202_s11 + $0xa0] ss:$36 sps:$4 sm:$0xff]  }
  0x3b   : > { %3499 = vmatpush3.bf16.msra.mxu0 %v3914_v2  ;;  %v3981_v2 = vld [vmem:[%s4202_s11 + $0xec] ss:$36 sps:$4 sm:$0xff]  }
  0x3c   : > { %3389 = vmatpush3.bf16.msra.mxu1 %v3876_v47  ;;  %3500 = vmatprep.subr.bf16.mxu0 %v3927_v8  ;;  %v4006_v47 = vld [vmem:[%s4948_s1 + $0x1f8] sm:$0xff]  }
  0x3d   : > { %3390 = vmatprep.subr.bf16.mxu1 %v3883_v48  ;;  %v4007_v48 = vld [vmem:[%s4948_s1 + $0x1b8] sm:$0xff]  }
  0x3e   : > { %v3987_v8 = vld [vmem:[%s4202_s11 + $0x134] ss:$36 sps:$4 sm:$0xff]  }
  0x3f   : > { %1807 = vmatmul.mubr.bf16.gmra.mrb[12].mxu0 %v3881_v49  ;;  %1903 = vmatmul.mubr.bf16.gmra.mrb[12].mxu1 %v3882_v50  ;;  %v3955_v49 = vld [vmem:[%s4202_s11 + $0x24c] ss:$36 sps:$4 sm:$0xff]   ;;  %v3959_v50 = vld [vmem:[%s4202_s11 + $0x14] ss:$36 sps:$4 sm:$0xff]  }
  0x40   : > { %3391 = vmatpush3.bf16.msra.mxu1 %v3884_v51  ;;  %1814 = vmatprep.mubr.bf16.mxu0 %v3889_v53  ;;  %v3957_v51 = vld [vmem:[%s4202_s11 + $0x10] ss:$36 sps:$4 sm:$0xff]  }
  0x41   : > { %3392 = vmatprep.subr.bf16.mxu1 %v3885_v52  ;;  %1943 = vmatprep.mubr.bf16.mxu1 %v3893_v54  ;;  %v3960_v52 = vld [vmem:[%s4202_s11 + $0x248] ss:$36 sps:$4 sm:$0xff]   ;;  %v3964_v53 = vld [vmem:[%s4202_s11 + $0x294] ss:$36 sps:$4 sm:$0xff]   ;;  %v3966_v54 = vld [vmem:[%s4202_s11 + $0x5c] ss:$36 sps:$4 sm:$0xff]  }
  0x42   : > { %3501 = vmatpush3.bf16.msra.mxu0 %v3929_v10  ;;  %v3989_v10 = vld [vmem:[%s4202_s11 + $0x368] ss:$36 sps:$4 sm:$0xff]  }
  0x43   : > { %3502 = vmatprep.subr.bf16.mxu0 %v3937_v15  ;;  %v3999_v15 = vld [vmem:[%s4202_s11 + $0x178] ss:$36 sps:$4 sm:$0xff]  }
  0x44   : > { %3393 = vmatpush3.bf16.msra.mxu1 %v3887_v57  ;;  %v3968_v57 = vld [vmem:[%s4202_s11 + $0x290] ss:$36 sps:$4 sm:$0xff]  }
  0x45   : > { %3602 = vmatprep.subr.bf16.mxu1 %v3895_v60  ;;  %v3972_v60 = vld [vmem:[%s4202_s11 + $0xa4] ss:$36 sps:$4 sm:$0xff]  }
  0x46   : > { %3503 = vmatpush3.bf16.msra.mxu0 %v3938_v16  ;;  %v4000_v16 = vld [vmem:[%s4202_s11 + $0x3fc] ss:$36 sps:$4 sm:$0xff]  }
  0x47   : > { %1815 = vmatmul.mubr.bf16.gmra.mrb[16].mxu0 %v3894_v59  ;;  %1944 = vmatmul.mubr.bf16.vlgmr.msra.gmra.mrb[16].mxu1 %v3891_v58  ;;  %v3969_v58 = vld [vmem:[%s4202_s11 + $0x58] ss:$36 sps:$4 sm:$0xff]  }
  0x48   : > { %3603 = vmatpush3.bf16.msra.mxu1 %v3896_v61  ;;  %1822 = vmatprep.mubr.bf16.mxu0 %v3897_v62  ;;  %v3970_v59 = vld [vmem:[%s4202_s11 + $0x2dc] ss:$36 sps:$4 sm:$0xff]  }
  0x49   : > { %1951 = vmatprep.mubr.bf16.mxu1 %v3899_v63  ;;  %3604 = vmatprep.subr.bf16.mxu1 %v3911_v1  ;;  %v4008_v61 = vld [vmem:[%s4948_s1 + $0x218] sm:$0xff]   ;;  %v4021_v62 = vld [vmem:[%s4948_s1 + $0x220] sm:$0xff]  }
  0x4a   : > { %3504 = vmatprep.subr.bf16.mxu0 %v3953_v24  ;;  %v3974_v63 = vld [vmem:[%s4202_s11 + $0x2d8] ss:$36 sps:$4 sm:$0xff]   ;;  %v3979_v1 = vld [vmem:[%s4202_s11 + $0x324] ss:$36 sps:$4 sm:$0xff]  }
  0x4b   : > { %3505 = vmatpush3.bf16.msra.mxu0 %v3954_v25  ;;  %v4015_v24 = vld [vmem:[%s4202_s11 + $0x254] ss:$36 sps:$4 sm:$0xff]   ;;  %v4019_v25 = vld [vmem:[%s4202_s11 + $0x1c] ss:$36 sps:$4 sm:$0xff]  }
  0x4c   : > { %3605 = vmatpush3.bf16.msra.mxu1 %v3912_v3  ;;  %3738 = vmatprep.subr.bf16.mxu0 %v3963_v29  ;;  %v4034_v3 = vld [vmem:[%s4948_s1 + $0x228] sm:$0xff]  }
  0x4d   : > { %3606 = vmatprep.subr.bf16.mxu1 %v3928_v9  ;;  %v4060_v9 = vld [vmem:[%s4948_s1 + $0x238] sm:$0xff]  }
  0x4f   : > { %1823 = vmatmul.mubr.bf16.gmra.mrb[20].mxu0 %v3901_v4  ;;  %1952 = vmatmul.mubr.bf16.gmra.mrb[20].mxu1 %v3902_v5  ;;  %v3983_v4 = vld [vmem:[%s4202_s11 + $0x320] ss:$36 sps:$4 sm:$0xff]   ;;  %v3984_v5 = vld [vmem:[%s4202_s11 + $0xe8] ss:$36 sps:$4 sm:$0xff]  }
  0x50   : > { %1830 = vmatprep.mubr.bf16.mxu0 %v3905_v6  ;;  %1959 = vmatprep.mubr.bf16.mxu1 %v3907_v7  ;;  %v4047_v6 = vld [vmem:[%s4948_s1 + $0x230] sm:$0xff]  }
  0x51   : > { %3607 = vmatpush3.bf16.msra.mxu1 %v3930_v11  ;;  %v3985_v7 = vld [vmem:[%s4202_s11 + $0x36c] ss:$36 sps:$4 sm:$0xff]  }
  0x52   : > { %3608 = vmatprep.subr.bf16.mxu1 %v3945_v18  ;;  %v3990_v11 = vld [vmem:[%s4202_s11 + $0x130] ss:$36 sps:$4 sm:$0xff]   ;;  %v4004_v18 = vld [vmem:[%s4202_s11 + $0x3f8] ss:$36 sps:$4 sm:$0xff]  }
  0x55   : > { %3609 = vmatpush3.bf16.msra.mxu1 %v3946_v19  ;;  %v4005_v19 = vld [vmem:[%s4202_s11 + $0x1c0] ss:$36 sps:$4 sm:$0xff]  }
  0x56   : > { %3610 = vmatprep.subr.bf16.mxu1 %v3961_v26  ;;  %v4017_v26 = vld [vmem:[%s4202_s11 + $0x18] ss:$36 sps:$4 sm:$0xff]  }
  0x57   : > { %1831 = vmatmul.mubr.bf16.gmra.mrb[24].mxu0 %v3909_v12  ;;  %1960 = vmatmul.mubr.bf16.gmra.mrb[24].mxu1 %v3910_v13  ;;  %v3994_v12 = vld [vmem:[%s4202_s11 + $0x3b4] ss:$36 sps:$4 sm:$0xff]   ;;  %v3996_v13 = vld [vmem:[%s4202_s11 + $0x17c] ss:$36 sps:$4 sm:$0xff]  }
  0x58   : > { %1838 = vmatprep.mubr.bf16.mxu0 %v3915_v14  ;;  %1967 = vmatprep.mubr.bf16.mxu1 %v3917_v17  ;;  %v3998_v14 = vld [vmem:[%s4202_s11 + $0x3b0] ss:$36 sps:$4 sm:$0xff]   ;;  %v4002_v17 = vld [vmem:[%s4202_s11 + $0x1c4] ss:$36 sps:$4 sm:$0xff]  }
  0x59   : > { %3611 = vmatpush3.bf16.msra.mxu1 %v3962_v28  ;;  %v4022_v28 = vld [vmem:[%s4202_s11 + $0x29c] ss:$36 sps:$4 sm:$0xff]  }
  0x5a   : > { %3612 = vmatprep.subr.bf16.mxu1 %v3976_v33  ;;  %v4030_v33 = vld [vmem:[%s4202_s11 + $0xac] ss:$36 sps:$4 sm:$0xff]  }
  0x5d   : > { %3613 = vmatpush3.bf16.msra.mxu1 %v3977_v35  ;;  %v4033_v35 = vld [vmem:[%s4202_s11 + $0xa8] ss:$36 sps:$4 sm:$0xff]  }
  0x5e   : > { %3614 = vmatprep.subr.bf16.mxu1 %v3991_v41  ;;  %v4043_v41 = vld [vmem:[%s4202_s11 + $0x13c] ss:$36 sps:$4 sm:$0xff]  }
  0x5f   : > { %1839 = vmatmul.mubr.bf16.gmra.mrb[28].mxu0 %v3919_v20  ;;  %1968 = vmatmul.mubr.bf16.gmra.mrb[28].mxu1 %v3920_v21  ;;  %v4009_v20 = vld [vmem:[%s4202_s11 + $0x444] ss:$36 sps:$4 sm:$0xff]   ;;  %v4011_v21 = vld [vmem:[%s4202_s11 + $0x20c] ss:$36 sps:$4 sm:$0xff]  }
  0x60   : > { %1846 = vmatprep.mubr.bf16.mxu0 %v3921_v22  ;;  %1975 = vmatprep.mubr.bf16.mxu1 %v3923_v23  ;;  %v4013_v22 = vld [vmem:[%s4202_s11 + $0x440] ss:$36 sps:$4 sm:$0xff]   ;;  %v4014_v23 = vld [vmem:[%s4202_s11 + $0x208] ss:$36 sps:$4 sm:$0xff]  }
  0x61   : > { %3615 = vmatpush3.bf16.msra.mxu1 %v3992_v42  ;;  %v4045_v42 = vld [vmem:[%s4202_s11 + $0x370] ss:$36 sps:$4 sm:$0xff]  }
  0x62   : > { %3616 = vmatprep.subr.bf16.mxu1 %v4006_v47  ;;  %v4053_v47 = vld [vmem:[%s4202_s11 + $0x180] ss:$36 sps:$4 sm:$0xff]  }
  0x65   : > { %3617 = vmatpush3.bf16.msra.mxu1 %v4007_v48  ;;  %v4054_v48 = vld [vmem:[%s4202_s11 + $0x404] ss:$36 sps:$4 sm:$0xff]  }
  0x67   : > { %1847 = vmatmul.mubr.bf16.gmra.mrb[32].mxu0 %v3925_v27  ;;  %1976 = vmatmul.mubr.bf16.gmra.mrb[32].mxu1 %v3926_v30  ;;  %v4020_v27 = vld [vmem:[%s4202_s11 + $0x250] ss:$36 sps:$4 sm:$0xff]   ;;  %v4026_v30 = vld [vmem:[%s4202_s11 + $0x298] ss:$36 sps:$4 sm:$0xff]  }
  0x68   : > { %1854 = vmatprep.mubr.bf16.mxu0 %v3931_v31  ;;  %1983 = vmatprep.mubr.bf16.mxu1 %v3933_v32  ;;  %v4027_v31 = vld [vmem:[%s4202_s11 + $0x60] ss:$36 sps:$4 sm:$0xff]  }
  0x69   : > { %v4028_v32 = vld [vmem:[%s4202_s11 + $0x2e4] ss:$36 sps:$4 sm:$0xff]  }
  0x6f   : > { %1855 = vmatmul.mubr.bf16.gmra.mrb[36].mxu0 %v3935_v34  ;;  %1984 = vmatmul.mubr.bf16.gmra.mrb[36].mxu1 %v3936_v36  ;;  %v4032_v34 = vld [vmem:[%s4202_s11 + $0x2e0] ss:$36 sps:$4 sm:$0xff]   ;;  %v4035_v36 = vld [vmem:[%s4202_s11 + $0x32c] ss:$36 sps:$4 sm:$0xff]  }
  0x70   : > { %1862 = vmatprep.mubr.bf16.mxu0 %v3939_v37  ;;  %1991 = vmatprep.mubr.bf16.mxu1 %v3941_v38  ;;  %v4037_v37 = vld [vmem:[%s4202_s11 + $0xf4] ss:$36 sps:$4 sm:$0xff]   ;;  %v4039_v38 = vld [vmem:[%s4202_s11 + $0x328] ss:$36 sps:$4 sm:$0xff]  }
  0x77   : > { %1863 = vmatmul.mubr.bf16.gmra.mrb[40].mxu0 %v3943_v39  ;;  %1992 = vmatmul.mubr.bf16.gmra.mrb[40].mxu1 %v3944_v40  ;;  %v4040_v39 = vld [vmem:[%s4202_s11 + $0xf0] ss:$36 sps:$4 sm:$0xff]  }
  0x78   : > { %1870 = vmatprep.mubr.bf16.mxu0 %v3947_v43  ;;  %1999 = vmatprep.mubr.bf16.mxu1 %v3949_v44  ;;  %v4041_v40 = vld [vmem:[%s4202_s11 + $0x374] ss:$36 sps:$4 sm:$0xff]   ;;  %v4048_v44 = vld [vmem:[%s4202_s11 + $0x3bc] ss:$36 sps:$4 sm:$0xff]  }
  0x79   : > { %v4046_v43 = vld [vmem:[%s4202_s11 + $0x138] ss:$36 sps:$4 sm:$0xff]  }
  0x7f   : > { %1871 = vmatmul.mubr.bf16.gmra.mrb[44].mxu0 %v3951_v45  ;;  %2000 = vmatmul.mubr.bf16.gmra.mrb[44].mxu1 %v3952_v46  ;;  %v4050_v45 = vld [vmem:[%s4202_s11 + $0x184] ss:$36 sps:$4 sm:$0xff]   ;;  %v4052_v46 = vld [vmem:[%s4202_s11 + $0x3b8] ss:$36 sps:$4 sm:$0xff]  }
  0x80   : > { %2007 = vmatprep.mubr.bf16.mxu1 %v3955_v49  ;;  %2104 = vmatprep.mubr.bf16.mxu0 %v3959_v50  ;;  %v4056_v49 = vld [vmem:[%s4202_s11 + $0x1cc] ss:$36 sps:$4 sm:$0xff]   ;;  %v4058_v50 = vld [vmem:[%s4202_s11 + $0x400] ss:$36 sps:$4 sm:$0xff]  }
  0x87   : > { %2008 = vmatmul.mubr.bf16.gmra.mrb[48].mxu1 %v3960_v52  ;;  %2105 = vmatmul.mubr.bf16.vlgmr.msra.gmra.mrb[48].mxu0 %v3957_v51  ;;  %v4059_v51 = vld [vmem:[%s4202_s11 + $0x1c8] ss:$36 sps:$4 sm:$0xff]  }
  0x88   : > { %3739 = vmatpush3.bf16.msra.mxu0 %v3963_v29  ;;  %2015 = vmatprep.mubr.bf16.mxu1 %v3964_v53  ;;  %v4024_v29 = vld [vmem:[%s4202_s11 + $0x64] ss:$36 sps:$4 sm:$0xff]   ;;  %v4061_v52 = vld [vmem:[%s4202_s11 + $0x44c] ss:$36 sps:$4 sm:$0xff]   ;;  %v4063_v53 = vld [vmem:[%s4202_s11 + $0x214] ss:$36 sps:$4 sm:$0xff]  }
  0x89   : > { %2112 = vmatprep.mubr.bf16.mxu0 %v3966_v54  ;;  %3740 = vmatprep.subr.bf16.mxu0 %v3978_v55 }
  0x8c   : > { %3741 = vmatpush3.bf16.msra.mxu0 %v3978_v55 }
  0x8d   : > { %3742 = vmatprep.subr.bf16.mxu0 %v3993_v56 }
  0x8f   : > { %2016 = vmatmul.mubr.bf16.gmra.mrb[52].mxu1 %v3968_v57  ;;  %2113 = vmatmul.mubr.bf16.gmra.mrb[52].mxu0 %v3969_v58  ;;  %v4065_v58 = vld [vmem:[%s4202_s11 + $0x448] ss:$36 sps:$4 sm:$0xff]  }
  0x90   : > { %2023 = vmatprep.mubr.bf16.mxu1 %v3970_v59  ;;  %2120 = vmatprep.mubr.bf16.mxu0 %v3972_v60  ;;  %v4066_v59 = vld [vmem:[%s4202_s11 + $0x210] ss:$36 sps:$4 sm:$0xff]  }
  0x91   : > { %3743 = vmatpush3.bf16.msra.mxu0 %v3993_v56 }
  0x92   : > { %3744 = vmatprep.subr.bf16.mxu0 %v4008_v61 }
  0x95   : > { %3745 = vmatpush3.bf16.msra.mxu0 %v4008_v61 }
  0x96   : > { %3746 = vmatprep.subr.bf16.mxu0 %v4021_v62 }
  0x97   : > { %2024 = vmatmul.mubr.bf16.gmra.mrb[56].mxu1 %v3974_v63  ;;  %2121 = vmatmul.mubr.bf16.gmra.mrb[56].mxu0 %v3975_v0  ;;  %v4067_v0 = vld [vmem:[%s4202_s11 + $0x25c] ss:$36 sps:$4 sm:$0xff]  }
  0x98   : > { %2031 = vmatprep.mubr.bf16.mxu1 %v3979_v1  ;;  %2128 = vmatprep.mubr.bf16.mxu0 %v3981_v2  ;;  %v4069_v1 = vld [vmem:[%s4202_s11 + $0x20] ss:$36 sps:$4 sm:$0xff]  }
  0x99   : > { %3747 = vmatpush3.bf16.msra.mxu0 %v4021_v62 }
  0x9a   : > { %3748 = vmatprep.subr.bf16.mxu0 %v4034_v3 }
  0x9d   : > { %3749 = vmatpush3.bf16.msra.mxu0 %v4034_v3 }
  0x9e   : > { %3750 = vmatprep.subr.bf16.mxu0 %v4047_v6 }
  0x9f   : > { %2032 = vmatmul.mubr.bf16.gmra.mrb[60].mxu1 %v3983_v4  ;;  %2129 = vmatmul.mubr.bf16.gmra.mrb[60].mxu0 %v3984_v5 }
  0xa0   : > { %2039 = vmatprep.mubr.bf16.mxu1 %v3985_v7  ;;  %2136 = vmatprep.mubr.bf16.mxu0 %v3987_v8 }
  0xa1   : > { %3751 = vmatpush3.bf16.msra.mxu0 %v4047_v6 }
  0xa2   : > { %3752 = vmatprep.subr.bf16.mxu0 %v4060_v9 }
  0xa5   : > { %3753 = vmatpush3.bf16.msra.mxu0 %v4060_v9 }
  0xa7   : > { %2040 = vmatmul.mubr.bf16.gmra.mrb[64].mxu1 %v3989_v10  ;;  %2137 = vmatmul.mubr.bf16.gmra.mrb[64].mxu0 %v3990_v11  ;;  %v4070_v10 = vld [vmem:[%s4202_s11 + $0x258] ss:$36 sps:$4 sm:$0xff]   ;;  %v4071_v11 = vld [vmem:[%s4202_s11 + $0x68] ss:$36 sps:$4 sm:$0xff]  }
  0xa8   : > { %2047 = vmatprep.mubr.bf16.mxu1 %v3994_v12  ;;  %2144 = vmatprep.mubr.bf16.mxu0 %v3996_v13 }
  0xaf   : > { %2048 = vmatmul.mubr.bf16.gmra.mrb[68].mxu1 %v3998_v14  ;;  %2145 = vmatmul.mubr.bf16.gmra.mrb[68].mxu0 %v3999_v15 }
  0xb0   : > { %2055 = vmatprep.mubr.bf16.mxu1 %v4000_v16  ;;  %2152 = vmatprep.mubr.bf16.mxu0 %v4002_v17  ;;  %v4072_v16 = vld [vmem:[%s4202_s11 + $0x2a4] ss:$36 sps:$4 sm:$0xff]   ;;  %v4074_v17 = vld [vmem:[%s4202_s11 + $0xb0] ss:$36 sps:$4 sm:$0xff]  }
  0xb7   : > { %2056 = vmatmul.mubr.bf16.gmra.mrb[72].mxu1 %v4004_v18  ;;  %2153 = vmatmul.mubr.bf16.gmra.mrb[72].mxu0 %v4005_v19 }
  0xb8   : > { %2063 = vmatprep.mubr.bf16.mxu1 %v4009_v20  ;;  %2160 = vmatprep.mubr.bf16.mxu0 %v4011_v21 }
  0xbf   : > { %2064 = vmatmul.mubr.bf16.gmra.mrb[76].mxu1 %v4013_v22  ;;  %2161 = vmatmul.mubr.bf16.gmra.mrb[76].mxu0 %v4014_v23 }
  0xc0   : > { %2168 = vmatprep.mubr.bf16.mxu0 %v4015_v24  ;;  %2265 = vmatprep.mubr.bf16.mxu1 %v4019_v25 }
  0xc7   : > { %2169 = vmatmul.mubr.bf16.gmra.mrb[80].mxu0 %v4020_v27  ;;  %2266 = vmatmul.mubr.bf16.vlgmr.msra.gmra.mrb[80].mxu1 %v4017_v26  ;;  %v4075_v26 = vld [vmem:[%s4202_s11 + $0x2a0] ss:$36 sps:$4 sm:$0xff]   ;;  %v4076_v27 = vld [vmem:[%s4202_s11 + $0xf8] ss:$36 sps:$4 sm:$0xff]  }
  0xc8   : > { %2176 = vmatprep.mubr.bf16.mxu0 %v4022_v28  ;;  %2273 = vmatprep.mubr.bf16.mxu1 %v4024_v29 }
  0xcf   : > { %2177 = vmatmul.mubr.bf16.gmra.mrb[84].mxu0 %v4026_v30  ;;  %2274 = vmatmul.mubr.bf16.gmra.mrb[84].mxu1 %v4027_v31 }
  0xd0   : > { %2184 = vmatprep.mubr.bf16.mxu0 %v4028_v32  ;;  %2281 = vmatprep.mubr.bf16.mxu1 %v4030_v33  ;;  %v4077_v32 = vld [vmem:[%s4202_s11 + $0x2ec] ss:$36 sps:$4 sm:$0xff]   ;;  %v4079_v33 = vld [vmem:[%s4202_s11 + $0x140] ss:$36 sps:$4 sm:$0xff]  }
  0xd7   : > { %2185 = vmatmul.mubr.bf16.gmra.mrb[88].mxu0 %v4032_v34  ;;  %2282 = vmatmul.mubr.bf16.gmra.mrb[88].mxu1 %v4033_v35 }
  0xd8   : > { %2192 = vmatprep.mubr.bf16.mxu0 %v4035_v36  ;;  %2289 = vmatprep.mubr.bf16.mxu1 %v4037_v37 }
  0xdf   : > { %2193 = vmatmul.mubr.bf16.gmra.mrb[92].mxu0 %v4039_v38  ;;  %2290 = vmatmul.mubr.bf16.gmra.mrb[92].mxu1 %v4040_v39 }
  0xe0   : > { %2200 = vmatprep.mubr.bf16.mxu0 %v4041_v40  ;;  %2297 = vmatprep.mubr.bf16.mxu1 %v4043_v41 }
  0xe7   : > { %2201 = vmatmul.mubr.bf16.gmra.mrb[96].mxu0 %v4045_v42  ;;  %2298 = vmatmul.mubr.bf16.gmra.mrb[96].mxu1 %v4046_v43  ;;  %v4080_v42 = vld [vmem:[%s4202_s11 + $0x2e8] ss:$36 sps:$4 sm:$0xff]  }
  0xe8   : > { %2208 = vmatprep.mubr.bf16.mxu0 %v4048_v44  ;;  %2305 = vmatprep.mubr.bf16.mxu1 %v4050_v45  ;;  %v4081_v43 = vld [vmem:[%s4202_s11 + $0x188] ss:$36 sps:$4 sm:$0xff]  }
  0xef   : > { %2209 = vmatmul.mubr.bf16.gmra.mrb[100].mxu0 %v4052_v46  ;;  %2306 = vmatmul.mubr.bf16.gmra.mrb[100].mxu1 %v4053_v47 }
  0xf0   : > { %2216 = vmatprep.mubr.bf16.mxu0 %v4054_v48  ;;  %2313 = vmatprep.mubr.bf16.mxu1 %v4056_v49  ;;  %v4082_v48 = vld [vmem:[%s4202_s11 + $0x334] ss:$36 sps:$4 sm:$0xff]  }
  0xf1   : > { %v4084_v49 = vld [vmem:[%s4202_s11 + $0x1d0] ss:$36 sps:$4 sm:$0xff]  }
  0xf7   : > { %2217 = vmatmul.mubr.bf16.gmra.mrb[104].mxu0 %v4058_v50  ;;  %2314 = vmatmul.mubr.bf16.gmra.mrb[104].mxu1 %v4059_v51 }
  0xf8   : > { %2224 = vmatprep.mubr.bf16.mxu0 %v4061_v52  ;;  %2321 = vmatprep.mubr.bf16.mxu1 %v4063_v53 }
  0xfa   : > { %v3354_v54 = vpop.f32.mrb[0].mxu1  ;;  %v3282_v55 = vpop.f32.mrb[0].mxu0 }
  0xfb   : > { %v3355_v56 = vpop.f32.mrb[1].mxu1  ;;  %v3283_v57 = vpop.f32.mrb[1].mxu0 }
  0xfc   : > { %v4505_v60 = vadd.f32 %v3355_v56, %v3354_v54  ;;  %v3357_v61 = vpop.f32.mrb[2].mxu1  ;;  %v4507_v62 = vadd.f32 %v3283_v57, %v3282_v55  ;;  %v3285_v63 = vpop.f32.mrb[2].mxu0  ;;  %v4554_v54 = vld [vmem:[%s4949_s2] ss:$0 sm:$0xff] }
  0xfd   : > { %v3358_v2 = vpop.f32.mrb[3].mxu1  ;;  %v3286_v3 = vpop.f32.mrb[3].mxu0 }
  0xfe   : > { %v4511_v4 = vadd.f32 %v3358_v2, %v3357_v61  ;;  %v4513_v5 = vadd.f32 %v3286_v3, %v3285_v63  ;;  %v4086_v61 = vld [vmem:[%s4202_s11 + $0x218] ss:$36 sps:$4 sm:$0xff]   ;;  %v1785_v63 = vadd.f32 %v4507_v62, %v4554_v54 }
  0xff   : > { %2225 = vmatmul.mubr.bf16.gmra.mrb[108].mxu0 %v4065_v58  ;;  %2322 = vmatmul.mubr.bf16.gmra.mrb[108].mxu1 %v4066_v59  ;;  %v4085_v59 = vld [vmem:[%s4202_s11 + $0x330] ss:$36 sps:$4 sm:$0xff]  }
 0x100   : > { %2329 = vmatprep.mubr.bf16.mxu1 %v4067_v0  ;;  %3754 = vmatprep.mubr.bf16.mxu0 %v4069_v1 }
 0x102   : > { %v3360_v6 = vpop.f32.mrb[4].mxu1  ;;  %v3288_v7 = vpop.f32.mrb[4].mxu0 }
 0x103   : > { %v3361_v8 = vpop.f32.mrb[5].mxu1  ;;  %v3289_v9 = vpop.f32.mrb[5].mxu0 }
 0x104   : > { %v4517_v12 = vadd.f32 %v3361_v8, %v3360_v6  ;;  %v3363_v13 = vpop.f32.mrb[6].mxu1  ;;  %v4519_v14 = vadd.f32 %v3289_v9, %v3288_v7  ;;  %v3291_v15 = vpop.f32.mrb[6].mxu0  ;;  %v4087_v6 = vld [vmem:[%s4202_s11 + $0x37c] ss:$36 sps:$4 sm:$0xff]  }
 0x105   : > { %v3364_v18 = vpop.f32.mrb[7].mxu1  ;;  %v3292_v19 = vpop.f32.mrb[7].mxu0  ;;  %v4089_v7 = vld [vmem:[%s4202_s11 + $0x260] ss:$36 sps:$4 sm:$0xff]  }
 0x106   : > { %v4523_v20 = vadd.f32 %v3364_v18, %v3363_v13  ;;  %v4525_v21 = vadd.f32 %v3292_v19, %v3291_v15 }
 0x107   : > { %2330 = vmatmul.mubr.bf16.gmra.mrb[112].mxu1 %v4070_v10  ;;  %3755 = vmatmul.mubr.bf16.vlgmr.msra.gmra.mrb[112].mxu0 %v4071_v11  ;;  %v1788_v10 = vadd.f32 %v4513_v5, %v4554_v54  ;;  %v1793_v5 = vadd.f32 %v4519_v14, %v4554_v54 }
 0x108   : > { %2337 = vmatprep.mubr.bf16.mxu1 %v4072_v16  ;;  %3758 = vmatprep.mubr.bf16.mxu0 %v4074_v17 }
 0x10a   : > { %v3366_v22 = vpop.f32.mrb[8].mxu1  ;;  %v3294_v23 = vpop.f32.mrb[8].mxu0 }
 0x10b   : > { %v3367_v24 = vpop.f32.mrb[9].mxu1  ;;  %v3295_v25 = vpop.f32.mrb[9].mxu0 }
 0x10c   : > { %v4529_v28 = vadd.f32 %v3367_v24, %v3366_v22  ;;  %v3369_v29 = vpop.f32.mrb[10].mxu1  ;;  %v4531_v30 = vadd.f32 %v3295_v25, %v3294_v23  ;;  %v3297_v31 = vpop.f32.mrb[10].mxu0  ;;  %v4090_v22 = vld [vmem:[%s4202_s11 + $0x378] ss:$36 sps:$4 sm:$0xff]   ;;  %v4091_v23 = vld [vmem:[%s4202_s11 + $0x2a8] ss:$36 sps:$4 sm:$0xff]  }
 0x10d   : > { %v3370_v34 = vpop.f32.mrb[11].mxu1  ;;  %v3298_v35 = vpop.f32.mrb[11].mxu0 }
 0x10e   : > { %v4535_v36 = vadd.f32 %v3370_v34, %v3369_v29  ;;  %v4537_v37 = vadd.f32 %v3298_v35, %v3297_v31  ;;  %v4092_v29 = vld [vmem:[%s4202_s11 + $0x3c4] ss:$36 sps:$4 sm:$0xff]   ;;  %v4094_v31 = vld [vmem:[%s4202_s11 + $0x2f0] ss:$36 sps:$4 sm:$0xff]   ;;  %v1796_v34 = vadd.f32 %v4525_v21, %v4554_v54  ;;  %v1801_v21 = vadd.f32 %v4531_v30, %v4554_v54 }
 0x10f   : > { %2338 = vmatmul.mubr.bf16.gmra.mrb[116].mxu1 %v4075_v26  ;;  %3759 = vmatmul.mubr.bf16.gmra.mrb[116].mxu0 %v4076_v27 }
 0x110   : > { %2345 = vmatprep.mubr.bf16.mxu1 %v4077_v32  ;;  %3762 = vmatprep.mubr.bf16.mxu0 %v4079_v33 }
 0x112   : > { %v3372_v38 = vpop.f32.mrb[12].mxu1  ;;  %v3300_v39 = vpop.f32.mrb[12].mxu0 }
 0x113   : > { %v3373_v40 = vpop.f32.mrb[13].mxu1  ;;  %v3301_v41 = vpop.f32.mrb[13].mxu0 }
 0x114   : > { %v4541_v44 = vadd.f32 %v3373_v40, %v3372_v38  ;;  %v3375_v45 = vpop.f32.mrb[14].mxu1  ;;  %v4543_v46 = vadd.f32 %v3301_v41, %v3300_v39  ;;  %v3303_v47 = vpop.f32.mrb[14].mxu0 }
 0x115   : > { %v3376_v50 = vpop.f32.mrb[15].mxu1  ;;  %v3304_v51 = vpop.f32.mrb[15].mxu0 }
 0x116   : > { %v4547_v52 = vadd.f32 %v3376_v50, %v3375_v45  ;;  %v4549_v53 = vadd.f32 %v3304_v51, %v3303_v47  ;;  %v4095_v45 = vld [vmem:[%s4202_s11 + $0x3c0] ss:$36 sps:$4 sm:$0xff]   ;;  %v4096_v47 = vld [vmem:[%s4202_s11 + $0x338] ss:$36 sps:$4 sm:$0xff]  }
 0x117   : > { %2346 = vmatmul.mubr.bf16.gmra.mrb[120].mxu1 %v4080_v42  ;;  %3763 = vmatmul.mubr.bf16.gmra.mrb[120].mxu0 %v4081_v43 }
 0x118   : > { %2353 = vmatprep.mubr.bf16.mxu1 %v4082_v48  ;;  %3766 = vmatprep.mubr.bf16.mxu0 %v4084_v49 }
 0x11a   : > { %v3394_v55 = vpop.f32.mrb[16].mxu1  ;;  %v3306_v56 = vpop.f32.mrb[16].mxu0 }
 0x11b   : > { %v3395_v57 = vpop.f32.mrb[17].mxu1  ;;  %v3307_v58 = vpop.f32.mrb[17].mxu0 }
 0x11c   : > { %v3396_v0 = vadd.f32 %v3395_v57, %v3394_v55  ;;  %v3397_v1 = vpop.f32.mrb[18].mxu1  ;;  %v4560_v2 = vadd.f32 %v3307_v58, %v3306_v56  ;;  %v3309_v3 = vpop.f32.mrb[18].mxu0  ;;  %v4097_v55 = vld [vmem:[%s4202_s11 + $0x40c] ss:$36 sps:$4 sm:$0xff]   ;;  %v4099_v56 = vld [vmem:[%s4202_s11 + $0x380] ss:$36 sps:$4 sm:$0xff]  }
 0x11d   : > { %v3398_v8 = vpop.f32.mrb[19].mxu1  ;;  %v3310_v9 = vpop.f32.mrb[19].mxu0 }
 0x11e   : > { %v4566_v11 = vadd.f32 %v3396_v0, %v1785_v63  ;;  %v3399_v13 = vadd.f32 %v3398_v8, %v3397_v1  ;;  %v4568_v15 = vadd.f32 %v3310_v9, %v3309_v3  ;;  %v4100_v8 = vld [vmem:[%s4202_s11 + $0x408] ss:$36 sps:$4 sm:$0xff]  }
 0x11f   : > { %2354 = vmatmul.mubr.bf16.gmra.mrb[124].mxu1 %v4085_v59  ;;  %3767 = vmatmul.mubr.bf16.gmra.mrb[124].mxu0 %v4086_v61  ;;  %v1804_v59 = vadd.f32 %v4537_v37, %v4554_v54  ;;  %v4101_v9 = vld [vmem:[%s4202_s11 + $0x3c8] ss:$36 sps:$4 sm:$0xff]   ;;  %v1809_v37 = vadd.f32 %v4543_v46, %v4554_v54 }
 0x120   : > { %v4570_v62 = vadd.f32 %v3399_v13, %v1788_v10  ;;  %2361 = vmatprep.mubr.bf16.mxu1 %v4087_v6  ;;  %3770 = vmatprep.mubr.bf16.mxu0 %v4089_v7 }
 0x122   : > { %v3400_v16 = vpop.f32.mrb[20].mxu1  ;;  %v3312_v17 = vpop.f32.mrb[20].mxu0 }
 0x123   : > { %v3401_v18 = vpop.f32.mrb[21].mxu1  ;;  %v3313_v19 = vpop.f32.mrb[21].mxu0 }
 0x124   : > { %v3402_v24 = vadd.f32 %v3401_v18, %v3400_v16  ;;  %v3403_v25 = vpop.f32.mrb[22].mxu1  ;;  %v4576_v26 = vadd.f32 %v3313_v19, %v3312_v17  ;;  %v3315_v27 = vpop.f32.mrb[22].mxu0  ;;  %v4102_v18 = vld [vmem:[%s4202_s11 + $0x454] ss:$36 sps:$4 sm:$0xff]  }
 0x125   : > { %v3404_v32 = vpop.f32.mrb[23].mxu1  ;;  %v3316_v33 = vpop.f32.mrb[23].mxu0  ;;  %v4104_v19 = vld [vmem:[%s4202_s11 + $0x410] ss:$36 sps:$4 sm:$0xff]  }
 0x126   : > { %v4582_v35 = vadd.f32 %v3402_v24, %v1793_v5  ;;  %v3405_v38 = vadd.f32 %v3404_v32, %v3403_v25  ;;  %v4584_v39 = vadd.f32 %v3316_v33, %v3315_v27  ;;  %v1812_v5 = vadd.f32 %v4549_v53, %v4554_v54 }
 0x127   : > { %2362 = vmatmul.mubr.bf16.gmra.mrb[128].mxu1 %v4090_v22  ;;  %3771 = vmatmul.mubr.bf16.gmra.mrb[128].mxu0 %v4091_v23  ;;  %v1817_v53 = vadd.f32 %v4560_v2, %v4554_v54 }
 0x128   : > { %v4586_v14 = vadd.f32 %v3405_v38, %v1796_v34  ;;  %2369 = vmatprep.mubr.bf16.mxu1 %v4092_v29  ;;  %3774 = vmatprep.mubr.bf16.mxu0 %v4094_v31  ;;  %v4105_v34 = vld [vmem:[%s4202_s11 + $0x450] ss:$36 sps:$4 sm:$0xff]   ;;  %v4106_v38 = vld [vmem:[%s4202_s11 + $0x458] ss:$36 sps:$4 sm:$0xff]   ;;  %s2887_s11 = sshll.u32 %s4956_s18, 2 }
 0x129   : > { %s4883_s9 = scalar_lea.vmem %s4950_s3, %s2887_s11 }
 0x12a   : > { %v3406_v40 = vpop.f32.mrb[24].mxu1  ;;  %v3318_v41 = vpop.f32.mrb[24].mxu0 }
 0x12b   : > { %v3407_v42 = vpop.f32.mrb[25].mxu1  ;;  %v3319_v43 = vpop.f32.mrb[25].mxu0 }
 0x12c   : > { %v3408_v48 = vadd.f32 %v3407_v42, %v3406_v40  ;;  %v3409_v49 = vpop.f32.mrb[26].mxu1  ;;  %v4592_v50 = vadd.f32 %v3319_v43, %v3318_v41  ;;  %v3321_v51 = vpop.f32.mrb[26].mxu0 }
 0x12d   : > { %v3410_v57 = vpop.f32.mrb[27].mxu1  ;;  %v3322_v58 = vpop.f32.mrb[27].mxu0 }
 0x12e   : > { %v4598_v61 = vadd.f32 %v3408_v48, %v1801_v21  ;;  %v3411_v63 = vadd.f32 %v3410_v57, %v3409_v49  ;;  %v4600_v0 = vadd.f32 %v3322_v58, %v3321_v51  ;;  %v1820_v21 = vadd.f32 %v4568_v15, %v4554_v54 }
 0x12f   : > { %2370 = vmatmul.mubr.bf16.gmra.mrb[132].mxu1 %v4095_v45  ;;  %3775 = vmatmul.mubr.bf16.gmra.mrb[132].mxu0 %v4096_v47 }
 0x130   : > { %v4602_v30 = vadd.f32 %v3411_v63, %v1804_v59  ;;  %2377 = vmatprep.mubr.bf16.mxu1 %v4097_v55  ;;  %3778 = vmatprep.mubr.bf16.mxu0 %v4099_v56  ;;  %v1825_v59 = vadd.f32 %v4576_v26, %v4554_v54 }
 0x132   : > { %v3412_v1 = vpop.f32.mrb[28].mxu1  ;;  %v3324_v3 = vpop.f32.mrb[28].mxu0 }
 0x133   : > { %v3413_v6 = vpop.f32.mrb[29].mxu1  ;;  %v3325_v7 = vpop.f32.mrb[29].mxu0 }
 0x134   : > { %v3414_v10 = vadd.f32 %v3413_v6, %v3412_v1  ;;  %v3415_v13 = vpop.f32.mrb[30].mxu1  ;;  %v4608_v16 = vadd.f32 %v3325_v7, %v3324_v3  ;;  %v3327_v17 = vpop.f32.mrb[30].mxu0 }
 0x135   : > { %v3416_v22 = vpop.f32.mrb[31].mxu1  ;;  %v3328_v23 = vpop.f32.mrb[31].mxu0 }
 0x136   : > { %v4614_v24 = vadd.f32 %v3414_v10, %v1809_v37  ;;  %v3417_v25 = vadd.f32 %v3416_v22, %v3415_v13  ;;  %v4616_v27 = vadd.f32 %v3328_v23, %v3327_v17  ;;  %v1833_v22 = vadd.f32 %v4592_v50, %v4554_v54 }
 0x137   : > { %2378 = vmatmul.mubr.bf16.gmra.mrb[136].mxu1 %v4100_v8  ;;  %3779 = vmatmul.mubr.bf16.gmra.mrb[136].mxu0 %v4101_v9  ;;  %v1828_v8 = vadd.f32 %v4584_v39, %v4554_v54 }
 0x138   : > { %v4618_v46 = vadd.f32 %v3417_v25, %v1812_v5  ;;  %2385 = vmatprep.mubr.bf16.mxu1 %v4102_v18  ;;  %3782 = vmatprep.mubr.bf16.mxu0 %v4104_v19 }
 0x13a   : > { %v3418_v29 = vpop.f32.mrb[32].mxu1  ;;  %v3330_v31 = vpop.f32.mrb[32].mxu0 }
 0x13b   : > { %v3419_v32 = vpop.f32.mrb[33].mxu1  ;;  %v3331_v33 = vpop.f32.mrb[33].mxu0 }
 0x13c   : > { %v3420_v40 = vadd.f32 %v3419_v32, %v3418_v29  ;;  %v3421_v41 = vpop.f32.mrb[34].mxu1  ;;  %v4624_v42 = vadd.f32 %v3331_v33, %v3330_v31  ;;  %v3333_v43 = vpop.f32.mrb[34].mxu0  ;;  %v1836_v32 = vadd.f32 %v4600_v0, %v4554_v54 }
 0x13d   : > { %v3422_v45 = vpop.f32.mrb[35].mxu1  ;;  %v3334_v47 = vpop.f32.mrb[35].mxu0 }
 0x13e   : > { %v4628_v48 = vadd.f32 %v3420_v40, %v1817_v53  ;;  %v3423_v49 = vadd.f32 %v3422_v45, %v3421_v41  ;;  %v3335_v51 = vadd.f32 %v3334_v47, %v3333_v43  ;;  %v1841_v45 = vadd.f32 %v4608_v16, %v4554_v54 }
 0x13f   : > { %2386 = vmatmul.mubr.bf16.gmra.mrb[140].mxu1 %v4105_v34  ;;  %3783 = vmatmul.mubr.bf16.gmra.mrb[140].mxu0 %v4106_v38 }
 0x140   : > { %v4630_v55 = vadd.f32 %v3423_v49, %v1820_v21 }
 0x142   : > { %v3424_v56 = vpop.f32.mrb[36].mxu1  ;;  %v3336_v2 = vpop.f32.mrb[36].mxu0 }
 0x143   : > { %v3425_v57 = vpop.f32.mrb[37].mxu1  ;;  %v3337_v58 = vpop.f32.mrb[37].mxu0 }
 0x144   : > { %v3426_v63 = vadd.f32 %v3425_v57, %v3424_v56  ;;  %v3427_v1 = vpop.f32.mrb[38].mxu1  ;;  %v4634_v3 = vadd.f32 %v3337_v58, %v3336_v2  ;;  %v3339_v15 = vpop.f32.mrb[38].mxu0  ;;  %v1844_v57 = vadd.f32 %v4616_v27, %v4554_v54  ;;  %v1852_v27 = vadd.f32 %v3335_v51, %v4554_v54 }
 0x145   : > { %v3428_v6 = vpop.f32.mrb[39].mxu1  ;;  %v3340_v7 = vpop.f32.mrb[39].mxu0 }
 0x146   : > { %v4638_v9 = vadd.f32 %v3426_v63, %v1825_v59  ;;  %v3429_v37 = vadd.f32 %v3428_v6, %v3427_v1  ;;  %v3341_v10 = vadd.f32 %v3340_v7, %v3339_v15  ;;  %v1857_v51 = vadd.f32 %v4634_v3, %v4554_v54 }
 0x148   : > { %v4640_v13 = vadd.f32 %v3429_v37, %v1828_v8  ;;  %v1849_v8 = vadd.f32 %v4624_v42, %v4554_v54 }
 0x14a   : > { %v3430_v17 = vpop.f32.mrb[40].mxu1  ;;  %v3342_v18 = vpop.f32.mrb[40].mxu0 }
 0x14b   : > { %v3431_v19 = vpop.f32.mrb[41].mxu1  ;;  %v3343_v26 = vpop.f32.mrb[41].mxu0 }
 0x14c   : > { %v3432_v23 = vadd.f32 %v3431_v19, %v3430_v17  ;;  %v3433_v5 = vpop.f32.mrb[42].mxu1  ;;  %v4644_v25 = vadd.f32 %v3343_v26, %v3342_v18  ;;  %v3345_v29 = vpop.f32.mrb[42].mxu0 }
 0x14d   : > { %v3434_v31 = vpop.f32.mrb[43].mxu1  ;;  %v3346_v39 = vpop.f32.mrb[43].mxu0 }
 0x14e   : > { %v4648_v33 = vadd.f32 %v3432_v23, %v1833_v22  ;;  %v3435_v34 = vadd.f32 %v3434_v31, %v3433_v5  ;;  %v4650_v38 = vadd.f32 %v3346_v39, %v3345_v29 }
 0x150   : > { %v4652_v53 = vadd.f32 %v3435_v34, %v1836_v32 }
 0x152   : > { %v3436_v40 = vpop.f32.mrb[44].mxu1  ;;  %v3348_v41 = vpop.f32.mrb[44].mxu0 }
 0x153   : > { %v3437_v50 = vpop.f32.mrb[45].mxu1  ;;  %v3349_v43 = vpop.f32.mrb[45].mxu0 }
 0x154   : > { %v3438_v47 = vadd.f32 %v3437_v50, %v3436_v40  ;;  %v3439_v21 = vpop.f32.mrb[46].mxu1  ;;  %v4656_v49 = vadd.f32 %v3349_v43, %v3348_v41  ;;  %v3351_v56 = vpop.f32.mrb[46].mxu0 }
 0x155   : > { %v3440_v0 = vpop.f32.mrb[47].mxu1  ;;  %v3352_v2 = vpop.f32.mrb[47].mxu0 }
 0x156   : > { %v4660_v58 = vadd.f32 %v3438_v47, %v1841_v45  ;;  %v3441_v59 = vadd.f32 %v3440_v0, %v3439_v21  ;;  %v4662_v63 = vadd.f32 %v3352_v2, %v3351_v56 }
 0x158   : > { %v4664_v1 = vadd.f32 %v3441_v59, %v1844_v57 }
 0x15a   : > { %v3442_v15 = vpop.f32.mrb[48].mxu1  ;;  %v3506_v6 = vpop.f32.mrb[48].mxu0 }
 0x15b   : > { %v3443_v16 = vpop.f32.mrb[49].mxu1  ;;  %v3507_v7 = vpop.f32.mrb[49].mxu0 }
 0x15c   : > { %v3444_v37 = vadd.f32 %v3443_v16, %v3442_v15  ;;  %v3508_v17 = vadd.f32 %v3507_v7, %v3506_v6  ;;  %v3445_v18 = vpop.f32.mrb[50].mxu1  ;;  %v3509_v19 = vpop.f32.mrb[50].mxu0 }
 0x15d   : > { %v3446_v26 = vpop.f32.mrb[51].mxu1  ;;  %v3510_v22 = vpop.f32.mrb[51].mxu0 }
 0x15e   : > { %v4669_v23 = vadd.f32 %v3444_v37, %v1849_v8  ;;  %v4672_v5 = vadd.f32 %v3508_v17, %v4566_v11  ;;  %v3447_v29 = vadd.f32 %v3446_v26, %v3445_v18  ;;  %v3511_v31 = vadd.f32 %v3510_v22, %v3509_v19 }
 0x15f   : > { %v1860_v11 = vadd.f32 %v3341_v10, %v4554_v54  ;;  %v1865_v10 = vadd.f32 %v4644_v25, %v4554_v54 }
 0x160   : > { %v4674_v39 = vadd.f32 %v3447_v29, %v1852_v27  ;;  %v4677_v32 = vadd.f32 %v3511_v31, %v4570_v62 }
 0x162   : > { %v3448_v42 = vpop.f32.mrb[52].mxu1  ;;  %v3512_v34 = vpop.f32.mrb[52].mxu0 }
 0x163   : > { %v3449_v40 = vpop.f32.mrb[53].mxu1  ;;  %v3513_v41 = vpop.f32.mrb[53].mxu0 }
 0x164   : > { %v3450_v50 = vadd.f32 %v3449_v40, %v3448_v42  ;;  %v3514_v43 = vadd.f32 %v3513_v41, %v3512_v34  ;;  %v3451_v45 = vpop.f32.mrb[54].mxu1  ;;  %v3515_v47 = vpop.f32.mrb[54].mxu0 }
 0x165   : > { %v3452_v21 = vpop.f32.mrb[55].mxu1  ;;  %v3516_v56 = vpop.f32.mrb[55].mxu0 }
 0x166   : > { %v4682_v0 = vadd.f32 %v3450_v50, %v1857_v51  ;;  %v4685_v62 = vadd.f32 %v3514_v43, %v4582_v35  ;;  %v3453_v2 = vadd.f32 %v3452_v21, %v3451_v45  ;;  %v3517_v57 = vadd.f32 %v3516_v56, %v3515_v47 }
 0x167   : > { %v1868_v35 = vadd.f32 %v4650_v38, %v4554_v54  ;;  %v1873_v38 = vadd.f32 %v4656_v49, %v4554_v54 }
 0x168   : > { %v4687_v59 = vadd.f32 %v3453_v2, %v1860_v11  ;;  %v4690_v15 = vadd.f32 %v3517_v57, %v4586_v14 }
 0x16a   : > { %v3454_v3 = vpop.f32.mrb[56].mxu1  ;;  %v3518_v6 = vpop.f32.mrb[56].mxu0 }
 0x16b   : > { %v3455_v16 = vpop.f32.mrb[57].mxu1  ;;  %v3519_v7 = vpop.f32.mrb[57].mxu0 }
 0x16c   : > { %v3456_v8 = vadd.f32 %v3455_v16, %v3454_v3  ;;  %v3520_v37 = vadd.f32 %v3519_v7, %v3518_v6  ;;  %v3457_v17 = vpop.f32.mrb[58].mxu1  ;;  %v3521_v18 = vpop.f32.mrb[58].mxu0 }
 0x16d   : > { %v3458_v19 = vpop.f32.mrb[59].mxu1  ;;  %v3522_v27 = vpop.f32.mrb[59].mxu0 }
 0x16e   : > { %v4696_v26 = vadd.f32 %v3456_v8, %v1865_v10  ;;  %v4699_v14 = vadd.f32 %v3520_v37, %v4598_v61  ;;  %v3459_v22 = vadd.f32 %v3458_v19, %v3457_v17  ;;  %v3523_v29 = vadd.f32 %v3522_v27, %v3521_v18 }
 0x16f   : > { %v1876_v61 = vadd.f32 %v4662_v63, %v4554_v54  ;;  %v1881_v63 = vadd.f32 %v4505_v60, %v4554_v54 }
 0x170   : > { %v4701_v31 = vadd.f32 %v3459_v22, %v1868_v35  ;;  %v4704_v25 = vadd.f32 %v3523_v29, %v4602_v30 }
 0x172   : > { %v3460_v42 = vpop.f32.mrb[60].mxu1  ;;  %v3524_v34 = vpop.f32.mrb[60].mxu0 }
 0x173   : > { %v3461_v40 = vpop.f32.mrb[61].mxu1  ;;  %v3525_v41 = vpop.f32.mrb[61].mxu0 }
 0x174   : > { %v3462_v51 = vadd.f32 %v3461_v40, %v3460_v42  ;;  %v3526_v50 = vadd.f32 %v3525_v41, %v3524_v34  ;;  %v3463_v43 = vpop.f32.mrb[62].mxu1  ;;  %v3527_v45 = vpop.f32.mrb[62].mxu0 }
 0x175   : > { %v3464_v47 = vpop.f32.mrb[63].mxu1  ;;  %v3528_v11 = vpop.f32.mrb[63].mxu0 }
 0x176   : > { %v4710_v21 = vadd.f32 %v3462_v51, %v1873_v38  ;;  %v4713_v30 = vadd.f32 %v3526_v50, %v4614_v24  ;;  %v3465_v56 = vadd.f32 %v3464_v47, %v3463_v43  ;;  %v3529_v2 = vadd.f32 %v3528_v11, %v3527_v45 }
 0x177   : > { %v1884_v24 = vadd.f32 %v4511_v4, %v4554_v54  ;;  %v1889_v4 = vadd.f32 %v4517_v12, %v4554_v54 }
 0x178   : > { %v4715_v57 = vadd.f32 %v3465_v56, %v1876_v61  ;;  %v4718_v49 = vadd.f32 %v3529_v2, %v4618_v46 }
 0x17a   : > { %v3466_v3 = vpop.f32.mrb[64].mxu1  ;;  %v3530_v6 = vpop.f32.mrb[64].mxu0 }
 0x17b   : > { %v3467_v16 = vpop.f32.mrb[65].mxu1  ;;  %v3531_v7 = vpop.f32.mrb[65].mxu0 }
 0x17c   : > { %v3468_v10 = vadd.f32 %v3467_v16, %v3466_v3  ;;  %v3532_v8 = vadd.f32 %v3531_v7, %v3530_v6  ;;  %v3469_v37 = vpop.f32.mrb[66].mxu1  ;;  %v3533_v17 = vpop.f32.mrb[66].mxu0 }
 0x17d   : > { %v3470_v18 = vpop.f32.mrb[67].mxu1  ;;  %v3534_v35 = vpop.f32.mrb[67].mxu0 }
 0x17e   : > { %v4724_v19 = vadd.f32 %v3468_v10, %v1881_v63  ;;  %v4727_v46 = vadd.f32 %v3532_v8, %v4628_v48  ;;  %v3471_v27 = vadd.f32 %v3470_v18, %v3469_v37  ;;  %v3535_v22 = vadd.f32 %v3534_v35, %v3533_v17 }
 0x17f   : > { %v1892_v48 = vadd.f32 %v4523_v20, %v4554_v54  ;;  %v1897_v20 = vadd.f32 %v4529_v28, %v4554_v54 }
 0x180   : > { %v4729_v29 = vadd.f32 %v3471_v27, %v1884_v24  ;;  %v4732_v60 = vadd.f32 %v3535_v22, %v4630_v55 }
 0x182   : > { %v3472_v42 = vpop.f32.mrb[68].mxu1  ;;  %v3536_v34 = vpop.f32.mrb[68].mxu0 }
 0x183   : > { %v3473_v40 = vpop.f32.mrb[69].mxu1  ;;  %v3537_v41 = vpop.f32.mrb[69].mxu0 }
 0x184   : > { %v3474_v38 = vadd.f32 %v3473_v40, %v3472_v42  ;;  %v3538_v51 = vadd.f32 %v3537_v41, %v3536_v34  ;;  %v3475_v50 = vpop.f32.mrb[70].mxu1  ;;  %v3539_v43 = vpop.f32.mrb[70].mxu0 }
 0x185   : > { %v3476_v45 = vpop.f32.mrb[71].mxu1  ;;  %v3540_v61 = vpop.f32.mrb[71].mxu0 }
 0x186   : > { %v4738_v47 = vadd.f32 %v3474_v38, %v1889_v4  ;;  %v4741_v55 = vadd.f32 %v3538_v51, %v4638_v9  ;;  %v3477_v11 = vadd.f32 %v3476_v45, %v3475_v50  ;;  %v3541_v56 = vadd.f32 %v3540_v61, %v3539_v43 }
 0x187   : > { %v1900_v9 = vadd.f32 %v4535_v36, %v4554_v54  ;;  %v1905_v36 = vadd.f32 %v4541_v44, %v4554_v54 }
 0x188   : > { %v4743_v2 = vadd.f32 %v3477_v11, %v1892_v48  ;;  %v4746_v12 = vadd.f32 %v3541_v56, %v4640_v13 }
 0x18a   : > { %v3478_v3 = vpop.f32.mrb[72].mxu1  ;;  %v3542_v6 = vpop.f32.mrb[72].mxu0 }
 0x18b   : > { %v3479_v16 = vpop.f32.mrb[73].mxu1  ;;  %v3543_v7 = vpop.f32.mrb[73].mxu0 }
 0x18c   : > { %v3480_v63 = vadd.f32 %v3479_v16, %v3478_v3  ;;  %v3544_v10 = vadd.f32 %v3543_v7, %v3542_v6  ;;  %v3481_v8 = vpop.f32.mrb[74].mxu1  ;;  %v3545_v37 = vpop.f32.mrb[74].mxu0 }
 0x18d   : > { %v3482_v17 = vpop.f32.mrb[75].mxu1  ;;  %v3546_v24 = vpop.f32.mrb[75].mxu0 }
 0x18e   : > { %v4752_v18 = vadd.f32 %v3480_v63, %v1897_v20  ;;  %v4755_v13 = vadd.f32 %v3544_v10, %v4648_v33  ;;  %v3483_v35 = vadd.f32 %v3482_v17, %v3481_v8  ;;  %v3547_v27 = vadd.f32 %v3546_v24, %v3545_v37 }
 0x18f   : > { %v1908_v33 = vadd.f32 %v4547_v52, %v4554_v54 }
 0x190   : > { %v4757_v22 = vadd.f32 %v3483_v35, %v1900_v9  ;;  %v4760_v28 = vadd.f32 %v3547_v27, %v4652_v53 }
 0x192   : > { %v3484_v42 = vpop.f32.mrb[76].mxu1  ;;  %v3548_v34 = vpop.f32.mrb[76].mxu0 }
 0x193   : > { %v3485_v40 = vpop.f32.mrb[77].mxu1  ;;  %v3549_v41 = vpop.f32.mrb[77].mxu0 }
 0x194   : > { %v3486_v4 = vadd.f32 %v3485_v40, %v3484_v42  ;;  %v3550_v38 = vadd.f32 %v3549_v41, %v3548_v34  ;;  %v3487_v51 = vpop.f32.mrb[78].mxu1  ;;  %v3551_v50 = vpop.f32.mrb[78].mxu0 }
 0x195   : > { %v3488_v43 = vpop.f32.mrb[79].mxu1  ;;  %v3552_v48 = vpop.f32.mrb[79].mxu0 }
 0x196   : > { %v4766_v45 = vadd.f32 %v3486_v4, %v1905_v36  ;;  %v4769_v53 = vadd.f32 %v3550_v38, %v4660_v58  ;;  %v3489_v61 = vadd.f32 %v3488_v43, %v3487_v51  ;;  %v3553_v11 = vadd.f32 %v3552_v48, %v3551_v50 }
 0x198   : > { %v4771_v56 = vadd.f32 %v3489_v61, %v1908_v33  ;;  %v4774_v44 = vadd.f32 %v3553_v11, %v4664_v1 }
 0x19a   : > { %v3554_v3 = vpop.f32.mrb[80].mxu0  ;;  %v3618_v6 = vpop.f32.mrb[80].mxu1 }
 0x19b   : > { %v3555_v16 = vpop.f32.mrb[81].mxu0  ;;  %v3619_v7 = vpop.f32.mrb[81].mxu1 }
 0x19c   : > { %v3556_v20 = vadd.f32 %v3555_v16, %v3554_v3  ;;  %v3620_v52 = vadd.f32 %v3619_v7, %v3618_v6  ;;  %v3557_v54 = vpop.f32.mrb[82].mxu0  ;;  %v3621_v63 = vpop.f32.mrb[82].mxu1 }
 0x19d   : > { %v3558_v10 = vpop.f32.mrb[83].mxu0  ;;  %v3622_v8 = vpop.f32.mrb[83].mxu1 }
 0x19e   : > { %v4777_v58 = vadd.f32 %v3556_v20, %v4669_v23  ;;  %v3559_v37 = vadd.f32 %v3558_v10, %v3557_v54  ;;  %v3623_v9 = vadd.f32 %v3622_v8, %v3621_v63  ;;  %v4780_v17 = vadd.f32 %v3620_v52, %v4672_v5 }
 0x1a0   : > { %v4783_v1 = vadd.f32 %v3559_v37, %v4674_v39  ;;  %v4786_v24 = vadd.f32 %v3623_v9, %v4677_v32 }
 0x1a2   : > { %v3560_v35 = vpop.f32.mrb[84].mxu0  ;;  %v3624_v27 = vpop.f32.mrb[84].mxu1 }
 0x1a3   : > { %v3561_v42 = vpop.f32.mrb[85].mxu0  ;;  %v3625_v34 = vpop.f32.mrb[85].mxu1 }
 0x1a4   : > { %v3562_v40 = vadd.f32 %v3561_v42, %v3560_v35  ;;  %v3626_v41 = vadd.f32 %v3625_v34, %v3624_v27  ;;  %v3563_v36 = vpop.f32.mrb[86].mxu0  ;;  %v3627_v23 = vpop.f32.mrb[86].mxu1 }
 0x1a5   : > { %v3564_v4 = vpop.f32.mrb[87].mxu0  ;;  %v3628_v38 = vpop.f32.mrb[87].mxu1 }
 0x1a6   : > { %v4789_v51 = vadd.f32 %v3562_v40, %v4682_v0  ;;  %v3565_v5 = vadd.f32 %v3564_v4, %v3563_v36  ;;  %v3629_v50 = vadd.f32 %v3628_v38, %v3627_v23  ;;  %v4792_v39 = vadd.f32 %v3626_v41, %v4685_v62 }
 0x1a8   : > { %v4795_v32 = vadd.f32 %v3565_v5, %v4687_v59  ;;  %v4798_v33 = vadd.f32 %v3629_v50, %v4690_v15 }
 0x1aa   : > { %v3566_v43 = vpop.f32.mrb[88].mxu0  ;;  %v3630_v48 = vpop.f32.mrb[88].mxu1 }
 0x1ab   : > { %v3567_v61 = vpop.f32.mrb[89].mxu0  ;;  %v3631_v11 = vpop.f32.mrb[89].mxu1 }
 0x1ac   : > { %v3568_v3 = vadd.f32 %v3567_v61, %v3566_v43  ;;  %v3632_v6 = vadd.f32 %v3631_v11, %v3630_v48  ;;  %v3569_v16 = vpop.f32.mrb[90].mxu0  ;;  %v3633_v0 = vpop.f32.mrb[90].mxu1 }
 0x1ad   : > { %v3570_v7 = vpop.f32.mrb[91].mxu0  ;;  %v3634_v20 = vpop.f32.mrb[91].mxu1 }
 0x1ae   : > { %v4801_v52 = vadd.f32 %v3568_v3, %v4696_v26  ;;  %v3571_v62 = vadd.f32 %v3570_v7, %v3569_v16  ;;  %v3635_v54 = vadd.f32 %v3634_v20, %v3633_v0  ;;  %v4804_v59 = vadd.f32 %v3632_v6, %v4699_v14 }
 0x1b0   : > { %v4807_v15 = vadd.f32 %v3571_v62, %v4701_v31  ;;  %v4810_v63 = vadd.f32 %v3635_v54, %v4704_v25 }
 0x1b2   : > { %v3572_v10 = vpop.f32.mrb[92].mxu0  ;;  %v3636_v8 = vpop.f32.mrb[92].mxu1 }
 0x1b3   : > { %v3573_v37 = vpop.f32.mrb[93].mxu0  ;;  %v3637_v9 = vpop.f32.mrb[93].mxu1 }
 0x1b4   : > { %v3574_v35 = vadd.f32 %v3573_v37, %v3572_v10  ;;  %v3638_v27 = vadd.f32 %v3637_v9, %v3636_v8  ;;  %v3575_v42 = vpop.f32.mrb[94].mxu0  ;;  %v3639_v26 = vpop.f32.mrb[94].mxu1 }
 0x1b5   : > { %v3576_v34 = vpop.f32.mrb[95].mxu0  ;;  %v3640_v40 = vpop.f32.mrb[95].mxu1 }
 0x1b6   : > { %v4813_v41 = vadd.f32 %v3574_v35, %v4710_v21  ;;  %v3577_v14 = vadd.f32 %v3576_v34, %v3575_v42  ;;  %v3641_v36 = vadd.f32 %v3640_v40, %v3639_v26  ;;  %v4816_v31 = vadd.f32 %v3638_v27, %v4713_v30 }
 0x1b8   : > { %v4819_v25 = vadd.f32 %v3577_v14, %v4715_v57  ;;  %v4822_v23 = vadd.f32 %v3641_v36, %v4718_v49 }
 0x1ba   : > { %v3578_v4 = vpop.f32.mrb[96].mxu0  ;;  %v3642_v38 = vpop.f32.mrb[96].mxu1 }
 0x1bb   : > { %v3579_v5 = vpop.f32.mrb[97].mxu0  ;;  %v3643_v50 = vpop.f32.mrb[97].mxu1 }
 0x1bc   : > { %v3580_v43 = vadd.f32 %v3579_v5, %v3578_v4  ;;  %v3644_v48 = vadd.f32 %v3643_v50, %v3642_v38  ;;  %v3581_v61 = vpop.f32.mrb[98].mxu0  ;;  %v3645_v21 = vpop.f32.mrb[98].mxu1 }
 0x1bd   : > { %v3582_v11 = vpop.f32.mrb[99].mxu0  ;;  %v3646_v3 = vpop.f32.mrb[99].mxu1 }
 0x1be   : > { %v4825_v6 = vadd.f32 %v3580_v43, %v4724_v19  ;;  %v3583_v30 = vadd.f32 %v3582_v11, %v3581_v61  ;;  %v3647_v16 = vadd.f32 %v3646_v3, %v3645_v21  ;;  %v4828_v57 = vadd.f32 %v3644_v48, %v4727_v46 }
 0x1c0   : > { %v4831_v49 = vadd.f32 %v3583_v30, %v4729_v29  ;;  %v4834_v0 = vadd.f32 %v3647_v16, %v4732_v60 }
 0x1c2   : > { %v3584_v7 = vpop.f32.mrb[100].mxu0  ;;  %v3648_v20 = vpop.f32.mrb[100].mxu1 }
 0x1c3   : > { %v3585_v62 = vpop.f32.mrb[101].mxu0  ;;  %v3649_v54 = vpop.f32.mrb[101].mxu1 }
 0x1c4   : > { %v3586_v10 = vadd.f32 %v3585_v62, %v3584_v7  ;;  %v3650_v8 = vadd.f32 %v3649_v54, %v3648_v20  ;;  %v3587_v37 = vpop.f32.mrb[102].mxu0  ;;  %v3651_v19 = vpop.f32.mrb[102].mxu1 }
 0x1c5   : > { %v3588_v9 = vpop.f32.mrb[103].mxu0  ;;  %v3652_v35 = vpop.f32.mrb[103].mxu1 }
 0x1c6   : > { %v4837_v27 = vadd.f32 %v3586_v10, %v4738_v47  ;;  %v3589_v46 = vadd.f32 %v3588_v9, %v3587_v37  ;;  %v3653_v42 = vadd.f32 %v3652_v35, %v3651_v19  ;;  %v4840_v29 = vadd.f32 %v3650_v8, %v4741_v55 }
 0x1c8   : > { %v4843_v60 = vadd.f32 %v3589_v46, %v4743_v2  ;;  %v4846_v26 = vadd.f32 %v3653_v42, %v4746_v12 }
 0x1ca   : > { %v3590_v34 = vpop.f32.mrb[104].mxu0  ;;  %v3654_v40 = vpop.f32.mrb[104].mxu1 }
 0x1cb   : > { %v3591_v14 = vpop.f32.mrb[105].mxu0  ;;  %v3655_v36 = vpop.f32.mrb[105].mxu1 }
 0x1cc   : > { %v3592_v4 = vadd.f32 %v3591_v14, %v3590_v34  ;;  %v3656_v38 = vadd.f32 %v3655_v36, %v3654_v40  ;;  %v3593_v5 = vpop.f32.mrb[106].mxu0  ;;  %v3657_v47 = vpop.f32.mrb[106].mxu1 }
 0x1cd   : > { %v3594_v50 = vpop.f32.mrb[107].mxu0  ;;  %v3658_v43 = vpop.f32.mrb[107].mxu1 }
 0x1ce   : > { %v4849_v48 = vadd.f32 %v3592_v4, %v4752_v18  ;;  %v3595_v55 = vadd.f32 %v3594_v50, %v3593_v5  ;;  %v3659_v61 = vadd.f32 %v3658_v43, %v3657_v47  ;;  %v4852_v2 = vadd.f32 %v3656_v38, %v4755_v13 }
 0x1d0   : > { %v4855_v12 = vadd.f32 %v3595_v55, %v4757_v22  ;;  %v4858_v21 = vadd.f32 %v3659_v61, %v4760_v28 }
 0x1d2   : > { %v3596_v11 = vpop.f32.mrb[108].mxu0  ;;  %v3660_v3 = vpop.f32.mrb[108].mxu1 }
 0x1d3   : > { %v3597_v30 = vpop.f32.mrb[109].mxu0  ;;  %v3661_v16 = vpop.f32.mrb[109].mxu1 }
 0x1d4   : > { %v3598_v7 = vadd.f32 %v3597_v30, %v3596_v11  ;;  %v3662_v20 = vadd.f32 %v3661_v16, %v3660_v3  ;;  %v3599_v62 = vpop.f32.mrb[110].mxu0  ;;  %v3663_v18 = vpop.f32.mrb[110].mxu1 }
 0x1d5   : > { %v3600_v54 = vpop.f32.mrb[111].mxu0  ;;  %v3664_v10 = vpop.f32.mrb[111].mxu1 }
 0x1d6   : > { %v4861_v13 = vadd.f32 %v3598_v7, %v4766_v45  ;;  %v3601_v8 = vadd.f32 %v3600_v54, %v3599_v62  ;;  %v3665_v22 = vadd.f32 %v3664_v10, %v3663_v18  ;;  %v4864_v37 = vadd.f32 %v3662_v20, %v4769_v53 }
 0x1d8   : > { %v4867_v28 = vadd.f32 %v3601_v8, %v4771_v56  ;;  %v4870_v19 = vadd.f32 %v3665_v22, %v4774_v44 }
 0x1da   : > { %v3666_v9 = vpop.f32.mrb[112].mxu1  ;;  %v3756_v35 = vpop.f32.mrb[112].mxu0 }
 0x1db   : > { %v2437_v46 = vadd.f32 %v3756_v35, %v4792_v39  ;;  %v3667_v42 = vpop.f32.mrb[113].mxu1  ;;  %v2428_v34 = vpop.f32.mrb[113].mxu0 }
 0x1dc   : > { %v3668_v40 = vadd.f32 %v3667_v42, %v3666_v9  ;;  %v2429_v45 = vadd.f32 %v2428_v34, %v4780_v17  ;;  %v3669_v14 = vpop.f32.mrb[114].mxu1  ;;  %v3757_v36 = vpop.f32.mrb[114].mxu0 }
 0x1dd   : > { %v2440_v53 = vadd.f32 %v3757_v36, %v4798_v33  ;;  %v3670_v4 = vpop.f32.mrb[115].mxu1  ;;  %v2431_v56 = vpop.f32.mrb[115].mxu0  ;;  %v2557_v47 = vmax.f32 %v2437_v46, 0.0 }
 0x1de   : > { %v3671_v38 = vadd.f32 %v3670_v4, %v3669_v14  ;;  %v2432_v44 = vadd.f32 %v2431_v56, %v4786_v24  ;;  %v4878_v5 = vadd.f32 %v3668_v40, %v4777_v58  ;;  %v2555_v50 = vmax.f32 %v2429_v45, 0.0 }
 0x1df   : > { %v2558_v39 = vmax.f32 %v2440_v53, 0.0 }
 0x1e0   : > { %v2556_v17 = vmax.f32 %v2432_v44, 0.0  ;;  %v4886_v33 = vadd.f32 %v3671_v38, %v4783_v1 }
 0x1e1   : > { %v3179_v43 = vpack.c.bf16 %v2558_v39, %v2557_v47 }
 0x1e2   : > { %v3174_v55 = vpack.c.bf16 %v2556_v17, %v2555_v50  ;;  %v3672_v24 = vpop.f32.mrb[116].mxu1  ;;  %v3760_v61 = vpop.f32.mrb[116].mxu0 }
 0x1e3   : > { %3251 = vst [vmem:[%s4883_s9 + $0x8] sm:$0xff] %v3179_v43   ;;  %v2453_v58 = vadd.f32 %v3760_v61, %v4816_v31  ;;  %v3673_v11 = vpop.f32.mrb[117].mxu1  ;;  %v2444_v3 = vpop.f32.mrb[117].mxu0 }
 0x1e4   : > { %3175 = vst [vmem:[%s4883_s9] sm:$0xff] %v3174_v55   ;;  %v3674_v30 = vadd.f32 %v3673_v11, %v3672_v24  ;;  %v2445_v16 = vadd.f32 %v2444_v3, %v4804_v59  ;;  %v3675_v7 = vpop.f32.mrb[118].mxu1  ;;  %v3761_v20 = vpop.f32.mrb[118].mxu0 }
 0x1e5   : > { %v2456_v62 = vadd.f32 %v3761_v20, %v4822_v23  ;;  %v3676_v1 = vpop.f32.mrb[119].mxu1  ;;  %v2447_v18 = vpop.f32.mrb[119].mxu0  ;;  %v2561_v31 = vmax.f32 %v2453_v58, 0.0 }
 0x1e6   : > { %v3677_v54 = vadd.f32 %v3676_v1, %v3675_v7  ;;  %v2448_v10 = vadd.f32 %v2447_v18, %v4810_v63  ;;  %v2340_v8 = vadd.f32 %v3674_v30, %v4789_v51  ;;  %v2559_v9 = vmax.f32 %v2445_v16, 0.0 }
 0x1e7   : > { %v2562_v22 = vmax.f32 %v2456_v62, 0.0 }
 0x1e8   : > { %v2560_v35 = vmax.f32 %v2448_v10, 0.0  ;;  %v2343_v46 = vadd.f32 %v3677_v54, %v4795_v32 }
 0x1e9   : > { %v3189_v59 = vpack.c.bf16 %v2562_v22, %v2561_v31 }
 0x1ea   : > { %v3184_v42 = vpack.c.bf16 %v2560_v35, %v2559_v9  ;;  %v3678_v34 = vpop.f32.mrb[120].mxu1  ;;  %v3764_v40 = vpop.f32.mrb[120].mxu0 }
 0x1eb   : > { %3253 = vst [vmem:[%s4883_s9 + $0x18] sm:$0xff] %v3189_v59   ;;  %v2469_v23 = vadd.f32 %v3764_v40, %v4840_v29  ;;  %v3679_v45 = vpop.f32.mrb[121].mxu1  ;;  %v2460_v14 = vpop.f32.mrb[121].mxu0 }
 0x1ec   : > { %3252 = vst [vmem:[%s4883_s9 + $0x10] sm:$0xff] %v3184_v42   ;;  %v3680_v36 = vadd.f32 %v3679_v45, %v3678_v34  ;;  %v2461_v63 = vadd.f32 %v2460_v14, %v4828_v57  ;;  %v3681_v51 = vpop.f32.mrb[122].mxu1  ;;  %v3765_v53 = vpop.f32.mrb[122].mxu0 }
 0x1ed   : > { %v2472_v4 = vadd.f32 %v3765_v53, %v4846_v26  ;;  %v3682_v56 = vpop.f32.mrb[123].mxu1  ;;  %v2463_v32 = vpop.f32.mrb[123].mxu0  ;;  %v2565_v29 = vmax.f32 %v2469_v23, 0.0 }
 0x1ee   : > { %v3683_v38 = vadd.f32 %v3682_v56, %v3681_v51  ;;  %v2464_v44 = vadd.f32 %v2463_v32, %v4834_v0  ;;  %v4903_v47 = vadd.f32 %v3680_v36, %v4801_v52  ;;  %v2563_v50 = vmax.f32 %v2461_v63, 0.0 }
 0x1ef   : > { %v2566_v39 = vmax.f32 %v2472_v4, 0.0 }
 0x1f0   : > { %v2564_v17 = vmax.f32 %v2464_v44, 0.0  ;;  %v4906_v57 = vadd.f32 %v3683_v38, %v4807_v15 }
 0x1f1   : > { %v3199_v43 = vpack.c.bf16 %v2566_v39, %v2565_v29 }
 0x1f2   : > { %v3194_v55 = vpack.c.bf16 %v2564_v17, %v2563_v50  ;;  %v3684_v24 = vpop.f32.mrb[124].mxu1  ;;  %v3768_v26 = vpop.f32.mrb[124].mxu0 }
 0x1f3   : > { %3255 = vst [vmem:[%s4883_s9 + $0x28] sm:$0xff] %v3199_v43   ;;  %v2485_v61 = vadd.f32 %v3768_v26, %v4864_v37  ;;  %v3685_v58 = vpop.f32.mrb[125].mxu1  ;;  %v2476_v11 = vpop.f32.mrb[125].mxu0 }
 0x1f4   : > { %3254 = vst [vmem:[%s4883_s9 + $0x20] sm:$0xff] %v3194_v55   ;;  %v3686_v0 = vadd.f32 %v3685_v58, %v3684_v24  ;;  %v2477_v52 = vadd.f32 %v2476_v11, %v4852_v2  ;;  %v3687_v3 = vpop.f32.mrb[126].mxu1  ;;  %v3769_v30 = vpop.f32.mrb[126].mxu0 }
 0x1f5   : > { %v2488_v16 = vadd.f32 %v3769_v30, %v4870_v19  ;;  %v3688_v15 = vpop.f32.mrb[127].mxu1  ;;  %v2479_v7 = vpop.f32.mrb[127].mxu0  ;;  %v2569_v37 = vmax.f32 %v2485_v61, 0.0 }
 0x1f6   : > { %v3689_v20 = vadd.f32 %v3688_v15, %v3687_v3  ;;  %v2480_v62 = vadd.f32 %v2479_v7, %v4858_v21  ;;  %v2356_v1 = vadd.f32 %v3686_v0, %v4813_v41  ;;  %v2567_v54 = vmax.f32 %v2477_v52, 0.0 }
 0x1f7   : > { %v2570_v18 = vmax.f32 %v2488_v16, 0.0 }
 0x1f8   : > { %v2568_v10 = vmax.f32 %v2480_v62, 0.0  ;;  %v2359_v31 = vadd.f32 %v3689_v20, %v4819_v25 }
 0x1f9   : > { %v3209_v2 = vpack.c.bf16 %v2570_v18, %v2569_v37 }
 0x1fa   : > { %v3204_v22 = vpack.c.bf16 %v2568_v10, %v2567_v54  ;;  %v3690_v9 = vpop.f32.mrb[128].mxu1  ;;  %v3772_v35 = vpop.f32.mrb[128].mxu0 }
 0x1fb   : > { %3257 = vst [vmem:[%s4883_s9 + $0x38] sm:$0xff] %v3209_v2   ;;  %v2501_v19 = vadd.f32 %v3772_v35, %v2340_v8  ;;  %v3691_v59 = vpop.f32.mrb[129].mxu1  ;;  %v2492_v42 = vpop.f32.mrb[129].mxu0 }
 0x1fc   : > { %3256 = vst [vmem:[%s4883_s9 + $0x30] sm:$0xff] %v3204_v22   ;;  %v3692_v34 = vadd.f32 %v3691_v59, %v3690_v9  ;;  %v2493_v21 = vadd.f32 %v2492_v42, %v4878_v5  ;;  %v3693_v40 = vpop.f32.mrb[130].mxu1  ;;  %v3773_v41 = vpop.f32.mrb[130].mxu0 }
 0x1fd   : > { %v2504_v23 = vadd.f32 %v3773_v41, %v2343_v46  ;;  %v3694_v45 = vpop.f32.mrb[131].mxu1  ;;  %v2495_v14 = vpop.f32.mrb[131].mxu0  ;;  %v2573_v51 = vmax.f32 %v2501_v19, 0.0 }
 0x1fe   : > { %v3695_v36 = vadd.f32 %v3694_v45, %v3693_v40  ;;  %v2496_v25 = vadd.f32 %v2495_v14, %v4886_v33  ;;  %v2364_v63 = vadd.f32 %v3692_v34, %v4825_v6  ;;  %v2571_v53 = vmax.f32 %v2493_v21, 0.0 }
 0x1ff   : > { %v2574_v8 = vmax.f32 %v2504_v23, 0.0 }
 0x200   : > { %v2572_v4 = vmax.f32 %v2496_v25, 0.0  ;;  %v2367_v56 = vadd.f32 %v3695_v36, %v4831_v49 }
 0x201   : > { %v3219_v32 = vpack.c.bf16 %v2574_v8, %v2573_v51 }
 0x202   : > { %v3214_v5 = vpack.c.bf16 %v2572_v4, %v2571_v53  ;;  %v3696_v38 = vpop.f32.mrb[132].mxu1  ;;  %v3776_v44 = vpop.f32.mrb[132].mxu0 }
 0x203   : > { %3259 = vst [vmem:[%s4883_s9 + $0x48] sm:$0xff] %v3219_v32   ;;  %v2517_v46 = vadd.f32 %v3776_v44, %v2356_v1  ;;  %v3697_v29 = vpop.f32.mrb[133].mxu1  ;;  %v2508_v39 = vpop.f32.mrb[133].mxu0 }
 0x204   : > { %3258 = vst [vmem:[%s4883_s9 + $0x40] sm:$0xff] %v3214_v5   ;;  %v3698_v50 = vadd.f32 %v3697_v29, %v3696_v38  ;;  %v2509_v33 = vadd.f32 %v2508_v39, %v4903_v47  ;;  %v3699_v17 = vpop.f32.mrb[134].mxu1  ;;  %v3777_v6 = vpop.f32.mrb[134].mxu0 }
 0x205   : > { %v2520_v43 = vadd.f32 %v3777_v6, %v2359_v31  ;;  %v3700_v55 = vpop.f32.mrb[135].mxu1  ;;  %v2511_v24 = vpop.f32.mrb[135].mxu0  ;;  %v2577_v58 = vmax.f32 %v2517_v46, 0.0 }
 0x206   : > { %v3701_v26 = vadd.f32 %v3700_v55, %v3699_v17  ;;  %v2512_v49 = vadd.f32 %v2511_v24, %v4906_v57  ;;  %v2372_v61 = vadd.f32 %v3698_v50, %v4837_v27  ;;  %v2575_v0 = vmax.f32 %v2509_v33, 0.0 }
 0x207   : > { %v2578_v11 = vmax.f32 %v2520_v43, 0.0 }
 0x208   : > { %v2576_v52 = vmax.f32 %v2512_v49, 0.0  ;;  %v2375_v3 = vadd.f32 %v3701_v26, %v4843_v60 }
 0x209   : > { %v3229_v30 = vpack.c.bf16 %v2578_v11, %v2577_v58 }
 0x20a   : > { %v3224_v47 = vpack.c.bf16 %v2576_v52, %v2575_v0  ;;  %v3702_v16 = vpop.f32.mrb[136].mxu1  ;;  %v3780_v15 = vpop.f32.mrb[136].mxu0 }
 0x20b   : > { %3261 = vst [vmem:[%s4883_s9 + $0x58] sm:$0xff] %v3229_v30   ;;  %v2533_v7 = vadd.f32 %v3780_v15, %v2372_v61  ;;  %v3703_v20 = vpop.f32.mrb[137].mxu1  ;;  %v2524_v62 = vpop.f32.mrb[137].mxu0 }
 0x20c   : > { %3260 = vst [vmem:[%s4883_s9 + $0x50] sm:$0xff] %v3224_v47   ;;  %v3704_v1 = vadd.f32 %v3703_v20, %v3702_v16  ;;  %v2525_v37 = vadd.f32 %v2524_v62, %v2364_v63  ;;  %v3705_v57 = vpop.f32.mrb[138].mxu1  ;;  %v3781_v18 = vpop.f32.mrb[138].mxu0 }
 0x20d   : > { %v2536_v27 = vadd.f32 %v3781_v18, %v2375_v3  ;;  %v3706_v54 = vpop.f32.mrb[139].mxu1  ;;  %v2527_v10 = vpop.f32.mrb[139].mxu0  ;;  %v2581_v22 = vmax.f32 %v2533_v7, 0.0 }
 0x20e   : > { %v3707_v31 = vadd.f32 %v3706_v54, %v3705_v57  ;;  %v2528_v60 = vadd.f32 %v2527_v10, %v2367_v56  ;;  %v2380_v2 = vadd.f32 %v3704_v1, %v4849_v48  ;;  %v2579_v35 = vmax.f32 %v2525_v37, 0.0 }
 0x20f   : > { %v2582_v9 = vmax.f32 %v2536_v27, 0.0 }
 0x210   : > { %v2580_v19 = vmax.f32 %v2528_v60, 0.0  ;;  %v2383_v59 = vadd.f32 %v3707_v31, %v4855_v12 }
 0x211   : > { %v3239_v42 = vpack.c.bf16 %v2582_v9, %v2581_v22 }
 0x212   : > { %v3234_v34 = vpack.c.bf16 %v2580_v19, %v2579_v35  ;;  %v3708_v21 = vpop.f32.mrb[140].mxu1  ;;  %v3784_v40 = vpop.f32.mrb[140].mxu0 }
 0x213   : > { %3263 = vst [vmem:[%s4883_s9 + $0x68] sm:$0xff] %v3239_v42   ;;  %v3709_v41 = vpop.f32.mrb[141].mxu1  ;;  %v2540_v23 = vpop.f32.mrb[141].mxu0 }
 0x214   : > { %3262 = vst [vmem:[%s4883_s9 + $0x60] sm:$0xff] %v3234_v34   ;;  %v3710_v45 = vadd.f32 %v3709_v41, %v3708_v21  ;;  %v2541_v14 = vadd.f32 %v2540_v23, %v2380_v2  ;;  %v3711_v36 = vpop.f32.mrb[142].mxu1  ;;  %v3785_v25 = vpop.f32.mrb[142].mxu0 }
 0x215   : > { %v3712_v48 = vpop.f32.mrb[143].mxu1  ;;  %v2543_v63 = vpop.f32.mrb[143].mxu0 }
 0x216   : > { %v2388_v51 = vadd.f32 %v3710_v45, %v4861_v13  ;;  %v3713_v8 = vadd.f32 %v3712_v48, %v3711_v36  ;;  %v2544_v12 = vadd.f32 %v2543_v63, %v2383_v59  ;;  %v2583_v4 = vmax.f32 %v2541_v14, 0.0 }
 0x218   : > { %v2549_v53 = vadd.f32 %v3784_v40, %v2388_v51  ;;  %v2391_v56 = vadd.f32 %v3713_v8, %v4867_v28  ;;  %v2584_v32 = vmax.f32 %v2544_v12, 0.0 }
 0x21a   : > { %v2552_v5 = vadd.f32 %v3785_v25, %v2391_v56  ;;  %v3244_v38 = vpack.c.bf16 %v2584_v32, %v2583_v4  ;;  %v2585_v44 = vmax.f32 %v2549_v53, 0.0 }
 0x21c   : > { %v2586_v46 = vmax.f32 %v2552_v5, 0.0  ;;  %3264 = vst [vmem:[%s4883_s9 + $0x70] sm:$0xff] %v3244_v38  }
 0x21e   : > { %v3249_v29 = vpack.c.bf16 %v2586_v46, %v2585_v44 }
 0x220   : > { %3265 = vst [vmem:[%s4883_s9 + $0x78] sm:$0xff] %v3249_v29  }
 0x221 PF: > { %s13_s14 = sadd.s32 1, %s4129_s14   ;;  %s4951_s12 = smov %s4125_s13 }
 0x222   : > { %p10_p5 = scmp.ge.s32.totalorder %s13_s14, 8   ;;  %s4952_s13 = smov %s4954_s15 }
 0x224   :  { %12 = sbr.rel (!%p10_p5) target bundleno = 2 (0x2), region = 68 }

// kernel: ensemble_forward.11
= control target key start
LH: loop header
LB: loop body
LE: loop exit
PB: predicated region body
PF: predicated region fallthrough
CT: control target
= control target key end

     0   :  { %s4151_s12 = smov 0   ;;  %s4153_s13 = smov 0   ;;  %s4947_s0 = inlined_call_operand.vmem [shape: bf16[1,1280,1152], index: 0, kind: input, shape index: {}]   ;;  %s4948_s1 = inlined_call_operand.vmem [shape: bf16[1,1152,128], index: 1, kind: input, shape index: {}]   ;;  %s4949_s2 = inlined_call_operand.vmem [shape: f32[1,1,128], index: 2, kind: input, shape index: {}]   ;;  %s4950_s3 = inlined_call_operand.vmem [shape: bf16[1,1280,128], index: 3, kind: output, shape index: {}]  }
   0x1   :  { %s4155_s14 = smov 0  }
   0x2 LB: > { %s28_s15 = sadd.s32 1, %s4125_s13  ;;  %p2883_p0 = scmp.ge.s32.totalorder %s4129_s14, 1  ;;  %s4129_s14 = sphi %s4155_s14, %s13_s14   ;;  %s4125_s13 = sphi %s4153_s13, %s4952_s13   ;;  %s4121_s12 = sphi %s4151_s12, %s4951_s12  }
   0x3   : > { %p30_p1 = scmp.ge.s32.totalorder %s28_s15, 5  ;;  %p190_p2 = scmp.lt.s32.totalorder %s4129_s14, 6 }
   0x5   : > { %s4954_s15 = smov (%p30_p1, %s28_s15), 0  ;;  %p191_p3 = pnand %p2883_p0, %p190_p2 }
   0x6   : > { %v3827_v0 = vld [vmem:[%s4948_s1 + $0x40] sm:$0xff] (!%p191_p3)   ;;  %s2884_s18 = sshll.u32 (!%p191_p3), %s4121_s12, 5  ;;  %v3829_v2 = vld [vmem:[%s4948_s1 + $0x48] sm:$0xff] (!%p191_p3)   ;;  %v3831_v4 = vld [vmem:[%s4948_s1 + $0x50] sm:$0xff] (!%p191_p3)  }
   0x7   : > { %194 = sbr.rel (%p191_p3) target bundleno = 545 (0x221), region = 32  ;;  %v3828_v1 = vld [vmem:[%s4948_s1] sm:$0xff] (!%p191_p3)   ;;  %3266 = vmatprep.subr.bf16.mxu0 (!%p191_p3), %v3827_v0  ;;  %3786 = vmatprep.subr.bf16.mxu1 (!%p191_p3), %v3827_v0  ;;  %p237_p4 = scmp.lt.s32.totalorder (!%p191_p3), %s2884_s18, 159  ;;  %v3830_v3 = vld [vmem:[%s4948_s1 + $0x8] sm:$0xff] (!%p191_p3)   ;;  %v3832_v5 = vld [vmem:[%s4948_s1 + $0x10] sm:$0xff] (!%p191_p3)  }
   0x8   : > { %3267 = vmatpush3.bf16.msra.mxu0 (!%p191_p3), %v3828_v1  ;;  %3794 = vmatpush3.bf16.msra.mxu1 (!%p191_p3), %v3828_v1  ;;  %v3833_v6 = vld [vmem:[%s4948_s1 + $0x58] sm:$0xff] (!%p191_p3)   ;;  %v3835_v8 = vld [vmem:[%s4948_s1 + $0x60] sm:$0xff] (!%p191_p3)   ;;  %v3837_v10 = vld [vmem:[%s4948_s1 + $0x68] sm:$0xff] (!%p191_p3)  }
   0x9   : > { %3268 = vmatprep.subr.bf16.mxu0 (!%p191_p3), %v3829_v2  ;;  %3787 = vmatprep.subr.bf16.mxu1 (!%p191_p3), %v3829_v2  ;;  %v3834_v7 = vld [vmem:[%s4948_s1 + $0x18] sm:$0xff] (!%p191_p3)   ;;  %v3836_v9 = vld [vmem:[%s4948_s1 + $0x20] sm:$0xff] (!%p191_p3)   ;;  %v3838_v13 = vld [vmem:[%s4948_s1 + $0x28] sm:$0xff] (!%p191_p3)  }
   0xa   : > { %v3839_v14 = vld [vmem:[%s4948_s1 + $0x70] sm:$0xff] (!%p191_p3)   ;;  %v3841_v16 = vld [vmem:[%s4948_s1 + $0x78] sm:$0xff] (!%p191_p3)   ;;  %v3849_v18 = vld [vmem:[%s4948_s1 + $0xc0] sm:$0xff] (!%p191_p3)  }
   0xb   : > { %v3840_v15 = vld [vmem:[%s4948_s1 + $0x30] sm:$0xff] (!%p191_p3)   ;;  %v3842_v17 = vld [vmem:[%s4948_s1 + $0x38] sm:$0xff] (!%p191_p3)   ;;  %v3852_v21 = vld [vmem:[%s4948_s1 + $0x140] sm:$0xff] (!%p191_p3)  }
   0xc   : > { %3269 = vmatpush3.bf16.msra.mxu0 (!%p191_p3), %v3830_v3  ;;  %3795 = vmatpush3.bf16.msra.mxu1 (!%p191_p3), %v3830_v3  ;;  %v3850_v22 = vld [vmem:[%s4948_s1 + $0x80] sm:$0xff] (!%p191_p3)   ;;  %v3851_v23 = vld [vmem:[%s4948_s1 + $0xc8] sm:$0xff] (!%p191_p3)   ;;  %v3861_v31 = vld [vmem:[%s4948_s1 + $0xd0] sm:$0xff] (!%p191_p3)  }
   0xd   : > { %3270 = vmatprep.subr.bf16.mxu0 (!%p191_p3), %v3831_v4  ;;  %3788 = vmatprep.subr.bf16.mxu1 (!%p191_p3), %v3831_v4  ;;  %v3854_v24 = vld [vmem:[%s4948_s1 + $0x100] sm:$0xff] (!%p191_p3)   ;;  %v3853_v27 = vld [vmem:[%s4948_s1 + $0x88] sm:$0xff] (!%p191_p3)   ;;  %v3862_v32 = vld [vmem:[%s4948_s1 + $0x90] sm:$0xff] (!%p191_p3)  }
   0xe   : > { %s4956_s18 = smov (!%p237_p4, %s2884_s18), 159  ;;  %v3872_v28 = vld [vmem:[%s4948_s1 + $0x148] sm:$0xff]   ;;  %v3863_v34 = vld [vmem:[%s4948_s1 + $0xd8] sm:$0xff]   ;;  %v3871_v40 = vld [vmem:[%s4948_s1 + $0xe0] sm:$0xff]  }
   0xf   : > { %s3802_s4 = smul.u32 36, %s4956_s18  ;;  %v3874_v33 = vld [vmem:[%s4948_s1 + $0x108] sm:$0xff]   ;;  %v3864_v37 = vld [vmem:[%s4948_s1 + $0x98] sm:$0xff]   ;;  %v3873_v41 = vld [vmem:[%s4948_s1 + $0xa0] sm:$0xff]  }
  0x10   : > { %3271 = vmatpush3.bf16.msra.mxu0 %v3832_v5  ;;  %3796 = vmatpush3.bf16.msra.mxu1 %v3832_v5  ;;  %v3875_v42 = vld [vmem:[%s4948_s1 + $0xe8] sm:$0xff]   ;;  %v3886_v43 = vld [vmem:[%s4948_s1 + $0x150] sm:$0xff]   ;;  %v3885_v52 = vld [vmem:[%s4948_s1 + $0xf8] sm:$0xff]  }
  0x11   : > { %3272 = vmatprep.subr.bf16.mxu0 %v3833_v6  ;;  %3789 = vmatprep.subr.bf16.mxu1 %v3833_v6  ;;  %s4202_s11 = scalar_lea.vmem %s4947_s0, %s3802_s4  ;;  %v3888_v46 = vld [vmem:[%s4948_s1 + $0x110] sm:$0xff]   ;;  %v3876_v47 = vld [vmem:[%s4948_s1 + $0xa8] sm:$0xff]   ;;  %v3903_v55 = vld [vmem:[%s4948_s1 + $0x158] sm:$0xff]  }
  0x12   : > { %v3845_v11 = vld [vmem:[%s4202_s11 + $0x4] ss:$36 sps:$4 sm:$0xff]   ;;  %v3855_v25 = vld [vmem:[%s4202_s11 + $0x4c] ss:$36 sps:$4 sm:$0xff]   ;;  %v3865_v35 = vld [vmem:[%s4202_s11 + $0x94] ss:$36 sps:$4 sm:$0xff]  }
  0x13   : > { %v3848_v12 = vld [vmem:[%s4202_s11 + $0x364] ss:$36 sps:$4 sm:$0xff]   ;;  %1782 = vmatprep.mubr.bf16.mxu0 %v3845_v11  ;;  %v3857_v26 = vld [vmem:[%s4202_s11 + $0x3ac] ss:$36 sps:$4 sm:$0xff]   ;;  %v3867_v36 = vld [vmem:[%s4202_s11 + $0x3f4] ss:$36 sps:$4 sm:$0xff]  }
  0x14   : > { %3273 = vmatpush3.bf16.msra.mxu0 %v3834_v7  ;;  %3797 = vmatpush3.bf16.msra.mxu1 %v3834_v7  ;;  %v3843_v19 = vld [vmem:[%s4202_s11] ss:$36 sps:$4 sm:$0xff]   ;;  %v3859_v29 = vld [vmem:[%s4202_s11 + $0x48] ss:$36 sps:$4 sm:$0xff]   ;;  %v3869_v38 = vld [vmem:[%s4202_s11 + $0x90] ss:$36 sps:$4 sm:$0xff]  }
  0x15   : > { %3274 = vmatprep.subr.bf16.mxu0 %v3835_v8  ;;  %3790 = vmatprep.subr.bf16.mxu1 %v3835_v8  ;;  %v3846_v20 = vld [vmem:[%s4202_s11 + $0x360] ss:$36 sps:$4 sm:$0xff]   ;;  %v3860_v30 = vld [vmem:[%s4202_s11 + $0x3a8] ss:$36 sps:$4 sm:$0xff]   ;;  %v3870_v39 = vld [vmem:[%s4202_s11 + $0x3f0] ss:$36 sps:$4 sm:$0xff]  }
  0x16   : > { %1878 = vmatprep.mubr.bf16.mxu1 %v3848_v12  ;;  %v3877_v44 = vld [vmem:[%s4202_s11 + $0xdc] ss:$36 sps:$4 sm:$0xff]   ;;  %v3883_v48 = vld [vmem:[%s4948_s1 + $0xf0] sm:$0xff]   ;;  %v3889_v53 = vld [vmem:[%s4202_s11 + $0x124] ss:$36 sps:$4 sm:$0xff]  }
  0x17   : > { %v3879_v45 = vld [vmem:[%s4202_s11 + $0x43c] ss:$36 sps:$4 sm:$0xff]   ;;  %v3884_v51 = vld [vmem:[%s4948_s1 + $0xb0] sm:$0xff]   ;;  %v3891_v58 = vld [vmem:[%s4202_s11 + $0x8] ss:$36 sps:$4 sm:$0xff]  }
  0x18   : > { %3275 = vmatpush3.bf16.msra.mxu0 %v3836_v9  ;;  %3798 = vmatpush3.bf16.msra.mxu1 %v3836_v9  ;;  %v3881_v49 = vld [vmem:[%s4202_s11 + $0xd8] ss:$36 sps:$4 sm:$0xff]   ;;  %v3893_v54 = vld [vmem:[%s4202_s11 + $0xc] ss:$36 sps:$4 sm:$0xff]   ;;  %v3894_v59 = vld [vmem:[%s4202_s11 + $0x120] ss:$36 sps:$4 sm:$0xff]  }
  0x19   : > { %3276 = vmatprep.subr.bf16.mxu0 %v3837_v10  ;;  %3791 = vmatprep.subr.bf16.mxu1 %v3837_v10  ;;  %v3882_v50 = vld [vmem:[%s4202_s11 + $0x438] ss:$36 sps:$4 sm:$0xff]   ;;  %v3895_v60 = vld [vmem:[%s4948_s1 + $0x1c0] sm:$0xff]   ;;  %v3897_v62 = vld [vmem:[%s4202_s11 + $0x16c] ss:$36 sps:$4 sm:$0xff]  }
  0x1a   : > { %v3904_v56 = vld [vmem:[%s4948_s1 + $0x118] sm:$0xff]   ;;  %v3896_v61 = vld [vmem:[%s4948_s1 + $0x180] sm:$0xff]   ;;  %v3911_v1 = vld [vmem:[%s4948_s1 + $0x1c8] sm:$0xff]  }
  0x1b   : > { %v3887_v57 = vld [vmem:[%s4948_s1 + $0xb8] sm:$0xff]   ;;  %v3913_v0 = vld [vmem:[%s4948_s1 + $0x160] sm:$0xff]   ;;  %v3912_v3 = vld [vmem:[%s4948_s1 + $0x188] sm:$0xff]  }
  0x1c   : > { %3277 = vmatpush3.bf16.msra.mxu0 %v3838_v13  ;;  %3799 = vmatpush3.bf16.msra.mxu1 %v3838_v13  ;;  %v3899_v63 = vld [vmem:[%s4202_s11 + $0x54] ss:$36 sps:$4 sm:$0xff]   ;;  %v3914_v2 = vld [vmem:[%s4948_s1 + $0x120] sm:$0xff]   ;;  %v3901_v4 = vld [vmem:[%s4202_s11 + $0x168] ss:$36 sps:$4 sm:$0xff]  }
  0x1d   : > { %3278 = vmatprep.subr.bf16.mxu0 %v3839_v14  ;;  %3792 = vmatprep.subr.bf16.mxu1 %v3839_v14  ;;  %v3902_v5 = vld [vmem:[%s4202_s11 + $0x50] ss:$36 sps:$4 sm:$0xff]   ;;  %v3907_v7 = vld [vmem:[%s4202_s11 + $0x9c] ss:$36 sps:$4 sm:$0xff]   ;;  %v3927_v8 = vld [vmem:[%s4948_s1 + $0x168] sm:$0xff]  }
  0x1e   : > { %v3905_v6 = vld [vmem:[%s4202_s11 + $0x1b4] ss:$36 sps:$4 sm:$0xff]   ;;  %v3929_v10 = vld [vmem:[%s4948_s1 + $0x128] sm:$0xff]   ;;  %v3915_v14 = vld [vmem:[%s4202_s11 + $0x1fc] ss:$36 sps:$4 sm:$0xff]  }
  0x1f   : > { %v3928_v9 = vld [vmem:[%s4948_s1 + $0x1d0] sm:$0xff]   ;;  %v3910_v13 = vld [vmem:[%s4202_s11 + $0x98] ss:$36 sps:$4 sm:$0xff]  }
  0x20   : > { %3279 = vmatpush3.bf16.msra.mxu0 %v3840_v15  ;;  %3800 = vmatpush3.bf16.msra.mxu1 %v3840_v15  ;;  %v3930_v11 = vld [vmem:[%s4948_s1 + $0x190] sm:$0xff]  }
  0x21   : > { %3280 = vmatprep.subr.bf16.mxu0 %v3841_v16  ;;  %3793 = vmatprep.subr.bf16.mxu1 %v3841_v16  ;;  %v3909_v12 = vld [vmem:[%s4202_s11 + $0x1b0] ss:$36 sps:$4 sm:$0xff]  }
  0x22   : > { %v3937_v15 = vld [vmem:[%s4948_s1 + $0x170] sm:$0xff]  }
  0x23   : > { %v3938_v16 = vld [vmem:[%s4948_s1 + $0x130] sm:$0xff]  }
  0x24   : > { %3281 = vmatpush3.bf16.msra.mxu0 %v3842_v17  ;;  %3801 = vmatpush3.bf16.msra.mxu1 %v3842_v17  ;;  %v3917_v17 = vld [vmem:[%s4202_s11 + $0xe4] ss:$36 sps:$4 sm:$0xff]  }
  0x25   : > { %3378 = vmatprep.subr.bf16.mxu1 %v3849_v18  ;;  %3490 = vmatprep.subr.bf16.mxu0 %v3852_v21  ;;  %v3945_v18 = vld [vmem:[%s4948_s1 + $0x1d8] sm:$0xff]   ;;  %v3920_v21 = vld [vmem:[%s4202_s11 + $0xe0] ss:$36 sps:$4 sm:$0xff]  }
  0x27   : > { %1783 = vmatmul.mubr.bf16.vlgmr.msra.gmra.mrb[0].mxu0 %v3843_v19  ;;  %1879 = vmatmul.mubr.bf16.vlgmr.msra.gmra.mrb[0].mxu1 %v3846_v20  ;;  %v3946_v19 = vld [vmem:[%s4948_s1 + $0x198] sm:$0xff]  }
  0x28   : > { %3379 = vmatpush3.bf16.msra.mxu1 %v3850_v22  ;;  %3491 = vmatpush3.bf16.msra.mxu0 %v3854_v24  ;;  %v3919_v20 = vld [vmem:[%s4202_s11 + $0x1f8] ss:$36 sps:$4 sm:$0xff]   ;;  %v3921_v22 = vld [vmem:[%s4202_s11 + $0x244] ss:$36 sps:$4 sm:$0xff]  }
  0x29   : > { %3380 = vmatprep.subr.bf16.mxu1 %v3851_v23  ;;  %1790 = vmatprep.mubr.bf16.mxu0 %v3855_v25  ;;  %v3923_v23 = vld [vmem:[%s4202_s11 + $0x12c] ss:$36 sps:$4 sm:$0xff]   ;;  %v3953_v24 = vld [vmem:[%s4948_s1 + $0x178] sm:$0xff]  }
  0x2a   : > { %1886 = vmatprep.mubr.bf16.mxu1 %v3857_v26  ;;  %3492 = vmatprep.subr.bf16.mxu0 %v3872_v28  ;;  %v3954_v25 = vld [vmem:[%s4948_s1 + $0x138] sm:$0xff]   ;;  %v3961_v26 = vld [vmem:[%s4948_s1 + $0x1e0] sm:$0xff]  }
  0x2b   : > { %v3962_v28 = vld [vmem:[%s4948_s1 + $0x1a0] sm:$0xff]  }
  0x2c   : > { %3381 = vmatpush3.bf16.msra.mxu1 %v3853_v27  ;;  %3493 = vmatpush3.bf16.msra.mxu0 %v3874_v33  ;;  %v3925_v27 = vld [vmem:[%s4202_s11 + $0x240] ss:$36 sps:$4 sm:$0xff]   ;;  %v3976_v33 = vld [vmem:[%s4948_s1 + $0x1e8] sm:$0xff]  }
  0x2d   : > { %3382 = vmatprep.subr.bf16.mxu1 %v3861_v31  ;;  %3494 = vmatprep.subr.bf16.mxu0 %v3886_v43  ;;  %v3931_v31 = vld [vmem:[%s4202_s11 + $0x28c] ss:$36 sps:$4 sm:$0xff]   ;;  %v3947_v43 = vld [vmem:[%s4202_s11 + $0x31c] ss:$36 sps:$4 sm:$0xff]  }
  0x2f   : > { %1791 = vmatmul.mubr.bf16.gmra.mrb[4].mxu0 %v3859_v29  ;;  %1887 = vmatmul.mubr.bf16.gmra.mrb[4].mxu1 %v3860_v30  ;;  %v3963_v29 = vld [vmem:[%s4948_s1 + $0x200] sm:$0xff]   ;;  %v3926_v30 = vld [vmem:[%s4202_s11 + $0x128] ss:$36 sps:$4 sm:$0xff]  }
  0x30   : > { %3383 = vmatpush3.bf16.msra.mxu1 %v3862_v32  ;;  %1798 = vmatprep.mubr.bf16.mxu0 %v3865_v35  ;;  %v3933_v32 = vld [vmem:[%s4202_s11 + $0x174] ss:$36 sps:$4 sm:$0xff]   ;;  %v3977_v35 = vld [vmem:[%s4948_s1 + $0x1a8] sm:$0xff]  }
  0x31   : > { %3384 = vmatprep.subr.bf16.mxu1 %v3863_v34  ;;  %1894 = vmatprep.mubr.bf16.mxu1 %v3867_v36  ;;  %v3935_v34 = vld [vmem:[%s4202_s11 + $0x288] ss:$36 sps:$4 sm:$0xff]   ;;  %v3936_v36 = vld [vmem:[%s4202_s11 + $0x170] ss:$36 sps:$4 sm:$0xff]  }
  0x32   : > { %3495 = vmatpush3.bf16.msra.mxu0 %v3888_v46  ;;  %v3952_v46 = vld [vmem:[%s4202_s11 + $0x200] ss:$36 sps:$4 sm:$0xff]  }
  0x33   : > { %3496 = vmatprep.subr.bf16.mxu0 %v3903_v55  ;;  %v3978_v55 = vld [vmem:[%s4948_s1 + $0x208] sm:$0xff]  }
  0x34   : > { %3385 = vmatpush3.bf16.msra.mxu1 %v3864_v37  ;;  %v3939_v37 = vld [vmem:[%s4202_s11 + $0x2d4] ss:$36 sps:$4 sm:$0xff]  }
  0x35   : > { %3386 = vmatprep.subr.bf16.mxu1 %v3871_v40  ;;  %v3944_v40 = vld [vmem:[%s4202_s11 + $0x1b8] ss:$36 sps:$4 sm:$0xff]  }
  0x36   : > { %3497 = vmatpush3.bf16.msra.mxu0 %v3904_v56  ;;  %v3993_v56 = vld [vmem:[%s4948_s1 + $0x210] sm:$0xff]  }
  0x37   : > { %1799 = vmatmul.mubr.bf16.gmra.mrb[8].mxu0 %v3869_v38  ;;  %1895 = vmatmul.mubr.bf16.gmra.mrb[8].mxu1 %v3870_v39  ;;  %v3941_v38 = vld [vmem:[%s4202_s11 + $0x1bc] ss:$36 sps:$4 sm:$0xff]   ;;  %v3943_v39 = vld [vmem:[%s4202_s11 + $0x2d0] ss:$36 sps:$4 sm:$0xff]  }
  0x38   : > { %3387 = vmatpush3.bf16.msra.mxu1 %v3873_v41  ;;  %1806 = vmatprep.mubr.bf16.mxu0 %v3877_v44  ;;  %v3991_v41 = vld [vmem:[%s4948_s1 + $0x1f0] sm:$0xff]   ;;  %v3949_v44 = vld [vmem:[%s4202_s11 + $0x204] ss:$36 sps:$4 sm:$0xff]  }
  0x39   : > { %3388 = vmatprep.subr.bf16.mxu1 %v3875_v42  ;;  %1902 = vmatprep.mubr.bf16.mxu1 %v3879_v45  ;;  %v3992_v42 = vld [vmem:[%s4948_s1 + $0x1b0] sm:$0xff]   ;;  %v3951_v45 = vld [vmem:[%s4202_s11 + $0x318] ss:$36 sps:$4 sm:$0xff]  }
  0x3a   : > { %3498 = vmatprep.subr.bf16.mxu0 %v3913_v0  ;;  %v3975_v0 = vld [vmem:[%s4202_s11 + $0xa0] ss:$36 sps:$4 sm:$0xff]  }
  0x3b   : > { %3499 = vmatpush3.bf16.msra.mxu0 %v3914_v2  ;;  %v3981_v2 = vld [vmem:[%s4202_s11 + $0xec] ss:$36 sps:$4 sm:$0xff]  }
  0x3c   : > { %3389 = vmatpush3.bf16.msra.mxu1 %v3876_v47  ;;  %3500 = vmatprep.subr.bf16.mxu0 %v3927_v8  ;;  %v4006_v47 = vld [vmem:[%s4948_s1 + $0x1f8] sm:$0xff]  }
  0x3d   : > { %3390 = vmatprep.subr.bf16.mxu1 %v3883_v48  ;;  %v4007_v48 = vld [vmem:[%s4948_s1 + $0x1b8] sm:$0xff]  }
  0x3e   : > { %v3987_v8 = vld [vmem:[%s4202_s11 + $0x134] ss:$36 sps:$4 sm:$0xff]  }
  0x3f   : > { %1807 = vmatmul.mubr.bf16.gmra.mrb[12].mxu0 %v3881_v49  ;;  %1903 = vmatmul.mubr.bf16.gmra.mrb[12].mxu1 %v3882_v50  ;;  %v3955_v49 = vld [vmem:[%s4202_s11 + $0x24c] ss:$36 sps:$4 sm:$0xff]   ;;  %v3959_v50 = vld [vmem:[%s4202_s11 + $0x14] ss:$36 sps:$4 sm:$0xff]  }
  0x40   : > { %3391 = vmatpush3.bf16.msra.mxu1 %v3884_v51  ;;  %1814 = vmatprep.mubr.bf16.mxu0 %v3889_v53  ;;  %v3957_v51 = vld [vmem:[%s4202_s11 + $0x10] ss:$36 sps:$4 sm:$0xff]  }
  0x41   : > { %3392 = vmatprep.subr.bf16.mxu1 %v3885_v52  ;;  %1943 = vmatprep.mubr.bf16.mxu1 %v3893_v54  ;;  %v3960_v52 = vld [vmem:[%s4202_s11 + $0x248] ss:$36 sps:$4 sm:$0xff]   ;;  %v3964_v53 = vld [vmem:[%s4202_s11 + $0x294] ss:$36 sps:$4 sm:$0xff]   ;;  %v3966_v54 = vld [vmem:[%s4202_s11 + $0x5c] ss:$36 sps:$4 sm:$0xff]  }
  0x42   : > { %3501 = vmatpush3.bf16.msra.mxu0 %v3929_v10  ;;  %v3989_v10 = vld [vmem:[%s4202_s11 + $0x368] ss:$36 sps:$4 sm:$0xff]  }
  0x43   : > { %3502 = vmatprep.subr.bf16.mxu0 %v3937_v15  ;;  %v3999_v15 = vld [vmem:[%s4202_s11 + $0x178] ss:$36 sps:$4 sm:$0xff]  }
  0x44   : > { %3393 = vmatpush3.bf16.msra.mxu1 %v3887_v57  ;;  %v3968_v57 = vld [vmem:[%s4202_s11 + $0x290] ss:$36 sps:$4 sm:$0xff]  }
  0x45   : > { %3602 = vmatprep.subr.bf16.mxu1 %v3895_v60  ;;  %v3972_v60 = vld [vmem:[%s4202_s11 + $0xa4] ss:$36 sps:$4 sm:$0xff]  }
  0x46   : > { %3503 = vmatpush3.bf16.msra.mxu0 %v3938_v16  ;;  %v4000_v16 = vld [vmem:[%s4202_s11 + $0x3fc] ss:$36 sps:$4 sm:$0xff]  }
  0x47   : > { %1815 = vmatmul.mubr.bf16.gmra.mrb[16].mxu0 %v3894_v59  ;;  %1944 = vmatmul.mubr.bf16.vlgmr.msra.gmra.mrb[16].mxu1 %v3891_v58  ;;  %v3969_v58 = vld [vmem:[%s4202_s11 + $0x58] ss:$36 sps:$4 sm:$0xff]  }
  0x48   : > { %3603 = vmatpush3.bf16.msra.mxu1 %v3896_v61  ;;  %1822 = vmatprep.mubr.bf16.mxu0 %v3897_v62  ;;  %v3970_v59 = vld [vmem:[%s4202_s11 + $0x2dc] ss:$36 sps:$4 sm:$0xff]  }
  0x49   : > { %1951 = vmatprep.mubr.bf16.mxu1 %v3899_v63  ;;  %3604 = vmatprep.subr.bf16.mxu1 %v3911_v1  ;;  %v4008_v61 = vld [vmem:[%s4948_s1 + $0x218] sm:$0xff]   ;;  %v4021_v62 = vld [vmem:[%s4948_s1 + $0x220] sm:$0xff]  }
  0x4a   : > { %3504 = vmatprep.subr.bf16.mxu0 %v3953_v24  ;;  %v3974_v63 = vld [vmem:[%s4202_s11 + $0x2d8] ss:$36 sps:$4 sm:$0xff]   ;;  %v3979_v1 = vld [vmem:[%s4202_s11 + $0x324] ss:$36 sps:$4 sm:$0xff]  }
  0x4b   : > { %3505 = vmatpush3.bf16.msra.mxu0 %v3954_v25  ;;  %v4015_v24 = vld [vmem:[%s4202_s11 + $0x254] ss:$36 sps:$4 sm:$0xff]   ;;  %v4019_v25 = vld [vmem:[%s4202_s11 + $0x1c] ss:$36 sps:$4 sm:$0xff]  }
  0x4c   : > { %3605 = vmatpush3.bf16.msra.mxu1 %v3912_v3  ;;  %3738 = vmatprep.subr.bf16.mxu0 %v3963_v29  ;;  %v4034_v3 = vld [vmem:[%s4948_s1 + $0x228] sm:$0xff]  }
  0x4d   : > { %3606 = vmatprep.subr.bf16.mxu1 %v3928_v9  ;;  %v4060_v9 = vld [vmem:[%s4948_s1 + $0x238] sm:$0xff]  }
  0x4f   : > { %1823 = vmatmul.mubr.bf16.gmra.mrb[20].mxu0 %v3901_v4  ;;  %1952 = vmatmul.mubr.bf16.gmra.mrb[20].mxu1 %v3902_v5  ;;  %v3983_v4 = vld [vmem:[%s4202_s11 + $0x320] ss:$36 sps:$4 sm:$0xff]   ;;  %v3984_v5 = vld [vmem:[%s4202_s11 + $0xe8] ss:$36 sps:$4 sm:$0xff]  }
  0x50   : > { %1830 = vmatprep.mubr.bf16.mxu0 %v3905_v6  ;;  %1959 = vmatprep.mubr.bf16.mxu1 %v3907_v7  ;;  %v4047_v6 = vld [vmem:[%s4948_s1 + $0x230] sm:$0xff]  }
  0x51   : > { %3607 = vmatpush3.bf16.msra.mxu1 %v3930_v11  ;;  %v3985_v7 = vld [vmem:[%s4202_s11 + $0x36c] ss:$36 sps:$4 sm:$0xff]  }
  0x52   : > { %3608 = vmatprep.subr.bf16.mxu1 %v3945_v18  ;;  %v3990_v11 = vld [vmem:[%s4202_s11 + $0x130] ss:$36 sps:$4 sm:$0xff]   ;;  %v4004_v18 = vld [vmem:[%s4202_s11 + $0x3f8] ss:$36 sps:$4 sm:$0xff]  }
  0x55   : > { %3609 = vmatpush3.bf16.msra.mxu1 %v3946_v19  ;;  %v4005_v19 = vld [vmem:[%s4202_s11 + $0x1c0] ss:$36 sps:$4 sm:$0xff]  }
  0x56   : > { %3610 = vmatprep.subr.bf16.mxu1 %v3961_v26  ;;  %v4017_v26 = vld [vmem:[%s4202_s11 + $0x18] ss:$36 sps:$4 sm:$0xff]  }
  0x57   : > { %1831 = vmatmul.mubr.bf16.gmra.mrb[24].mxu0 %v3909_v12  ;;  %1960 = vmatmul.mubr.bf16.gmra.mrb[24].mxu1 %v3910_v13  ;;  %v3994_v12 = vld [vmem:[%s4202_s11 + $0x3b4] ss:$36 sps:$4 sm:$0xff]   ;;  %v3996_v13 = vld [vmem:[%s4202_s11 + $0x17c] ss:$36 sps:$4 sm:$0xff]  }
  0x58   : > { %1838 = vmatprep.mubr.bf16.mxu0 %v3915_v14  ;;  %1967 = vmatprep.mubr.bf16.mxu1 %v3917_v17  ;;  %v3998_v14 = vld [vmem:[%s4202_s11 + $0x3b0] ss:$36 sps:$4 sm:$0xff]   ;;  %v4002_v17 = vld [vmem:[%s4202_s11 + $0x1c4] ss:$36 sps:$4 sm:$0xff]  }
  0x59   : > { %3611 = vmatpush3.bf16.msra.mxu1 %v3962_v28  ;;  %v4022_v28 = vld [vmem:[%s4202_s11 + $0x29c] ss:$36 sps:$4 sm:$0xff]  }
  0x5a   : > { %3612 = vmatprep.subr.bf16.mxu1 %v3976_v33  ;;  %v4030_v33 = vld [vmem:[%s4202_s11 + $0xac] ss:$36 sps:$4 sm:$0xff]  }
  0x5d   : > { %3613 = vmatpush3.bf16.msra.mxu1 %v3977_v35  ;;  %v4033_v35 = vld [vmem:[%s4202_s11 + $0xa8] ss:$36 sps:$4 sm:$0xff]  }
  0x5e   : > { %3614 = vmatprep.subr.bf16.mxu1 %v3991_v41  ;;  %v4043_v41 = vld [vmem:[%s4202_s11 + $0x13c] ss:$36 sps:$4 sm:$0xff]  }
  0x5f   : > { %1839 = vmatmul.mubr.bf16.gmra.mrb[28].mxu0 %v3919_v20  ;;  %1968 = vmatmul.mubr.bf16.gmra.mrb[28].mxu1 %v3920_v21  ;;  %v4009_v20 = vld [vmem:[%s4202_s11 + $0x444] ss:$36 sps:$4 sm:$0xff]   ;;  %v4011_v21 = vld [vmem:[%s4202_s11 + $0x20c] ss:$36 sps:$4 sm:$0xff]  }
  0x60   : > { %1846 = vmatprep.mubr.bf16.mxu0 %v3921_v22  ;;  %1975 = vmatprep.mubr.bf16.mxu1 %v3923_v23  ;;  %v4013_v22 = vld [vmem:[%s4202_s11 + $0x440] ss:$36 sps:$4 sm:$0xff]   ;;  %v4014_v23 = vld [vmem:[%s4202_s11 + $0x208] ss:$36 sps:$4 sm:$0xff]  }
  0x61   : > { %3615 = vmatpush3.bf16.msra.mxu1 %v3992_v42  ;;  %v4045_v42 = vld [vmem:[%s4202_s11 + $0x370] ss:$36 sps:$4 sm:$0xff]  }
  0x62   : > { %3616 = vmatprep.subr.bf16.mxu1 %v4006_v47  ;;  %v4053_v47 = vld [vmem:[%s4202_s11 + $0x180] ss:$36 sps:$4 sm:$0xff]  }
  0x65   : > { %3617 = vmatpush3.bf16.msra.mxu1 %v4007_v48  ;;  %v4054_v48 = vld [vmem:[%s4202_s11 + $0x404] ss:$36 sps:$4 sm:$0xff]  }
  0x67   : > { %1847 = vmatmul.mubr.bf16.gmra.mrb[32].mxu0 %v3925_v27  ;;  %1976 = vmatmul.mubr.bf16.gmra.mrb[32].mxu1 %v3926_v30  ;;  %v4020_v27 = vld [vmem:[%s4202_s11 + $0x250] ss:$36 sps:$4 sm:$0xff]   ;;  %v4026_v30 = vld [vmem:[%s4202_s11 + $0x298] ss:$36 sps:$4 sm:$0xff]  }
  0x68   : > { %1854 = vmatprep.mubr.bf16.mxu0 %v3931_v31  ;;  %1983 = vmatprep.mubr.bf16.mxu1 %v3933_v32  ;;  %v4027_v31 = vld [vmem:[%s4202_s11 + $0x60] ss:$36 sps:$4 sm:$0xff]  }
  0x69   : > { %v4028_v32 = vld [vmem:[%s4202_s11 + $0x2e4] ss:$36 sps:$4 sm:$0xff]  }
  0x6f   : > { %1855 = vmatmul.mubr.bf16.gmra.mrb[36].mxu0 %v3935_v34  ;;  %1984 = vmatmul.mubr.bf16.gmra.mrb[36].mxu1 %v3936_v36  ;;  %v4032_v34 = vld [vmem:[%s4202_s11 + $0x2e0] ss:$36 sps:$4 sm:$0xff]   ;;  %v4035_v36 = vld [vmem:[%s4202_s11 + $0x32c] ss:$36 sps:$4 sm:$0xff]  }
  0x70   : > { %1862 = vmatprep.mubr.bf16.mxu0 %v3939_v37  ;;  %1991 = vmatprep.mubr.bf16.mxu1 %v3941_v38  ;;  %v4037_v37 = vld [vmem:[%s4202_s11 + $0xf4] ss:$36 sps:$4 sm:$0xff]   ;;  %v4039_v38 = vld [vmem:[%s4202_s11 + $0x328] ss:$36 sps:$4 sm:$0xff]  }
  0x77   : > { %1863 = vmatmul.mubr.bf16.gmra.mrb[40].mxu0 %v3943_v39  ;;  %1992 = vmatmul.mubr.bf16.gmra.mrb[40].mxu1 %v3944_v40  ;;  %v4040_v39 = vld [vmem:[%s4202_s11 + $0xf0] ss:$36 sps:$4 sm:$0xff]  }
  0x78   : > { %1870 = vmatprep.mubr.bf16.mxu0 %v3947_v43  ;;  %1999 = vmatprep.mubr.bf16.mxu1 %v3949_v44  ;;  %v4041_v40 = vld [vmem:[%s4202_s11 + $0x374] ss:$36 sps:$4 sm:$0xff]   ;;  %v4048_v44 = vld [vmem:[%s4202_s11 + $0x3bc] ss:$36 sps:$4 sm:$0xff]  }
  0x79   : > { %v4046_v43 = vld [vmem:[%s4202_s11 + $0x138] ss:$36 sps:$4 sm:$0xff]  }
  0x7f   : > { %1871 = vmatmul.mubr.bf16.gmra.mrb[44].mxu0 %v3951_v45  ;;  %2000 = vmatmul.mubr.bf16.gmra.mrb[44].mxu1 %v3952_v46  ;;  %v4050_v45 = vld [vmem:[%s4202_s11 + $0x184] ss:$36 sps:$4 sm:$0xff]   ;;  %v4052_v46 = vld [vmem:[%s4202_s11 + $0x3b8] ss:$36 sps:$4 sm:$0xff]  }
  0x80   : > { %2007 = vmatprep.mubr.bf16.mxu1 %v3955_v49  ;;  %2104 = vmatprep.mubr.bf16.mxu0 %v3959_v50  ;;  %v4056_v49 = vld [vmem:[%s4202_s11 + $0x1cc] ss:$36 sps:$4 sm:$0xff]   ;;  %v4058_v50 = vld [vmem:[%s4202_s11 + $0x400] ss:$36 sps:$4 sm:$0xff]  }
  0x87   : > { %2008 = vmatmul.mubr.bf16.gmra.mrb[48].mxu1 %v3960_v52  ;;  %2105 = vmatmul.mubr.bf16.vlgmr.msra.gmra.mrb[48].mxu0 %v3957_v51  ;;  %v4059_v51 = vld [vmem:[%s4202_s11 + $0x1c8] ss:$36 sps:$4 sm:$0xff]  }
  0x88   : > { %3739 = vmatpush3.bf16.msra.mxu0 %v3963_v29  ;;  %2015 = vmatprep.mubr.bf16.mxu1 %v3964_v53  ;;  %v4024_v29 = vld [vmem:[%s4202_s11 + $0x64] ss:$36 sps:$4 sm:$0xff]   ;;  %v4061_v52 = vld [vmem:[%s4202_s11 + $0x44c] ss:$36 sps:$4 sm:$0xff]   ;;  %v4063_v53 = vld [vmem:[%s4202_s11 + $0x214] ss:$36 sps:$4 sm:$0xff]  }
  0x89   : > { %2112 = vmatprep.mubr.bf16.mxu0 %v3966_v54  ;;  %3740 = vmatprep.subr.bf16.mxu0 %v3978_v55 }
  0x8c   : > { %3741 = vmatpush3.bf16.msra.mxu0 %v3978_v55 }
  0x8d   : > { %3742 = vmatprep.subr.bf16.mxu0 %v3993_v56 }
  0x8f   : > { %2016 = vmatmul.mubr.bf16.gmra.mrb[52].mxu1 %v3968_v57  ;;  %2113 = vmatmul.mubr.bf16.gmra.mrb[52].mxu0 %v3969_v58  ;;  %v4065_v58 = vld [vmem:[%s4202_s11 + $0x448] ss:$36 sps:$4 sm:$0xff]  }
  0x90   : > { %2023 = vmatprep.mubr.bf16.mxu1 %v3970_v59  ;;  %2120 = vmatprep.mubr.bf16.mxu0 %v3972_v60  ;;  %v4066_v59 = vld [vmem:[%s4202_s11 + $0x210] ss:$36 sps:$4 sm:$0xff]  }
  0x91   : > { %3743 = vmatpush3.bf16.msra.mxu0 %v3993_v56 }
  0x92   : > { %3744 = vmatprep.subr.bf16.mxu0 %v4008_v61 }
  0x95   : > { %3745 = vmatpush3.bf16.msra.mxu0 %v4008_v61 }
  0x96   : > { %3746 = vmatprep.subr.bf16.mxu0 %v4021_v62 }
  0x97   : > { %2024 = vmatmul.mubr.bf16.gmra.mrb[56].mxu1 %v3974_v63  ;;  %2121 = vmatmul.mubr.bf16.gmra.mrb[56].mxu0 %v3975_v0  ;;  %v4067_v0 = vld [vmem:[%s4202_s11 + $0x25c] ss:$36 sps:$4 sm:$0xff]  }
  0x98   : > { %2031 = vmatprep.mubr.bf16.mxu1 %v3979_v1  ;;  %2128 = vmatprep.mubr.bf16.mxu0 %v3981_v2  ;;  %v4069_v1 = vld [vmem:[%s4202_s11 + $0x20] ss:$36 sps:$4 sm:$0xff]  }
  0x99   : > { %3747 = vmatpush3.bf16.msra.mxu0 %v4021_v62 }
  0x9a   : > { %3748 = vmatprep.subr.bf16.mxu0 %v4034_v3 }
  0x9d   : > { %3749 = vmatpush3.bf16.msra.mxu0 %v4034_v3 }
  0x9e   : > { %3750 = vmatprep.subr.bf16.mxu0 %v4047_v6 }
  0x9f   : > { %2032 = vmatmul.mubr.bf16.gmra.mrb[60].mxu1 %v3983_v4  ;;  %2129 = vmatmul.mubr.bf16.gmra.mrb[60].mxu0 %v3984_v5 }
  0xa0   : > { %2039 = vmatprep.mubr.bf16.mxu1 %v3985_v7  ;;  %2136 = vmatprep.mubr.bf16.mxu0 %v3987_v8 }
  0xa1   : > { %3751 = vmatpush3.bf16.msra.mxu0 %v4047_v6 }
  0xa2   : > { %3752 = vmatprep.subr.bf16.mxu0 %v4060_v9 }
  0xa5   : > { %3753 = vmatpush3.bf16.msra.mxu0 %v4060_v9 }
  0xa7   : > { %2040 = vmatmul.mubr.bf16.gmra.mrb[64].mxu1 %v3989_v10  ;;  %2137 = vmatmul.mubr.bf16.gmra.mrb[64].mxu0 %v3990_v11  ;;  %v4070_v10 = vld [vmem:[%s4202_s11 + $0x258] ss:$36 sps:$4 sm:$0xff]   ;;  %v4071_v11 = vld [vmem:[%s4202_s11 + $0x68] ss:$36 sps:$4 sm:$0xff]  }
  0xa8   : > { %2047 = vmatprep.mubr.bf16.mxu1 %v3994_v12  ;;  %2144 = vmatprep.mubr.bf16.mxu0 %v3996_v13 }
  0xaf   : > { %2048 = vmatmul.mubr.bf16.gmra.mrb[68].mxu1 %v3998_v14  ;;  %2145 = vmatmul.mubr.bf16.gmra.mrb[68].mxu0 %v3999_v15 }
  0xb0   : > { %2055 = vmatprep.mubr.bf16.mxu1 %v4000_v16  ;;  %2152 = vmatprep.mubr.bf16.mxu0 %v4002_v17  ;;  %v4072_v16 = vld [vmem:[%s4202_s11 + $0x2a4] ss:$36 sps:$4 sm:$0xff]   ;;  %v4074_v17 = vld [vmem:[%s4202_s11 + $0xb0] ss:$36 sps:$4 sm:$0xff]  }
  0xb7   : > { %2056 = vmatmul.mubr.bf16.gmra.mrb[72].mxu1 %v4004_v18  ;;  %2153 = vmatmul.mubr.bf16.gmra.mrb[72].mxu0 %v4005_v19 }
  0xb8   : > { %2063 = vmatprep.mubr.bf16.mxu1 %v4009_v20  ;;  %2160 = vmatprep.mubr.bf16.mxu0 %v4011_v21 }
  0xbf   : > { %2064 = vmatmul.mubr.bf16.gmra.mrb[76].mxu1 %v4013_v22  ;;  %2161 = vmatmul.mubr.bf16.gmra.mrb[76].mxu0 %v4014_v23 }
  0xc0   : > { %2168 = vmatprep.mubr.bf16.mxu0 %v4015_v24  ;;  %2265 = vmatprep.mubr.bf16.mxu1 %v4019_v25 }
  0xc7   : > { %2169 = vmatmul.mubr.bf16.gmra.mrb[80].mxu0 %v4020_v27  ;;  %2266 = vmatmul.mubr.bf16.vlgmr.msra.gmra.mrb[80].mxu1 %v4017_v26  ;;  %v4075_v26 = vld [vmem:[%s4202_s11 + $0x2a0] ss:$36 sps:$4 sm:$0xff]   ;;  %v4076_v27 = vld [vmem:[%s4202_s11 + $0xf8] ss:$36 sps:$4 sm:$0xff]  }
  0xc8   : > { %2176 = vmatprep.mubr.bf16.mxu0 %v4022_v28  ;;  %2273 = vmatprep.mubr.bf16.mxu1 %v4024_v29 }
  0xcf   : > { %2177 = vmatmul.mubr.bf16.gmra.mrb[84].mxu0 %v4026_v30  ;;  %2274 = vmatmul.mubr.bf16.gmra.mrb[84].mxu1 %v4027_v31 }
  0xd0   : > { %2184 = vmatprep.mubr.bf16.mxu0 %v4028_v32  ;;  %2281 = vmatprep.mubr.bf16.mxu1 %v4030_v33  ;;  %v4077_v32 = vld [vmem:[%s4202_s11 + $0x2ec] ss:$36 sps:$4 sm:$0xff]   ;;  %v4079_v33 = vld [vmem:[%s4202_s11 + $0x140] ss:$36 sps:$4 sm:$0xff]  }
  0xd7   : > { %2185 = vmatmul.mubr.bf16.gmra.mrb[88].mxu0 %v4032_v34  ;;  %2282 = vmatmul.mubr.bf16.gmra.mrb[88].mxu1 %v4033_v35 }
  0xd8   : > { %2192 = vmatprep.mubr.bf16.mxu0 %v4035_v36  ;;  %2289 = vmatprep.mubr.bf16.mxu1 %v4037_v37 }
  0xdf   : > { %2193 = vmatmul.mubr.bf16.gmra.mrb[92].mxu0 %v4039_v38  ;;  %2290 = vmatmul.mubr.bf16.gmra.mrb[92].mxu1 %v4040_v39 }
  0xe0   : > { %2200 = vmatprep.mubr.bf16.mxu0 %v4041_v40  ;;  %2297 = vmatprep.mubr.bf16.mxu1 %v4043_v41 }
  0xe7   : > { %2201 = vmatmul.mubr.bf16.gmra.mrb[96].mxu0 %v4045_v42  ;;  %2298 = vmatmul.mubr.bf16.gmra.mrb[96].mxu1 %v4046_v43  ;;  %v4080_v42 = vld [vmem:[%s4202_s11 + $0x2e8] ss:$36 sps:$4 sm:$0xff]  }
  0xe8   : > { %2208 = vmatprep.mubr.bf16.mxu0 %v4048_v44  ;;  %2305 = vmatprep.mubr.bf16.mxu1 %v4050_v45  ;;  %v4081_v43 = vld [vmem:[%s4202_s11 + $0x188] ss:$36 sps:$4 sm:$0xff]  }
  0xef   : > { %2209 = vmatmul.mubr.bf16.gmra.mrb[100].mxu0 %v4052_v46  ;;  %2306 = vmatmul.mubr.bf16.gmra.mrb[100].mxu1 %v4053_v47 }
  0xf0   : > { %2216 = vmatprep.mubr.bf16.mxu0 %v4054_v48  ;;  %2313 = vmatprep.mubr.bf16.mxu1 %v4056_v49  ;;  %v4082_v48 = vld [vmem:[%s4202_s11 + $0x334] ss:$36 sps:$4 sm:$0xff]  }
  0xf1   : > { %v4084_v49 = vld [vmem:[%s4202_s11 + $0x1d0] ss:$36 sps:$4 sm:$0xff]  }
  0xf7   : > { %2217 = vmatmul.mubr.bf16.gmra.mrb[104].mxu0 %v4058_v50  ;;  %2314 = vmatmul.mubr.bf16.gmra.mrb[104].mxu1 %v4059_v51 }
  0xf8   : > { %2224 = vmatprep.mubr.bf16.mxu0 %v4061_v52  ;;  %2321 = vmatprep.mubr.bf16.mxu1 %v4063_v53 }
  0xfa   : > { %v3354_v54 = vpop.f32.mrb[0].mxu1  ;;  %v3282_v55 = vpop.f32.mrb[0].mxu0 }
  0xfb   : > { %v3355_v56 = vpop.f32.mrb[1].mxu1  ;;  %v3283_v57 = vpop.f32.mrb[1].mxu0 }
  0xfc   : > { %v4505_v60 = vadd.f32 %v3355_v56, %v3354_v54  ;;  %v3357_v61 = vpop.f32.mrb[2].mxu1  ;;  %v4507_v62 = vadd.f32 %v3283_v57, %v3282_v55  ;;  %v3285_v63 = vpop.f32.mrb[2].mxu0  ;;  %v4554_v54 = vld [vmem:[%s4949_s2] ss:$0 sm:$0xff] }
  0xfd   : > { %v3358_v2 = vpop.f32.mrb[3].mxu1  ;;  %v3286_v3 = vpop.f32.mrb[3].mxu0 }
  0xfe   : > { %v4511_v4 = vadd.f32 %v3358_v2, %v3357_v61  ;;  %v4513_v5 = vadd.f32 %v3286_v3, %v3285_v63  ;;  %v4086_v61 = vld [vmem:[%s4202_s11 + $0x218] ss:$36 sps:$4 sm:$0xff]   ;;  %v1785_v63 = vadd.f32 %v4507_v62, %v4554_v54 }
  0xff   : > { %2225 = vmatmul.mubr.bf16.gmra.mrb[108].mxu0 %v4065_v58  ;;  %2322 = vmatmul.mubr.bf16.gmra.mrb[108].mxu1 %v4066_v59  ;;  %v4085_v59 = vld [vmem:[%s4202_s11 + $0x330] ss:$36 sps:$4 sm:$0xff]  }
 0x100   : > { %2329 = vmatprep.mubr.bf16.mxu1 %v4067_v0  ;;  %3754 = vmatprep.mubr.bf16.mxu0 %v4069_v1 }
 0x102   : > { %v3360_v6 = vpop.f32.mrb[4].mxu1  ;;  %v3288_v7 = vpop.f32.mrb[4].mxu0 }
 0x103   : > { %v3361_v8 = vpop.f32.mrb[5].mxu1  ;;  %v3289_v9 = vpop.f32.mrb[5].mxu0 }
 0x104   : > { %v4517_v12 = vadd.f32 %v3361_v8, %v3360_v6  ;;  %v3363_v13 = vpop.f32.mrb[6].mxu1  ;;  %v4519_v14 = vadd.f32 %v3289_v9, %v3288_v7  ;;  %v3291_v15 = vpop.f32.mrb[6].mxu0  ;;  %v4087_v6 = vld [vmem:[%s4202_s11 + $0x37c] ss:$36 sps:$4 sm:$0xff]  }
 0x105   : > { %v3364_v18 = vpop.f32.mrb[7].mxu1  ;;  %v3292_v19 = vpop.f32.mrb[7].mxu0  ;;  %v4089_v7 = vld [vmem:[%s4202_s11 + $0x260] ss:$36 sps:$4 sm:$0xff]  }
 0x106   : > { %v4523_v20 = vadd.f32 %v3364_v18, %v3363_v13  ;;  %v4525_v21 = vadd.f32 %v3292_v19, %v3291_v15 }
 0x107   : > { %2330 = vmatmul.mubr.bf16.gmra.mrb[112].mxu1 %v4070_v10  ;;  %3755 = vmatmul.mubr.bf16.vlgmr.msra.gmra.mrb[112].mxu0 %v4071_v11  ;;  %v1788_v10 = vadd.f32 %v4513_v5, %v4554_v54  ;;  %v1793_v5 = vadd.f32 %v4519_v14, %v4554_v54 }
 0x108   : > { %2337 = vmatprep.mubr.bf16.mxu1 %v4072_v16  ;;  %3758 = vmatprep.mubr.bf16.mxu0 %v4074_v17 }
 0x10a   : > { %v3366_v22 = vpop.f32.mrb[8].mxu1  ;;  %v3294_v23 = vpop.f32.mrb[8].mxu0 }
 0x10b   : > { %v3367_v24 = vpop.f32.mrb[9].mxu1  ;;  %v3295_v25 = vpop.f32.mrb[9].mxu0 }
 0x10c   : > { %v4529_v28 = vadd.f32 %v3367_v24, %v3366_v22  ;;  %v3369_v29 = vpop.f32.mrb[10].mxu1  ;;  %v4531_v30 = vadd.f32 %v3295_v25, %v3294_v23  ;;  %v3297_v31 = vpop.f32.mrb[10].mxu0  ;;  %v4090_v22 = vld [vmem:[%s4202_s11 + $0x378] ss:$36 sps:$4 sm:$0xff]   ;;  %v4091_v23 = vld [vmem:[%s4202_s11 + $0x2a8] ss:$36 sps:$4 sm:$0xff]  }
 0x10d   : > { %v3370_v34 = vpop.f32.mrb[11].mxu1  ;;  %v3298_v35 = vpop.f32.mrb[11].mxu0 }
 0x10e   : > { %v4535_v36 = vadd.f32 %v3370_v34, %v3369_v29  ;;  %v4537_v37 = vadd.f32 %v3298_v35, %v3297_v31  ;;  %v4092_v29 = vld [vmem:[%s4202_s11 + $0x3c4] ss:$36 sps:$4 sm:$0xff]   ;;  %v4094_v31 = vld [vmem:[%s4202_s11 + $0x2f0] ss:$36 sps:$4 sm:$0xff]   ;;  %v1796_v34 = vadd.f32 %v4525_v21, %v4554_v54  ;;  %v1801_v21 = vadd.f32 %v4531_v30, %v4554_v54 }
 0x10f   : > { %2338 = vmatmul.mubr.bf16.gmra.mrb[116].mxu1 %v4075_v26  ;;  %3759 = vmatmul.mubr.bf16.gmra.mrb[116].mxu0 %v4076_v27 }
 0x110   : > { %2345 = vmatprep.mubr.bf16.mxu1 %v4077_v32  ;;  %3762 = vmatprep.mubr.bf16.mxu0 %v4079_v33 }
 0x112   : > { %v3372_v38 = vpop.f32.mrb[12].mxu1  ;;  %v3300_v39 = vpop.f32.mrb[12].mxu0 }
 0x113   : > { %v3373_v40 = vpop.f32.mrb[13].mxu1  ;;  %v3301_v41 = vpop.f32.mrb[13].mxu0 }
 0x114   : > { %v4541_v44 = vadd.f32 %v3373_v40, %v3372_v38  ;;  %v3375_v45 = vpop.f32.mrb[14].mxu1  ;;  %v4543_v46 = vadd.f32 %v3301_v41, %v3300_v39  ;;  %v3303_v47 = vpop.f32.mrb[14].mxu0 }
 0x115   : > { %v3376_v50 = vpop.f32.mrb[15].mxu1  ;;  %v3304_v51 = vpop.f32.mrb[15].mxu0 }
 0x116   : > { %v4547_v52 = vadd.f32 %v3376_v50, %v3375_v45  ;;  %v4549_v53 = vadd.f32 %v3304_v51, %v3303_v47  ;;  %v4095_v45 = vld [vmem:[%s4202_s11 + $0x3c0] ss:$36 sps:$4 sm:$0xff]   ;;  %v4096_v47 = vld [vmem:[%s4202_s11 + $0x338] ss:$36 sps:$4 sm:$0xff]  }
 0x117   : > { %2346 = vmatmul.mubr.bf16.gmra.mrb[120].mxu1 %v4080_v42  ;;  %3763 = vmatmul.mubr.bf16.gmra.mrb[120].mxu0 %v4081_v43 }
 0x118   : > { %2353 = vmatprep.mubr.bf16.mxu1 %v4082_v48  ;;  %3766 = vmatprep.mubr.bf16.mxu0 %v4084_v49 }
 0x11a   : > { %v3394_v55 = vpop.f32.mrb[16].mxu1  ;;  %v3306_v56 = vpop.f32.mrb[16].mxu0 }
 0x11b   : > { %v3395_v57 = vpop.f32.mrb[17].mxu1  ;;  %v3307_v58 = vpop.f32.mrb[17].mxu0 }
 0x11c   : > { %v3396_v0 = vadd.f32 %v3395_v57, %v3394_v55  ;;  %v3397_v1 = vpop.f32.mrb[18].mxu1  ;;  %v4560_v2 = vadd.f32 %v3307_v58, %v3306_v56  ;;  %v3309_v3 = vpop.f32.mrb[18].mxu0  ;;  %v4097_v55 = vld [vmem:[%s4202_s11 + $0x40c] ss:$36 sps:$4 sm:$0xff]   ;;  %v4099_v56 = vld [vmem:[%s4202_s11 + $0x380] ss:$36 sps:$4 sm:$0xff]  }
 0x11d   : > { %v3398_v8 = vpop.f32.mrb[19].mxu1  ;;  %v3310_v9 = vpop.f32.mrb[19].mxu0 }
 0x11e   : > { %v4566_v11 = vadd.f32 %v3396_v0, %v1785_v63  ;;  %v3399_v13 = vadd.f32 %v3398_v8, %v3397_v1  ;;  %v4568_v15 = vadd.f32 %v3310_v9, %v3309_v3  ;;  %v4100_v8 = vld [vmem:[%s4202_s11 + $0x408] ss:$36 sps:$4 sm:$0xff]  }
 0x11f   : > { %2354 = vmatmul.mubr.bf16.gmra.mrb[124].mxu1 %v4085_v59  ;;  %3767 = vmatmul.mubr.bf16.gmra.mrb[124].mxu0 %v4086_v61  ;;  %v1804_v59 = vadd.f32 %v4537_v37, %v4554_v54  ;;  %v4101_v9 = vld [vmem:[%s4202_s11 + $0x3c8] ss:$36 sps:$4 sm:$0xff]   ;;  %v1809_v37 = vadd.f32 %v4543_v46, %v4554_v54 }
 0x120   : > { %v4570_v62 = vadd.f32 %v3399_v13, %v1788_v10  ;;  %2361 = vmatprep.mubr.bf16.mxu1 %v4087_v6  ;;  %3770 = vmatprep.mubr.bf16.mxu0 %v4089_v7 }
 0x122   : > { %v3400_v16 = vpop.f32.mrb[20].mxu1  ;;  %v3312_v17 = vpop.f32.mrb[20].mxu0 }
 0x123   : > { %v3401_v18 = vpop.f32.mrb[21].mxu1  ;;  %v3313_v19 = vpop.f32.mrb[21].mxu0 }
 0x124   : > { %v3402_v24 = vadd.f32 %v3401_v18, %v3400_v16  ;;  %v3403_v25 = vpop.f32.mrb[22].mxu1  ;;  %v4576_v26 = vadd.f32 %v3313_v19, %v3312_v17  ;;  %v3315_v27 = vpop.f32.mrb[22].mxu0  ;;  %v4102_v18 = vld [vmem:[%s4202_s11 + $0x454] ss:$36 sps:$4 sm:$0xff]  }
 0x125   : > { %v3404_v32 = vpop.f32.mrb[23].mxu1  ;;  %v3316_v33 = vpop.f32.mrb[23].mxu0  ;;  %v4104_v19 = vld [vmem:[%s4202_s11 + $0x410] ss:$36 sps:$4 sm:$0xff]  }
 0x126   : > { %v4582_v35 = vadd.f32 %v3402_v24, %v1793_v5  ;;  %v3405_v38 = vadd.f32 %v3404_v32, %v3403_v25  ;;  %v4584_v39 = vadd.f32 %v3316_v33, %v3315_v27  ;;  %v1812_v5 = vadd.f32 %v4549_v53, %v4554_v54 }
 0x127   : > { %2362 = vmatmul.mubr.bf16.gmra.mrb[128].mxu1 %v4090_v22  ;;  %3771 = vmatmul.mubr.bf16.gmra.mrb[128].mxu0 %v4091_v23  ;;  %v1817_v53 = vadd.f32 %v4560_v2, %v4554_v54 }
 0x128   : > { %v4586_v14 = vadd.f32 %v3405_v38, %v1796_v34  ;;  %2369 = vmatprep.mubr.bf16.mxu1 %v4092_v29  ;;  %3774 = vmatprep.mubr.bf16.mxu0 %v4094_v31  ;;  %v4105_v34 = vld [vmem:[%s4202_s11 + $0x450] ss:$36 sps:$4 sm:$0xff]   ;;  %v4106_v38 = vld [vmem:[%s4202_s11 + $0x458] ss:$36 sps:$4 sm:$0xff]   ;;  %s2887_s11 = sshll.u32 %s4956_s18, 2 }
 0x129   : > { %s4883_s9 = scalar_lea.vmem %s4950_s3, %s2887_s11 }
 0x12a   : > { %v3406_v40 = vpop.f32.mrb[24].mxu1  ;;  %v3318_v41 = vpop.f32.mrb[24].mxu0 }
 0x12b   : > { %v3407_v42 = vpop.f32.mrb[25].mxu1  ;;  %v3319_v43 = vpop.f32.mrb[25].mxu0 }
 0x12c   : > { %v3408_v48 = vadd.f32 %v3407_v42, %v3406_v40  ;;  %v3409_v49 = vpop.f32.mrb[26].mxu1  ;;  %v4592_v50 = vadd.f32 %v3319_v43, %v3318_v41  ;;  %v3321_v51 = vpop.f32.mrb[26].mxu0 }
 0x12d   : > { %v3410_v57 = vpop.f32.mrb[27].mxu1  ;;  %v3322_v58 = vpop.f32.mrb[27].mxu0 }
 0x12e   : > { %v4598_v61 = vadd.f32 %v3408_v48, %v1801_v21  ;;  %v3411_v63 = vadd.f32 %v3410_v57, %v3409_v49  ;;  %v4600_v0 = vadd.f32 %v3322_v58, %v3321_v51  ;;  %v1820_v21 = vadd.f32 %v4568_v15, %v4554_v54 }
 0x12f   : > { %2370 = vmatmul.mubr.bf16.gmra.mrb[132].mxu1 %v4095_v45  ;;  %3775 = vmatmul.mubr.bf16.gmra.mrb[132].mxu0 %v4096_v47 }
 0x130   : > { %v4602_v30 = vadd.f32 %v3411_v63, %v1804_v59  ;;  %2377 = vmatprep.mubr.bf16.mxu1 %v4097_v55  ;;  %3778 = vmatprep.mubr.bf16.mxu0 %v4099_v56  ;;  %v1825_v59 = vadd.f32 %v4576_v26, %v4554_v54 }
 0x132   : > { %v3412_v1 = vpop.f32.mrb[28].mxu1  ;;  %v3324_v3 = vpop.f32.mrb[28].mxu0 }
 0x133   : > { %v3413_v6 = vpop.f32.mrb[29].mxu1  ;;  %v3325_v7 = vpop.f32.mrb[29].mxu0 }
 0x134   : > { %v3414_v10 = vadd.f32 %v3413_v6, %v3412_v1  ;;  %v3415_v13 = vpop.f32.mrb[30].mxu1  ;;  %v4608_v16 = vadd.f32 %v3325_v7, %v3324_v3  ;;  %v3327_v17 = vpop.f32.mrb[30].mxu0 }
 0x135   : > { %v3416_v22 = vpop.f32.mrb[31].mxu1  ;;  %v3328_v23 = vpop.f32.mrb[31].mxu0 }
 0x136   : > { %v4614_v24 = vadd.f32 %v3414_v10, %v1809_v37  ;;  %v3417_v25 = vadd.f32 %v3416_v22, %v3415_v13  ;;  %v4616_v27 = vadd.f32 %v3328_v23, %v3327_v17  ;;  %v1833_v22 = vadd.f32 %v4592_v50, %v4554_v54 }
 0x137   : > { %2378 = vmatmul.mubr.bf16.gmra.mrb[136].mxu1 %v4100_v8  ;;  %3779 = vmatmul.mubr.bf16.gmra.mrb[136].mxu0 %v4101_v9  ;;  %v1828_v8 = vadd.f32 %v4584_v39, %v4554_v54 }
 0x138   : > { %v4618_v46 = vadd.f32 %v3417_v25, %v1812_v5  ;;  %2385 = vmatprep.mubr.bf16.mxu1 %v4102_v18  ;;  %3782 = vmatprep.mubr.bf16.mxu0 %v4104_v19 }
 0x13a   : > { %v3418_v29 = vpop.f32.mrb[32].mxu1  ;;  %v3330_v31 = vpop.f32.mrb[32].mxu0 }
 0x13b   : > { %v3419_v32 = vpop.f32.mrb[33].mxu1  ;;  %v3331_v33 = vpop.f32.mrb[33].mxu0 }
 0x13c   : > { %v3420_v40 = vadd.f32 %v3419_v32, %v3418_v29  ;;  %v3421_v41 = vpop.f32.mrb[34].mxu1  ;;  %v4624_v42 = vadd.f32 %v3331_v33, %v3330_v31  ;;  %v3333_v43 = vpop.f32.mrb[34].mxu0  ;;  %v1836_v32 = vadd.f32 %v4600_v0, %v4554_v54 }
 0x13d   : > { %v3422_v45 = vpop.f32.mrb[35].mxu1  ;;  %v3334_v47 = vpop.f32.mrb[35].mxu0 }
 0x13e   : > { %v4628_v48 = vadd.f32 %v3420_v40, %v1817_v53  ;;  %v3423_v49 = vadd.f32 %v3422_v45, %v3421_v41  ;;  %v3335_v51 = vadd.f32 %v3334_v47, %v3333_v43  ;;  %v1841_v45 = vadd.f32 %v4608_v16, %v4554_v54 }
 0x13f   : > { %2386 = vmatmul.mubr.bf16.gmra.mrb[140].mxu1 %v4105_v34  ;;  %3783 = vmatmul.mubr.bf16.gmra.mrb[140].mxu0 %v4106_v38 }
 0x140   : > { %v4630_v55 = vadd.f32 %v3423_v49, %v1820_v21 }
 0x142   : > { %v3424_v56 = vpop.f32.mrb[36].mxu1  ;;  %v3336_v2 = vpop.f32.mrb[36].mxu0 }
 0x143   : > { %v3425_v57 = vpop.f32.mrb[37].mxu1  ;;  %v3337_v58 = vpop.f32.mrb[37].mxu0 }
 0x144   : > { %v3426_v63 = vadd.f32 %v3425_v57, %v3424_v56  ;;  %v3427_v1 = vpop.f32.mrb[38].mxu1  ;;  %v4634_v3 = vadd.f32 %v3337_v58, %v3336_v2  ;;  %v3339_v15 = vpop.f32.mrb[38].mxu0  ;;  %v1844_v57 = vadd.f32 %v4616_v27, %v4554_v54  ;;  %v1852_v27 = vadd.f32 %v3335_v51, %v4554_v54 }
 0x145   : > { %v3428_v6 = vpop.f32.mrb[39].mxu1  ;;  %v3340_v7 = vpop.f32.mrb[39].mxu0 }
 0x146   : > { %v4638_v9 = vadd.f32 %v3426_v63, %v1825_v59  ;;  %v3429_v37 = vadd.f32 %v3428_v6, %v3427_v1  ;;  %v3341_v10 = vadd.f32 %v3340_v7, %v3339_v15  ;;  %v1857_v51 = vadd.f32 %v4634_v3, %v4554_v54 }
 0x148   : > { %v4640_v13 = vadd.f32 %v3429_v37, %v1828_v8  ;;  %v1849_v8 = vadd.f32 %v4624_v42, %v4554_v54 }
 0x14a   : > { %v3430_v17 = vpop.f32.mrb[40].mxu1  ;;  %v3342_v18 = vpop.f32.mrb[40].mxu0 }
 0x14b   : > { %v3431_v19 = vpop.f32.mrb[41].mxu1  ;;  %v3343_v26 = vpop.f32.mrb[41].mxu0 }
 0x14c   : > { %v3432_v23 = vadd.f32 %v3431_v19, %v3430_v17  ;;  %v3433_v5 = vpop.f32.mrb[42].mxu1  ;;  %v4644_v25 = vadd.f32 %v3343_v26, %v3342_v18  ;;  %v3345_v29 = vpop.f32.mrb[42].mxu0 }
 0x14d   : > { %v3434_v31 = vpop.f32.mrb[43].mxu1  ;;  %v3346_v39 = vpop.f32.mrb[43].mxu0 }
 0x14e   : > { %v4648_v33 = vadd.f32 %v3432_v23, %v1833_v22  ;;  %v3435_v34 = vadd.f32 %v3434_v31, %v3433_v5  ;;  %v4650_v38 = vadd.f32 %v3346_v39, %v3345_v29 }
 0x150   : > { %v4652_v53 = vadd.f32 %v3435_v34, %v1836_v32 }
 0x152   : > { %v3436_v40 = vpop.f32.mrb[44].mxu1  ;;  %v3348_v41 = vpop.f32.mrb[44].mxu0 }
 0x153   : > { %v3437_v50 = vpop.f32.mrb[45].mxu1  ;;  %v3349_v43 = vpop.f32.mrb[45].mxu0 }
 0x154   : > { %v3438_v47 = vadd.f32 %v3437_v50, %v3436_v40  ;;  %v3439_v21 = vpop.f32.mrb[46].mxu1  ;;  %v4656_v49 = vadd.f32 %v3349_v43, %v3348_v41  ;;  %v3351_v56 = vpop.f32.mrb[46].mxu0 }
 0x155   : > { %v3440_v0 = vpop.f32.mrb[47].mxu1  ;;  %v3352_v2 = vpop.f32.mrb[47].mxu0 }
 0x156   : > { %v4660_v58 = vadd.f32 %v3438_v47, %v1841_v45  ;;  %v3441_v59 = vadd.f32 %v3440_v0, %v3439_v21  ;;  %v4662_v63 = vadd.f32 %v3352_v2, %v3351_v56 }
 0x158   : > { %v4664_v1 = vadd.f32 %v3441_v59, %v1844_v57 }
 0x15a   : > { %v3442_v15 = vpop.f32.mrb[48].mxu1  ;;  %v3506_v6 = vpop.f32.mrb[48].mxu0 }
 0x15b   : > { %v3443_v16 = vpop.f32.mrb[49].mxu1  ;;  %v3507_v7 = vpop.f32.mrb[49].mxu0 }
 0x15c   : > { %v3444_v37 = vadd.f32 %v3443_v16, %v3442_v15  ;;  %v3508_v17 = vadd.f32 %v3507_v7, %v3506_v6  ;;  %v3445_v18 = vpop.f32.mrb[50].mxu1  ;;  %v3509_v19 = vpop.f32.mrb[50].mxu0 }
 0x15d   : > { %v3446_v26 = vpop.f32.mrb[51].mxu1  ;;  %v3510_v22 = vpop.f32.mrb[51].mxu0 }
 0x15e   : > { %v4669_v23 = vadd.f32 %v3444_v37, %v1849_v8  ;;  %v4672_v5 = vadd.f32 %v3508_v17, %v4566_v11  ;;  %v3447_v29 = vadd.f32 %v3446_v26, %v3445_v18  ;;  %v3511_v31 = vadd.f32 %v3510_v22, %v3509_v19 }
 0x15f   : > { %v1860_v11 = vadd.f32 %v3341_v10, %v4554_v54  ;;  %v1865_v10 = vadd.f32 %v4644_v25, %v4554_v54 }
 0x160   : > { %v4674_v39 = vadd.f32 %v3447_v29, %v1852_v27  ;;  %v4677_v32 = vadd.f32 %v3511_v31, %v4570_v62 }
 0x162   : > { %v3448_v42 = vpop.f32.mrb[52].mxu1  ;;  %v3512_v34 = vpop.f32.mrb[52].mxu0 }
 0x163   : > { %v3449_v40 = vpop.f32.mrb[53].mxu1  ;;  %v3513_v41 = vpop.f32.mrb[53].mxu0 }
 0x164   : > { %v3450_v50 = vadd.f32 %v3449_v40, %v3448_v42  ;;  %v3514_v43 = vadd.f32 %v3513_v41, %v3512_v34  ;;  %v3451_v45 = vpop.f32.mrb[54].mxu1  ;;  %v3515_v47 = vpop.f32.mrb[54].mxu0 }
 0x165   : > { %v3452_v21 = vpop.f32.mrb[55].mxu1  ;;  %v3516_v56 = vpop.f32.mrb[55].mxu0 }
 0x166   : > { %v4682_v0 = vadd.f32 %v3450_v50, %v1857_v51  ;;  %v4685_v62 = vadd.f32 %v3514_v43, %v4582_v35  ;;  %v3453_v2 = vadd.f32 %v3452_v21, %v3451_v45  ;;  %v3517_v57 = vadd.f32 %v3516_v56, %v3515_v47 }
 0x167   : > { %v1868_v35 = vadd.f32 %v4650_v38, %v4554_v54  ;;  %v1873_v38 = vadd.f32 %v4656_v49, %v4554_v54 }
 0x168   : > { %v4687_v59 = vadd.f32 %v3453_v2, %v1860_v11  ;;  %v4690_v15 = vadd.f32 %v3517_v57, %v4586_v14 }
 0x16a   : > { %v3454_v3 = vpop.f32.mrb[56].mxu1  ;;  %v3518_v6 = vpop.f32.mrb[56].mxu0 }
 0x16b   : > { %v3455_v16 = vpop.f32.mrb[57].mxu1  ;;  %v3519_v7 = vpop.f32.mrb[57].mxu0 }
 0x16c   : > { %v3456_v8 = vadd.f32 %v3455_v16, %v3454_v3  ;;  %v3520_v37 = vadd.f32 %v3519_v7, %v3518_v6  ;;  %v3457_v17 = vpop.f32.mrb[58].mxu1  ;;  %v3521_v18 = vpop.f32.mrb[58].mxu0 }
 0x16d   : > { %v3458_v19 = vpop.f32.mrb[59].mxu1  ;;  %v3522_v27 = vpop.f32.mrb[59].mxu0 }
 0x16e   : > { %v4696_v26 = vadd.f32 %v3456_v8, %v1865_v10  ;;  %v4699_v14 = vadd.f32 %v3520_v37, %v4598_v61  ;;  %v3459_v22 = vadd.f32 %v3458_v19, %v3457_v17  ;;  %v3523_v29 = vadd.f32 %v3522_v27, %v3521_v18 }
 0x16f   : > { %v1876_v61 = vadd.f32 %v4662_v63, %v4554_v54  ;;  %v1881_v63 = vadd.f32 %v4505_v60, %v4554_v54 }
 0x170   : > { %v4701_v31 = vadd.f32 %v3459_v22, %v1868_v35  ;;  %v4704_v25 = vadd.f32 %v3523_v29, %v4602_v30 }
 0x172   : > { %v3460_v42 = vpop.f32.mrb[60].mxu1  ;;  %v3524_v34 = vpop.f32.mrb[60].mxu0 }
 0x173   : > { %v3461_v40 = vpop.f32.mrb[61].mxu1  ;;  %v3525_v41 = vpop.f32.mrb[61].mxu0 }
 0x174   : > { %v3462_v51 = vadd.f32 %v3461_v40, %v3460_v42  ;;  %v3526_v50 = vadd.f32 %v3525_v41, %v3524_v34  ;;  %v3463_v43 = vpop.f32.mrb[62].mxu1  ;;  %v3527_v45 = vpop.f32.mrb[62].mxu0 }
 0x175   : > { %v3464_v47 = vpop.f32.mrb[63].mxu1  ;;  %v3528_v11 = vpop.f32.mrb[63].mxu0 }
 0x176   : > { %v4710_v21 = vadd.f32 %v3462_v51, %v1873_v38  ;;  %v4713_v30 = vadd.f32 %v3526_v50, %v4614_v24  ;;  %v3465_v56 = vadd.f32 %v3464_v47, %v3463_v43  ;;  %v3529_v2 = vadd.f32 %v3528_v11, %v3527_v45 }
 0x177   : > { %v1884_v24 = vadd.f32 %v4511_v4, %v4554_v54  ;;  %v1889_v4 = vadd.f32 %v4517_v12, %v4554_v54 }
 0x178   : > { %v4715_v57 = vadd.f32 %v3465_v56, %v1876_v61  ;;  %v4718_v49 = vadd.f32 %v3529_v2, %v4618_v46 }
 0x17a   : > { %v3466_v3 = vpop.f32.mrb[64].mxu1  ;;  %v3530_v6 = vpop.f32.mrb[64].mxu0 }
 0x17b   : > { %v3467_v16 = vpop.f32.mrb[65].mxu1  ;;  %v3531_v7 = vpop.f32.mrb[65].mxu0 }
 0x17c   : > { %v3468_v10 = vadd.f32 %v3467_v16, %v3466_v3  ;;  %v3532_v8 = vadd.f32 %v3531_v7, %v3530_v6  ;;  %v3469_v37 = vpop.f32.mrb[66].mxu1  ;;  %v3533_v17 = vpop.f32.mrb[66].mxu0 }
 0x17d   : > { %v3470_v18 = vpop.f32.mrb[67].mxu1  ;;  %v3534_v35 = vpop.f32.mrb[67].mxu0 }
 0x17e   : > { %v4724_v19 = vadd.f32 %v3468_v10, %v1881_v63  ;;  %v4727_v46 = vadd.f32 %v3532_v8, %v4628_v48  ;;  %v3471_v27 = vadd.f32 %v3470_v18, %v3469_v37  ;;  %v3535_v22 = vadd.f32 %v3534_v35, %v3533_v17 }
 0x17f   : > { %v1892_v48 = vadd.f32 %v4523_v20, %v4554_v54  ;;  %v1897_v20 = vadd.f32 %v4529_v28, %v4554_v54 }
 0x180   : > { %v4729_v29 = vadd.f32 %v3471_v27, %v1884_v24  ;;  %v4732_v60 = vadd.f32 %v3535_v22, %v4630_v55 }
 0x182   : > { %v3472_v42 = vpop.f32.mrb[68].mxu1  ;;  %v3536_v34 = vpop.f32.mrb[68].mxu0 }
 0x183   : > { %v3473_v40 = vpop.f32.mrb[69].mxu1  ;;  %v3537_v41 = vpop.f32.mrb[69].mxu0 }
 0x184   : > { %v3474_v38 = vadd.f32 %v3473_v40, %v3472_v42  ;;  %v3538_v51 = vadd.f32 %v3537_v41, %v3536_v34  ;;  %v3475_v50 = vpop.f32.mrb[70].mxu1  ;;  %v3539_v43 = vpop.f32.mrb[70].mxu0 }
 0x185   : > { %v3476_v45 = vpop.f32.mrb[71].mxu1  ;;  %v3540_v61 = vpop.f32.mrb[71].mxu0 }
 0x186   : > { %v4738_v47 = vadd.f32 %v3474_v38, %v1889_v4  ;;  %v4741_v55 = vadd.f32 %v3538_v51, %v4638_v9  ;;  %v3477_v11 = vadd.f32 %v3476_v45, %v3475_v50  ;;  %v3541_v56 = vadd.f32 %v3540_v61, %v3539_v43 }
 0x187   : > { %v1900_v9 = vadd.f32 %v4535_v36, %v4554_v54  ;;  %v1905_v36 = vadd.f32 %v4541_v44, %v4554_v54 }
 0x188   : > { %v4743_v2 = vadd.f32 %v3477_v11, %v1892_v48  ;;  %v4746_v12 = vadd.f32 %v3541_v56, %v4640_v13 }
 0x18a   : > { %v3478_v3 = vpop.f32.mrb[72].mxu1  ;;  %v3542_v6 = vpop.f32.mrb[72].mxu0 }
 0x18b   : > { %v3479_v16 = vpop.f32.mrb[73].mxu1  ;;  %v3543_v7 = vpop.f32.mrb[73].mxu0 }
 0x18c   : > { %v3480_v63 = vadd.f32 %v3479_v16, %v3478_v3  ;;  %v3544_v10 = vadd.f32 %v3543_v7, %v3542_v6  ;;  %v3481_v8 = vpop.f32.mrb[74].mxu1  ;;  %v3545_v37 = vpop.f32.mrb[74].mxu0 }
 0x18d   : > { %v3482_v17 = vpop.f32.mrb[75].mxu1  ;;  %v3546_v24 = vpop.f32.mrb[75].mxu0 }
 0x18e   : > { %v4752_v18 = vadd.f32 %v3480_v63, %v1897_v20  ;;  %v4755_v13 = vadd.f32 %v3544_v10, %v4648_v33  ;;  %v3483_v35 = vadd.f32 %v3482_v17, %v3481_v8  ;;  %v3547_v27 = vadd.f32 %v3546_v24, %v3545_v37 }
 0x18f   : > { %v1908_v33 = vadd.f32 %v4547_v52, %v4554_v54 }
 0x190   : > { %v4757_v22 = vadd.f32 %v3483_v35, %v1900_v9  ;;  %v4760_v28 = vadd.f32 %v3547_v27, %v4652_v53 }
 0x192   : > { %v3484_v42 = vpop.f32.mrb[76].mxu1  ;;  %v3548_v34 = vpop.f32.mrb[76].mxu0 }
 0x193   : > { %v3485_v40 = vpop.f32.mrb[77].mxu1  ;;  %v3549_v41 = vpop.f32.mrb[77].mxu0 }
 0x194   : > { %v3486_v4 = vadd.f32 %v3485_v40, %v3484_v42  ;;  %v3550_v38 = vadd.f32 %v3549_v41, %v3548_v34  ;;  %v3487_v51 = vpop.f32.mrb[78].mxu1  ;;  %v3551_v50 = vpop.f32.mrb[78].mxu0 }
 0x195   : > { %v3488_v43 = vpop.f32.mrb[79].mxu1  ;;  %v3552_v48 = vpop.f32.mrb[79].mxu0 }
 0x196   : > { %v4766_v45 = vadd.f32 %v3486_v4, %v1905_v36  ;;  %v4769_v53 = vadd.f32 %v3550_v38, %v4660_v58  ;;  %v3489_v61 = vadd.f32 %v3488_v43, %v3487_v51  ;;  %v3553_v11 = vadd.f32 %v3552_v48, %v3551_v50 }
 0x198   : > { %v4771_v56 = vadd.f32 %v3489_v61, %v1908_v33  ;;  %v4774_v44 = vadd.f32 %v3553_v11, %v4664_v1 }
 0x19a   : > { %v3554_v3 = vpop.f32.mrb[80].mxu0  ;;  %v3618_v6 = vpop.f32.mrb[80].mxu1 }
 0x19b   : > { %v3555_v16 = vpop.f32.mrb[81].mxu0  ;;  %v3619_v7 = vpop.f32.mrb[81].mxu1 }
 0x19c   : > { %v3556_v20 = vadd.f32 %v3555_v16, %v3554_v3  ;;  %v3620_v52 = vadd.f32 %v3619_v7, %v3618_v6  ;;  %v3557_v54 = vpop.f32.mrb[82].mxu0  ;;  %v3621_v63 = vpop.f32.mrb[82].mxu1 }
 0x19d   : > { %v3558_v10 = vpop.f32.mrb[83].mxu0  ;;  %v3622_v8 = vpop.f32.mrb[83].mxu1 }
 0x19e   : > { %v4777_v58 = vadd.f32 %v3556_v20, %v4669_v23  ;;  %v3559_v37 = vadd.f32 %v3558_v10, %v3557_v54  ;;  %v3623_v9 = vadd.f32 %v3622_v8, %v3621_v63  ;;  %v4780_v17 = vadd.f32 %v3620_v52, %v4672_v5 }
 0x1a0   : > { %v4783_v1 = vadd.f32 %v3559_v37, %v4674_v39  ;;  %v4786_v24 = vadd.f32 %v3623_v9, %v4677_v32 }
 0x1a2   : > { %v3560_v35 = vpop.f32.mrb[84].mxu0  ;;  %v3624_v27 = vpop.f32.mrb[84].mxu1 }
 0x1a3   : > { %v3561_v42 = vpop.f32.mrb[85].mxu0  ;;  %v3625_v34 = vpop.f32.mrb[85].mxu1 }
 0x1a4   : > { %v3562_v40 = vadd.f32 %v3561_v42, %v3560_v35  ;;  %v3626_v41 = vadd.f32 %v3625_v34, %v3624_v27  ;;  %v3563_v36 = vpop.f32.mrb[86].mxu0  ;;  %v3627_v23 = vpop.f32.mrb[86].mxu1 }
 0x1a5   : > { %v3564_v4 = vpop.f32.mrb[87].mxu0  ;;  %v3628_v38 = vpop.f32.mrb[87].mxu1 }
 0x1a6   : > { %v4789_v51 = vadd.f32 %v3562_v40, %v4682_v0  ;;  %v3565_v5 = vadd.f32 %v3564_v4, %v3563_v36  ;;  %v3629_v50 = vadd.f32 %v3628_v38, %v3627_v23  ;;  %v4792_v39 = vadd.f32 %v3626_v41, %v4685_v62 }
 0x1a8   : > { %v4795_v32 = vadd.f32 %v3565_v5, %v4687_v59  ;;  %v4798_v33 = vadd.f32 %v3629_v50, %v4690_v15 }
 0x1aa   : > { %v3566_v43 = vpop.f32.mrb[88].mxu0  ;;  %v3630_v48 = vpop.f32.mrb[88].mxu1 }
 0x1ab   : > { %v3567_v61 = vpop.f32.mrb[89].mxu0  ;;  %v3631_v11 = vpop.f32.mrb[89].mxu1 }
 0x1ac   : > { %v3568_v3 = vadd.f32 %v3567_v61, %v3566_v43  ;;  %v3632_v6 = vadd.f32 %v3631_v11, %v3630_v48  ;;  %v3569_v16 = vpop.f32.mrb[90].mxu0  ;;  %v3633_v0 = vpop.f32.mrb[90].mxu1 }
 0x1ad   : > { %v3570_v7 = vpop.f32.mrb[91].mxu0  ;;  %v3634_v20 = vpop.f32.mrb[91].mxu1 }
 0x1ae   : > { %v4801_v52 = vadd.f32 %v3568_v3, %v4696_v26  ;;  %v3571_v62 = vadd.f32 %v3570_v7, %v3569_v16  ;;  %v3635_v54 = vadd.f32 %v3634_v20, %v3633_v0  ;;  %v4804_v59 = vadd.f32 %v3632_v6, %v4699_v14 }
 0x1b0   : > { %v4807_v15 = vadd.f32 %v3571_v62, %v4701_v31  ;;  %v4810_v63 = vadd.f32 %v3635_v54, %v4704_v25 }
 0x1b2   : > { %v3572_v10 = vpop.f32.mrb[92].mxu0  ;;  %v3636_v8 = vpop.f32.mrb[92].mxu1 }
 0x1b3   : > { %v3573_v37 = vpop.f32.mrb[93].mxu0  ;;  %v3637_v9 = vpop.f32.mrb[93].mxu1 }
 0x1b4   : > { %v3574_v35 = vadd.f32 %v3573_v37, %v3572_v10  ;;  %v3638_v27 = vadd.f32 %v3637_v9, %v3636_v8  ;;  %v3575_v42 = vpop.f32.mrb[94].mxu0  ;;  %v3639_v26 = vpop.f32.mrb[94].mxu1 }
 0x1b5   : > { %v3576_v34 = vpop.f32.mrb[95].mxu0  ;;  %v3640_v40 = vpop.f32.mrb[95].mxu1 }
 0x1b6   : > { %v4813_v41 = vadd.f32 %v3574_v35, %v4710_v21  ;;  %v3577_v14 = vadd.f32 %v3576_v34, %v3575_v42  ;;  %v3641_v36 = vadd.f32 %v3640_v40, %v3639_v26  ;;  %v4816_v31 = vadd.f32 %v3638_v27, %v4713_v30 }
 0x1b8   : > { %v4819_v25 = vadd.f32 %v3577_v14, %v4715_v57  ;;  %v4822_v23 = vadd.f32 %v3641_v36, %v4718_v49 }
 0x1ba   : > { %v3578_v4 = vpop.f32.mrb[96].mxu0  ;;  %v3642_v38 = vpop.f32.mrb[96].mxu1 }
 0x1bb   : > { %v3579_v5 = vpop.f32.mrb[97].mxu0  ;;  %v3643_v50 = vpop.f32.mrb[97].mxu1 }
 0x1bc   : > { %v3580_v43 = vadd.f32 %v3579_v5, %v3578_v4  ;;  %v3644_v48 = vadd.f32 %v3643_v50, %v3642_v38  ;;  %v3581_v61 = vpop.f32.mrb[98].mxu0  ;;  %v3645_v21 = vpop.f32.mrb[98].mxu1 }
 0x1bd   : > { %v3582_v11 = vpop.f32.mrb[99].mxu0  ;;  %v3646_v3 = vpop.f32.mrb[99].mxu1 }
 0x1be   : > { %v4825_v6 = vadd.f32 %v3580_v43, %v4724_v19  ;;  %v3583_v30 = vadd.f32 %v3582_v11, %v3581_v61  ;;  %v3647_v16 = vadd.f32 %v3646_v3, %v3645_v21  ;;  %v4828_v57 = vadd.f32 %v3644_v48, %v4727_v46 }
 0x1c0   : > { %v4831_v49 = vadd.f32 %v3583_v30, %v4729_v29  ;;  %v4834_v0 = vadd.f32 %v3647_v16, %v4732_v60 }
 0x1c2   : > { %v3584_v7 = vpop.f32.mrb[100].mxu0  ;;  %v3648_v20 = vpop.f32.mrb[100].mxu1 }
 0x1c3   : > { %v3585_v62 = vpop.f32.mrb[101].mxu0  ;;  %v3649_v54 = vpop.f32.mrb[101].mxu1 }
 0x1c4   : > { %v3586_v10 = vadd.f32 %v3585_v62, %v3584_v7  ;;  %v3650_v8 = vadd.f32 %v3649_v54, %v3648_v20  ;;  %v3587_v37 = vpop.f32.mrb[102].mxu0  ;;  %v3651_v19 = vpop.f32.mrb[102].mxu1 }
 0x1c5   : > { %v3588_v9 = vpop.f32.mrb[103].mxu0  ;;  %v3652_v35 = vpop.f32.mrb[103].mxu1 }
 0x1c6   : > { %v4837_v27 = vadd.f32 %v3586_v10, %v4738_v47  ;;  %v3589_v46 = vadd.f32 %v3588_v9, %v3587_v37  ;;  %v3653_v42 = vadd.f32 %v3652_v35, %v3651_v19  ;;  %v4840_v29 = vadd.f32 %v3650_v8, %v4741_v55 }
 0x1c8   : > { %v4843_v60 = vadd.f32 %v3589_v46, %v4743_v2  ;;  %v4846_v26 = vadd.f32 %v3653_v42, %v4746_v12 }
 0x1ca   : > { %v3590_v34 = vpop.f32.mrb[104].mxu0  ;;  %v3654_v40 = vpop.f32.mrb[104].mxu1 }
 0x1cb   : > { %v3591_v14 = vpop.f32.mrb[105].mxu0  ;;  %v3655_v36 = vpop.f32.mrb[105].mxu1 }
 0x1cc   : > { %v3592_v4 = vadd.f32 %v3591_v14, %v3590_v34  ;;  %v3656_v38 = vadd.f32 %v3655_v36, %v3654_v40  ;;  %v3593_v5 = vpop.f32.mrb[106].mxu0  ;;  %v3657_v47 = vpop.f32.mrb[106].mxu1 }
 0x1cd   : > { %v3594_v50 = vpop.f32.mrb[107].mxu0  ;;  %v3658_v43 = vpop.f32.mrb[107].mxu1 }
 0x1ce   : > { %v4849_v48 = vadd.f32 %v3592_v4, %v4752_v18  ;;  %v3595_v55 = vadd.f32 %v3594_v50, %v3593_v5  ;;  %v3659_v61 = vadd.f32 %v3658_v43, %v3657_v47  ;;  %v4852_v2 = vadd.f32 %v3656_v38, %v4755_v13 }
 0x1d0   : > { %v4855_v12 = vadd.f32 %v3595_v55, %v4757_v22  ;;  %v4858_v21 = vadd.f32 %v3659_v61, %v4760_v28 }
 0x1d2   : > { %v3596_v11 = vpop.f32.mrb[108].mxu0  ;;  %v3660_v3 = vpop.f32.mrb[108].mxu1 }
 0x1d3   : > { %v3597_v30 = vpop.f32.mrb[109].mxu0  ;;  %v3661_v16 = vpop.f32.mrb[109].mxu1 }
 0x1d4   : > { %v3598_v7 = vadd.f32 %v3597_v30, %v3596_v11  ;;  %v3662_v20 = vadd.f32 %v3661_v16, %v3660_v3  ;;  %v3599_v62 = vpop.f32.mrb[110].mxu0  ;;  %v3663_v18 = vpop.f32.mrb[110].mxu1 }
 0x1d5   : > { %v3600_v54 = vpop.f32.mrb[111].mxu0  ;;  %v3664_v10 = vpop.f32.mrb[111].mxu1 }
 0x1d6   : > { %v4861_v13 = vadd.f32 %v3598_v7, %v4766_v45  ;;  %v3601_v8 = vadd.f32 %v3600_v54, %v3599_v62  ;;  %v3665_v22 = vadd.f32 %v3664_v10, %v3663_v18  ;;  %v4864_v37 = vadd.f32 %v3662_v20, %v4769_v53 }
 0x1d8   : > { %v4867_v28 = vadd.f32 %v3601_v8, %v4771_v56  ;;  %v4870_v19 = vadd.f32 %v3665_v22, %v4774_v44 }
 0x1da   : > { %v3666_v9 = vpop.f32.mrb[112].mxu1  ;;  %v3756_v35 = vpop.f32.mrb[112].mxu0 }
 0x1db   : > { %v2437_v46 = vadd.f32 %v3756_v35, %v4792_v39  ;;  %v3667_v42 = vpop.f32.mrb[113].mxu1  ;;  %v2428_v34 = vpop.f32.mrb[113].mxu0 }
 0x1dc   : > { %v3668_v40 = vadd.f32 %v3667_v42, %v3666_v9  ;;  %v2429_v45 = vadd.f32 %v2428_v34, %v4780_v17  ;;  %v3669_v14 = vpop.f32.mrb[114].mxu1  ;;  %v3757_v36 = vpop.f32.mrb[114].mxu0 }
 0x1dd   : > { %v2440_v53 = vadd.f32 %v3757_v36, %v4798_v33  ;;  %v3670_v4 = vpop.f32.mrb[115].mxu1  ;;  %v2431_v56 = vpop.f32.mrb[115].mxu0  ;;  %v2557_v47 = vmax.f32 %v2437_v46, 0.0 }
 0x1de   : > { %v3671_v38 = vadd.f32 %v3670_v4, %v3669_v14  ;;  %v2432_v44 = vadd.f32 %v2431_v56, %v4786_v24  ;;  %v4878_v5 = vadd.f32 %v3668_v40, %v4777_v58  ;;  %v2555_v50 = vmax.f32 %v2429_v45, 0.0 }
 0x1df   : > { %v2558_v39 = vmax.f32 %v2440_v53, 0.0 }
 0x1e0   : > { %v2556_v17 = vmax.f32 %v2432_v44, 0.0  ;;  %v4886_v33 = vadd.f32 %v3671_v38, %v4783_v1 }
 0x1e1   : > { %v3179_v43 = vpack.c.bf16 %v2558_v39, %v2557_v47 }
 0x1e2   : > { %v3174_v55 = vpack.c.bf16 %v2556_v17, %v2555_v50  ;;  %v3672_v24 = vpop.f32.mrb[116].mxu1  ;;  %v3760_v61 = vpop.f32.mrb[116].mxu0 }
 0x1e3   : > { %3251 = vst [vmem:[%s4883_s9 + $0x8] sm:$0xff] %v3179_v43   ;;  %v2453_v58 = vadd.f32 %v3760_v61, %v4816_v31  ;;  %v3673_v11 = vpop.f32.mrb[117].mxu1  ;;  %v2444_v3 = vpop.f32.mrb[117].mxu0 }
 0x1e4   : > { %3175 = vst [vmem:[%s4883_s9] sm:$0xff] %v3174_v55   ;;  %v3674_v30 = vadd.f32 %v3673_v11, %v3672_v24  ;;  %v2445_v16 = vadd.f32 %v2444_v3, %v4804_v59  ;;  %v3675_v7 = vpop.f32.mrb[118].mxu1  ;;  %v3761_v20 = vpop.f32.mrb[118].mxu0 }
 0x1e5   : > { %v2456_v62 = vadd.f32 %v3761_v20, %v4822_v23  ;;  %v3676_v1 = vpop.f32.mrb[119].mxu1  ;;  %v2447_v18 = vpop.f32.mrb[119].mxu0  ;;  %v2561_v31 = vmax.f32 %v2453_v58, 0.0 }
 0x1e6   : > { %v3677_v54 = vadd.f32 %v3676_v1, %v3675_v7  ;;  %v2448_v10 = vadd.f32 %v2447_v18, %v4810_v63  ;;  %v2340_v8 = vadd.f32 %v3674_v30, %v4789_v51  ;;  %v2559_v9 = vmax.f32 %v2445_v16, 0.0 }
 0x1e7   : > { %v2562_v22 = vmax.f32 %v2456_v62, 0.0 }
 0x1e8   : > { %v2560_v35 = vmax.f32 %v2448_v10, 0.0  ;;  %v2343_v46 = vadd.f32 %v3677_v54, %v4795_v32 }
 0x1e9   : > { %v3189_v59 = vpack.c.bf16 %v2562_v22, %v2561_v31 }
 0x1ea   : > { %v3184_v42 = vpack.c.bf16 %v2560_v35, %v2559_v9  ;;  %v3678_v34 = vpop.f32.mrb[120].mxu1  ;;  %v3764_v40 = vpop.f32.mrb[120].mxu0 }
 0x1eb   : > { %3253 = vst [vmem:[%s4883_s9 + $0x18] sm:$0xff] %v3189_v59   ;;  %v2469_v23 = vadd.f32 %v3764_v40, %v4840_v29  ;;  %v3679_v45 = vpop.f32.mrb[121].mxu1  ;;  %v2460_v14 = vpop.f32.mrb[121].mxu0 }
 0x1ec   : > { %3252 = vst [vmem:[%s4883_s9 + $0x10] sm:$0xff] %v3184_v42   ;;  %v3680_v36 = vadd.f32 %v3679_v45, %v3678_v34  ;;  %v2461_v63 = vadd.f32 %v2460_v14, %v4828_v57  ;;  %v3681_v51 = vpop.f32.mrb[122].mxu1  ;;  %v3765_v53 = vpop.f32.mrb[122].mxu0 }
 0x1ed   : > { %v2472_v4 = vadd.f32 %v3765_v53, %v4846_v26  ;;  %v3682_v56 = vpop.f32.mrb[123].mxu1  ;;  %v2463_v32 = vpop.f32.mrb[123].mxu0  ;;  %v2565_v29 = vmax.f32 %v2469_v23, 0.0 }
 0x1ee   : > { %v3683_v38 = vadd.f32 %v3682_v56, %v3681_v51  ;;  %v2464_v44 = vadd.f32 %v2463_v32, %v4834_v0  ;;  %v4903_v47 = vadd.f32 %v3680_v36, %v4801_v52  ;;  %v2563_v50 = vmax.f32 %v2461_v63, 0.0 }
 0x1ef   : > { %v2566_v39 = vmax.f32 %v2472_v4, 0.0 }
 0x1f0   : > { %v2564_v17 = vmax.f32 %v2464_v44, 0.0  ;;  %v4906_v57 = vadd.f32 %v3683_v38, %v4807_v15 }
 0x1f1   : > { %v3199_v43 = vpack.c.bf16 %v2566_v39, %v2565_v29 }
 0x1f2   : > { %v3194_v55 = vpack.c.bf16 %v2564_v17, %v2563_v50  ;;  %v3684_v24 = vpop.f32.mrb[124].mxu1  ;;  %v3768_v26 = vpop.f32.mrb[124].mxu0 }
 0x1f3   : > { %3255 = vst [vmem:[%s4883_s9 + $0x28] sm:$0xff] %v3199_v43   ;;  %v2485_v61 = vadd.f32 %v3768_v26, %v4864_v37  ;;  %v3685_v58 = vpop.f32.mrb[125].mxu1  ;;  %v2476_v11 = vpop.f32.mrb[125].mxu0 }
 0x1f4   : > { %3254 = vst [vmem:[%s4883_s9 + $0x20] sm:$0xff] %v3194_v55   ;;  %v3686_v0 = vadd.f32 %v3685_v58, %v3684_v24  ;;  %v2477_v52 = vadd.f32 %v2476_v11, %v4852_v2  ;;  %v3687_v3 = vpop.f32.mrb[126].mxu1  ;;  %v3769_v30 = vpop.f32.mrb[126].mxu0 }
 0x1f5   : > { %v2488_v16 = vadd.f32 %v3769_v30, %v4870_v19  ;;  %v3688_v15 = vpop.f32.mrb[127].mxu1  ;;  %v2479_v7 = vpop.f32.mrb[127].mxu0  ;;  %v2569_v37 = vmax.f32 %v2485_v61, 0.0 }
 0x1f6   : > { %v3689_v20 = vadd.f32 %v3688_v15, %v3687_v3  ;;  %v2480_v62 = vadd.f32 %v2479_v7, %v4858_v21  ;;  %v2356_v1 = vadd.f32 %v3686_v0, %v4813_v41  ;;  %v2567_v54 = vmax.f32 %v2477_v52, 0.0 }
 0x1f7   : > { %v2570_v18 = vmax.f32 %v2488_v16, 0.0 }
 0x1f8   : > { %v2568_v10 = vmax.f32 %v2480_v62, 0.0  ;;  %v2359_v31 = vadd.f32 %v3689_v20, %v4819_v25 }
 0x1f9   : > { %v3209_v2 = vpack.c.bf16 %v2570_v18, %v2569_v37 }
 0x1fa   : > { %v3204_v22 = vpack.c.bf16 %v2568_v10, %v2567_v54  ;;  %v3690_v9 = vpop.f32.mrb[128].mxu1  ;;  %v3772_v35 = vpop.f32.mrb[128].mxu0 }
 0x1fb   : > { %3257 = vst [vmem:[%s4883_s9 + $0x38] sm:$0xff] %v3209_v2   ;;  %v2501_v19 = vadd.f32 %v3772_v35, %v2340_v8  ;;  %v3691_v59 = vpop.f32.mrb[129].mxu1  ;;  %v2492_v42 = vpop.f32.mrb[129].mxu0 }
 0x1fc   : > { %3256 = vst [vmem:[%s4883_s9 + $0x30] sm:$0xff] %v3204_v22   ;;  %v3692_v34 = vadd.f32 %v3691_v59, %v3690_v9  ;;  %v2493_v21 = vadd.f32 %v2492_v42, %v4878_v5  ;;  %v3693_v40 = vpop.f32.mrb[130].mxu1  ;;  %v3773_v41 = vpop.f32.mrb[130].mxu0 }
 0x1fd   : > { %v2504_v23 = vadd.f32 %v3773_v41, %v2343_v46  ;;  %v3694_v45 = vpop.f32.mrb[131].mxu1  ;;  %v2495_v14 = vpop.f32.mrb[131].mxu0  ;;  %v2573_v51 = vmax.f32 %v2501_v19, 0.0 }
 0x1fe   : > { %v3695_v36 = vadd.f32 %v3694_v45, %v3693_v40  ;;  %v2496_v25 = vadd.f32 %v2495_v14, %v4886_v33  ;;  %v2364_v63 = vadd.f32 %v3692_v34, %v4825_v6  ;;  %v2571_v53 = vmax.f32 %v2493_v21, 0.0 }
 0x1ff   : > { %v2574_v8 = vmax.f32 %v2504_v23, 0.0 }
 0x200   : > { %v2572_v4 = vmax.f32 %v2496_v25, 0.0  ;;  %v2367_v56 = vadd.f32 %v3695_v36, %v4831_v49 }
 0x201   : > { %v3219_v32 = vpack.c.bf16 %v2574_v8, %v2573_v51 }
 0x202   : > { %v3214_v5 = vpack.c.bf16 %v2572_v4, %v2571_v53  ;;  %v3696_v38 = vpop.f32.mrb[132].mxu1  ;;  %v3776_v44 = vpop.f32.mrb[132].mxu0 }
 0x203   : > { %3259 = vst [vmem:[%s4883_s9 + $0x48] sm:$0xff] %v3219_v32   ;;  %v2517_v46 = vadd.f32 %v3776_v44, %v2356_v1  ;;  %v3697_v29 = vpop.f32.mrb[133].mxu1  ;;  %v2508_v39 = vpop.f32.mrb[133].mxu0 }
 0x204   : > { %3258 = vst [vmem:[%s4883_s9 + $0x40] sm:$0xff] %v3214_v5   ;;  %v3698_v50 = vadd.f32 %v3697_v29, %v3696_v38  ;;  %v2509_v33 = vadd.f32 %v2508_v39, %v4903_v47  ;;  %v3699_v17 = vpop.f32.mrb[134].mxu1  ;;  %v3777_v6 = vpop.f32.mrb[134].mxu0 }
 0x205   : > { %v2520_v43 = vadd.f32 %v3777_v6, %v2359_v31  ;;  %v3700_v55 = vpop.f32.mrb[135].mxu1  ;;  %v2511_v24 = vpop.f32.mrb[135].mxu0  ;;  %v2577_v58 = vmax.f32 %v2517_v46, 0.0 }
 0x206   : > { %v3701_v26 = vadd.f32 %v3700_v55, %v3699_v17  ;;  %v2512_v49 = vadd.f32 %v2511_v24, %v4906_v57  ;;  %v2372_v61 = vadd.f32 %v3698_v50, %v4837_v27  ;;  %v2575_v0 = vmax.f32 %v2509_v33, 0.0 }
 0x207   : > { %v2578_v11 = vmax.f32 %v2520_v43, 0.0 }
 0x208   : > { %v2576_v52 = vmax.f32 %v2512_v49, 0.0  ;;  %v2375_v3 = vadd.f32 %v3701_v26, %v4843_v60 }
 0x209   : > { %v3229_v30 = vpack.c.bf16 %v2578_v11, %v2577_v58 }
 0x20a   : > { %v3224_v47 = vpack.c.bf16 %v2576_v52, %v2575_v0  ;;  %v3702_v16 = vpop.f32.mrb[136].mxu1  ;;  %v3780_v15 = vpop.f32.mrb[136].mxu0 }
 0x20b   : > { %3261 = vst [vmem:[%s4883_s9 + $0x58] sm:$0xff] %v3229_v30   ;;  %v2533_v7 = vadd.f32 %v3780_v15, %v2372_v61  ;;  %v3703_v20 = vpop.f32.mrb[137].mxu1  ;;  %v2524_v62 = vpop.f32.mrb[137].mxu0 }
 0x20c   : > { %3260 = vst [vmem:[%s4883_s9 + $0x50] sm:$0xff] %v3224_v47   ;;  %v3704_v1 = vadd.f32 %v3703_v20, %v3702_v16  ;;  %v2525_v37 = vadd.f32 %v2524_v62, %v2364_v63  ;;  %v3705_v57 = vpop.f32.mrb[138].mxu1  ;;  %v3781_v18 = vpop.f32.mrb[138].mxu0 }
 0x20d   : > { %v2536_v27 = vadd.f32 %v3781_v18, %v2375_v3  ;;  %v3706_v54 = vpop.f32.mrb[139].mxu1  ;;  %v2527_v10 = vpop.f32.mrb[139].mxu0  ;;  %v2581_v22 = vmax.f32 %v2533_v7, 0.0 }
 0x20e   : > { %v3707_v31 = vadd.f32 %v3706_v54, %v3705_v57  ;;  %v2528_v60 = vadd.f32 %v2527_v10, %v2367_v56  ;;  %v2380_v2 = vadd.f32 %v3704_v1, %v4849_v48  ;;  %v2579_v35 = vmax.f32 %v2525_v37, 0.0 }
 0x20f   : > { %v2582_v9 = vmax.f32 %v2536_v27, 0.0 }
 0x210   : > { %v2580_v19 = vmax.f32 %v2528_v60, 0.0  ;;  %v2383_v59 = vadd.f32 %v3707_v31, %v4855_v12 }
 0x211   : > { %v3239_v42 = vpack.c.bf16 %v2582_v9, %v2581_v22 }
 0x212   : > { %v3234_v34 = vpack.c.bf16 %v2580_v19, %v2579_v35  ;;  %v3708_v21 = vpop.f32.mrb[140].mxu1  ;;  %v3784_v40 = vpop.f32.mrb[140].mxu0 }
 0x213   : > { %3263 = vst [vmem:[%s4883_s9 + $0x68] sm:$0xff] %v3239_v42   ;;  %v3709_v41 = vpop.f32.mrb[141].mxu1  ;;  %v2540_v23 = vpop.f32.mrb[141].mxu0 }
 0x214   : > { %3262 = vst [vmem:[%s4883_s9 + $0x60] sm:$0xff] %v3234_v34   ;;  %v3710_v45 = vadd.f32 %v3709_v41, %v3708_v21  ;;  %v2541_v14 = vadd.f32 %v2540_v23, %v2380_v2  ;;  %v3711_v36 = vpop.f32.mrb[142].mxu1  ;;  %v3785_v25 = vpop.f32.mrb[142].mxu0 }
 0x215   : > { %v3712_v48 = vpop.f32.mrb[143].mxu1  ;;  %v2543_v63 = vpop.f32.mrb[143].mxu0 }
 0x216   : > { %v2388_v51 = vadd.f32 %v3710_v45, %v4861_v13  ;;  %v3713_v8 = vadd.f32 %v3712_v48, %v3711_v36  ;;  %v2544_v12 = vadd.f32 %v2543_v63, %v2383_v59  ;;  %v2583_v4 = vmax.f32 %v2541_v14, 0.0 }
 0x218   : > { %v2549_v53 = vadd.f32 %v3784_v40, %v2388_v51  ;;  %v2391_v56 = vadd.f32 %v3713_v8, %v4867_v28  ;;  %v2584_v32 = vmax.f32 %v2544_v12, 0.0 }
 0x21a   : > { %v2552_v5 = vadd.f32 %v3785_v25, %v2391_v56  ;;  %v3244_v38 = vpack.c.bf16 %v2584_v32, %v2583_v4  ;;  %v2585_v44 = vmax.f32 %v2549_v53, 0.0 }
 0x21c   : > { %v2586_v46 = vmax.f32 %v2552_v5, 0.0  ;;  %3264 = vst [vmem:[%s4883_s9 + $0x70] sm:$0xff] %v3244_v38  }
 0x21e   : > { %v3249_v29 = vpack.c.bf16 %v2586_v46, %v2585_v44 }
 0x220   : > { %3265 = vst [vmem:[%s4883_s9 + $0x78] sm:$0xff] %v3249_v29  }
 0x221 PF: > { %s13_s14 = sadd.s32 1, %s4129_s14   ;;  %s4951_s12 = smov %s4125_s13 }
 0x222   : > { %p10_p5 = scmp.ge.s32.totalorder %s13_s14, 7   ;;  %s4952_s13 = smov %s4954_s15 }
 0x224   :  { %12 = sbr.rel (!%p10_p5) target bundleno = 2 (0x2), region = 68 }

// kernel: ensemble_forward.12
= control target key start
LH: loop header
LB: loop body
LE: loop exit
PB: predicated region body
PF: predicated region fallthrough
CT: control target
= control target key end

     0   :  { %s3634_s12 = smov 0   ;;  %s3636_s13 = smov 0   ;;  %s4314_s0 = inlined_call_operand.vmem [shape: bf16[1,200,1152], index: 0, kind: input, shape index: {}]   ;;  %s4315_s1 = inlined_call_operand.vmem [shape: bf16[2,1152,128], index: 1, kind: input, shape index: {}]   ;;  %s4316_s2 = inlined_call_operand.vmem [shape: f32[2,1,128], index: 2, kind: input, shape index: {}]   ;;  %s4317_s3 = inlined_call_operand.vmem [shape: bf16[2,200,128], index: 3, kind: output, shape index: {}]  }
   0x1   :  { %s3638_s14 = smov 0  }
   0x2 LB: > { %s32_s15 = sadd.s32 1, %s3606_s13  ;;  %p2526_p0 = scmp.ge.s32.totalorder %s3610_s14, 1  ;;  %s3610_s14 = sphi %s3638_s14, %s13_s14   ;;  %s3606_s13 = sphi %s3636_s13, %s4319_s13   ;;  %s3602_s12 = sphi %s3634_s12, %s4318_s12  }
   0x3   : > { %p34_p1 = scmp.ge.s32.totalorder %s32_s15, 2  ;;  %p190_p2 = scmp.lt.s32.totalorder %s3610_s14, 3 }
   0x5   : > { %s4321_s15 = smov (%p34_p1, %s32_s15), 0  ;;  %p191_p3 = pnand %p2526_p0, %p190_p2 }
   0x6   : > { %p243_p4 = scmp.lt.s32.totalorder (!%p191_p3), %s3602_s12, 1  ;;  %v3369_v0 = vld [vmem:[%s4314_s0 + $0x4] ss:$36 sps:$4 sm:$0xff] (!%p191_p3)   ;;  %v3372_v1 = vld [vmem:[%s4314_s0 + $0x1fc] ss:$36 sps:$4 sm:$0xff] (!%p191_p3)   ;;  %vm3613_vm0 = vmmov (!%p191_p3), 0  }
   0x7   : > { %194 = sbr.rel (%p191_p3) target bundleno = 526 (0x20e), region = 32  ;;  %1595 = vmatprep.mubr.bf16.mxu0 (!%p191_p3), %v3369_v0  ;;  %1651 = vmatprep.mubr.bf16.mxu1 (!%p191_p3), %v3372_v1  ;;  %v3367_v19 = vld [vmem:[%s4314_s0] ss:$36 sps:$4 sm:$0xff] (!%p191_p3)   ;;  %v3370_v21 = vld [vmem:[%s4314_s0 + $0x1f8] ss:$36 sps:$4 sm:$0xff] (!%p191_p3)  }
   0x8   : > { %v3377_v23 = vld [vmem:[%s4314_s0 + $0x4c] ss:$36 sps:$4 sm:$0xff] (!%p191_p3)   ;;  %v3379_v24 = vld [vmem:[%s4314_s0 + $0x244] ss:$36 sps:$4 sm:$0xff] (!%p191_p3)   ;;  %v3388_v34 = vld [vmem:[%s4314_s0 + $0x94] ss:$36 sps:$4 sm:$0xff] (!%p191_p3)  }
   0x9   : > { %v3382_v31 = vld [vmem:[%s4314_s0 + $0x48] ss:$36 sps:$4 sm:$0xff] (!%p191_p3)   ;;  %v3383_v32 = vld [vmem:[%s4314_s0 + $0x240] ss:$36 sps:$4 sm:$0xff] (!%p191_p3)   ;;  %v3394_v42 = vld [vmem:[%s4314_s0 + $0x90] ss:$36 sps:$4 sm:$0xff] (!%p191_p3)  }
   0xa   : > { %v3390_v35 = vld [vmem:[%s4314_s0 + $0x28c] ss:$36 sps:$4 sm:$0xff] (!%p191_p3)   ;;  %v3401_v46 = vld [vmem:[%s4314_s0 + $0xdc] ss:$36 sps:$4 sm:$0xff] (!%p191_p3)   ;;  %v3403_v47 = vld [vmem:[%s4314_s0 + $0x2d4] ss:$36 sps:$4 sm:$0xff] (!%p191_p3)  }
   0xb   : > { %v3395_v43 = vld [vmem:[%s4314_s0 + $0x288] ss:$36 sps:$4 sm:$0xff] (!%p191_p3)   ;;  %v3405_v54 = vld [vmem:[%s4314_s0 + $0xd8] ss:$36 sps:$4 sm:$0xff] (!%p191_p3)   ;;  %v3406_v55 = vld [vmem:[%s4314_s0 + $0x2d0] ss:$36 sps:$4 sm:$0xff] (!%p191_p3)  }
   0xc   : > { %v3411_v57 = vld [vmem:[%s4314_s0 + $0x124] ss:$36 sps:$4 sm:$0xff] (!%p191_p3)   ;;  %v3413_v59 = vld [vmem:[%s4314_s0 + $0x31c] ss:$36 sps:$4 sm:$0xff] (!%p191_p3)  }
   0xd   : > { %v391_v0 = vld [vmem:[%s4314_s0 + $0x360] sm:$0xff] (!%p191_p3) }
   0xe   : > { %s4323_s12 = smov (!%p243_p4, %s3602_s12), 1 }
   0xf   : > { %s3323_s20 = smul.u32 576, %s4323_s12  ;;  %s256_s22 = scalar_lea.vmem %s4316_s2, %s4323_s12 }
  0x11   : > { %s3664_s23 = scalar_lea.vmem %s4315_s1, %s3323_s20 }
  0x12   : > { %v3351_v2 = vld [vmem:[%s3664_s23 + $0x40] sm:$0xff]   ;;  %v3353_v4 = vld [vmem:[%s3664_s23 + $0x48] sm:$0xff]   ;;  %v3355_v6 = vld [vmem:[%s3664_s23 + $0x50] sm:$0xff]  }
  0x13   : > { %v3352_v3 = vld [vmem:[%s3664_s23] sm:$0xff]   ;;  %2842 = vmatprep.subr.bf16.mxu0 %v3351_v2  ;;  %3307 = vmatprep.subr.bf16.mxu1 %v3351_v2  ;;  %v3354_v5 = vld [vmem:[%s3664_s23 + $0x8] sm:$0xff]   ;;  %v3356_v7 = vld [vmem:[%s3664_s23 + $0x10] sm:$0xff]  }
  0x14   : > { %2843 = vmatpush3.bf16.msra.mxu0 %v3352_v3  ;;  %3315 = vmatpush3.bf16.msra.mxu1 %v3352_v3  ;;  %v3357_v8 = vld [vmem:[%s3664_s23 + $0x58] sm:$0xff]   ;;  %v3359_v10 = vld [vmem:[%s3664_s23 + $0x60] sm:$0xff]   ;;  %v3361_v12 = vld [vmem:[%s3664_s23 + $0x68] sm:$0xff]  }
  0x15   : > { %2844 = vmatprep.subr.bf16.mxu0 %v3353_v4  ;;  %3308 = vmatprep.subr.bf16.mxu1 %v3353_v4  ;;  %v3358_v9 = vld [vmem:[%s3664_s23 + $0x18] sm:$0xff]   ;;  %v3360_v11 = vld [vmem:[%s3664_s23 + $0x20] sm:$0xff]   ;;  %v3362_v13 = vld [vmem:[%s3664_s23 + $0x28] sm:$0xff]  }
  0x16   : > { %v3363_v14 = vld [vmem:[%s3664_s23 + $0x70] sm:$0xff]   ;;  %v3365_v16 = vld [vmem:[%s3664_s23 + $0x78] sm:$0xff]   ;;  %v3373_v18 = vld [vmem:[%s3664_s23 + $0x140] sm:$0xff]  }
  0x17   : > { %v3364_v15 = vld [vmem:[%s3664_s23 + $0x30] sm:$0xff]   ;;  %v3366_v17 = vld [vmem:[%s3664_s23 + $0x38] sm:$0xff]   ;;  %v3375_v20 = vld [vmem:[%s3664_s23 + $0xc0] sm:$0xff]  }
  0x18   : > { %2845 = vmatpush3.bf16.msra.mxu0 %v3354_v5  ;;  %3316 = vmatpush3.bf16.msra.mxu1 %v3354_v5  ;;  %v3374_v22 = vld [vmem:[%s3664_s23 + $0x100] sm:$0xff]   ;;  %v3381_v26 = vld [vmem:[%s3664_s23 + $0x148] sm:$0xff]   ;;  %v3387_v30 = vld [vmem:[%s3664_s23 + $0x150] sm:$0xff]  }
  0x19   : > { %2846 = vmatprep.subr.bf16.mxu0 %v3355_v6  ;;  %3309 = vmatprep.subr.bf16.mxu1 %v3355_v6  ;;  %v3376_v25 = vld [vmem:[%s3664_s23 + $0x80] sm:$0xff]   ;;  %v3385_v27 = vld [vmem:[%s3664_s23 + $0xc8] sm:$0xff]   ;;  %v3392_v33 = vld [vmem:[%s3664_s23 + $0xd0] sm:$0xff]  }
  0x1a   : > { %v3384_v28 = vld [vmem:[%s3664_s23 + $0x108] sm:$0xff]   ;;  %v3393_v36 = vld [vmem:[%s3664_s23 + $0x110] sm:$0xff]   ;;  %v3397_v38 = vld [vmem:[%s3664_s23 + $0xd8] sm:$0xff]  }
  0x1b   : > { %v3386_v29 = vld [vmem:[%s3664_s23 + $0x88] sm:$0xff]   ;;  %v3396_v37 = vld [vmem:[%s3664_s23 + $0x90] sm:$0xff]   ;;  %v3398_v39 = vld [vmem:[%s3664_s23 + $0x158] sm:$0xff]  }
  0x1c   : > { %2847 = vmatpush3.bf16.msra.mxu0 %v3356_v7  ;;  %3317 = vmatpush3.bf16.msra.mxu1 %v3356_v7  ;;  %v3399_v40 = vld [vmem:[%s3664_s23 + $0x98] sm:$0xff]   ;;  %v3407_v44 = vld [vmem:[%s3664_s23 + $0xe0] sm:$0xff]   ;;  %v3417_v50 = vld [vmem:[%s3664_s23 + $0xe8] sm:$0xff]   ;;  %v2639_v7 = vcombine.high %v391_v0, %v391_v0 }
  0x1d   : > { %2848 = vmatprep.subr.bf16.mxu0 %v3357_v8  ;;  %3310 = vmatprep.subr.bf16.mxu1 %v3357_v8  ;;  %v3400_v41 = vld [vmem:[%s3664_s23 + $0x118] sm:$0xff]   ;;  %v3409_v45 = vld [vmem:[%s3664_s23 + $0x160] sm:$0xff]   ;;  %v3419_v51 = vld [vmem:[%s3664_s23 + $0x168] sm:$0xff]   ;;  %v3612_v8 = vmov 0.0  }
  0x1e   : > { %v3408_v48 = vld [vmem:[%s3664_s23 + $0xa0] sm:$0xff]   ;;  %v3418_v52 = vld [vmem:[%s3664_s23 + $0xa8] sm:$0xff]   ;;  %v3424_v56 = vld [vmem:[%s3664_s23 + $0xf0] sm:$0xff]  }
  0x1f   : > { %v3410_v49 = vld [vmem:[%s3664_s23 + $0x120] sm:$0xff]   ;;  %v3420_v53 = vld [vmem:[%s3664_s23 + $0x128] sm:$0xff]   ;;  %v3428_v58 = vld [vmem:[%s3664_s23 + $0x170] sm:$0xff]  }
  0x20   : > { %2849 = vmatpush3.bf16.msra.mxu0 %v3358_v9  ;;  %3318 = vmatpush3.bf16.msra.mxu1 %v3358_v9  ;;  %v3427_v60 = vld [vmem:[%s3664_s23 + $0xb0] sm:$0xff]   ;;  %v3430_v62 = vld [vmem:[%s3664_s23 + $0xf8] sm:$0xff]   ;;  %v3440_v3 = vld [vmem:[%s3664_s23 + $0x1c0] sm:$0xff]  }
  0x21   : > { %2850 = vmatprep.subr.bf16.mxu0 %v3359_v10  ;;  %3311 = vmatprep.subr.bf16.mxu1 %v3359_v10  ;;  %v3429_v61 = vld [vmem:[%s3664_s23 + $0x130] sm:$0xff]   ;;  %v3438_v63 = vld [vmem:[%s3664_s23 + $0x178] sm:$0xff]   ;;  %v3415_v4 = vld [vmem:[%s4314_s0 + $0x120] ss:$36 sps:$4 sm:$0xff]   ;;  %v2638_v10 = vcombine.low %v391_v0, %v391_v0 }
  0x22   : > { %v3431_v1 = vld [vmem:[%s3664_s23 + $0xb8] sm:$0xff]   ;;  %v3421_v6 = vld [vmem:[%s4314_s0 + $0x16c] ss:$36 sps:$4 sm:$0xff]   ;;  %v3493_v0 = vld [vmem:[%s4314_s0 + $0x200] ss:$36 sps:$4 sm:$0xff]  }
  0x23   : > { %v3439_v2 = vld [vmem:[%s3664_s23 + $0x138] sm:$0xff]   ;;  %v3425_v9 = vld [vmem:[%s4314_s0 + $0x168] ss:$36 sps:$4 sm:$0xff]  }
  0x24   : > { %2851 = vmatpush3.bf16.msra.mxu0 %v3360_v11  ;;  %3319 = vmatpush3.bf16.msra.mxu1 %v3360_v11  ;;  %v3416_v5 = vld [vmem:[%s4314_s0 + $0x318] ss:$36 sps:$4 sm:$0xff]  }
  0x25   : > { %2852 = vmatprep.subr.bf16.mxu0 %v3361_v12  ;;  %3312 = vmatprep.subr.bf16.mxu1 %v3361_v12  ;;  %v3432_v11 = vld [vmem:[%s4314_s0 + $0x1b4] ss:$36 sps:$4 sm:$0xff]   ;;  %v3436_v12 = vld [vmem:[%s4314_s0 + $0xc] ss:$36 sps:$4 sm:$0xff]  }
  0x28   : > { %2853 = vmatpush3.bf16.msra.mxu0 %v3362_v13  ;;  %3320 = vmatpush3.bf16.msra.mxu1 %v3362_v13  ;;  %v3434_v13 = vld [vmem:[%s4314_s0 + $0x8] ss:$36 sps:$4 sm:$0xff]  }
  0x29   : > { %2854 = vmatprep.subr.bf16.mxu0 %v3363_v14  ;;  %3313 = vmatprep.subr.bf16.mxu1 %v3363_v14  ;;  %v3437_v14 = vld [vmem:[%s4314_s0 + $0x1b0] ss:$36 sps:$4 sm:$0xff]  }
  0x2c   : > { %2855 = vmatpush3.bf16.msra.mxu0 %v3364_v15  ;;  %3321 = vmatpush3.bf16.msra.mxu1 %v3364_v15  ;;  %v3441_v15 = vld [vmem:[%s3664_s23 + $0x180] sm:$0xff]  }
  0x2d   : > { %2856 = vmatprep.subr.bf16.mxu0 %v3365_v16  ;;  %3314 = vmatprep.subr.bf16.mxu1 %v3365_v16  ;;  %v3442_v16 = vld [vmem:[%s4314_s0 + $0x54] ss:$36 sps:$4 sm:$0xff]  }
  0x30   : > { %2857 = vmatpush3.bf16.msra.mxu0 %v3366_v17  ;;  %3322 = vmatpush3.bf16.msra.mxu1 %v3366_v17  ;;  %v3446_v17 = vld [vmem:[%s4314_s0 + $0x14] ss:$36 sps:$4 sm:$0xff]  }
  0x31   : > { %3030 = vmatprep.subr.bf16.mxu0 %v3373_v18  ;;  %2936 = vmatprep.subr.bf16.mxu1 %v3375_v20  ;;  %v3455_v18 = vld [vmem:[%s3664_s23 + $0x1c8] sm:$0xff]   ;;  %v3464_v20 = vld [vmem:[%s3664_s23 + $0x1d0] sm:$0xff]  }
  0x33   : > { %1596 = vmatmul.mubr.bf16.vlgmr.msra.gmra.mrb[0].mxu0 %v3367_v19  ;;  %1652 = vmatmul.mubr.bf16.vlgmr.msra.gmra.mrb[0].mxu1 %v3370_v21  ;;  %v3456_v19 = vld [vmem:[%s3664_s23 + $0x188] sm:$0xff]   ;;  %v3444_v21 = vld [vmem:[%s4314_s0 + $0x10] ss:$36 sps:$4 sm:$0xff]  }
  0x34   : > { %3031 = vmatpush3.bf16.msra.mxu0 %v3374_v22  ;;  %2937 = vmatpush3.bf16.msra.mxu1 %v3376_v25  ;;  %v3447_v22 = vld [vmem:[%s4314_s0 + $0x50] ss:$36 sps:$4 sm:$0xff]   ;;  %v3451_v25 = vld [vmem:[%s4314_s0 + $0x5c] ss:$36 sps:$4 sm:$0xff]  }
  0x35   : > { %1603 = vmatprep.mubr.bf16.mxu0 %v3377_v23  ;;  %1659 = vmatprep.mubr.bf16.mxu1 %v3379_v24  ;;  %v3448_v23 = vld [vmem:[%s3664_s23 + $0x200] sm:$0xff]  }
  0x36   : > { %3032 = vmatprep.subr.bf16.mxu0 %v3381_v26  ;;  %2938 = vmatprep.subr.bf16.mxu1 %v3385_v27  ;;  %v3449_v24 = vld [vmem:[%s4314_s0 + $0x9c] ss:$36 sps:$4 sm:$0xff]   ;;  %v3465_v26 = vld [vmem:[%s3664_s23 + $0x190] sm:$0xff]  }
  0x37   : > { %v3479_v27 = vld [vmem:[%s3664_s23 + $0x1d8] sm:$0xff]  }
  0x38   : > { %3033 = vmatpush3.bf16.msra.mxu0 %v3384_v28  ;;  %2939 = vmatpush3.bf16.msra.mxu1 %v3386_v29  ;;  %v3457_v28 = vld [vmem:[%s3664_s23 + $0x208] sm:$0xff]   ;;  %v3453_v29 = vld [vmem:[%s4314_s0 + $0x98] ss:$36 sps:$4 sm:$0xff]  }
  0x39   : > { %3034 = vmatprep.subr.bf16.mxu0 %v3387_v30  ;;  %2940 = vmatprep.subr.bf16.mxu1 %v3392_v33  ;;  %v3480_v30 = vld [vmem:[%s3664_s23 + $0x198] sm:$0xff]   ;;  %v3460_v33 = vld [vmem:[%s4314_s0 + $0xa4] ss:$36 sps:$4 sm:$0xff]  }
  0x3b   : > { %1604 = vmatmul.mubr.bf16.gmra.mrb[4].mxu0 %v3382_v31  ;;  %1660 = vmatmul.mubr.bf16.gmra.mrb[4].mxu1 %v3383_v32  ;;  %v3454_v31 = vld [vmem:[%s4314_s0 + $0x58] ss:$36 sps:$4 sm:$0xff]   ;;  %v3458_v32 = vld [vmem:[%s4314_s0 + $0xe4] ss:$36 sps:$4 sm:$0xff]  }
  0x3c   : > { %1611 = vmatprep.mubr.bf16.mxu0 %v3388_v34  ;;  %1667 = vmatprep.mubr.bf16.mxu1 %v3390_v35  ;;  %v3472_v34 = vld [vmem:[%s3664_s23 + $0x210] sm:$0xff]   ;;  %v3492_v35 = vld [vmem:[%s3664_s23 + $0x1e0] sm:$0xff]  }
  0x3d   : > { %3035 = vmatpush3.bf16.msra.mxu0 %v3393_v36  ;;  %2941 = vmatpush3.bf16.msra.mxu1 %v3396_v37  ;;  %v3495_v36 = vld [vmem:[%s3664_s23 + $0x1a0] sm:$0xff]   ;;  %v3503_v37 = vld [vmem:[%s3664_s23 + $0x1e8] sm:$0xff]  }
  0x3e   : > { %2942 = vmatprep.subr.bf16.mxu1 %v3397_v38  ;;  %3036 = vmatprep.subr.bf16.mxu0 %v3398_v39  ;;  %v3462_v38 = vld [vmem:[%s4314_s0 + $0xe0] ss:$36 sps:$4 sm:$0xff]  }
  0x3f   : > { %v3463_v39 = vld [vmem:[%s4314_s0 + $0xa0] ss:$36 sps:$4 sm:$0xff]  }
  0x41   : > { %2943 = vmatpush3.bf16.msra.mxu1 %v3399_v40  ;;  %3037 = vmatpush3.bf16.msra.mxu0 %v3400_v41  ;;  %v3487_v40 = vld [vmem:[%s3664_s23 + $0x218] sm:$0xff]   ;;  %v3504_v41 = vld [vmem:[%s3664_s23 + $0x1a8] sm:$0xff]  }
  0x42   : > { %2944 = vmatprep.subr.bf16.mxu1 %v3407_v44  ;;  %3038 = vmatprep.subr.bf16.mxu0 %v3409_v45  ;;  %v3496_v44 = vld [vmem:[%s3664_s23 + $0x220] sm:$0xff]   ;;  %v3518_v45 = vld [vmem:[%s3664_s23 + $0x1f0] sm:$0xff]  }
  0x43   : > { %1612 = vmatmul.mubr.bf16.gmra.mrb[8].mxu0 %v3394_v42  ;;  %1668 = vmatmul.mubr.bf16.gmra.mrb[8].mxu1 %v3395_v43  ;;  %v3466_v42 = vld [vmem:[%s4314_s0 + $0x12c] ss:$36 sps:$4 sm:$0xff]  }
  0x44   : > { %1619 = vmatprep.mubr.bf16.mxu0 %v3401_v46  ;;  %1675 = vmatprep.mubr.bf16.mxu1 %v3403_v47  ;;  %v3468_v43 = vld [vmem:[%s4314_s0 + $0xec] ss:$36 sps:$4 sm:$0xff]  }
  0x45   : > { %2945 = vmatpush3.bf16.msra.mxu1 %v3408_v48  ;;  %3039 = vmatpush3.bf16.msra.mxu0 %v3410_v49  ;;  %v3519_v46 = vld [vmem:[%s3664_s23 + $0x1b0] sm:$0xff]   ;;  %v3470_v47 = vld [vmem:[%s4314_s0 + $0x128] ss:$36 sps:$4 sm:$0xff]  }
  0x46   : > { %2946 = vmatprep.subr.bf16.mxu1 %v3417_v50  ;;  %3040 = vmatprep.subr.bf16.mxu0 %v3419_v51  ;;  %v3471_v48 = vld [vmem:[%s4314_s0 + $0xe8] ss:$36 sps:$4 sm:$0xff]   ;;  %v3527_v50 = vld [vmem:[%s3664_s23 + $0x1f8] sm:$0xff]  }
  0x47   : > { %v3511_v49 = vld [vmem:[%s3664_s23 + $0x228] sm:$0xff]   ;;  %v3473_v51 = vld [vmem:[%s4314_s0 + $0x174] ss:$36 sps:$4 sm:$0xff]  }
  0x49   : > { %2947 = vmatpush3.bf16.msra.mxu1 %v3418_v52  ;;  %3041 = vmatpush3.bf16.msra.mxu0 %v3420_v53  ;;  %v3475_v52 = vld [vmem:[%s4314_s0 + $0x134] ss:$36 sps:$4 sm:$0xff]  }
  0x4a   : > { %2948 = vmatprep.subr.bf16.mxu1 %v3424_v56  ;;  %3042 = vmatprep.subr.bf16.mxu0 %v3428_v58  ;;  %v3524_v53 = vld [vmem:[%s3664_s23 + $0x230] sm:$0xff]   ;;  %v3481_v58 = vld [vmem:[%s4314_s0 + $0x1bc] ss:$36 sps:$4 sm:$0xff]  }
  0x4b   : > { %1620 = vmatmul.mubr.bf16.gmra.mrb[12].mxu0 %v3405_v54  ;;  %1676 = vmatmul.mubr.bf16.gmra.mrb[12].mxu1 %v3406_v55  ;;  %v3531_v54 = vld [vmem:[%s3664_s23 + $0x1b8] sm:$0xff]   ;;  %v3477_v56 = vld [vmem:[%s4314_s0 + $0x170] ss:$36 sps:$4 sm:$0xff]  }
  0x4c   : > { %1627 = vmatprep.mubr.bf16.mxu0 %v3411_v57  ;;  %1683 = vmatprep.mubr.bf16.mxu1 %v3413_v59  ;;  %v3534_v55 = vld [vmem:[%s3664_s23 + $0x238] sm:$0xff]   ;;  %v3478_v57 = vld [vmem:[%s4314_s0 + $0x130] ss:$36 sps:$4 sm:$0xff]  }
  0x4d   : > { %2949 = vmatpush3.bf16.msra.mxu1 %v3427_v60  ;;  %3043 = vmatpush3.bf16.msra.mxu0 %v3429_v61  ;;  %v3483_v59 = vld [vmem:[%s4314_s0 + $0x17c] ss:$36 sps:$4 sm:$0xff]  }
  0x4e   : > { %2950 = vmatprep.subr.bf16.mxu1 %v3430_v62  ;;  %3044 = vmatprep.subr.bf16.mxu0 %v3438_v63  ;;  %v3485_v60 = vld [vmem:[%s4314_s0 + $0x1b8] ss:$36 sps:$4 sm:$0xff]   ;;  %v3488_v62 = vld [vmem:[%s4314_s0 + $0x204] ss:$36 sps:$4 sm:$0xff]  }
  0x4f   : > { %v3486_v61 = vld [vmem:[%s4314_s0 + $0x178] ss:$36 sps:$4 sm:$0xff]   ;;  %v3490_v63 = vld [vmem:[%s4314_s0 + $0x1c4] ss:$36 sps:$4 sm:$0xff]  }
  0x51   : > { %2951 = vmatpush3.bf16.msra.mxu1 %v3431_v1  ;;  %3045 = vmatpush3.bf16.msra.mxu0 %v3439_v2  ;;  %v3494_v1 = vld [vmem:[%s4314_s0 + $0x1c0] ss:$36 sps:$4 sm:$0xff]   ;;  %v3497_v2 = vld [vmem:[%s4314_s0 + $0x24c] ss:$36 sps:$4 sm:$0xff]  }
  0x52   : > { %3124 = vmatprep.subr.bf16.mxu1 %v3440_v3  ;;  %3239 = vmatprep.subr.bf16.mxu0 %v3612_v8  ;;  %v3499_v3 = vld [vmem:[%s4314_s0 + $0x20c] ss:$36 sps:$4 sm:$0xff]  }
  0x53   : > { %1628 = vmatmul.mubr.bf16.gmra.mrb[16].mxu0 %v3415_v4  ;;  %1684 = vmatmul.mubr.bf16.gmra.mrb[16].mxu1 %v3416_v5  ;;  %v3501_v4 = vld [vmem:[%s4314_s0 + $0x248] ss:$36 sps:$4 sm:$0xff]  }
  0x54   : > { %1635 = vmatprep.mubr.bf16.mxu0 %v3421_v6  ;;  %1691 = vmatprep.mubr.bf16.mxu1 %v2639_v7  ;;  %v3502_v5 = vld [vmem:[%s4314_s0 + $0x208] ss:$36 sps:$4 sm:$0xff]   ;;  %v3505_v6 = vld [vmem:[%s4314_s0 + $0x294] ss:$36 sps:$4 sm:$0xff]  }
  0x55   : > { %v3507_v7 = vld [vmem:[%s4314_s0 + $0x254] ss:$36 sps:$4 sm:$0xff]  }
  0x5b   : > { %1636 = vmatmul.mubr.bf16.gmra.mrb[20].mxu0 %v3425_v9  ;;  %1692 = vmatmul.mubr.bf16.gmra.mrb[20].mxu1 %v2638_v10  ;;  %v3509_v9 = vld [vmem:[%s4314_s0 + $0x290] ss:$36 sps:$4 sm:$0xff]  }
  0x5c   : > { %1643 = vmatprep.mubr.bf16.mxu0 %v3432_v11  ;;  %1731 = vmatprep.mubr.bf16.mxu1 %v3436_v12  ;;  %v3510_v10 = vld [vmem:[%s4314_s0 + $0x250] ss:$36 sps:$4 sm:$0xff]   ;;  %v3512_v11 = vld [vmem:[%s4314_s0 + $0x2dc] ss:$36 sps:$4 sm:$0xff]  }
  0x5d   : > { %v3514_v12 = vld [vmem:[%s4314_s0 + $0x29c] ss:$36 sps:$4 sm:$0xff]  }
  0x63   : > { %1644 = vmatmul.mubr.bf16.gmra.mrb[24].mxu0 %v3437_v14  ;;  %1732 = vmatmul.mubr.bf16.vlgmr.msra.gmra.mrb[24].mxu1 %v3434_v13  ;;  %v3516_v13 = vld [vmem:[%s4314_s0 + $0x2d8] ss:$36 sps:$4 sm:$0xff]  }
  0x64   : > { %3125 = vmatpush3.bf16.msra.mxu1 %v3441_v15  ;;  %1739 = vmatprep.mubr.bf16.mxu1 %v3442_v16  ;;  %v3517_v14 = vld [vmem:[%s4314_s0 + $0x298] ss:$36 sps:$4 sm:$0xff]   ;;  %v3520_v15 = vld [vmem:[%s4314_s0 + $0x324] ss:$36 sps:$4 sm:$0xff]  }
  0x65   : > { %1867 = vmatprep.mubr.bf16.mxu0 %v3446_v17  ;;  %3126 = vmatprep.subr.bf16.mxu1 %v3455_v18  ;;  %v3522_v16 = vld [vmem:[%s4314_s0 + $0x2e4] ss:$36 sps:$4 sm:$0xff]  }
  0x66   : > { %v392_v17 = vld [vmem:[%s4314_s0 + $0x368] sm:$0xff]  ;;  %v3525_v18 = vld [vmem:[%s4314_s0 + $0x320] ss:$36 sps:$4 sm:$0xff]  }
  0x68   : > { %3127 = vmatpush3.bf16.msra.mxu1 %v3456_v19  ;;  %v3526_v19 = vld [vmem:[%s4314_s0 + $0x2e0] ss:$36 sps:$4 sm:$0xff]  }
  0x69   : > { %3128 = vmatprep.subr.bf16.mxu1 %v3464_v20  ;;  %v2641_v20 = vcombine.high %v392_v17, %v392_v17 }
  0x6b   : > { %1740 = vmatmul.mubr.bf16.gmra.mrb[28].mxu1 %v3447_v22  ;;  %1868 = vmatmul.mubr.bf16.vlgmr.msra.gmra.mrb[28].mxu0 %v3444_v21  ;;  %v3529_v21 = vld [vmem:[%s4314_s0 + $0x32c] ss:$36 sps:$4 sm:$0xff]  }
  0x6c   : > { %3240 = vmatpush3.bf16.msra.mxu0 %v3448_v23  ;;  %1747 = vmatprep.mubr.bf16.mxu1 %v3449_v24  ;;  %v393_v22 = vld [vmem:[%s4314_s0 + $0x370] sm:$0xff]  ;;  %v2640_v23 = vcombine.low %v392_v17, %v392_v17  ;;  %v3533_v24 = vld [vmem:[%s4314_s0 + $0x328] ss:$36 sps:$4 sm:$0xff]  }
  0x6d   : > { %1875 = vmatprep.mubr.bf16.mxu0 %v3451_v25  ;;  %3241 = vmatprep.subr.bf16.mxu0 %v3612_v8  ;;  %v2643_v25 = vcombine.high %v393_v22, %v393_v22 }
  0x6e   : > { %3129 = vmatpush3.bf16.msra.mxu1 %v3465_v26  ;;  %v3538_v26 = vld [vmem:[%s4314_s0 + $0x1c] ss:$36 sps:$4 sm:$0xff]  }
  0x6f   : > { %3130 = vmatprep.subr.bf16.mxu1 %v3479_v27  ;;  %v3536_v27 = vld [vmem:[%s4314_s0 + $0x18] ss:$36 sps:$4 sm:$0xff]  }
  0x70   : > { %3242 = vmatpush3.bf16.msra.mxu0 %v3457_v28  ;;  %v2642_v28 = vcombine.low %v393_v22, %v393_v22 }
  0x71   : > { %3243 = vmatprep.subr.bf16.mxu0 %v3612_v8 }
  0x72   : > { %3131 = vmatpush3.bf16.msra.mxu1 %v3480_v30  ;;  %v3542_v30 = vld [vmem:[%s4314_s0 + $0x60] ss:$36 sps:$4 sm:$0xff]  }
  0x73   : > { %1748 = vmatmul.mubr.bf16.gmra.mrb[32].mxu1 %v3453_v29  ;;  %1876 = vmatmul.mubr.bf16.gmra.mrb[32].mxu0 %v3454_v31  ;;  %v3540_v29 = vld [vmem:[%s4314_s0 + $0x64] ss:$36 sps:$4 sm:$0xff]  }
  0x74   : > { %1755 = vmatprep.mubr.bf16.mxu1 %v3458_v32  ;;  %1883 = vmatprep.mubr.bf16.mxu0 %v3460_v33  ;;  %v3543_v31 = vld [vmem:[%s4314_s0 + $0x20] ss:$36 sps:$4 sm:$0xff]   ;;  %v3544_v32 = vld [vmem:[%s4314_s0 + $0xac] ss:$36 sps:$4 sm:$0xff]  }
  0x75   : > { %3244 = vmatpush3.bf16.msra.mxu0 %v3472_v34  ;;  %3132 = vmatprep.subr.bf16.mxu1 %v3492_v35  ;;  %v3546_v33 = vld [vmem:[%s4314_s0 + $0xa8] ss:$36 sps:$4 sm:$0xff]   ;;  %v3548_v35 = vld [vmem:[%s4314_s0 + $0xf4] ss:$36 sps:$4 sm:$0xff]  }
  0x76   : > { %3245 = vmatprep.subr.bf16.mxu0 %v3612_v8  ;;  %3133 = vmatpush3.bf16.msra.mxu1 %v3495_v36  ;;  %v3547_v34 = vld [vmem:[%s4314_s0 + $0x68] ss:$36 sps:$4 sm:$0xff]   ;;  %v3550_v36 = vld [vmem:[%s4314_s0 + $0xf0] ss:$36 sps:$4 sm:$0xff]  }
  0x77   : > { %3134 = vmatprep.subr.bf16.mxu1 %v3503_v37  ;;  %v3551_v37 = vld [vmem:[%s4314_s0 + $0xb0] ss:$36 sps:$4 sm:$0xff]  }
  0x79   : > { %3246 = vmatpush3.bf16.msra.mxu0 %v3487_v40  ;;  %v3555_v40 = vld [vmem:[%s4314_s0 + $0xf8] ss:$36 sps:$4 sm:$0xff]  }
  0x7a   : > { %3247 = vmatprep.subr.bf16.mxu0 %v3612_v8  ;;  %3135 = vmatpush3.bf16.msra.mxu1 %v3504_v41  ;;  %v3556_v41 = vld [vmem:[%s4314_s0 + $0x184] ss:$36 sps:$4 sm:$0xff]  }
  0x7b   : > { %1756 = vmatmul.mubr.bf16.gmra.mrb[36].mxu1 %v3462_v38  ;;  %1884 = vmatmul.mubr.bf16.gmra.mrb[36].mxu0 %v3463_v39  ;;  %v3552_v38 = vld [vmem:[%s4314_s0 + $0x13c] ss:$36 sps:$4 sm:$0xff]  }
  0x7c   : > { %1763 = vmatprep.mubr.bf16.mxu1 %v3466_v42  ;;  %1891 = vmatprep.mubr.bf16.mxu0 %v3468_v43  ;;  %v3554_v39 = vld [vmem:[%s4314_s0 + $0x138] ss:$36 sps:$4 sm:$0xff]   ;;  %v3558_v42 = vld [vmem:[%s4314_s0 + $0x180] ss:$36 sps:$4 sm:$0xff]  }
  0x7d   : > { %3248 = vmatpush3.bf16.msra.mxu0 %v3496_v44  ;;  %3136 = vmatprep.subr.bf16.mxu1 %v3518_v45  ;;  %v3559_v43 = vld [vmem:[%s4314_s0 + $0x140] ss:$36 sps:$4 sm:$0xff]   ;;  %v3560_v44 = vld [vmem:[%s4314_s0 + $0x1cc] ss:$36 sps:$4 sm:$0xff]  }
  0x7e   : > { %3249 = vmatprep.subr.bf16.mxu0 %v3612_v8  ;;  %3137 = vmatpush3.bf16.msra.mxu1 %v3519_v46  ;;  %v3562_v45 = vld [vmem:[%s4314_s0 + $0x1c8] ss:$36 sps:$4 sm:$0xff]  }
  0x7f   : > { %3138 = vmatprep.subr.bf16.mxu1 %v3527_v50  ;;  %v3563_v46 = vld [vmem:[%s4314_s0 + $0x188] ss:$36 sps:$4 sm:$0xff]   ;;  %v3568_v50 = vld [vmem:[%s4314_s0 + $0x25c] ss:$36 sps:$4 sm:$0xff]  }
  0x81   : > { %3250 = vmatpush3.bf16.msra.mxu0 %v3511_v49  ;;  %v3567_v49 = vld [vmem:[%s4314_s0 + $0x1d0] ss:$36 sps:$4 sm:$0xff]  }
  0x82   : > { %3251 = vmatprep.subr.bf16.mxu0 %v3612_v8  ;;  %3139 = vmatpush3.bf16.msra.mxu1 %v3531_v54 }
  0x83   : > { %1764 = vmatmul.mubr.bf16.gmra.mrb[40].mxu1 %v3470_v47  ;;  %1892 = vmatmul.mubr.bf16.gmra.mrb[40].mxu0 %v3471_v48  ;;  %v3564_v47 = vld [vmem:[%s4314_s0 + $0x214] ss:$36 sps:$4 sm:$0xff]  }
  0x84   : > { %1771 = vmatprep.mubr.bf16.mxu1 %v3473_v51  ;;  %1899 = vmatprep.mubr.bf16.mxu0 %v3475_v52  ;;  %v3566_v48 = vld [vmem:[%s4314_s0 + $0x210] ss:$36 sps:$4 sm:$0xff]  }
  0x85   : > { %3252 = vmatpush3.bf16.msra.mxu0 %v3524_v53 }
  0x86   : > { %3253 = vmatprep.subr.bf16.mxu0 %v3612_v8 }
  0x89   : > { %3254 = vmatpush3.bf16.msra.mxu0 %v3534_v55  ;;  %v3570_v55 = vld [vmem:[%s4314_s0 + $0x258] ss:$36 sps:$4 sm:$0xff]  }
  0x8b   : > { %1772 = vmatmul.mubr.bf16.gmra.mrb[44].mxu1 %v3477_v56  ;;  %1900 = vmatmul.mubr.bf16.gmra.mrb[44].mxu0 %v3478_v57  ;;  %v3571_v56 = vld [vmem:[%s4314_s0 + $0x218] ss:$36 sps:$4 sm:$0xff]  }
  0x8c   : > { %1779 = vmatprep.mubr.bf16.mxu1 %v3481_v58  ;;  %1907 = vmatprep.mubr.bf16.mxu0 %v3483_v59 }
  0x93   : > { %1780 = vmatmul.mubr.bf16.gmra.mrb[48].mxu1 %v3485_v60  ;;  %1908 = vmatmul.mubr.bf16.gmra.mrb[48].mxu0 %v3486_v61  ;;  %v3572_v61 = vld [vmem:[%s4314_s0 + $0x2a4] ss:$36 sps:$4 sm:$0xff]  }
  0x94   : > { %1787 = vmatprep.mubr.bf16.mxu1 %v3488_v62  ;;  %1915 = vmatprep.mubr.bf16.mxu0 %v3490_v63 }
  0x9b   : > { %1788 = vmatmul.mubr.bf16.gmra.mrb[52].mxu1 %v3493_v0  ;;  %1916 = vmatmul.mubr.bf16.gmra.mrb[52].mxu0 %v3494_v1 }
  0x9c   : > { %1795 = vmatprep.mubr.bf16.mxu1 %v3497_v2  ;;  %1923 = vmatprep.mubr.bf16.mxu0 %v3499_v3 }
  0xa3   : > { %1796 = vmatmul.mubr.bf16.gmra.mrb[56].mxu1 %v3501_v4  ;;  %1924 = vmatmul.mubr.bf16.gmra.mrb[56].mxu0 %v3502_v5 }
  0xa4   : > { %1803 = vmatprep.mubr.bf16.mxu1 %v3505_v6  ;;  %1931 = vmatprep.mubr.bf16.mxu0 %v3507_v7  ;;  %v3574_v6 = vld [vmem:[%s4314_s0 + $0x2a0] ss:$36 sps:$4 sm:$0xff]  }
  0xa5   : > { %v3575_v7 = vld [vmem:[%s4314_s0 + $0x260] ss:$36 sps:$4 sm:$0xff]  }
  0xab   : > { %1804 = vmatmul.mubr.bf16.gmra.mrb[60].mxu1 %v3509_v9  ;;  %1932 = vmatmul.mubr.bf16.gmra.mrb[60].mxu0 %v3510_v10 }
  0xac   : > { %1811 = vmatprep.mubr.bf16.mxu1 %v3512_v11  ;;  %1939 = vmatprep.mubr.bf16.mxu0 %v3514_v12 }
  0xb3   : > { %1812 = vmatmul.mubr.bf16.gmra.mrb[64].mxu1 %v3516_v13  ;;  %1940 = vmatmul.mubr.bf16.gmra.mrb[64].mxu0 %v3517_v14  ;;  %v3576_v13 = vld [vmem:[%s4314_s0 + $0x2ec] ss:$36 sps:$4 sm:$0xff]   ;;  %v4087_v14 = vld [vmem:[%s256_s22] ss:$0 sm:$0xff]  ;;  %s3324_s22 = smul.u32 100, %s4323_s12 }
  0xb4   : > { %1819 = vmatprep.mubr.bf16.mxu1 %v3520_v15  ;;  %1947 = vmatprep.mubr.bf16.mxu0 %v3522_v16 }
  0xb5   : > { %s4268_s26 = scalar_lea.vmem %s4317_s3, %s3324_s22 }
  0xbb   : > { %1820 = vmatmul.mubr.bf16.gmra.mrb[68].mxu1 %v3525_v18  ;;  %1948 = vmatmul.mubr.bf16.gmra.mrb[68].mxu0 %v3526_v19 }
  0xbc   : > { %1827 = vmatprep.mubr.bf16.mxu1 %v2641_v20  ;;  %1955 = vmatprep.mubr.bf16.mxu0 %v3529_v21 }
  0xc3   : > { %1828 = vmatmul.mubr.bf16.gmra.mrb[72].mxu1 %v2640_v23  ;;  %1956 = vmatmul.mubr.bf16.gmra.mrb[72].mxu0 %v3533_v24 }
  0xc4   : > { %1963 = vmatprep.mubr.bf16.mxu0 %v2643_v25  ;;  %2003 = vmatprep.mubr.bf16.mxu1 %v3538_v26  ;;  %v3578_v25 = vld [vmem:[%s4314_s0 + $0x2e8] ss:$36 sps:$4 sm:$0xff]  }
  0xc5   : > { %v3579_v26 = vld [vmem:[%s4314_s0 + $0x2a8] ss:$36 sps:$4 sm:$0xff]  }
  0xcb   : > { %1964 = vmatmul.mubr.bf16.gmra.mrb[76].mxu0 %v2642_v28  ;;  %2004 = vmatmul.mubr.bf16.vlgmr.msra.gmra.mrb[76].mxu1 %v3536_v27 }
  0xcc   : > { %2011 = vmatprep.mubr.bf16.mxu1 %v3540_v29  ;;  %3255 = vmatprep.mubr.msk.bf16.mxu0 %vm3613_vm0, %v3612_v8 }
  0xd3   : > { %2012 = vmatmul.mubr.bf16.gmra.mrb[80].mxu1 %v3542_v30  ;;  %3256 = vmatmul.mubr.bf16.vlgmr.msra.gmra.mrb[80].mxu0 %v3543_v31  ;;  %v3580_v31 = vld [vmem:[%s4314_s0 + $0x334] ss:$36 sps:$4 sm:$0xff]  }
  0xd4   : > { %2019 = vmatprep.mubr.bf16.mxu1 %v3544_v32  ;;  %3259 = vmatprep.mubr.msk.bf16.mxu0 %vm3613_vm0, %v3612_v8 }
  0xdb   : > { %2020 = vmatmul.mubr.bf16.gmra.mrb[84].mxu1 %v3546_v33  ;;  %3260 = vmatmul.mubr.bf16.gmra.mrb[84].mxu0 %v3547_v34 }
  0xdc   : > { %2027 = vmatprep.mubr.bf16.mxu1 %v3548_v35  ;;  %3263 = vmatprep.mubr.msk.bf16.mxu0 %vm3613_vm0, %v3612_v8 }
  0xe3   : > { %2028 = vmatmul.mubr.bf16.gmra.mrb[88].mxu1 %v3550_v36  ;;  %3264 = vmatmul.mubr.bf16.gmra.mrb[88].mxu0 %v3551_v37 }
  0xe4   : > { %2035 = vmatprep.mubr.bf16.mxu1 %v3552_v38  ;;  %3267 = vmatprep.mubr.msk.bf16.mxu0 %vm3613_vm0, %v3612_v8  ;;  %v394_v38 = vld [vmem:[%s4314_s0 + $0x378] sm:$0xff] }
  0xeb   : > { %2036 = vmatmul.mubr.bf16.gmra.mrb[92].mxu1 %v3554_v39  ;;  %3268 = vmatmul.mubr.bf16.gmra.mrb[92].mxu0 %v3555_v40 }
  0xec   : > { %2043 = vmatprep.mubr.bf16.mxu1 %v3556_v41  ;;  %3271 = vmatprep.mubr.msk.bf16.mxu0 %vm3613_vm0, %v3612_v8 }
  0xf3   : > { %2044 = vmatmul.mubr.bf16.gmra.mrb[96].mxu1 %v3558_v42  ;;  %3272 = vmatmul.mubr.bf16.gmra.mrb[96].mxu0 %v3559_v43  ;;  %v3582_v43 = vld [vmem:[%s4314_s0 + $0x330] ss:$36 sps:$4 sm:$0xff]  }
  0xf4   : > { %2051 = vmatprep.mubr.bf16.mxu1 %v3560_v44  ;;  %3275 = vmatprep.mubr.msk.bf16.mxu0 %vm3613_vm0, %v3612_v8  ;;  %v3583_v44 = vld [vmem:[%s4314_s0 + $0x2f0] ss:$36 sps:$4 sm:$0xff]  }
  0xfb   : > { %2052 = vmatmul.mubr.bf16.gmra.mrb[100].mxu1 %v3562_v45  ;;  %3276 = vmatmul.mubr.bf16.gmra.mrb[100].mxu0 %v3563_v46 }
  0xfc   : > { %2059 = vmatprep.mubr.bf16.mxu1 %v3564_v47  ;;  %3279 = vmatprep.mubr.msk.bf16.mxu0 %vm3613_vm0, %v3612_v8 }
 0x103   : > { %2060 = vmatmul.mubr.bf16.gmra.mrb[104].mxu1 %v3566_v48  ;;  %3280 = vmatmul.mubr.bf16.gmra.mrb[104].mxu0 %v3567_v49  ;;  %v2645_v49 = vcombine.high %v394_v38, %v394_v38 }
 0x104   : > { %2067 = vmatprep.mubr.bf16.mxu1 %v3568_v50  ;;  %3283 = vmatprep.mubr.msk.bf16.mxu0 %vm3613_vm0, %v3612_v8 }
 0x106   : > { %v2858_v51 = vpop.f32.mrb[0].mxu0  ;;  %v2900_v52 = vpop.f32.mrb[0].mxu1 }
 0x107   : > { %v2859_v53 = vpop.f32.mrb[1].mxu0  ;;  %v2901_v54 = vpop.f32.mrb[1].mxu1 }
 0x108   : > { %v4059_v57 = vadd.f32 %v2859_v53, %v2858_v51  ;;  %v2861_v58 = vpop.f32.mrb[2].mxu0  ;;  %v4061_v59 = vadd.f32 %v2901_v54, %v2900_v52  ;;  %v2903_v60 = vpop.f32.mrb[2].mxu1 }
 0x109   : > { %v2862_v62 = vpop.f32.mrb[3].mxu0  ;;  %v2904_v63 = vpop.f32.mrb[3].mxu1 }
 0x10a   : > { %v4066_v0 = vadd.f32 %v2862_v62, %v2861_v58  ;;  %v4068_v1 = vadd.f32 %v2904_v63, %v2903_v60  ;;  %v2644_v62 = vcombine.low %v394_v38, %v394_v38  ;;  %v3586_v63 = vld [vmem:[%s4314_s0 + $0x338] ss:$36 sps:$4 sm:$0xff]   ;;  %v1598_v38 = vadd.f32 %v4059_v57, %v4087_v14 }
 0x10b   : > { %2068 = vmatmul.mubr.bf16.gmra.mrb[108].mxu1 %v3570_v55  ;;  %3284 = vmatmul.mubr.bf16.gmra.mrb[108].mxu0 %v3571_v56 }
 0x10c   : > { %2075 = vmatprep.mubr.bf16.mxu1 %v3572_v61  ;;  %3287 = vmatprep.mubr.msk.bf16.mxu0 %vm3613_vm0, %v3612_v8 }
 0x10e   : > { %v2864_v2 = vpop.f32.mrb[4].mxu0  ;;  %v2906_v3 = vpop.f32.mrb[4].mxu1 }
 0x10f   : > { %v2865_v4 = vpop.f32.mrb[5].mxu0  ;;  %v2907_v5 = vpop.f32.mrb[5].mxu1 }
 0x110   : > { %v4082_v9 = vadd.f32 %v2865_v4, %v2864_v2  ;;  %v2867_v10 = vpop.f32.mrb[6].mxu0  ;;  %v2908_v11 = vadd.f32 %v2907_v5, %v2906_v3  ;;  %v2909_v12 = vpop.f32.mrb[6].mxu1 }
 0x111   : > { %v2868_v15 = vpop.f32.mrb[7].mxu0  ;;  %v2910_v16 = vpop.f32.mrb[7].mxu1 }
 0x112   : > { %v4090_v17 = vadd.f32 %v2908_v11, %v4087_v14  ;;  %v4092_v18 = vadd.f32 %v2868_v15, %v2867_v10  ;;  %v2911_v19 = vadd.f32 %v2910_v16, %v2909_v12  ;;  %v1606_v57 = vadd.f32 %v4082_v9, %v4087_v14 }
 0x113   : > { %2076 = vmatmul.mubr.bf16.gmra.mrb[112].mxu1 %v3574_v6  ;;  %3288 = vmatmul.mubr.bf16.gmra.mrb[112].mxu0 %v3575_v7 }
 0x114   : > { %v4095_v20 = vadd.f32 %v2911_v19, %v4087_v14  ;;  %2083 = vmatprep.mubr.bf16.mxu1 %v3576_v13  ;;  %3291 = vmatprep.mubr.msk.bf16.mxu0 %vm3613_vm0, %v3612_v8 }
 0x116   : > { %v2870_v21 = vpop.f32.mrb[8].mxu0  ;;  %v2912_v22 = vpop.f32.mrb[8].mxu1 }
 0x117   : > { %v2871_v23 = vpop.f32.mrb[9].mxu0  ;;  %v2913_v24 = vpop.f32.mrb[9].mxu1 }
 0x118   : > { %v4105_v27 = vadd.f32 %v2871_v23, %v2870_v21  ;;  %v2873_v28 = vpop.f32.mrb[10].mxu0  ;;  %v2914_v29 = vadd.f32 %v2913_v24, %v2912_v22  ;;  %v2915_v30 = vpop.f32.mrb[10].mxu1  ;;  %v3587_v22 = vld [vmem:[%s4314_s0 + $0x380] ss:$0 sps:$4 sm:$0xff]  }
 0x119   : > { %v2874_v32 = vpop.f32.mrb[11].mxu0  ;;  %v2916_v33 = vpop.f32.mrb[11].mxu1 }
 0x11a   : > { %v4111_v34 = vadd.f32 %v2914_v29, %v4087_v14  ;;  %v4113_v35 = vadd.f32 %v2874_v32, %v2873_v28  ;;  %v2917_v36 = vadd.f32 %v2916_v33, %v2915_v30 }
 0x11b   : > { %2084 = vmatmul.mubr.bf16.gmra.mrb[116].mxu1 %v3578_v25  ;;  %3292 = vmatmul.mubr.bf16.gmra.mrb[116].mxu0 %v3579_v26 }
 0x11c   : > { %v4116_v37 = vadd.f32 %v2917_v36, %v4087_v14  ;;  %2091 = vmatprep.mubr.bf16.mxu1 %v3580_v31  ;;  %3295 = vmatprep.mubr.msk.bf16.mxu0 %vm3613_vm0, %v3612_v8 }
 0x11e   : > { %v2876_v39 = vpop.f32.mrb[12].mxu0  ;;  %v2918_v40 = vpop.f32.mrb[12].mxu1 }
 0x11f   : > { %v2877_v41 = vpop.f32.mrb[13].mxu0  ;;  %v2919_v42 = vpop.f32.mrb[13].mxu1 }
 0x120   : > { %v4129_v45 = vadd.f32 %v2877_v41, %v2876_v39  ;;  %v2879_v46 = vpop.f32.mrb[14].mxu0  ;;  %v2920_v47 = vadd.f32 %v2919_v42, %v2918_v40  ;;  %v2921_v48 = vpop.f32.mrb[14].mxu1 }
 0x121   : > { %v2880_v50 = vpop.f32.mrb[15].mxu0  ;;  %v2922_v51 = vpop.f32.mrb[15].mxu1 }
 0x122   : > { %v4132_v52 = vadd.f32 %v2920_v47, %v4087_v14  ;;  %v4134_v53 = vadd.f32 %v2880_v50, %v2879_v46  ;;  %v2923_v54 = vadd.f32 %v2922_v51, %v2921_v48  ;;  %v1601_v46 = vadd.f32 %v4066_v0, %v4087_v14 }
 0x123   : > { %2092 = vmatmul.mubr.bf16.gmra.mrb[120].mxu1 %v3582_v43  ;;  %3296 = vmatmul.mubr.bf16.gmra.mrb[120].mxu0 %v3583_v44 }
 0x124   : > { %v4137_v55 = vadd.f32 %v2923_v54, %v4087_v14  ;;  %2099 = vmatprep.mubr.bf16.mxu1 %v2645_v49  ;;  %3299 = vmatprep.mubr.msk.bf16.mxu0 %vm3613_vm0, %v3612_v8 }
 0x126   : > { %v2882_v56 = vpop.f32.mrb[16].mxu0  ;;  %v2924_v58 = vpop.f32.mrb[16].mxu1 }
 0x127   : > { %v2883_v60 = vpop.f32.mrb[17].mxu0  ;;  %v2925_v61 = vpop.f32.mrb[17].mxu1 }
 0x128   : > { %v4144_v2 = vadd.f32 %v2883_v60, %v2882_v56  ;;  %v2885_v3 = vpop.f32.mrb[18].mxu0  ;;  %v2926_v4 = vadd.f32 %v2925_v61, %v2924_v58  ;;  %v2927_v5 = vpop.f32.mrb[18].mxu1 }
 0x129   : > { %v2886_v6 = vpop.f32.mrb[19].mxu0  ;;  %v2928_v7 = vpop.f32.mrb[19].mxu1 }
 0x12a   : > { %v4147_v10 = vadd.f32 %v2926_v4, %v4087_v14  ;;  %v4149_v11 = vadd.f32 %v2886_v6, %v2885_v3  ;;  %v2929_v12 = vadd.f32 %v2928_v7, %v2927_v5  ;;  %v1609_v3 = vadd.f32 %v4092_v18, %v4087_v14 }
 0x12b   : > { %2100 = vmatmul.mubr.bf16.gmra.mrb[124].mxu1 %v2644_v62  ;;  %3300 = vmatmul.mubr.bf16.gmra.mrb[124].mxu0 %v3586_v63 }
 0x12c   : > { %v4152_v13 = vadd.f32 %v2929_v12, %v4087_v14  ;;  %3303 = vmatprep.mubr.msk.bf16.mxu0 %vm3613_vm0, %v3612_v8 }
 0x12e   : > { %v2888_v15 = vpop.f32.mrb[20].mxu0  ;;  %v2930_v16 = vpop.f32.mrb[20].mxu1 }
 0x12f   : > { %v2889_v19 = vpop.f32.mrb[21].mxu0  ;;  %v2931_v21 = vpop.f32.mrb[21].mxu1 }
 0x130   : > { %v4159_v23 = vadd.f32 %v2889_v19, %v2888_v15  ;;  %v2891_v24 = vpop.f32.mrb[22].mxu0  ;;  %v2932_v25 = vadd.f32 %v2931_v21, %v2930_v16  ;;  %v2933_v26 = vpop.f32.mrb[22].mxu1 }
 0x131   : > { %v2892_v28 = vpop.f32.mrb[23].mxu0  ;;  %v2934_v29 = vpop.f32.mrb[23].mxu1 }
 0x132   : > { %v4162_v30 = vadd.f32 %v2932_v25, %v4087_v14  ;;  %v4164_v31 = vadd.f32 %v2892_v28, %v2891_v24  ;;  %v1614_v24 = vadd.f32 %v4105_v27, %v4087_v14  ;;  %v1617_v29 = vadd.f32 %v4113_v35, %v4087_v14 }
 0x133   : > { %3304 = vmatmul.mubr.bf16.gmra.mrb[128].mxu0 %v3587_v22 }
 0x136   : > { %v2894_v8 = vpop.f32.mrb[24].mxu0  ;;  %v2952_v32 = vpop.f32.mrb[24].mxu1 }
 0x137   : > { %v2895_v33 = vpop.f32.mrb[25].mxu0  ;;  %v2953_v36 = vpop.f32.mrb[25].mxu1 }
 0x138   : > { %v4168_v39 = vadd.f32 %v2895_v33, %v2894_v8  ;;  %v2954_v40 = vadd.f32 %v2953_v36, %v2952_v32  ;;  %v2897_v41 = vpop.f32.mrb[26].mxu0  ;;  %v2955_v42 = vpop.f32.mrb[26].mxu1 }
 0x139   : > { %v2898_v43 = vpop.f32.mrb[27].mxu0  ;;  %v2956_v44 = vpop.f32.mrb[27].mxu1 }
 0x13a   : > { %v1734_v47 = vadd.f32 %v2954_v40, %v1598_v38  ;;  %v4172_v48 = vadd.f32 %v2898_v43, %v2897_v41  ;;  %v2957_v49 = vadd.f32 %v2956_v44, %v2955_v42 }
 0x13c   : > { %v1737_v50 = vadd.f32 %v2957_v49, %v1601_v46 }
 0x13e   : > { %v2958_v51 = vpop.f32.mrb[28].mxu1  ;;  %v3046_v54 = vpop.f32.mrb[28].mxu0 }
 0x13f   : > { %v2959_v56 = vpop.f32.mrb[29].mxu1  ;;  %v3047_v58 = vpop.f32.mrb[29].mxu0 }
 0x140   : > { %v2960_v60 = vadd.f32 %v2959_v56, %v2958_v51  ;;  %v3048_v61 = vadd.f32 %v3047_v58, %v3046_v54  ;;  %v2961_v62 = vpop.f32.mrb[30].mxu1  ;;  %v3049_v63 = vpop.f32.mrb[30].mxu0  ;;  %v1625_v54 = vadd.f32 %v4134_v53, %v4087_v14 }
 0x141   : > { %v2962_v0 = vpop.f32.mrb[31].mxu1  ;;  %v3050_v4 = vpop.f32.mrb[31].mxu0 }
 0x142   : > { %v1742_v5 = vadd.f32 %v2960_v60, %v1606_v57  ;;  %v4178_v6 = vadd.f32 %v3048_v61, %v1734_v47  ;;  %v2963_v7 = vadd.f32 %v2962_v0, %v2961_v62  ;;  %v3051_v12 = vadd.f32 %v3050_v4, %v3049_v63 }
 0x143   : > { %v1622_v47 = vadd.f32 %v4129_v45, %v4087_v14 }
 0x144   : > { %v1745_v15 = vadd.f32 %v2963_v7, %v1609_v3  ;;  %v4180_v16 = vadd.f32 %v3051_v12, %v1737_v50  ;;  %v1630_v7 = vadd.f32 %v4144_v2, %v4087_v14 }
 0x146   : > { %v2964_v19 = vpop.f32.mrb[32].mxu1  ;;  %v3052_v21 = vpop.f32.mrb[32].mxu0 }
 0x147   : > { %v2965_v9 = vpop.f32.mrb[33].mxu1  ;;  %v3053_v22 = vpop.f32.mrb[33].mxu0 }
 0x148   : > { %v2966_v25 = vadd.f32 %v2965_v9, %v2964_v19  ;;  %v3054_v26 = vadd.f32 %v3053_v22, %v3052_v21  ;;  %v2967_v18 = vpop.f32.mrb[34].mxu1  ;;  %v3055_v28 = vpop.f32.mrb[34].mxu0  ;;  %v1633_v21 = vadd.f32 %v4149_v11, %v4087_v14 }
 0x149   : > { %v2968_v8 = vpop.f32.mrb[35].mxu1  ;;  %v3056_v32 = vpop.f32.mrb[35].mxu0 }
 0x14a   : > { %v1750_v33 = vadd.f32 %v2966_v25, %v1614_v24  ;;  %v4186_v36 = vadd.f32 %v3054_v26, %v1742_v5  ;;  %v2969_v38 = vadd.f32 %v2968_v8, %v2967_v18  ;;  %v3057_v40 = vadd.f32 %v3056_v32, %v3055_v28 }
 0x14c   : > { %v1753_v41 = vadd.f32 %v2969_v38, %v1617_v29  ;;  %v4188_v42 = vadd.f32 %v3057_v40, %v1745_v15  ;;  %v1638_v38 = vadd.f32 %v4159_v23, %v4087_v14 }
 0x14e   : > { %v2970_v43 = vpop.f32.mrb[36].mxu1  ;;  %v3058_v44 = vpop.f32.mrb[36].mxu0 }
 0x14f   : > { %v2971_v27 = vpop.f32.mrb[37].mxu1  ;;  %v3059_v46 = vpop.f32.mrb[37].mxu0 }
 0x150   : > { %v2972_v49 = vadd.f32 %v2971_v27, %v2970_v43  ;;  %v3060_v50 = vadd.f32 %v3059_v46, %v3058_v44  ;;  %v2973_v35 = vpop.f32.mrb[38].mxu1  ;;  %v3061_v51 = vpop.f32.mrb[38].mxu0  ;;  %v1641_v44 = vadd.f32 %v4164_v31, %v4087_v14 }
 0x151   : > { %v2974_v56 = vpop.f32.mrb[39].mxu1  ;;  %v3062_v58 = vpop.f32.mrb[39].mxu0 }
 0x152   : > { %v1758_v57 = vadd.f32 %v2972_v49, %v1622_v47  ;;  %v4194_v60 = vadd.f32 %v3060_v50, %v1750_v33  ;;  %v2975_v61 = vadd.f32 %v2974_v56, %v2973_v35  ;;  %v3063_v62 = vadd.f32 %v3062_v58, %v3061_v51 }
 0x154   : > { %v1761_v63 = vadd.f32 %v2975_v61, %v1625_v54  ;;  %v4196_v3 = vadd.f32 %v3063_v62, %v1753_v41  ;;  %v1646_v61 = vadd.f32 %v4168_v39, %v4087_v14 }
 0x156   : > { %v2976_v0 = vpop.f32.mrb[40].mxu1  ;;  %v3064_v4 = vpop.f32.mrb[40].mxu0 }
 0x157   : > { %v2977_v45 = vpop.f32.mrb[41].mxu1  ;;  %v3065_v5 = vpop.f32.mrb[41].mxu0 }
 0x158   : > { %v2978_v12 = vadd.f32 %v2977_v45, %v2976_v0  ;;  %v3066_v15 = vadd.f32 %v3065_v5, %v3064_v4  ;;  %v2979_v53 = vpop.f32.mrb[42].mxu1  ;;  %v3067_v19 = vpop.f32.mrb[42].mxu0  ;;  %v1649_v4 = vadd.f32 %v4172_v48, %v4087_v14 }
 0x159   : > { %v2980_v9 = vpop.f32.mrb[43].mxu1  ;;  %v3068_v22 = vpop.f32.mrb[43].mxu0 }
 0x15a   : > { %v1766_v24 = vadd.f32 %v2978_v12, %v1630_v7  ;;  %v4202_v25 = vadd.f32 %v3066_v15, %v1758_v57  ;;  %v2981_v26 = vadd.f32 %v2980_v9, %v2979_v53  ;;  %v3069_v18 = vadd.f32 %v3068_v22, %v3067_v19 }
 0x15c   : > { %v1769_v28 = vadd.f32 %v2981_v26, %v1633_v21  ;;  %v4204_v29 = vadd.f32 %v3069_v18, %v1761_v63  ;;  %v1654_v26 = vadd.f32 %v4061_v59, %v4087_v14 }
 0x15e   : > { %v2982_v8 = vpop.f32.mrb[44].mxu1  ;;  %v3070_v32 = vpop.f32.mrb[44].mxu0 }
 0x15f   : > { %v2983_v2 = vpop.f32.mrb[45].mxu1  ;;  %v3071_v33 = vpop.f32.mrb[45].mxu0 }
 0x160   : > { %v2984_v40 = vadd.f32 %v2983_v2, %v2982_v8  ;;  %v3072_v41 = vadd.f32 %v3071_v33, %v3070_v32  ;;  %v2985_v11 = vpop.f32.mrb[46].mxu1  ;;  %v3073_v43 = vpop.f32.mrb[46].mxu0  ;;  %v1657_v32 = vadd.f32 %v4068_v1, %v4087_v14 }
 0x161   : > { %v2986_v27 = vpop.f32.mrb[47].mxu1  ;;  %v3074_v46 = vpop.f32.mrb[47].mxu0 }
 0x162   : > { %v1774_v47 = vadd.f32 %v2984_v40, %v1638_v38  ;;  %v4210_v49 = vadd.f32 %v3072_v41, %v1766_v24  ;;  %v2987_v50 = vadd.f32 %v2986_v27, %v2985_v11  ;;  %v3075_v35 = vadd.f32 %v3074_v46, %v3073_v43 }
 0x164   : > { %v1777_v51 = vadd.f32 %v2987_v50, %v1641_v44  ;;  %v4212_v54 = vadd.f32 %v3075_v35, %v1769_v28 }
 0x166   : > { %v2988_v56 = vpop.f32.mrb[48].mxu1  ;;  %v3076_v58 = vpop.f32.mrb[48].mxu0 }
 0x167   : > { %v2989_v23 = vpop.f32.mrb[49].mxu1  ;;  %v3077_v57 = vpop.f32.mrb[49].mxu0 }
 0x168   : > { %v2990_v62 = vadd.f32 %v2989_v23, %v2988_v56  ;;  %v3078_v63 = vadd.f32 %v3077_v57, %v3076_v58  ;;  %v2991_v31 = vpop.f32.mrb[50].mxu1  ;;  %v3079_v0 = vpop.f32.mrb[50].mxu0 }
 0x169   : > { %v2992_v45 = vpop.f32.mrb[51].mxu1  ;;  %v3080_v5 = vpop.f32.mrb[51].mxu0 }
 0x16a   : > { %v1782_v7 = vadd.f32 %v2990_v62, %v1646_v61  ;;  %v4218_v12 = vadd.f32 %v3078_v63, %v1774_v47  ;;  %v2993_v15 = vadd.f32 %v2992_v45, %v2991_v31  ;;  %v3081_v53 = vadd.f32 %v3080_v5, %v3079_v0 }
 0x16c   : > { %v1785_v19 = vadd.f32 %v2993_v15, %v1649_v4  ;;  %v4220_v21 = vadd.f32 %v3081_v53, %v1777_v51 }
 0x16e   : > { %v2994_v9 = vpop.f32.mrb[52].mxu1  ;;  %v3082_v22 = vpop.f32.mrb[52].mxu0 }
 0x16f   : > { %v2995_v39 = vpop.f32.mrb[53].mxu1  ;;  %v3083_v24 = vpop.f32.mrb[53].mxu0 }
 0x170   : > { %v2996_v18 = vadd.f32 %v2995_v39, %v2994_v9  ;;  %v3084_v28 = vadd.f32 %v3083_v24, %v3082_v22  ;;  %v2997_v48 = vpop.f32.mrb[54].mxu1  ;;  %v3085_v8 = vpop.f32.mrb[54].mxu0 }
 0x171   : > { %v2998_v2 = vpop.f32.mrb[55].mxu1  ;;  %v3086_v33 = vpop.f32.mrb[55].mxu0 }
 0x172   : > { %v1790_v38 = vadd.f32 %v2996_v18, %v1654_v26  ;;  %v4226_v40 = vadd.f32 %v3084_v28, %v1782_v7  ;;  %v2999_v41 = vadd.f32 %v2998_v2, %v2997_v48  ;;  %v3087_v11 = vadd.f32 %v3086_v33, %v3085_v8 }
 0x174   : > { %v1793_v43 = vadd.f32 %v2999_v41, %v1657_v32  ;;  %v4228_v44 = vadd.f32 %v3087_v11, %v1785_v19 }
 0x176   : > { %v3000_v27 = vpop.f32.mrb[56].mxu1  ;;  %v3088_v46 = vpop.f32.mrb[56].mxu0 }
 0x177   : > { %v3001_v59 = vpop.f32.mrb[57].mxu1  ;;  %v3089_v47 = vpop.f32.mrb[57].mxu0 }
 0x178   : > { %v3002_v50 = vadd.f32 %v3001_v59, %v3000_v27  ;;  %v3090_v35 = vadd.f32 %v3089_v47, %v3088_v46  ;;  %v3003_v51 = vpop.f32.mrb[58].mxu1  ;;  %v3091_v56 = vpop.f32.mrb[58].mxu0 }
 0x179   : > { %v3004_v58 = vpop.f32.mrb[59].mxu1  ;;  %v3092_v1 = vpop.f32.mrb[59].mxu0 }
 0x17a   : > { %v1798_v14 = vadd.f32 %v3002_v50, %v4090_v17  ;;  %v4231_v23 = vadd.f32 %v3090_v35, %v1790_v38  ;;  %v3005_v57 = vadd.f32 %v3004_v58, %v3003_v51  ;;  %v3093_v61 = vadd.f32 %v3092_v1, %v3091_v56 }
 0x17c   : > { %v1801_v62 = vadd.f32 %v3005_v57, %v4095_v20  ;;  %v4234_v63 = vadd.f32 %v3093_v61, %v1793_v43 }
 0x17e   : > { %v3006_v31 = vpop.f32.mrb[60].mxu1  ;;  %v3094_v0 = vpop.f32.mrb[60].mxu0 }
 0x17f   : > { %v3007_v4 = vpop.f32.mrb[61].mxu1  ;;  %v3095_v45 = vpop.f32.mrb[61].mxu0 }
 0x180   : > { %v3008_v5 = vadd.f32 %v3007_v4, %v3006_v31  ;;  %v3096_v7 = vadd.f32 %v3095_v45, %v3094_v0  ;;  %v3009_v15 = vpop.f32.mrb[62].mxu1  ;;  %v3097_v53 = vpop.f32.mrb[62].mxu0 }
 0x181   : > { %v3010_v19 = vpop.f32.mrb[63].mxu1  ;;  %v3098_v9 = vpop.f32.mrb[63].mxu0 }
 0x182   : > { %v1806_v17 = vadd.f32 %v3008_v5, %v4111_v34  ;;  %v4237_v22 = vadd.f32 %v3096_v7, %v1798_v14  ;;  %v3011_v39 = vadd.f32 %v3010_v19, %v3009_v15  ;;  %v3099_v24 = vadd.f32 %v3098_v9, %v3097_v53 }
 0x184   : > { %v1809_v20 = vadd.f32 %v3011_v39, %v4116_v37  ;;  %v4240_v26 = vadd.f32 %v3099_v24, %v1801_v62 }
 0x186   : > { %v3012_v18 = vpop.f32.mrb[64].mxu1  ;;  %v3100_v28 = vpop.f32.mrb[64].mxu0 }
 0x187   : > { %v3013_v48 = vpop.f32.mrb[65].mxu1  ;;  %v3101_v8 = vpop.f32.mrb[65].mxu0 }
 0x188   : > { %v3014_v32 = vadd.f32 %v3013_v48, %v3012_v18  ;;  %v3102_v2 = vadd.f32 %v3101_v8, %v3100_v28  ;;  %v3015_v33 = vpop.f32.mrb[66].mxu1  ;;  %v3103_v38 = vpop.f32.mrb[66].mxu0 }
 0x189   : > { %v3016_v41 = vpop.f32.mrb[67].mxu1  ;;  %v3104_v11 = vpop.f32.mrb[67].mxu0 }
 0x18a   : > { %v1814_v34 = vadd.f32 %v3014_v32, %v4132_v52  ;;  %v4243_v43 = vadd.f32 %v3102_v2, %v1806_v17  ;;  %v3017_v27 = vadd.f32 %v3016_v41, %v3015_v33  ;;  %v3105_v46 = vadd.f32 %v3104_v11, %v3103_v38 }
 0x18c   : > { %v1817_v37 = vadd.f32 %v3017_v27, %v4137_v55  ;;  %v4246_v59 = vadd.f32 %v3105_v46, %v1809_v20 }
 0x18e   : > { %v3018_v47 = vpop.f32.mrb[68].mxu1  ;;  %v3106_v50 = vpop.f32.mrb[68].mxu0 }
 0x18f   : > { %v3019_v35 = vpop.f32.mrb[69].mxu1  ;;  %v3107_v51 = vpop.f32.mrb[69].mxu0 }
 0x190   : > { %v3020_v56 = vadd.f32 %v3019_v35, %v3018_v47  ;;  %v3108_v58 = vadd.f32 %v3107_v51, %v3106_v50  ;;  %v3021_v1 = vpop.f32.mrb[70].mxu1  ;;  %v3109_v14 = vpop.f32.mrb[70].mxu0 }
 0x191   : > { %v3022_v57 = vpop.f32.mrb[71].mxu1  ;;  %v3110_v61 = vpop.f32.mrb[71].mxu0 }
 0x192   : > { %v1822_v52 = vadd.f32 %v3020_v56, %v4147_v10  ;;  %v4249_v62 = vadd.f32 %v3108_v58, %v1814_v34  ;;  %v3023_v31 = vadd.f32 %v3022_v57, %v3021_v1  ;;  %v3111_v0 = vadd.f32 %v3110_v61, %v3109_v14 }
 0x194   : > { %v1825_v55 = vadd.f32 %v3023_v31, %v4152_v13  ;;  %v4252_v4 = vadd.f32 %v3111_v0, %v1817_v37 }
 0x196   : > { %v3024_v45 = vpop.f32.mrb[72].mxu1  ;;  %v3112_v5 = vpop.f32.mrb[72].mxu0 }
 0x197   : > { %v3025_v7 = vpop.f32.mrb[73].mxu1  ;;  %v3113_v15 = vpop.f32.mrb[73].mxu0 }
 0x198   : > { %v3026_v53 = vadd.f32 %v3025_v7, %v3024_v45  ;;  %v3114_v19 = vadd.f32 %v3113_v15, %v3112_v5  ;;  %v3115_v9 = vpop.f32.mrb[74].mxu0  ;;  %v3027_v17 = vpop.f32.mrb[74].mxu1 }
 0x199   : > { %v3116_v39 = vpop.f32.mrb[75].mxu0  ;;  %v3028_v24 = vpop.f32.mrb[75].mxu1 }
 0x19a   : > { %v1830_v10 = vadd.f32 %v3026_v53, %v4162_v30  ;;  %v4255_v20 = vadd.f32 %v3114_v19, %v1822_v52  ;;  %v3117_v18 = vadd.f32 %v3116_v39, %v3115_v9 }
 0x19c   : > { %v4257_v28 = vadd.f32 %v3117_v18, %v1825_v55 }
 0x19e   : > { %v3118_v13 = vpop.f32.mrb[76].mxu0  ;;  %v3140_v48 = vpop.f32.mrb[76].mxu1 }
 0x19f   : > { %v3119_v8 = vpop.f32.mrb[77].mxu0  ;;  %v3141_v32 = vpop.f32.mrb[77].mxu1 }
 0x1a0   : > { %v3120_v2 = vadd.f32 %v3119_v8, %v3118_v13  ;;  %v3142_v33 = vadd.f32 %v3141_v32, %v3140_v48  ;;  %v3121_v38 = vpop.f32.mrb[78].mxu0  ;;  %v3143_v41 = vpop.f32.mrb[78].mxu1 }
 0x1a1   : > { %v3122_v11 = vpop.f32.mrb[79].mxu0  ;;  %v3144_v34 = vpop.f32.mrb[79].mxu1 }
 0x1a2   : > { %v4259_v27 = vadd.f32 %v3120_v2, %v1830_v10  ;;  %v3145_v46 = vadd.f32 %v3144_v34, %v3143_v41  ;;  %v2006_v30 = vadd.f32 %v3142_v33, %v4178_v6 }
 0x1a4   : > { %v2009_v37 = vadd.f32 %v3145_v46, %v4180_v16 }
 0x1a6   : > { %v3146_v47 = vpop.f32.mrb[80].mxu1  ;;  %v2141_v50 = vpop.f32.mrb[80].mxu0 }
 0x1a7   : > { %v2142_v35 = vadd.f32 %v2141_v50, %v2006_v30  ;;  %v3147_v51 = vpop.f32.mrb[81].mxu1  ;;  %v3257_v56 = vpop.f32.mrb[81].mxu0 }
 0x1a8   : > { %v3148_v58 = vadd.f32 %v3147_v51, %v3146_v47  ;;  %v3149_v1 = vpop.f32.mrb[82].mxu1  ;;  %v2144_v14 = vpop.f32.mrb[82].mxu0 }
 0x1a9   : > { %v2145_v57 = vadd.f32 %v2144_v14, %v2009_v37  ;;  %v3150_v61 = vpop.f32.mrb[83].mxu1  ;;  %v3258_v52 = vpop.f32.mrb[83].mxu0  ;;  %v2243_v55 = vmax.f32 %v2142_v35, 0.0 }
 0x1aa   : > { %v3151_v31 = vadd.f32 %v3150_v61, %v3149_v1  ;;  %v2014_v0 = vadd.f32 %v3148_v58, %v4186_v36 }
 0x1ab   : > { %v2244_v45 = vmax.f32 %v2145_v57, 0.0 }
 0x1ac   : > { %v2017_v6 = vadd.f32 %v3151_v31, %v4188_v42 }
 0x1ad   : > { %v2774_v16 = vpack.c.bf16 %v2244_v45, %v2243_v55 }
 0x1ae   : > { %v3152_v5 = vpop.f32.mrb[84].mxu1  ;;  %v2149_v7 = vpop.f32.mrb[84].mxu0 }
 0x1af   : > { %2775 = vst [vmem:[%s4268_s26] sm:$0xff] %v2774_v16   ;;  %v2150_v15 = vadd.f32 %v2149_v7, %v2014_v0  ;;  %v3153_v53 = vpop.f32.mrb[85].mxu1  ;;  %v3261_v19 = vpop.f32.mrb[85].mxu0 }
 0x1b0   : > { %v3154_v9 = vadd.f32 %v3153_v53, %v3152_v5  ;;  %v3155_v36 = vpop.f32.mrb[86].mxu1  ;;  %v2152_v17 = vpop.f32.mrb[86].mxu0 }
 0x1b1   : > { %v2153_v39 = vadd.f32 %v2152_v17, %v2017_v6  ;;  %v3156_v24 = vpop.f32.mrb[87].mxu1  ;;  %v3262_v10 = vpop.f32.mrb[87].mxu0  ;;  %v2245_v48 = vmax.f32 %v2150_v15, 0.0 }
 0x1b2   : > { %v3157_v18 = vadd.f32 %v3156_v24, %v3155_v36  ;;  %v2022_v13 = vadd.f32 %v3154_v9, %v4194_v60 }
 0x1b3   : > { %v2246_v8 = vmax.f32 %v2153_v39, 0.0 }
 0x1b4   : > { %v2025_v42 = vadd.f32 %v3157_v18, %v4196_v3 }
 0x1b5   : > { %v2779_v32 = vpack.c.bf16 %v2246_v8, %v2245_v48 }
 0x1b6   : > { %v3158_v2 = vpop.f32.mrb[88].mxu1  ;;  %v2157_v33 = vpop.f32.mrb[88].mxu0 }
 0x1b7   : > { %2831 = vst [vmem:[%s4268_s26 + $0x8] sm:$0xff] %v2779_v32   ;;  %v2158_v38 = vadd.f32 %v2157_v33, %v2022_v13  ;;  %v3159_v41 = vpop.f32.mrb[89].mxu1  ;;  %v3265_v11 = vpop.f32.mrb[89].mxu0 }
 0x1b8   : > { %v3160_v34 = vadd.f32 %v3159_v41, %v3158_v2  ;;  %v3161_v46 = vpop.f32.mrb[90].mxu1  ;;  %v2160_v30 = vpop.f32.mrb[90].mxu0 }
 0x1b9   : > { %v2161_v37 = vadd.f32 %v2160_v30, %v2025_v42  ;;  %v3162_v47 = vpop.f32.mrb[91].mxu1  ;;  %v3266_v50 = vpop.f32.mrb[91].mxu0  ;;  %v2247_v51 = vmax.f32 %v2158_v38, 0.0 }
 0x1ba   : > { %v3163_v35 = vadd.f32 %v3162_v47, %v3161_v46  ;;  %v2030_v60 = vadd.f32 %v3160_v34, %v4202_v25 }
 0x1bb   : > { %v2248_v56 = vmax.f32 %v2161_v37, 0.0 }
 0x1bc   : > { %v2033_v3 = vadd.f32 %v3163_v35, %v4204_v29 }
 0x1bd   : > { %v2784_v58 = vpack.c.bf16 %v2248_v56, %v2247_v51 }
 0x1be   : > { %v3164_v1 = vpop.f32.mrb[92].mxu1  ;;  %v2165_v14 = vpop.f32.mrb[92].mxu0 }
 0x1bf   : > { %2832 = vst [vmem:[%s4268_s26 + $0x10] sm:$0xff] %v2784_v58   ;;  %v2166_v57 = vadd.f32 %v2165_v14, %v2030_v60  ;;  %v3165_v61 = vpop.f32.mrb[93].mxu1  ;;  %v3269_v52 = vpop.f32.mrb[93].mxu0 }
 0x1c0   : > { %v3166_v31 = vadd.f32 %v3165_v61, %v3164_v1  ;;  %v3167_v0 = vpop.f32.mrb[94].mxu1  ;;  %v2168_v55 = vpop.f32.mrb[94].mxu0 }
 0x1c1   : > { %v2169_v45 = vadd.f32 %v2168_v55, %v2033_v3  ;;  %v3168_v6 = vpop.f32.mrb[95].mxu1  ;;  %v3270_v16 = vpop.f32.mrb[95].mxu0  ;;  %v2249_v7 = vmax.f32 %v2166_v57, 0.0 }
 0x1c2   : > { %v3169_v5 = vadd.f32 %v3168_v6, %v3167_v0  ;;  %v2038_v25 = vadd.f32 %v3166_v31, %v4210_v49 }
 0x1c3   : > { %v2250_v15 = vmax.f32 %v2169_v45, 0.0 }
 0x1c4   : > { %v2041_v29 = vadd.f32 %v3169_v5, %v4212_v54 }
 0x1c5   : > { %v2789_v53 = vpack.c.bf16 %v2250_v15, %v2249_v7 }
 0x1c6   : > { %v3170_v19 = vpop.f32.mrb[96].mxu1  ;;  %v2173_v9 = vpop.f32.mrb[96].mxu0 }
 0x1c7   : > { %2833 = vst [vmem:[%s4268_s26 + $0x18] sm:$0xff] %v2789_v53   ;;  %v2174_v36 = vadd.f32 %v2173_v9, %v2038_v25  ;;  %v3171_v17 = vpop.f32.mrb[97].mxu1  ;;  %v3273_v39 = vpop.f32.mrb[97].mxu0 }
 0x1c8   : > { %v3172_v24 = vadd.f32 %v3171_v17, %v3170_v19  ;;  %v3173_v10 = vpop.f32.mrb[98].mxu1  ;;  %v2176_v18 = vpop.f32.mrb[98].mxu0 }
 0x1c9   : > { %v2177_v13 = vadd.f32 %v2176_v18, %v2041_v29  ;;  %v3174_v48 = vpop.f32.mrb[99].mxu1  ;;  %v3274_v8 = vpop.f32.mrb[99].mxu0  ;;  %v2251_v32 = vmax.f32 %v2174_v36, 0.0 }
 0x1ca   : > { %v3175_v42 = vadd.f32 %v3174_v48, %v3173_v10  ;;  %v2046_v49 = vadd.f32 %v3172_v24, %v4218_v12 }
 0x1cb   : > { %v2252_v2 = vmax.f32 %v2177_v13, 0.0 }
 0x1cc   : > { %v2049_v54 = vadd.f32 %v3175_v42, %v4220_v21 }
 0x1cd   : > { %v2794_v33 = vpack.c.bf16 %v2252_v2, %v2251_v32 }
 0x1ce   : > { %v3176_v38 = vpop.f32.mrb[100].mxu1  ;;  %v2181_v41 = vpop.f32.mrb[100].mxu0 }
 0x1cf   : > { %2834 = vst [vmem:[%s4268_s26 + $0x20] sm:$0xff] %v2794_v33   ;;  %v2182_v11 = vadd.f32 %v2181_v41, %v2046_v49  ;;  %v3177_v34 = vpop.f32.mrb[101].mxu1  ;;  %v3277_v46 = vpop.f32.mrb[101].mxu0 }
 0x1d0   : > { %v3178_v30 = vadd.f32 %v3177_v34, %v3176_v38  ;;  %v3179_v37 = vpop.f32.mrb[102].mxu1  ;;  %v2184_v47 = vpop.f32.mrb[102].mxu0 }
 0x1d1   : > { %v2185_v50 = vadd.f32 %v2184_v47, %v2049_v54  ;;  %v3180_v35 = vpop.f32.mrb[103].mxu1  ;;  %v3278_v60 = vpop.f32.mrb[103].mxu0  ;;  %v2253_v56 = vmax.f32 %v2182_v11, 0.0 }
 0x1d2   : > { %v3181_v51 = vadd.f32 %v3180_v35, %v3179_v37  ;;  %v2054_v12 = vadd.f32 %v3178_v30, %v4226_v40 }
 0x1d3   : > { %v2254_v3 = vmax.f32 %v2185_v50, 0.0 }
 0x1d4   : > { %v2057_v21 = vadd.f32 %v3181_v51, %v4228_v44 }
 0x1d5   : > { %v2799_v58 = vpack.c.bf16 %v2254_v3, %v2253_v56 }
 0x1d6   : > { %v3182_v1 = vpop.f32.mrb[104].mxu1  ;;  %v2189_v14 = vpop.f32.mrb[104].mxu0 }
 0x1d7   : > { %2835 = vst [vmem:[%s4268_s26 + $0x28] sm:$0xff] %v2799_v58   ;;  %v2190_v57 = vadd.f32 %v2189_v14, %v2054_v12  ;;  %v3183_v61 = vpop.f32.mrb[105].mxu1  ;;  %v3281_v52 = vpop.f32.mrb[105].mxu0 }
 0x1d8   : > { %v3184_v31 = vadd.f32 %v3183_v61, %v3182_v1  ;;  %v3185_v0 = vpop.f32.mrb[106].mxu1  ;;  %v2192_v55 = vpop.f32.mrb[106].mxu0 }
 0x1d9   : > { %v2193_v45 = vadd.f32 %v2192_v55, %v2057_v21  ;;  %v3186_v6 = vpop.f32.mrb[107].mxu1  ;;  %v3282_v16 = vpop.f32.mrb[107].mxu0  ;;  %v2255_v25 = vmax.f32 %v2190_v57, 0.0 }
 0x1da   : > { %v3187_v5 = vadd.f32 %v3186_v6, %v3185_v0  ;;  %v2062_v40 = vadd.f32 %v3184_v31, %v4231_v23 }
 0x1db   : > { %v2256_v7 = vmax.f32 %v2193_v45, 0.0 }
 0x1dc   : > { %v2065_v44 = vadd.f32 %v3187_v5, %v4234_v63 }
 0x1dd   : > { %v2804_v15 = vpack.c.bf16 %v2256_v7, %v2255_v25 }
 0x1de   : > { %v3188_v29 = vpop.f32.mrb[108].mxu1  ;;  %v2197_v53 = vpop.f32.mrb[108].mxu0 }
 0x1df   : > { %2836 = vst [vmem:[%s4268_s26 + $0x30] sm:$0xff] %v2804_v15   ;;  %v2198_v19 = vadd.f32 %v2197_v53, %v2062_v40  ;;  %v3189_v9 = vpop.f32.mrb[109].mxu1  ;;  %v3285_v36 = vpop.f32.mrb[109].mxu0 }
 0x1e0   : > { %v3190_v17 = vadd.f32 %v3189_v9, %v3188_v29  ;;  %v3191_v39 = vpop.f32.mrb[110].mxu1  ;;  %v2200_v24 = vpop.f32.mrb[110].mxu0 }
 0x1e1   : > { %v2201_v10 = vadd.f32 %v2200_v24, %v2065_v44  ;;  %v3192_v18 = vpop.f32.mrb[111].mxu1  ;;  %v3286_v13 = vpop.f32.mrb[111].mxu0  ;;  %v2257_v8 = vmax.f32 %v2198_v19, 0.0 }
 0x1e2   : > { %v3193_v48 = vadd.f32 %v3192_v18, %v3191_v39  ;;  %v2070_v23 = vadd.f32 %v3190_v17, %v4237_v22 }
 0x1e3   : > { %v2258_v42 = vmax.f32 %v2201_v10, 0.0 }
 0x1e4   : > { %v2073_v63 = vadd.f32 %v3193_v48, %v4240_v26 }
 0x1e5   : > { %v2809_v49 = vpack.c.bf16 %v2258_v42, %v2257_v8 }
 0x1e6   : > { %v3194_v32 = vpop.f32.mrb[112].mxu1  ;;  %v2205_v2 = vpop.f32.mrb[112].mxu0 }
 0x1e7   : > { %2837 = vst [vmem:[%s4268_s26 + $0x38] sm:$0xff] %v2809_v49   ;;  %v2206_v54 = vadd.f32 %v2205_v2, %v2070_v23  ;;  %v3195_v33 = vpop.f32.mrb[113].mxu1  ;;  %v3289_v38 = vpop.f32.mrb[113].mxu0 }
 0x1e8   : > { %v3196_v41 = vadd.f32 %v3195_v33, %v3194_v32  ;;  %v3197_v11 = vpop.f32.mrb[114].mxu1  ;;  %v2208_v34 = vpop.f32.mrb[114].mxu0 }
 0x1e9   : > { %v2209_v46 = vadd.f32 %v2208_v34, %v2073_v63  ;;  %v3198_v30 = vpop.f32.mrb[115].mxu1  ;;  %v3290_v37 = vpop.f32.mrb[115].mxu0  ;;  %v2259_v50 = vmax.f32 %v2206_v54, 0.0 }
 0x1ea   : > { %v3199_v47 = vadd.f32 %v3198_v30, %v3197_v11  ;;  %v2078_v22 = vadd.f32 %v3196_v41, %v4243_v43 }
 0x1eb   : > { %v2260_v35 = vmax.f32 %v2209_v46, 0.0 }
 0x1ec   : > { %v2081_v26 = vadd.f32 %v3199_v47, %v4246_v59 }
 0x1ed   : > { %v2814_v60 = vpack.c.bf16 %v2260_v35, %v2259_v50 }
 0x1ee   : > { %v3200_v51 = vpop.f32.mrb[116].mxu1  ;;  %v2213_v12 = vpop.f32.mrb[116].mxu0 }
 0x1ef   : > { %2838 = vst [vmem:[%s4268_s26 + $0x40] sm:$0xff] %v2814_v60   ;;  %v2214_v56 = vadd.f32 %v2213_v12, %v2078_v22  ;;  %v3201_v3 = vpop.f32.mrb[117].mxu1  ;;  %v3293_v21 = vpop.f32.mrb[117].mxu0 }
 0x1f0   : > { %v3202_v58 = vadd.f32 %v3201_v3, %v3200_v51  ;;  %v3203_v1 = vpop.f32.mrb[118].mxu1  ;;  %v2216_v14 = vpop.f32.mrb[118].mxu0 }
 0x1f1   : > { %v2217_v57 = vadd.f32 %v2216_v14, %v2081_v26  ;;  %v3204_v61 = vpop.f32.mrb[119].mxu1  ;;  %v3294_v52 = vpop.f32.mrb[119].mxu0  ;;  %v2261_v0 = vmax.f32 %v2214_v56, 0.0 }
 0x1f2   : > { %v3205_v31 = vadd.f32 %v3204_v61, %v3203_v1  ;;  %v2086_v43 = vadd.f32 %v3202_v58, %v4249_v62 }
 0x1f3   : > { %v2262_v55 = vmax.f32 %v2217_v57, 0.0 }
 0x1f4   : > { %v2089_v59 = vadd.f32 %v3205_v31, %v4252_v4 }
 0x1f5   : > { %v2819_v45 = vpack.c.bf16 %v2262_v55, %v2261_v0 }
 0x1f6   : > { %v3206_v6 = vpop.f32.mrb[120].mxu1  ;;  %v2221_v16 = vpop.f32.mrb[120].mxu0 }
 0x1f7   : > { %2839 = vst [vmem:[%s4268_s26 + $0x48] sm:$0xff] %v2819_v45   ;;  %v2222_v5 = vadd.f32 %v2221_v16, %v2086_v43  ;;  %v3207_v40 = vpop.f32.mrb[121].mxu1  ;;  %v3297_v25 = vpop.f32.mrb[121].mxu0 }
 0x1f8   : > { %v3208_v7 = vadd.f32 %v3207_v40, %v3206_v6  ;;  %v3209_v44 = vpop.f32.mrb[122].mxu1  ;;  %v2224_v15 = vpop.f32.mrb[122].mxu0 }
 0x1f9   : > { %v2225_v29 = vadd.f32 %v2224_v15, %v2089_v59  ;;  %v3210_v53 = vpop.f32.mrb[123].mxu1  ;;  %v3298_v19 = vpop.f32.mrb[123].mxu0  ;;  %v2263_v36 = vmax.f32 %v2222_v5, 0.0 }
 0x1fa   : > { %v3211_v9 = vadd.f32 %v3210_v53, %v3209_v44  ;;  %v2094_v62 = vadd.f32 %v3208_v7, %v4255_v20 }
 0x1fb   : > { %v2264_v17 = vmax.f32 %v2225_v29, 0.0 }
 0x1fc   : > { %v2097_v4 = vadd.f32 %v3211_v9, %v4257_v28 }
 0x1fd   : > { %v2824_v39 = vpack.c.bf16 %v2264_v17, %v2263_v36 }
 0x1fe   : > { %v3212_v24 = vpop.f32.mrb[124].mxu1  ;;  %v2229_v10 = vpop.f32.mrb[124].mxu0 }
 0x1ff   : > { %2840 = vst [vmem:[%s4268_s26 + $0x50] sm:$0xff] %v2824_v39   ;;  %v2230_v18 = vadd.f32 %v2229_v10, %v2094_v62  ;;  %v3213_v13 = vpop.f32.mrb[125].mxu1  ;;  %v3301_v48 = vpop.f32.mrb[125].mxu0 }
 0x200   : > { %v3214_v23 = vadd.f32 %v3213_v13, %v3212_v24  ;;  %v2232_v8 = vpop.f32.mrb[126].mxu0  ;;  %v3215_v42 = vpop.f32.mrb[126].mxu1 }
 0x201   : > { %v2233_v63 = vadd.f32 %v2232_v8, %v2097_v4  ;;  %v3302_v49 = vpop.f32.mrb[127].mxu0  ;;  %v3216_v32 = vpop.f32.mrb[127].mxu1  ;;  %v2265_v2 = vmax.f32 %v2230_v18, 0.0 }
 0x202   : > { %v2102_v20 = vadd.f32 %v3214_v23, %v4259_v27 }
 0x203   : > { %v2266_v54 = vmax.f32 %v2233_v63, 0.0 }
 0x205   : > { %v2829_v28 = vpack.c.bf16 %v2266_v54, %v2265_v2 }
 0x206   : > { %v2237_v33 = vpop.f32.mrb[128].mxu0 }
 0x207   : > { %2841 = vst [vmem:[%s4268_s26 + $0x58] sm:$0xff] %v2829_v28   ;;  %v2238_v38 = vadd.f32 %v2237_v33, %v2102_v20  ;;  %v3305_v41 = vpop.f32.mrb[129].mxu0 }
 0x208   : > { %v2240_v11 = vpop.f32.mrb[130].mxu0 }
 0x209   : > { %v2267_v34 = vmax.f32 %v2238_v38, 0.0  ;;  %v3306_v46 = vpop.f32.mrb[131].mxu0 }
 0x20b   : > { %v2770_v30 = vpack.c.bf16 %v2267_v34, %v2267_v34 }
 0x20d   : > { %2393 = vst [vmem:[%s4268_s26 + $0x60] sm:$0xf] %v2770_v30 }
 0x20e PF: > { %s13_s14 = sadd.s32 1, %s3610_s14   ;;  %s4318_s12 = smov %s3606_s13 }
 0x20f   : > { %p10_p5 = scmp.ge.s32.totalorder %s13_s14, 4   ;;  %s4319_s13 = smov %s4321_s15 }
 0x211   :  { %12 = sbr.rel (!%p10_p5) target bundleno = 2 (0x2), region = 68 }

// kernel: ensemble_forward.13
= control target key start
LH: loop header
LB: loop body
LE: loop exit
PB: predicated region body
PF: predicated region fallthrough
CT: control target
= control target key end

     0   :  { %s3326_s12 = smov 0   ;;  %s3328_s13 = smov 0   ;;  %s3898_s0 = inlined_call_operand.vmem [shape: bf16[2,128,1152], index: 0, kind: input, shape index: {}]   ;;  %s3899_s1 = inlined_call_operand.vmem [shape: bf16[2,1152,256], index: 1, kind: input, shape index: {}]   ;;  %s3900_s2 = inlined_call_operand.vmem [shape: f32[2,1,256], index: 2, kind: input, shape index: {}]   ;;  %s3901_s3 = inlined_call_operand.vmem [shape: bf16[2,128,256], index: 3, kind: output, shape index: {}]  }
   0x1   :  { %s3330_s14 = smov 0  }
   0x2 LB: > { %s32_s15 = sadd.s32 1, %s3299_s13  ;;  %p2485_p0 = scmp.ge.s32.totalorder %s3303_s14, 1  ;;  %s3303_s14 = sphi %s3330_s14, %s13_s14   ;;  %s3299_s13 = sphi %s3328_s13, %s3903_s13   ;;  %s3295_s12 = sphi %s3326_s12, %s3902_s12  }
   0x3   : > { %p34_p1 = scmp.ge.s32.totalorder %s32_s15, 2  ;;  %p201_p2 = scmp.lt.s32.totalorder %s3303_s14, 3 }
   0x5   : > { %s3905_s15 = smov (%p34_p1, %s32_s15), 0  ;;  %p202_p3 = pnand %p2485_p0, %p201_p2 }
   0x6   : > { %p257_p4 = scmp.lt.s32.totalorder (!%p202_p3), %s3295_s12, 1 }
   0x7   : > { %205 = sbr.rel (%p202_p3) target bundleno = 459 (0x1cb), region = 32 }
   0xe   : > { %s3907_s12 = smov (!%p257_p4, %s3295_s12), 1 }
   0xf   : > { %s2935_s16 = smul.u32 1152, %s3907_s12  ;;  %s2488_s24 = sshll.u32 %s3907_s12, 1 }
  0x10   : > { %s2934_s20 = smul.u32 576, %s3907_s12  ;;  %s284_s27 = scalar_lea.vmem %s3900_s2, %s2488_s24 }
  0x11   : > { %s3350_s19 = scalar_lea.vmem %s3899_s1, %s2935_s16  ;;  %s2725_s28 = sshll.u32 %s3907_s12, 7 }
  0x12   : > { %v2961_v0 = vld [vmem:[%s3350_s19 + $0x4] ss:$8 sps:$4 sm:$0xff]   ;;  %v2965_v2 = vld [vmem:[%s3350_s19] ss:$8 sps:$4 sm:$0xff]   ;;  %v2967_v4 = vld [vmem:[%s3350_s19 + $0x14] ss:$8 sps:$4 sm:$0xff]   ;;  %s3401_s23 = scalar_lea.vmem %s3898_s0, %s2934_s20  ;;  %s3781_s4 = scalar_lea.vmem %s3901_s3, %s2725_s28 }
  0x13   : > { %v2963_v1 = vld [vmem:[%s3350_s19 + $0x204] ss:$8 sps:$4 sm:$0xff]   ;;  %1627 = vmatprep.subr.bf16.mxu1 %v2961_v0  ;;  %v2966_v3 = vld [vmem:[%s3350_s19 + $0x200] ss:$8 sps:$4 sm:$0xff]   ;;  %v2969_v5 = vld [vmem:[%s3350_s19 + $0x214] ss:$8 sps:$4 sm:$0xff]  }
  0x14   : > { %1853 = vmatprep.subr.bf16.mxu0 %v2963_v1  ;;  %1628 = vmatpush1.bf16.msra.mxu1 %v2965_v2  ;;  %v2971_v6 = vld [vmem:[%s3350_s19 + $0x10] ss:$8 sps:$4 sm:$0xff]   ;;  %v2973_v8 = vld [vmem:[%s3350_s19 + $0x24] ss:$8 sps:$4 sm:$0xff]   ;;  %v2977_v10 = vld [vmem:[%s3350_s19 + $0x20] ss:$8 sps:$4 sm:$0xff]  }
  0x15   : > { %1854 = vmatpush1.bf16.msra.mxu0 %v2966_v3  ;;  %1629 = vmatprep.subr.bf16.mxu1 %v2967_v4  ;;  %v2972_v7 = vld [vmem:[%s3350_s19 + $0x210] ss:$8 sps:$4 sm:$0xff]   ;;  %v2975_v9 = vld [vmem:[%s3350_s19 + $0x224] ss:$8 sps:$4 sm:$0xff]   ;;  %v2978_v11 = vld [vmem:[%s3350_s19 + $0x220] ss:$8 sps:$4 sm:$0xff]  }
  0x16   : > { %1855 = vmatprep.subr.bf16.mxu0 %v2969_v5  ;;  %v2979_v12 = vld [vmem:[%s3350_s19 + $0x34] ss:$8 sps:$4 sm:$0xff]   ;;  %v2983_v14 = vld [vmem:[%s3350_s19 + $0x30] ss:$8 sps:$4 sm:$0xff]   ;;  %v2985_v16 = vld [vmem:[%s3350_s19 + $0x44] ss:$8 sps:$4 sm:$0xff]  }
  0x17   : > { %v2981_v13 = vld [vmem:[%s3350_s19 + $0x234] ss:$8 sps:$4 sm:$0xff]   ;;  %v2984_v15 = vld [vmem:[%s3350_s19 + $0x230] ss:$8 sps:$4 sm:$0xff]   ;;  %v2987_v17 = vld [vmem:[%s3350_s19 + $0x244] ss:$8 sps:$4 sm:$0xff]  }
  0x18   : > { %1630 = vmatpush1.bf16.msra.mxu1 %v2971_v6  ;;  %v2989_v18 = vld [vmem:[%s3350_s19 + $0x40] ss:$8 sps:$4 sm:$0xff]   ;;  %v2991_v20 = vld [vmem:[%s3350_s19 + $0x54] ss:$8 sps:$4 sm:$0xff]   ;;  %v2995_v22 = vld [vmem:[%s3350_s19 + $0x50] ss:$8 sps:$4 sm:$0xff]  }
  0x19   : > { %1856 = vmatpush1.bf16.msra.mxu0 %v2972_v7  ;;  %1631 = vmatprep.subr.bf16.mxu1 %v2973_v8  ;;  %v2990_v19 = vld [vmem:[%s3350_s19 + $0x240] ss:$8 sps:$4 sm:$0xff]   ;;  %v2993_v21 = vld [vmem:[%s3350_s19 + $0x254] ss:$8 sps:$4 sm:$0xff]   ;;  %v2996_v23 = vld [vmem:[%s3350_s19 + $0x250] ss:$8 sps:$4 sm:$0xff]  }
  0x1a   : > { %1857 = vmatprep.subr.bf16.mxu0 %v2975_v9  ;;  %v2997_v24 = vld [vmem:[%s3350_s19 + $0x64] ss:$8 sps:$4 sm:$0xff]   ;;  %v3001_v26 = vld [vmem:[%s3350_s19 + $0x60] ss:$8 sps:$4 sm:$0xff]   ;;  %v3003_v28 = vld [vmem:[%s3350_s19 + $0x74] ss:$8 sps:$4 sm:$0xff]  }
  0x1b   : > { %v2999_v25 = vld [vmem:[%s3350_s19 + $0x264] ss:$8 sps:$4 sm:$0xff]   ;;  %v3002_v27 = vld [vmem:[%s3350_s19 + $0x260] ss:$8 sps:$4 sm:$0xff]   ;;  %v3005_v29 = vld [vmem:[%s3350_s19 + $0x274] ss:$8 sps:$4 sm:$0xff]  }
  0x1c   : > { %1632 = vmatpush1.bf16.msra.mxu1 %v2977_v10  ;;  %v3007_v30 = vld [vmem:[%s3350_s19 + $0x70] ss:$8 sps:$4 sm:$0xff]   ;;  %v3009_v32 = vld [vmem:[%s3350_s19 + $0x84] ss:$8 sps:$4 sm:$0xff]   ;;  %v3013_v34 = vld [vmem:[%s3350_s19 + $0x80] ss:$8 sps:$4 sm:$0xff]  }
  0x1d   : > { %1858 = vmatpush1.bf16.msra.mxu0 %v2978_v11  ;;  %1633 = vmatprep.subr.bf16.mxu1 %v2979_v12  ;;  %v3008_v31 = vld [vmem:[%s3350_s19 + $0x270] ss:$8 sps:$4 sm:$0xff]   ;;  %v3011_v33 = vld [vmem:[%s3350_s19 + $0x284] ss:$8 sps:$4 sm:$0xff]   ;;  %v3014_v35 = vld [vmem:[%s3350_s19 + $0x280] ss:$8 sps:$4 sm:$0xff]  }
  0x1e   : > { %1859 = vmatprep.subr.bf16.mxu0 %v2981_v13  ;;  %v3015_v36 = vld [vmem:[%s3350_s19 + $0x94] ss:$8 sps:$4 sm:$0xff]   ;;  %v3019_v38 = vld [vmem:[%s3350_s19 + $0x90] ss:$8 sps:$4 sm:$0xff]   ;;  %v3021_v40 = vld [vmem:[%s3350_s19 + $0xa4] ss:$8 sps:$4 sm:$0xff]  }
  0x1f   : > { %v3017_v37 = vld [vmem:[%s3350_s19 + $0x294] ss:$8 sps:$4 sm:$0xff]   ;;  %v3020_v39 = vld [vmem:[%s3350_s19 + $0x290] ss:$8 sps:$4 sm:$0xff]   ;;  %v3023_v41 = vld [vmem:[%s3350_s19 + $0x2a4] ss:$8 sps:$4 sm:$0xff]  }
  0x20   : > { %1634 = vmatpush1.bf16.msra.mxu1 %v2983_v14  ;;  %v3025_v42 = vld [vmem:[%s3350_s19 + $0xa0] ss:$8 sps:$4 sm:$0xff]   ;;  %v3027_v44 = vld [vmem:[%s3350_s19 + $0xb4] ss:$8 sps:$4 sm:$0xff]   ;;  %v3031_v46 = vld [vmem:[%s3350_s19 + $0xb0] ss:$8 sps:$4 sm:$0xff]  }
  0x21   : > { %1860 = vmatpush1.bf16.msra.mxu0 %v2984_v15  ;;  %1635 = vmatprep.subr.bf16.mxu1 %v2985_v16  ;;  %v3026_v43 = vld [vmem:[%s3350_s19 + $0x2a0] ss:$8 sps:$4 sm:$0xff]   ;;  %v3029_v45 = vld [vmem:[%s3350_s19 + $0x2b4] ss:$8 sps:$4 sm:$0xff]   ;;  %v3032_v47 = vld [vmem:[%s3350_s19 + $0x2b0] ss:$8 sps:$4 sm:$0xff]  }
  0x22   : > { %1861 = vmatprep.subr.bf16.mxu0 %v2987_v17  ;;  %v3033_v48 = vld [vmem:[%s3350_s19 + $0xc4] ss:$8 sps:$4 sm:$0xff]   ;;  %v3062_v51 = vld [vmem:[%s3401_s23 + $0x14] ss:$36 sps:$4 sm:$0xff]   ;;  %v3037_v52 = vld [vmem:[%s3350_s19 + $0xc0] ss:$8 sps:$4 sm:$0xff]  }
  0x23   : > { %v3059_v49 = vld [vmem:[%s3401_s23 + $0x4] ss:$36 sps:$4 sm:$0xff]   ;;  %1885 = vmatprep.mubr.bf16.mxu0 %v3062_v51  ;;  %v3039_v54 = vld [vmem:[%s3350_s19 + $0xd4] ss:$8 sps:$4 sm:$0xff]   ;;  %v3043_v56 = vld [vmem:[%s3350_s19 + $0xd0] ss:$8 sps:$4 sm:$0xff]  }
  0x24   : > { %1636 = vmatpush1.bf16.msra.mxu1 %v2989_v18  ;;  %v3035_v50 = vld [vmem:[%s3350_s19 + $0x2c4] ss:$8 sps:$4 sm:$0xff]   ;;  %1659 = vmatprep.mubr.bf16.mxu1 %v3059_v49  ;;  %v3038_v53 = vld [vmem:[%s3350_s19 + $0x2c0] ss:$8 sps:$4 sm:$0xff]   ;;  %v3041_v55 = vld [vmem:[%s3350_s19 + $0x2d4] ss:$8 sps:$4 sm:$0xff]  }
  0x25   : > { %1862 = vmatpush1.bf16.msra.mxu0 %v2990_v19  ;;  %1637 = vmatprep.subr.bf16.mxu1 %v2991_v20  ;;  %v3044_v57 = vld [vmem:[%s3350_s19 + $0x2d0] ss:$8 sps:$4 sm:$0xff]   ;;  %v3045_v58 = vld [vmem:[%s3350_s19 + $0xe4] ss:$8 sps:$4 sm:$0xff]   ;;  %v3049_v60 = vld [vmem:[%s3350_s19 + $0xe0] ss:$8 sps:$4 sm:$0xff]  }
  0x26   : > { %1863 = vmatprep.subr.bf16.mxu0 %v2993_v21  ;;  %v3047_v59 = vld [vmem:[%s3350_s19 + $0x2e4] ss:$8 sps:$4 sm:$0xff]   ;;  %v3050_v61 = vld [vmem:[%s3350_s19 + $0x2e0] ss:$8 sps:$4 sm:$0xff]   ;;  %v3051_v62 = vld [vmem:[%s3350_s19 + $0xf4] ss:$8 sps:$4 sm:$0xff]  }
  0x27   : > { %v3053_v63 = vld [vmem:[%s3350_s19 + $0x2f4] ss:$8 sps:$4 sm:$0xff]   ;;  %v3055_v0 = vld [vmem:[%s3350_s19 + $0xf0] ss:$8 sps:$4 sm:$0xff]   ;;  %v3065_v2 = vld [vmem:[%s3350_s19 + $0x104] ss:$8 sps:$4 sm:$0xff]  }
  0x28   : > { %1638 = vmatpush1.bf16.msra.mxu1 %v2995_v22  ;;  %v3056_v1 = vld [vmem:[%s3350_s19 + $0x2f0] ss:$8 sps:$4 sm:$0xff]   ;;  %v3426_v3 = vld [vmem:[%s3350_s19 + $0x304] ss:$8 sps:$4 sm:$0xff]   ;;  %v3063_v6 = vld [vmem:[%s3350_s19 + $0x100] ss:$8 sps:$4 sm:$0xff]  }
  0x29   : > { %1864 = vmatpush1.bf16.msra.mxu0 %v2996_v23  ;;  %1639 = vmatprep.subr.bf16.mxu1 %v2997_v24  ;;  %v3057_v4 = vld [vmem:[%s3401_s23] ss:$36 sps:$4 sm:$0xff]   ;;  %v3060_v5 = vld [vmem:[%s3401_s23 + $0x10] ss:$36 sps:$4 sm:$0xff]   ;;  %v3079_v16 = vld [vmem:[%s3401_s23 + $0x48] ss:$36 sps:$4 sm:$0xff]  }
  0x2a   : > { %1865 = vmatprep.subr.bf16.mxu0 %v2999_v25  ;;  %v3432_v7 = vld [vmem:[%s3350_s19 + $0x300] ss:$8 sps:$4 sm:$0xff]   ;;  %v3071_v8 = vld [vmem:[%s3350_s19 + $0x114] ss:$8 sps:$4 sm:$0xff]   ;;  %v3075_v10 = vld [vmem:[%s3401_s23 + $0x4c] ss:$36 sps:$4 sm:$0xff]  }
  0x2b   : > { %v3437_v9 = vld [vmem:[%s3350_s19 + $0x314] ss:$8 sps:$4 sm:$0xff]   ;;  %v3069_v12 = vld [vmem:[%s3350_s19 + $0x110] ss:$8 sps:$4 sm:$0xff]   ;;  %v3082_v14 = vld [vmem:[%s3350_s19 + $0x124] ss:$8 sps:$4 sm:$0xff]  }
  0x2c   : > { %1640 = vmatpush1.bf16.msra.mxu1 %v3001_v26  ;;  %v3077_v11 = vld [vmem:[%s3401_s23 + $0x5c] ss:$36 sps:$4 sm:$0xff]   ;;  %v3444_v13 = vld [vmem:[%s3350_s19 + $0x310] ss:$8 sps:$4 sm:$0xff]   ;;  %v3449_v15 = vld [vmem:[%s3350_s19 + $0x324] ss:$8 sps:$4 sm:$0xff]  }
  0x2d   : > { %1866 = vmatpush1.bf16.msra.mxu0 %v3002_v27  ;;  %1641 = vmatprep.subr.bf16.mxu1 %v3003_v28  ;;  %v3080_v17 = vld [vmem:[%s3350_s19 + $0x120] ss:$8 sps:$4 sm:$0xff]   ;;  %v3083_v18 = vld [vmem:[%s3401_s23 + $0x58] ss:$36 sps:$4 sm:$0xff]   ;;  %v3100_v26 = vld [vmem:[%s3350_s19 + $0x144] ss:$8 sps:$4 sm:$0xff]  }
  0x2e   : > { %1867 = vmatprep.subr.bf16.mxu0 %v3005_v29  ;;  %v3455_v19 = vld [vmem:[%s3350_s19 + $0x320] ss:$8 sps:$4 sm:$0xff]   ;;  %v3089_v20 = vld [vmem:[%s3350_s19 + $0x134] ss:$8 sps:$4 sm:$0xff]   ;;  %v3087_v24 = vld [vmem:[%s3350_s19 + $0x130] ss:$8 sps:$4 sm:$0xff]  }
  0x2f   : > { %v3461_v21 = vld [vmem:[%s3350_s19 + $0x334] ss:$8 sps:$4 sm:$0xff]   ;;  %v3095_v23 = vld [vmem:[%s3401_s23 + $0xa4] ss:$36 sps:$4 sm:$0xff]   ;;  %v3468_v25 = vld [vmem:[%s3350_s19 + $0x330] ss:$8 sps:$4 sm:$0xff]  }
  0x30   : > { %1642 = vmatpush1.bf16.msra.mxu1 %v3007_v30  ;;  %v3093_v22 = vld [vmem:[%s3401_s23 + $0x94] ss:$36 sps:$4 sm:$0xff]   ;;  %v3473_v27 = vld [vmem:[%s3350_s19 + $0x344] ss:$8 sps:$4 sm:$0xff]   ;;  %v3098_v29 = vld [vmem:[%s3350_s19 + $0x140] ss:$8 sps:$4 sm:$0xff]  }
  0x31   : > { %1868 = vmatpush1.bf16.msra.mxu0 %v3008_v31  ;;  %1643 = vmatprep.subr.bf16.mxu1 %v3009_v32  ;;  %v3097_v28 = vld [vmem:[%s3401_s23 + $0x90] ss:$36 sps:$4 sm:$0xff]   ;;  %v3101_v30 = vld [vmem:[%s3401_s23 + $0xa0] ss:$36 sps:$4 sm:$0xff]  }
  0x32   : > { %1869 = vmatprep.subr.bf16.mxu0 %v3011_v33  ;;  %v3479_v31 = vld [vmem:[%s3350_s19 + $0x340] ss:$8 sps:$4 sm:$0xff]   ;;  %v3107_v32 = vld [vmem:[%s3350_s19 + $0x154] ss:$8 sps:$4 sm:$0xff]   ;;  %v3516_v49 = vld [vmem:[%s3350_s19 + $0x370] ss:$8 sps:$4 sm:$0xff]  }
  0x33   : > { %v3485_v33 = vld [vmem:[%s3350_s19 + $0x354] ss:$8 sps:$4 sm:$0xff]   ;;  %v3521_v51 = vld [vmem:[%s3350_s19 + $0x384] ss:$8 sps:$4 sm:$0xff]  }
  0x34   : > { %1644 = vmatpush1.bf16.msra.mxu1 %v3013_v34  ;;  %v3111_v34 = vld [vmem:[%s3401_s23 + $0xdc] ss:$36 sps:$4 sm:$0xff]  }
  0x35   : > { %1870 = vmatpush1.bf16.msra.mxu0 %v3014_v35  ;;  %1645 = vmatprep.subr.bf16.mxu1 %v3015_v36  ;;  %v3113_v35 = vld [vmem:[%s3401_s23 + $0xec] ss:$36 sps:$4 sm:$0xff]  }
  0x36   : > { %1871 = vmatprep.subr.bf16.mxu0 %v3017_v37  ;;  %v3105_v36 = vld [vmem:[%s3350_s19 + $0x150] ss:$8 sps:$4 sm:$0xff]  }
  0x37   : > { %v3492_v37 = vld [vmem:[%s3350_s19 + $0x350] ss:$8 sps:$4 sm:$0xff]  }
  0x38   : > { %1646 = vmatpush1.bf16.msra.mxu1 %v3019_v38  ;;  %v3118_v38 = vld [vmem:[%s3350_s19 + $0x164] ss:$8 sps:$4 sm:$0xff]  }
  0x39   : > { %1872 = vmatpush1.bf16.msra.mxu0 %v3020_v39  ;;  %1647 = vmatprep.subr.bf16.mxu1 %v3021_v40  ;;  %v3497_v39 = vld [vmem:[%s3350_s19 + $0x364] ss:$8 sps:$4 sm:$0xff]   ;;  %v3115_v40 = vld [vmem:[%s3401_s23 + $0xd8] ss:$36 sps:$4 sm:$0xff]  }
  0x3a   : > { %1873 = vmatprep.subr.bf16.mxu0 %v3023_v41  ;;  %v3116_v41 = vld [vmem:[%s3350_s19 + $0x160] ss:$8 sps:$4 sm:$0xff]  }
  0x3c   : > { %1648 = vmatpush1.bf16.msra.mxu1 %v3025_v42  ;;  %v3119_v42 = vld [vmem:[%s3401_s23 + $0xe8] ss:$36 sps:$4 sm:$0xff]  }
  0x3d   : > { %1874 = vmatpush1.bf16.msra.mxu0 %v3026_v43  ;;  %1649 = vmatprep.subr.bf16.mxu1 %v3027_v44  ;;  %v3503_v43 = vld [vmem:[%s3350_s19 + $0x360] ss:$8 sps:$4 sm:$0xff]   ;;  %v3125_v44 = vld [vmem:[%s3350_s19 + $0x174] ss:$8 sps:$4 sm:$0xff]  }
  0x3e   : > { %1875 = vmatprep.subr.bf16.mxu0 %v3029_v45  ;;  %v3509_v45 = vld [vmem:[%s3350_s19 + $0x374] ss:$8 sps:$4 sm:$0xff]  }
  0x40   : > { %1650 = vmatpush1.bf16.msra.mxu1 %v3031_v46  ;;  %v3129_v46 = vld [vmem:[%s3401_s23 + $0x124] ss:$36 sps:$4 sm:$0xff]  }
  0x41   : > { %1876 = vmatpush1.bf16.msra.mxu0 %v3032_v47  ;;  %1651 = vmatprep.subr.bf16.mxu1 %v3033_v48  ;;  %v3131_v47 = vld [vmem:[%s3401_s23 + $0x134] ss:$36 sps:$4 sm:$0xff]  }
  0x42   : > { %1877 = vmatprep.subr.bf16.mxu0 %v3035_v50  ;;  %v3123_v48 = vld [vmem:[%s3350_s19 + $0x170] ss:$8 sps:$4 sm:$0xff]   ;;  %v3136_v50 = vld [vmem:[%s3350_s19 + $0x184] ss:$8 sps:$4 sm:$0xff]  }
  0x44   : > { %1652 = vmatpush1.bf16.msra.mxu1 %v3037_v52  ;;  %v3133_v52 = vld [vmem:[%s3401_s23 + $0x120] ss:$36 sps:$4 sm:$0xff]  }
  0x45   : > { %1878 = vmatpush1.bf16.msra.mxu0 %v3038_v53  ;;  %1653 = vmatprep.subr.bf16.mxu1 %v3039_v54  ;;  %v3134_v53 = vld [vmem:[%s3350_s19 + $0x180] ss:$8 sps:$4 sm:$0xff]   ;;  %v3137_v54 = vld [vmem:[%s3401_s23 + $0x130] ss:$36 sps:$4 sm:$0xff]  }
  0x46   : > { %1879 = vmatprep.subr.bf16.mxu0 %v3041_v55  ;;  %v3527_v55 = vld [vmem:[%s3350_s19 + $0x380] ss:$8 sps:$4 sm:$0xff]  }
  0x48   : > { %1654 = vmatpush1.bf16.msra.mxu1 %v3043_v56  ;;  %v3143_v56 = vld [vmem:[%s3350_s19 + $0x194] ss:$8 sps:$4 sm:$0xff]  }
  0x49   : > { %1880 = vmatpush1.bf16.msra.mxu0 %v3044_v57  ;;  %1655 = vmatprep.subr.bf16.mxu1 %v3045_v58  ;;  %v3533_v57 = vld [vmem:[%s3350_s19 + $0x394] ss:$8 sps:$4 sm:$0xff]   ;;  %v3147_v58 = vld [vmem:[%s3401_s23 + $0x16c] ss:$36 sps:$4 sm:$0xff]  }
  0x4a   : > { %1881 = vmatprep.subr.bf16.mxu0 %v3047_v59  ;;  %v3149_v59 = vld [vmem:[%s3401_s23 + $0x17c] ss:$36 sps:$4 sm:$0xff]  }
  0x4c   : > { %1656 = vmatpush1.bf16.msra.mxu1 %v3049_v60  ;;  %v3141_v60 = vld [vmem:[%s3350_s19 + $0x190] ss:$8 sps:$4 sm:$0xff]  }
  0x4d   : > { %1882 = vmatpush1.bf16.msra.mxu0 %v3050_v61  ;;  %1657 = vmatprep.subr.bf16.mxu1 %v3051_v62  ;;  %v3540_v61 = vld [vmem:[%s3350_s19 + $0x390] ss:$8 sps:$4 sm:$0xff]   ;;  %v3154_v62 = vld [vmem:[%s3350_s19 + $0x1a4] ss:$8 sps:$4 sm:$0xff]  }
  0x4e   : > { %1883 = vmatprep.subr.bf16.mxu0 %v3053_v63  ;;  %v3545_v63 = vld [vmem:[%s3350_s19 + $0x3a4] ss:$8 sps:$4 sm:$0xff]  }
  0x50   : > { %1658 = vmatpush1.bf16.msra.mxu1 %v3055_v0  ;;  %v3151_v0 = vld [vmem:[%s3401_s23 + $0x168] ss:$36 sps:$4 sm:$0xff]  }
  0x51   : > { %1884 = vmatpush1.bf16.msra.mxu0 %v3056_v1  ;;  %1740 = vmatprep.subr.bf16.mxu1 %v3065_v2  ;;  %v3152_v1 = vld [vmem:[%s3350_s19 + $0x1a0] ss:$8 sps:$4 sm:$0xff]   ;;  %v3155_v2 = vld [vmem:[%s3401_s23 + $0x178] ss:$36 sps:$4 sm:$0xff]  }
  0x52   : > { %1966 = vmatprep.subr.bf16.mxu0 %v3426_v3 }
  0x53   : > { %1660 = vmatmul.mubr.bf16.vlgmr.msra.gmra.mrb[0].mxu1 %v3057_v4  ;;  %v3551_v4 = vld [vmem:[%s3350_s19 + $0x3a0] ss:$8 sps:$4 sm:$0xff]  }
  0x54   : > { %1886 = vmatmul.mubr.bf16.vlgmr.msra.gmra.mrb[0].mxu0 %v3060_v5  ;;  %1741 = vmatpush1.bf16.msra.mxu1 %v3063_v6  ;;  %v3161_v5 = vld [vmem:[%s3350_s19 + $0x1b4] ss:$8 sps:$4 sm:$0xff]  }
  0x55   : > { %1967 = vmatpush1.bf16.msra.mxu0 %v3432_v7  ;;  %1742 = vmatprep.subr.bf16.mxu1 %v3071_v8  ;;  %v3557_v6 = vld [vmem:[%s3350_s19 + $0x3b4] ss:$8 sps:$4 sm:$0xff]  }
  0x56   : > { %1968 = vmatprep.subr.bf16.mxu0 %v3437_v9  ;;  %1669 = vmatprep.mubr.bf16.mxu1 %v3075_v10  ;;  %v3165_v8 = vld [vmem:[%s3401_s23 + $0x1b4] ss:$36 sps:$4 sm:$0xff]   ;;  %v3167_v10 = vld [vmem:[%s3401_s23 + $0x1c4] ss:$36 sps:$4 sm:$0xff]  }
  0x57   : > { %1895 = vmatprep.mubr.bf16.mxu0 %v3077_v11  ;;  %v3159_v11 = vld [vmem:[%s3350_s19 + $0x1b0] ss:$8 sps:$4 sm:$0xff]  }
  0x58   : > { %1743 = vmatpush1.bf16.msra.mxu1 %v3069_v12  ;;  %v3563_v12 = vld [vmem:[%s3350_s19 + $0x3b0] ss:$8 sps:$4 sm:$0xff]  }
  0x59   : > { %1969 = vmatpush1.bf16.msra.mxu0 %v3444_v13  ;;  %1744 = vmatprep.subr.bf16.mxu1 %v3082_v14  ;;  %v3172_v14 = vld [vmem:[%s3350_s19 + $0x1c4] ss:$8 sps:$4 sm:$0xff]  }
  0x5a   : > { %1970 = vmatprep.subr.bf16.mxu0 %v3449_v15 }
  0x5b   : > { %1670 = vmatmul.mubr.bf16.gmra.mrb[4].mxu1 %v3079_v16  ;;  %v3569_v16 = vld [vmem:[%s3350_s19 + $0x3c4] ss:$8 sps:$4 sm:$0xff]  }
  0x5c   : > { %1896 = vmatmul.mubr.bf16.gmra.mrb[4].mxu0 %v3083_v18  ;;  %1745 = vmatpush1.bf16.msra.mxu1 %v3080_v17  ;;  %v3169_v17 = vld [vmem:[%s3401_s23 + $0x1b0] ss:$36 sps:$4 sm:$0xff]   ;;  %v3170_v18 = vld [vmem:[%s3350_s19 + $0x1c0] ss:$8 sps:$4 sm:$0xff]  }
  0x5d   : > { %1971 = vmatpush1.bf16.msra.mxu0 %v3455_v19  ;;  %1746 = vmatprep.subr.bf16.mxu1 %v3089_v20  ;;  %v3173_v20 = vld [vmem:[%s3401_s23 + $0x1c0] ss:$36 sps:$4 sm:$0xff]  }
  0x5e   : > { %1972 = vmatprep.subr.bf16.mxu0 %v3461_v21  ;;  %1679 = vmatprep.mubr.bf16.mxu1 %v3093_v22  ;;  %v3575_v22 = vld [vmem:[%s3350_s19 + $0x3c0] ss:$8 sps:$4 sm:$0xff]  }
  0x5f   : > { %1905 = vmatprep.mubr.bf16.mxu0 %v3095_v23  ;;  %v3179_v23 = vld [vmem:[%s3350_s19 + $0x1d4] ss:$8 sps:$4 sm:$0xff]  }
  0x60   : > { %1747 = vmatpush1.bf16.msra.mxu1 %v3087_v24  ;;  %v3581_v24 = vld [vmem:[%s3350_s19 + $0x3d4] ss:$8 sps:$4 sm:$0xff]  }
  0x61   : > { %1973 = vmatpush1.bf16.msra.mxu0 %v3468_v25  ;;  %1748 = vmatprep.subr.bf16.mxu1 %v3100_v26  ;;  %v3183_v26 = vld [vmem:[%s3401_s23 + $0x1fc] ss:$36 sps:$4 sm:$0xff]  }
  0x62   : > { %1974 = vmatprep.subr.bf16.mxu0 %v3473_v27 }
  0x63   : > { %1680 = vmatmul.mubr.bf16.gmra.mrb[8].mxu1 %v3097_v28  ;;  %v3185_v28 = vld [vmem:[%s3401_s23 + $0x20c] ss:$36 sps:$4 sm:$0xff]  }
  0x64   : > { %1906 = vmatmul.mubr.bf16.gmra.mrb[8].mxu0 %v3101_v30  ;;  %1749 = vmatpush1.bf16.msra.mxu1 %v3098_v29  ;;  %v3177_v29 = vld [vmem:[%s3350_s19 + $0x1d0] ss:$8 sps:$4 sm:$0xff]  }
  0x65   : > { %1975 = vmatpush1.bf16.msra.mxu0 %v3479_v31  ;;  %1750 = vmatprep.subr.bf16.mxu1 %v3107_v32  ;;  %v3587_v30 = vld [vmem:[%s3350_s19 + $0x3d0] ss:$8 sps:$4 sm:$0xff]   ;;  %v3190_v32 = vld [vmem:[%s3350_s19 + $0x1e4] ss:$8 sps:$4 sm:$0xff]  }
  0x66   : > { %1976 = vmatprep.subr.bf16.mxu0 %v3485_v33  ;;  %1689 = vmatprep.mubr.bf16.mxu1 %v3111_v34  ;;  %v3593_v34 = vld [vmem:[%s3350_s19 + $0x3e4] ss:$8 sps:$4 sm:$0xff]  }
  0x67   : > { %1915 = vmatprep.mubr.bf16.mxu0 %v3113_v35  ;;  %v3187_v35 = vld [vmem:[%s3401_s23 + $0x1f8] ss:$36 sps:$4 sm:$0xff]  }
  0x68   : > { %1751 = vmatpush1.bf16.msra.mxu1 %v3105_v36  ;;  %v3188_v36 = vld [vmem:[%s3350_s19 + $0x1e0] ss:$8 sps:$4 sm:$0xff]  }
  0x69   : > { %1977 = vmatpush1.bf16.msra.mxu0 %v3492_v37  ;;  %1752 = vmatprep.subr.bf16.mxu1 %v3118_v38  ;;  %v3191_v38 = vld [vmem:[%s3401_s23 + $0x208] ss:$36 sps:$4 sm:$0xff]  }
  0x6a   : > { %1978 = vmatprep.subr.bf16.mxu0 %v3497_v39 }
  0x6b   : > { %1690 = vmatmul.mubr.bf16.gmra.mrb[12].mxu1 %v3115_v40  ;;  %v3599_v40 = vld [vmem:[%s3350_s19 + $0x3e0] ss:$8 sps:$4 sm:$0xff]  }
  0x6c   : > { %1916 = vmatmul.mubr.bf16.gmra.mrb[12].mxu0 %v3119_v42  ;;  %1753 = vmatpush1.bf16.msra.mxu1 %v3116_v41  ;;  %v3197_v41 = vld [vmem:[%s3350_s19 + $0x1f4] ss:$8 sps:$4 sm:$0xff]  }
  0x6d   : > { %1979 = vmatpush1.bf16.msra.mxu0 %v3503_v43  ;;  %1754 = vmatprep.subr.bf16.mxu1 %v3125_v44  ;;  %v3605_v42 = vld [vmem:[%s3350_s19 + $0x3f4] ss:$8 sps:$4 sm:$0xff]   ;;  %v3203_v44 = vld [vmem:[%s3401_s23 + $0xc] ss:$36 sps:$4 sm:$0xff]  }
  0x6e   : > { %1980 = vmatprep.subr.bf16.mxu0 %v3509_v45  ;;  %1699 = vmatprep.mubr.bf16.mxu1 %v3129_v46  ;;  %v3206_v46 = vld [vmem:[%s3401_s23 + $0x1c] ss:$36 sps:$4 sm:$0xff]  }
  0x6f   : > { %1925 = vmatprep.mubr.bf16.mxu0 %v3131_v47  ;;  %v3195_v47 = vld [vmem:[%s3350_s19 + $0x1f0] ss:$8 sps:$4 sm:$0xff]  }
  0x70   : > { %1755 = vmatpush1.bf16.msra.mxu1 %v3123_v48  ;;  %v3612_v48 = vld [vmem:[%s3350_s19 + $0x3f0] ss:$8 sps:$4 sm:$0xff]  }
  0x71   : > { %1981 = vmatpush1.bf16.msra.mxu0 %v3516_v49  ;;  %1756 = vmatprep.subr.bf16.mxu1 %v3136_v50  ;;  %v3209_v50 = vld [vmem:[%s3350_s19 + $0x404] ss:$8 sps:$4 sm:$0xff]  }
  0x72   : > { %1982 = vmatprep.subr.bf16.mxu0 %v3521_v51 }
  0x73   : > { %1700 = vmatmul.mubr.bf16.gmra.mrb[16].mxu1 %v3133_v52  ;;  %v3201_v52 = vld [vmem:[%s3401_s23 + $0x8] ss:$36 sps:$4 sm:$0xff]  }
  0x74   : > { %1926 = vmatmul.mubr.bf16.gmra.mrb[16].mxu0 %v3137_v54  ;;  %1757 = vmatpush1.bf16.msra.mxu1 %v3134_v53  ;;  %v3204_v53 = vld [vmem:[%s3401_s23 + $0x18] ss:$36 sps:$4 sm:$0xff]   ;;  %v3207_v54 = vld [vmem:[%s3350_s19 + $0x400] ss:$8 sps:$4 sm:$0xff]  }
  0x75   : > { %1983 = vmatpush1.bf16.msra.mxu0 %v3527_v55  ;;  %1758 = vmatprep.subr.bf16.mxu1 %v3143_v56  ;;  %v3212_v56 = vld [vmem:[%s3350_s19 + $0x414] ss:$8 sps:$4 sm:$0xff]  }
  0x76   : > { %1984 = vmatprep.subr.bf16.mxu0 %v3533_v57  ;;  %1709 = vmatprep.mubr.bf16.mxu1 %v3147_v58  ;;  %v3213_v58 = vld [vmem:[%s3401_s23 + $0x54] ss:$36 sps:$4 sm:$0xff]  }
  0x77   : > { %1935 = vmatprep.mubr.bf16.mxu0 %v3149_v59  ;;  %v3215_v59 = vld [vmem:[%s3401_s23 + $0x64] ss:$36 sps:$4 sm:$0xff]  }
  0x78   : > { %1759 = vmatpush1.bf16.msra.mxu1 %v3141_v60  ;;  %v3210_v60 = vld [vmem:[%s3350_s19 + $0x410] ss:$8 sps:$4 sm:$0xff]  }
  0x79   : > { %1985 = vmatpush1.bf16.msra.mxu0 %v3540_v61  ;;  %1760 = vmatprep.subr.bf16.mxu1 %v3154_v62  ;;  %v3221_v62 = vld [vmem:[%s3350_s19 + $0x424] ss:$8 sps:$4 sm:$0xff]  }
  0x7a   : > { %1986 = vmatprep.subr.bf16.mxu0 %v3545_v63 }
  0x7b   : > { %1710 = vmatmul.mubr.bf16.gmra.mrb[20].mxu1 %v3151_v0  ;;  %v3218_v0 = vld [vmem:[%s3401_s23 + $0x60] ss:$36 sps:$4 sm:$0xff]  }
  0x7c   : > { %1936 = vmatmul.mubr.bf16.gmra.mrb[20].mxu0 %v3155_v2  ;;  %1761 = vmatpush1.bf16.msra.mxu1 %v3152_v1  ;;  %v3219_v1 = vld [vmem:[%s3350_s19 + $0x420] ss:$8 sps:$4 sm:$0xff]  }
  0x7d   : > { %1987 = vmatpush1.bf16.msra.mxu0 %v3551_v4  ;;  %1762 = vmatprep.subr.bf16.mxu1 %v3161_v5  ;;  %v3225_v2 = vld [vmem:[%s3401_s23 + $0x9c] ss:$36 sps:$4 sm:$0xff]   ;;  %v3233_v5 = vld [vmem:[%s3350_s19 + $0x444] ss:$8 sps:$4 sm:$0xff]  }
  0x7e   : > { %1988 = vmatprep.subr.bf16.mxu0 %v3557_v6  ;;  %1719 = vmatprep.mubr.bf16.mxu1 %v3165_v8  ;;  %v3230_v8 = vld [vmem:[%s3401_s23 + $0xa8] ss:$36 sps:$4 sm:$0xff]  }
  0x7f   : > { %1945 = vmatprep.mubr.bf16.mxu0 %v3167_v10  ;;  %v3231_v10 = vld [vmem:[%s3350_s19 + $0x440] ss:$8 sps:$4 sm:$0xff]  }
  0x80   : > { %1763 = vmatpush1.bf16.msra.mxu1 %v3159_v11  ;;  %v3237_v11 = vld [vmem:[%s3401_s23 + $0xe4] ss:$36 sps:$4 sm:$0xff]  }
  0x81   : > { %1989 = vmatpush1.bf16.msra.mxu0 %v3563_v12  ;;  %1764 = vmatprep.subr.bf16.mxu1 %v3172_v14  ;;  %v3234_v14 = vld [vmem:[%s3350_s19 + $0x450] ss:$8 sps:$4 sm:$0xff]  }
  0x82   : > { %1990 = vmatprep.subr.bf16.mxu0 %v3569_v16 }
  0x83   : > { %1720 = vmatmul.mubr.bf16.gmra.mrb[24].mxu1 %v3169_v17  ;;  %v3242_v17 = vld [vmem:[%s3401_s23 + $0xf0] ss:$36 sps:$4 sm:$0xff]  }
  0x84   : > { %1946 = vmatmul.mubr.bf16.gmra.mrb[24].mxu0 %v3173_v20  ;;  %1765 = vmatpush1.bf16.msra.mxu1 %v3170_v18  ;;  %v3243_v18 = vld [vmem:[%s3350_s19 + $0x460] ss:$8 sps:$4 sm:$0xff]   ;;  %v3249_v20 = vld [vmem:[%s3401_s23 + $0x12c] ss:$36 sps:$4 sm:$0xff]  }
  0x85   : > { %1991 = vmatpush1.bf16.msra.mxu0 %v3575_v22  ;;  %1766 = vmatprep.subr.bf16.mxu1 %v3179_v23  ;;  %v3252_v23 = vld [vmem:[%s3401_s23 + $0x20] ss:$36 sps:$4 sm:$0xff]  }
  0x86   : > { %1992 = vmatprep.subr.bf16.mxu0 %v3581_v24  ;;  %1729 = vmatprep.mubr.bf16.mxu1 %v3183_v26  ;;  %v3253_v26 = vld [vmem:[%s3401_s23 + $0x174] ss:$36 sps:$4 sm:$0xff]  }
  0x87   : > { %1955 = vmatprep.mubr.bf16.mxu0 %v3185_v28  ;;  %v3273_v28 = vld [vmem:[%s3401_s23 + $0x1cc] ss:$36 sps:$4 sm:$0xff]  }
  0x88   : > { %1767 = vmatpush1.bf16.msra.mxu1 %v3177_v29  ;;  %v3275_v29 = vld [vmem:[%s3401_s23 + $0x1c8] ss:$36 sps:$4 sm:$0xff]  }
  0x89   : > { %1993 = vmatpush1.bf16.msra.mxu0 %v3587_v30  ;;  %1768 = vmatprep.subr.bf16.mxu1 %v3190_v32  ;;  %v3277_v32 = vld [vmem:[%s3401_s23 + $0x214] ss:$36 sps:$4 sm:$0xff]  }
  0x8a   : > { %1994 = vmatprep.subr.bf16.mxu0 %v3593_v34 }
  0x8b   : > { %1730 = vmatmul.mubr.bf16.gmra.mrb[28].mxu1 %v3187_v35  ;;  %v3280_v35 = vld [vmem:[%s3401_s23 + $0x218] ss:$36 sps:$4 sm:$0xff]  }
  0x8c   : > { %1956 = vmatmul.mubr.bf16.gmra.mrb[28].mxu0 %v3191_v38  ;;  %1769 = vmatpush1.bf16.msra.mxu1 %v3188_v36 }
  0x8d   : > { %1995 = vmatpush1.bf16.msra.mxu0 %v3599_v40  ;;  %1770 = vmatprep.subr.bf16.mxu1 %v3197_v41 }
  0x8e   : > { %1996 = vmatprep.subr.bf16.mxu0 %v3605_v42  ;;  %1772 = vmatprep.mubr.bf16.mxu1 %v3203_v44 }
  0x8f   : > { %1998 = vmatprep.mubr.bf16.mxu0 %v3206_v46 }
  0x90   : > { %1771 = vmatpush1.bf16.msra.mxu1 %v3195_v47 }
  0x91   : > { %1997 = vmatpush1.bf16.msra.mxu0 %v3612_v48  ;;  %2742 = vmatprep.subr.bf16.mxu1 %v3426_v3  ;;  %v3217_v3 = vld [vmem:[%s3401_s23 + $0x50] ss:$36 sps:$4 sm:$0xff]  }
  0x92   : > { %2079 = vmatprep.subr.bf16.mxu0 %v3209_v50 }
  0x93   : > { %1773 = vmatmul.mubr.bf16.vlgmr.msra.gmra.mrb[0].mxu1 %v3201_v52 }
  0x94   : > { %1999 = vmatmul.mubr.bf16.vlgmr.msra.gmra.mrb[0].mxu0 %v3204_v53  ;;  %2758 = vmatpush1.bf16.msra.mxu1 %v3432_v7  ;;  %v3224_v7 = vld [vmem:[%s3350_s19 + $0x434] ss:$8 sps:$4 sm:$0xff]  }
  0x95   : > { %2080 = vmatpush1.bf16.msra.mxu0 %v3207_v54  ;;  %2743 = vmatprep.subr.bf16.mxu1 %v3437_v9  ;;  %v3227_v9 = vld [vmem:[%s3401_s23 + $0xac] ss:$36 sps:$4 sm:$0xff]  }
  0x96   : > { %2081 = vmatprep.subr.bf16.mxu0 %v3212_v56  ;;  %1782 = vmatprep.mubr.bf16.mxu1 %v3213_v58 }
  0x97   : > { %2008 = vmatprep.mubr.bf16.mxu0 %v3215_v59 }
  0x98   : > { %2759 = vmatpush1.bf16.msra.mxu1 %v3444_v13  ;;  %v3222_v13 = vld [vmem:[%s3350_s19 + $0x430] ss:$8 sps:$4 sm:$0xff]  }
  0x99   : > { %2082 = vmatpush1.bf16.msra.mxu0 %v3210_v60  ;;  %2744 = vmatprep.subr.bf16.mxu1 %v3449_v15  ;;  %v3229_v15 = vld [vmem:[%s3401_s23 + $0x98] ss:$36 sps:$4 sm:$0xff]  }
  0x9a   : > { %2083 = vmatprep.subr.bf16.mxu0 %v3221_v62 }
  0x9b   : > { %1783 = vmatmul.mubr.bf16.gmra.mrb[4].mxu1 %v3217_v3 }
  0x9c   : > { %2009 = vmatmul.mubr.bf16.gmra.mrb[4].mxu0 %v3218_v0  ;;  %2760 = vmatpush1.bf16.msra.mxu1 %v3455_v19  ;;  %v3236_v19 = vld [vmem:[%s3350_s19 + $0x454] ss:$8 sps:$4 sm:$0xff]  }
  0x9d   : > { %2084 = vmatpush1.bf16.msra.mxu0 %v3219_v1  ;;  %2745 = vmatprep.subr.bf16.mxu1 %v3461_v21  ;;  %v3239_v21 = vld [vmem:[%s3401_s23 + $0xf4] ss:$36 sps:$4 sm:$0xff]  }
  0x9e   : > { %2085 = vmatprep.subr.bf16.mxu0 %v3224_v7  ;;  %1792 = vmatprep.mubr.bf16.mxu1 %v3225_v2 }
  0x9f   : > { %2018 = vmatprep.mubr.bf16.mxu0 %v3227_v9 }
  0xa0   : > { %2761 = vmatpush1.bf16.msra.mxu1 %v3468_v25  ;;  %v3245_v25 = vld [vmem:[%s3350_s19 + $0x464] ss:$8 sps:$4 sm:$0xff]  }
  0xa1   : > { %2086 = vmatpush1.bf16.msra.mxu0 %v3222_v13  ;;  %2746 = vmatprep.subr.bf16.mxu1 %v3473_v27  ;;  %v3241_v27 = vld [vmem:[%s3401_s23 + $0xe0] ss:$36 sps:$4 sm:$0xff]   ;;  %v529_v13 = vlaneseq }
  0xa2   : > { %2087 = vmatprep.subr.bf16.mxu0 %v3233_v5 }
  0xa3   : > { %1793 = vmatmul.mubr.bf16.gmra.mrb[8].mxu1 %v3229_v15 }
  0xa4   : > { %2019 = vmatmul.mubr.bf16.gmra.mrb[8].mxu0 %v3230_v8  ;;  %2762 = vmatpush1.bf16.msra.mxu1 %v3479_v31  ;;  %v3248_v31 = vld [vmem:[%s3350_s19 + $0x474] ss:$8 sps:$4 sm:$0xff]  }
  0xa5   : > { %2088 = vmatpush1.bf16.msra.mxu0 %v3231_v10  ;;  %2747 = vmatprep.subr.bf16.mxu1 %v3485_v33  ;;  %v3246_v33 = vld [vmem:[%s3350_s19 + $0x470] ss:$8 sps:$4 sm:$0xff]   ;;  %v530_v10 = vshrl.u32 %v529_v13, 7 }
  0xa6   : > { %2089 = vmatprep.subr.bf16.mxu0 %v3236_v19  ;;  %1802 = vmatprep.mubr.bf16.mxu1 %v3237_v11 }
  0xa7   : > { %2028 = vmatprep.mubr.bf16.mxu0 %v3239_v21  ;;  %v531_v11 = vsub.s32 0, %v530_v10  ;;  %v527_v21 = vld [vmem:[%s284_s27] sm:$0x3] }
  0xa8   : > { %2763 = vmatpush1.bf16.msra.mxu1 %v3492_v37  ;;  %v3305_v37 = vmov 0  }
  0xa9   : > { %2090 = vmatpush1.bf16.msra.mxu0 %v3234_v14  ;;  %2748 = vmatprep.subr.bf16.mxu1 %v3497_v39  ;;  %v3251_v39 = vld [vmem:[%s3401_s23 + $0x128] ss:$36 sps:$4 sm:$0xff]   ;;  %v535_v14 = vsub.s32 1, %v530_v10 }
  0xaa   : > { %2091 = vmatprep.subr.bf16.mxu0 %v3245_v25 }
  0xab   : > { %1803 = vmatmul.mubr.bf16.gmra.mrb[12].mxu1 %v3241_v27 }
  0xac   : > { %2029 = vmatmul.mubr.bf16.gmra.mrb[12].mxu0 %v3242_v17  ;;  %2764 = vmatpush1.bf16.msra.mxu1 %v3503_v43  ;;  %v3255_v43 = vld [vmem:[%s3401_s23 + $0x170] ss:$36 sps:$4 sm:$0xff]  }
  0xad   : > { %2092 = vmatpush1.bf16.msra.mxu0 %v3243_v18  ;;  %2749 = vmatprep.subr.bf16.mxu1 %v3509_v45  ;;  %v3256_v45 = vld [vmem:[%s3401_s23 + $0x68] ss:$36 sps:$4 sm:$0xff]   ;;  %v3758_v18 = vrot.slane %v527_v21, %v531_v11 }
  0xae   : > { %2093 = vmatprep.subr.bf16.mxu0 %v3248_v31  ;;  %1812 = vmatprep.mubr.bf16.mxu1 %v3249_v20  ;;  %v3762_v20 = vrot.slane %v527_v21, %v535_v14 }
  0xaf   : > { %2111 = vmatprep.mubr.bf16.mxu0 %v3305_v37 }
  0xb0   : > { %2765 = vmatpush1.bf16.msra.mxu1 %v3516_v49  ;;  %v3257_v49 = vld [vmem:[%s3401_s23 + $0x1bc] ss:$36 sps:$4 sm:$0xff]  }
  0xb1   : > { %2094 = vmatpush1.bf16.msra.mxu0 %v3246_v33  ;;  %2750 = vmatprep.subr.bf16.mxu1 %v3521_v51  ;;  %v3259_v51 = vld [vmem:[%s3401_s23 + $0x1b8] ss:$36 sps:$4 sm:$0xff]  }
  0xb3   : > { %1813 = vmatmul.mubr.bf16.gmra.mrb[16].mxu1 %v3251_v39 }
  0xb4   : > { %2112 = vmatmul.mubr.bf16.vlgmr.msra.gmra.mrb[0].mxu0 %v3252_v23  ;;  %2766 = vmatpush1.bf16.msra.mxu1 %v3527_v55  ;;  %v3260_v55 = vld [vmem:[%s3401_s23 + $0xb0] ss:$36 sps:$4 sm:$0xff]  }
  0xb5   : > { %1822 = vmatprep.mubr.bf16.mxu1 %v3253_v26  ;;  %2751 = vmatprep.subr.bf16.mxu1 %v3533_v57  ;;  %v3261_v57 = vld [vmem:[%s3401_s23 + $0x204] ss:$36 sps:$4 sm:$0xff]  }
  0xb6   : > { %2121 = vmatprep.mubr.bf16.mxu0 %v3305_v37 }
  0xb8   : > { %2767 = vmatpush1.bf16.msra.mxu1 %v3540_v61  ;;  %v3263_v61 = vld [vmem:[%s3401_s23 + $0x200] ss:$36 sps:$4 sm:$0xff]  }
  0xb9   : > { %2752 = vmatprep.subr.bf16.mxu1 %v3545_v63  ;;  %v3264_v63 = vld [vmem:[%s3401_s23 + $0xf8] ss:$36 sps:$4 sm:$0xff]  }
  0xbb   : > { %1823 = vmatmul.mubr.bf16.gmra.mrb[20].mxu1 %v3255_v43 }
  0xbc   : > { %2122 = vmatmul.mubr.bf16.gmra.mrb[4].mxu0 %v3256_v45  ;;  %2768 = vmatpush1.bf16.msra.mxu1 %v3551_v4  ;;  %v3267_v4 = vld [vmem:[%s3401_s23 + $0x13c] ss:$36 sps:$4 sm:$0xff]  }
  0xbd   : > { %1832 = vmatprep.mubr.bf16.mxu1 %v3257_v49  ;;  %2753 = vmatprep.subr.bf16.mxu1 %v3557_v6  ;;  %v3265_v6 = vld [vmem:[%s3401_s23 + $0x138] ss:$36 sps:$4 sm:$0xff]  }
  0xbe   : > { %2131 = vmatprep.mubr.bf16.mxu0 %v3305_v37 }
  0xc0   : > { %2769 = vmatpush1.bf16.msra.mxu1 %v3563_v12  ;;  %v3268_v12 = vld [vmem:[%s3401_s23 + $0x140] ss:$36 sps:$4 sm:$0xff]  }
  0xc1   : > { %2754 = vmatprep.subr.bf16.mxu1 %v3569_v16  ;;  %v3269_v16 = vld [vmem:[%s3401_s23 + $0x184] ss:$36 sps:$4 sm:$0xff]  }
  0xc3   : > { %1833 = vmatmul.mubr.bf16.gmra.mrb[24].mxu1 %v3259_v51 }
  0xc4   : > { %2132 = vmatmul.mubr.bf16.gmra.mrb[8].mxu0 %v3260_v55  ;;  %2770 = vmatpush1.bf16.msra.mxu1 %v3575_v22  ;;  %v3271_v22 = vld [vmem:[%s3401_s23 + $0x180] ss:$36 sps:$4 sm:$0xff]  }
  0xc5   : > { %1842 = vmatprep.mubr.bf16.mxu1 %v3261_v57  ;;  %2755 = vmatprep.subr.bf16.mxu1 %v3581_v24  ;;  %v3272_v24 = vld [vmem:[%s3401_s23 + $0x188] ss:$36 sps:$4 sm:$0xff]  }
  0xc6   : > { %2141 = vmatprep.mubr.bf16.mxu0 %v3305_v37 }
  0xc8   : > { %2771 = vmatpush1.bf16.msra.mxu1 %v3587_v30  ;;  %v3276_v30 = vld [vmem:[%s3401_s23 + $0x1d0] ss:$36 sps:$4 sm:$0xff]  }
  0xc9   : > { %2756 = vmatprep.subr.bf16.mxu1 %v3593_v34  ;;  %v3279_v34 = vld [vmem:[%s3401_s23 + $0x210] ss:$36 sps:$4 sm:$0xff]  }
  0xcb   : > { %1843 = vmatmul.mubr.bf16.gmra.mrb[28].mxu1 %v3263_v61 }
  0xcc   : > { %2142 = vmatmul.mubr.bf16.gmra.mrb[12].mxu0 %v3264_v63  ;;  %2772 = vmatpush1.bf16.msra.mxu1 %v3599_v40 }
  0xcd   : > { %2038 = vmatprep.mubr.bf16.mxu1 %v3267_v4  ;;  %2757 = vmatprep.subr.bf16.mxu1 %v3605_v42 }
  0xce   : > { %2151 = vmatprep.mubr.bf16.mxu0 %v3305_v37 }
  0xd0   : > { %2773 = vmatpush1.bf16.msra.mxu1 %v3612_v48 }
  0xd3   : > { %2039 = vmatmul.mubr.bf16.vlgmr.msra.gmra.mrb[32].mxu1 %v3265_v6 }
  0xd4   : > { %2152 = vmatmul.mubr.bf16.gmra.mrb[32].mxu0 %v3268_v12  ;;  %2048 = vmatprep.mubr.bf16.mxu1 %v3269_v16 }
  0xd5   : > { %2161 = vmatprep.mubr.bf16.mxu0 %v3305_v37 }
  0xdb   : > { %2049 = vmatmul.mubr.bf16.gmra.mrb[36].mxu1 %v3271_v22 }
  0xdc   : > { %2162 = vmatmul.mubr.bf16.gmra.mrb[36].mxu0 %v3272_v24  ;;  %2058 = vmatprep.mubr.bf16.mxu1 %v3273_v28 }
  0xdd   : > { %2171 = vmatprep.mubr.bf16.mxu0 %v3305_v37 }
  0xe3   : > { %2059 = vmatmul.mubr.bf16.gmra.mrb[40].mxu1 %v3275_v29 }
  0xe4   : > { %2172 = vmatmul.mubr.bf16.gmra.mrb[40].mxu0 %v3276_v30  ;;  %2068 = vmatprep.mubr.bf16.mxu1 %v3277_v32 }
  0xe5   : > { %2181 = vmatprep.mubr.bf16.mxu0 %v3305_v37 }
  0xeb   : > { %2069 = vmatmul.mubr.bf16.gmra.mrb[44].mxu1 %v3279_v34 }
  0xec   : > { %2182 = vmatmul.mubr.bf16.gmra.mrb[44].mxu0 %v3280_v35 }
 0x147   : > { %v1927_v36 = vpop.f32.mrb[16].mxu0 }
 0x148   : > { %v3710_v38 = vpop.f32.mrb[17].mxu0 }
 0x149   : > { %v3712_v40 = vpop.f32.mrb[18].mxu0 }
 0x14a   : > { %v3714_v41 = vpop.f32.mrb[19].mxu0 }
 0x14f   : > { %v3716_v42 = vpop.f32.mrb[20].mxu0 }
 0x150   : > { %v3718_v44 = vpop.f32.mrb[21].mxu0 }
 0x151   : > { %v3720_v46 = vpop.f32.mrb[22].mxu0 }
 0x152   : > { %v3722_v47 = vpop.f32.mrb[23].mxu0 }
 0x157   : > { %v3724_v48 = vpop.f32.mrb[24].mxu0 }
 0x158   : > { %v3726_v50 = vpop.f32.mrb[25].mxu0 }
 0x159   : > { %v3728_v52 = vpop.f32.mrb[26].mxu0 }
 0x15a   : > { %v3730_v53 = vpop.f32.mrb[27].mxu0 }
 0x15f   : > { %v3732_v54 = vpop.f32.mrb[28].mxu0 }
 0x160   : > { %v3734_v56 = vpop.f32.mrb[29].mxu0 }
 0x161   : > { %v3736_v58 = vpop.f32.mrb[30].mxu0 }
 0x162   : > { %v3738_v59 = vpop.f32.mrb[31].mxu0 }
 0x166   : > { %v1774_v60 = vpop.f32.mrb[0].mxu1 }
 0x167   : > { %v1776_v62 = vpop.f32.mrb[1].mxu1  ;;  %v2774_v33 = vadd.f32 %v1774_v60, %v3758_v18 }
 0x168   : > { %v1778_v3 = vpop.f32.mrb[2].mxu1  ;;  %v2776_v37 = vadd.f32 %v1776_v62, %v3762_v20 }
 0x169   : > { %v1780_v0 = vpop.f32.mrb[3].mxu1  ;;  %v2778_v26 = vadd.f32 %v1778_v3, %v3758_v18 }
 0x16a   : > { %v2780_v55 = vadd.f32 %v1780_v0, %v3762_v20 }
 0x16e   : > { %v1784_v1 = vpop.f32.mrb[4].mxu1 }
 0x16f   : > { %v1786_v7 = vpop.f32.mrb[5].mxu1  ;;  %v2782_v0 = vadd.f32 %v1784_v1, %v3758_v18 }
 0x170   : > { %v1788_v2 = vpop.f32.mrb[6].mxu1 }
 0x171   : > { %v1790_v9 = vpop.f32.mrb[7].mxu1  ;;  %v2786_v21 = vadd.f32 %v1788_v2, %v3758_v18 }
 0x176   : > { %v3740_v5 = vpop.f32.mrb[8].mxu1 }
 0x177   : > { %v3742_v15 = vpop.f32.mrb[9].mxu1 }
 0x178   : > { %v3745_v8 = vpop.f32.mrb[10].mxu1 }
 0x179   : > { %v3747_v19 = vpop.f32.mrb[11].mxu1 }
 0x17e   : > { %v3752_v25 = vpop.f32.mrb[12].mxu1 }
 0x17f   : > { %v3754_v27 = vpop.f32.mrb[13].mxu1 }
 0x180   : > { %v3756_v17 = vpop.f32.mrb[14].mxu1 }
 0x181   : > { %v3760_v31 = vpop.f32.mrb[15].mxu1 }
 0x186   : > { %v1814_v39 = vpop.f32.mrb[16].mxu1 }
 0x187   : > { %v2113_v23 = vpop.f32.mrb[0].mxu0  ;;  %v2806_v43 = vadd.f32 %v1814_v39, %v3758_v18  ;;  %v1816_v49 = vpop.f32.mrb[17].mxu1  ;;  %v2788_v39 = vadd.f32 %v1790_v9, %v3762_v20 }
 0x188   : > { %v2775_v45 = vadd.f32 %v2774_v33, %v2113_v23  ;;  %v2115_v51 = vpop.f32.mrb[1].mxu0  ;;  %v2810_v57 = vadd.f32 %v1816_v49, %v3762_v20  ;;  %v1818_v63 = vpop.f32.mrb[18].mxu1 }
 0x189   : > { %v2777_v61 = vadd.f32 %v2776_v37, %v2115_v51  ;;  %v2117_v4 = vpop.f32.mrb[2].mxu0  ;;  %v2814_v12 = vadd.f32 %v1818_v63, %v3758_v18  ;;  %v1820_v22 = vpop.f32.mrb[19].mxu1  ;;  %v3772_v28 = vadd.f32 %v2806_v43, %v1927_v36 }
 0x18a   : > { %v2192_v6 = vmax.f32 %v2775_v45, 0.0  ;;  %v2779_v16 = vadd.f32 %v2778_v26, %v2117_v4  ;;  %v2119_v24 = vpop.f32.mrb[3].mxu0  ;;  %v2818_v30 = vadd.f32 %v1820_v22, %v3762_v20  ;;  %v3776_v34 = vadd.f32 %v2810_v57, %v3710_v38 }
 0x18b   : > { %v2193_v29 = vmax.f32 %v2777_v61, 0.0  ;;  %v2781_v32 = vadd.f32 %v2780_v55, %v2119_v24  ;;  %v3784_v60 = vadd.f32 %v2814_v12, %v3712_v40  ;;  %v2784_v38 = vadd.f32 %v1786_v7, %v3762_v20 }
 0x18c   : > { %v2194_v35 = vmax.f32 %v2779_v16, 0.0  ;;  %v3787_v3 = vadd.f32 %v2818_v30, %v3714_v41  ;;  %v2792_v22 = vadd.f32 %v3742_v15, %v3762_v20 }
 0x18d   : > { %v2726_v36 = vpack.c.bf16 %v2193_v29, %v2192_v6  ;;  %v2195_v62 = vmax.f32 %v2781_v32, 0.0 }
 0x18e   : > { %v1824_v10 = vpop.f32.mrb[20].mxu1 }
 0x18f   : > { %2320 = vst [vmem:[%s3781_s4] sm:$0xff] %v2726_v36  ;;  %v2727_v13 = vpack.c.bf16 %v2195_v62, %v2194_v35  ;;  %v2123_v11 = vpop.f32.mrb[4].mxu0  ;;  %v2822_v14 = vadd.f32 %v1824_v10, %v3758_v18  ;;  %v1826_v33 = vpop.f32.mrb[21].mxu1 }
 0x190   : > { %v2783_v40 = vadd.f32 %v2782_v0, %v2123_v11  ;;  %v2125_v37 = vpop.f32.mrb[5].mxu0  ;;  %v2826_v41 = vadd.f32 %v1826_v33, %v3762_v20  ;;  %v1828_v1 = vpop.f32.mrb[22].mxu1 }
 0x191   : > { %2321 = vst [vmem:[%s3781_s4 + $0x8] sm:$0xff] %v2727_v13  ;;  %v2785_v23 = vadd.f32 %v2784_v38, %v2125_v37  ;;  %v2127_v26 = vpop.f32.mrb[6].mxu0  ;;  %v2830_v43 = vadd.f32 %v1828_v1, %v3758_v18  ;;  %v1830_v49 = vpop.f32.mrb[23].mxu1  ;;  %v3799_v51 = vadd.f32 %v2822_v14, %v3716_v42  ;;  %v2790_v42 = vadd.f32 %v3740_v5, %v3758_v18 }
 0x192   : > { %v2196_v7 = vmax.f32 %v2783_v40, 0.0  ;;  %v2787_v45 = vadd.f32 %v2786_v21, %v2127_v26  ;;  %v2129_v2 = vpop.f32.mrb[7].mxu0  ;;  %v2834_v57 = vadd.f32 %v1830_v49, %v3762_v20  ;;  %v3803_v61 = vadd.f32 %v2826_v41, %v3718_v44 }
 0x193   : > { %v2197_v55 = vmax.f32 %v2785_v23, 0.0  ;;  %v2789_v9 = vadd.f32 %v2788_v39, %v2129_v2  ;;  %v3806_v4 = vadd.f32 %v2830_v43, %v3720_v46  ;;  %v2794_v46 = vadd.f32 %v3745_v8, %v3758_v18 }
 0x194   : > { %v2198_v63 = vmax.f32 %v2787_v45, 0.0  ;;  %v3809_v16 = vadd.f32 %v2834_v57, %v3722_v47  ;;  %v2796_v47 = vadd.f32 %v3747_v19, %v3762_v20  ;;  %v2800_v26 = vadd.f32 %v3754_v27, %v3762_v20 }
 0x195   : > { %v2728_v6 = vpack.c.bf16 %v2197_v55, %v2196_v7  ;;  %v2199_v12 = vmax.f32 %v2789_v9, 0.0 }
 0x196   : > { %v1834_v44 = vpop.f32.mrb[24].mxu1 }
 0x197   : > { %2322 = vst [vmem:[%s3781_s4 + $0x10] sm:$0xff] %v2728_v6  ;;  %v2729_v24 = vpack.c.bf16 %v2199_v12, %v2198_v63  ;;  %v2133_v29 = vpop.f32.mrb[8].mxu0  ;;  %v2838_v30 = vadd.f32 %v1834_v44, %v3758_v18  ;;  %v1836_v35 = vpop.f32.mrb[25].mxu1 }
 0x198   : > { %v2791_v32 = vadd.f32 %v2790_v42, %v2133_v29  ;;  %v2135_v36 = vpop.f32.mrb[9].mxu0  ;;  %v2842_v5 = vadd.f32 %v1836_v35, %v3762_v20  ;;  %v1838_v15 = vpop.f32.mrb[26].mxu1 }
 0x199   : > { %2323 = vst [vmem:[%s3781_s4 + $0x18] sm:$0xff] %v2729_v24  ;;  %v2793_v62 = vadd.f32 %v2792_v22, %v2135_v36  ;;  %v2137_v0 = vpop.f32.mrb[10].mxu0  ;;  %v2846_v13 = vadd.f32 %v1838_v15, %v3758_v18  ;;  %v1840_v8 = vpop.f32.mrb[27].mxu1  ;;  %v3825_v21 = vadd.f32 %v2838_v30, %v3724_v48  ;;  %v2798_v48 = vadd.f32 %v3752_v25, %v3758_v18 }
 0x19a   : > { %v2200_v38 = vmax.f32 %v2791_v32, 0.0  ;;  %v2795_v10 = vadd.f32 %v2794_v46, %v2137_v0  ;;  %v2139_v11 = vpop.f32.mrb[11].mxu0  ;;  %v2850_v40 = vadd.f32 %v1840_v8, %v3762_v20  ;;  %v3829_v33 = vadd.f32 %v2842_v5, %v3726_v50 }
 0x19b   : > { %v2201_v14 = vmax.f32 %v2793_v62, 0.0  ;;  %v2797_v19 = vadd.f32 %v2796_v47, %v2139_v11  ;;  %v3832_v39 = vadd.f32 %v2846_v13, %v3728_v52  ;;  %v2802_v52 = vadd.f32 %v3756_v17, %v3758_v18 }
 0x19c   : > { %v2202_v37 = vmax.f32 %v2795_v10, 0.0  ;;  %v3835_v1 = vadd.f32 %v2850_v40, %v3730_v53  ;;  %v2804_v53 = vadd.f32 %v3760_v31, %v3762_v20 }
 0x19d   : > { %v2730_v41 = vpack.c.bf16 %v2201_v14, %v2200_v38  ;;  %v2203_v23 = vmax.f32 %v2797_v19, 0.0 }
 0x19e   : > { %v1844_v50 = vpop.f32.mrb[28].mxu1 }
 0x19f   : > { %2324 = vst [vmem:[%s3781_s4 + $0x20] sm:$0xff] %v2730_v41  ;;  %v2731_v7 = vpack.c.bf16 %v2203_v23, %v2202_v37  ;;  %v2143_v43 = vpop.f32.mrb[12].mxu0  ;;  %v2854_v45 = vadd.f32 %v1844_v50, %v3758_v18  ;;  %v1846_v2 = vpop.f32.mrb[29].mxu1 }
 0x1a0   : > { %v2799_v49 = vadd.f32 %v2798_v48, %v2143_v43  ;;  %v2145_v55 = vpop.f32.mrb[13].mxu0  ;;  %v2858_v25 = vadd.f32 %v1846_v2, %v3762_v20  ;;  %v1848_v27 = vpop.f32.mrb[30].mxu1 }
 0x1a1   : > { %2325 = vst [vmem:[%s3781_s4 + $0x28] sm:$0xff] %v2731_v7  ;;  %v2801_v57 = vadd.f32 %v2800_v26, %v2145_v55  ;;  %v2147_v9 = vpop.f32.mrb[14].mxu0  ;;  %v2862_v6 = vadd.f32 %v1848_v27, %v3758_v18  ;;  %v1850_v17 = vpop.f32.mrb[31].mxu1  ;;  %v3851_v22 = vadd.f32 %v2854_v45, %v3732_v54 }
 0x1a2   : > { %v2204_v63 = vmax.f32 %v2799_v49, 0.0  ;;  %v2803_v12 = vadd.f32 %v2802_v52, %v2147_v9  ;;  %v2149_v42 = vpop.f32.mrb[15].mxu0  ;;  %v2866_v31 = vadd.f32 %v1850_v17, %v3762_v20  ;;  %v3855_v29 = vadd.f32 %v2858_v25, %v3734_v56 }
 0x1a3   : > { %v2205_v24 = vmax.f32 %v2801_v57, 0.0  ;;  %v2805_v44 = vadd.f32 %v2804_v53, %v2149_v42  ;;  %v3858_v30 = vadd.f32 %v2862_v6, %v3736_v58 }
 0x1a4   : > { %v2206_v46 = vmax.f32 %v2803_v12, 0.0  ;;  %v3861_v35 = vadd.f32 %v2866_v31, %v3738_v59 }
 0x1a5   : > { %v2732_v32 = vpack.c.bf16 %v2205_v24, %v2204_v63  ;;  %v2207_v18 = vmax.f32 %v2805_v44, 0.0 }
 0x1a6   : > { %v2040_v36 = vpop.f32.mrb[32].mxu1 }
 0x1a7   : > { %2326 = vst [vmem:[%s3781_s4 + $0x30] sm:$0xff] %v2732_v32  ;;  %v2733_v54 = vpack.c.bf16 %v2207_v18, %v2206_v46  ;;  %v2153_v47 = vpop.f32.mrb[32].mxu0  ;;  %v2808_v5 = vadd.f32 %v3772_v28, %v2040_v36  ;;  %v2042_v20 = vpop.f32.mrb[33].mxu1 }
 0x1a8   : > { %v2155_v62 = vpop.f32.mrb[33].mxu0  ;;  %v2812_v56 = vadd.f32 %v3776_v34, %v2042_v20  ;;  %v2044_v15 = vpop.f32.mrb[34].mxu1 }
 0x1a9   : > { %2327 = vst [vmem:[%s3781_s4 + $0x38] sm:$0xff] %v2733_v54  ;;  %v2157_v0 = vpop.f32.mrb[34].mxu0  ;;  %v2809_v58 = vadd.f32 %v2808_v5, %v2153_v47  ;;  %v2816_v38 = vadd.f32 %v3784_v60, %v2044_v15  ;;  %v2046_v13 = vpop.f32.mrb[35].mxu1 }
 0x1aa   : > { %v2159_v59 = vpop.f32.mrb[35].mxu0  ;;  %v2813_v10 = vadd.f32 %v2812_v56, %v2155_v62  ;;  %v2820_v8 = vadd.f32 %v3787_v3, %v2046_v13 }
 0x1ab   : > { %v2208_v11 = vmax.f32 %v2809_v58, 0.0  ;;  %v2817_v14 = vadd.f32 %v2816_v38, %v2157_v0 }
 0x1ac   : > { %v2209_v40 = vmax.f32 %v2813_v10, 0.0  ;;  %v2821_v28 = vadd.f32 %v2820_v8, %v2159_v59 }
 0x1ad   : > { %v2210_v19 = vmax.f32 %v2817_v14, 0.0 }
 0x1ae   : > { %v2734_v37 = vpack.c.bf16 %v2209_v40, %v2208_v11  ;;  %v2211_v41 = vmax.f32 %v2821_v28, 0.0  ;;  %v2050_v34 = vpop.f32.mrb[36].mxu1 }
 0x1af   : > { %v2163_v23 = vpop.f32.mrb[36].mxu0  ;;  %v2824_v48 = vadd.f32 %v3799_v51, %v2050_v34  ;;  %v2052_v26 = vpop.f32.mrb[37].mxu1 }
 0x1b0   : > { %v2165_v60 = vpop.f32.mrb[37].mxu0  ;;  %2328 = vst [vmem:[%s3781_s4 + $0x40] sm:$0xff] %v2734_v37  ;;  %v2735_v7 = vpack.c.bf16 %v2211_v41, %v2210_v19  ;;  %v2828_v50 = vadd.f32 %v3803_v61, %v2052_v26  ;;  %v2054_v43 = vpop.f32.mrb[38].mxu1 }
 0x1b1   : > { %v2167_v3 = vpop.f32.mrb[38].mxu0  ;;  %v2825_v52 = vadd.f32 %v2824_v48, %v2163_v23  ;;  %v2832_v45 = vadd.f32 %v3806_v4, %v2054_v43  ;;  %v2056_v49 = vpop.f32.mrb[39].mxu1 }
 0x1b2   : > { %v2169_v2 = vpop.f32.mrb[39].mxu0  ;;  %2329 = vst [vmem:[%s3781_s4 + $0x48] sm:$0xff] %v2735_v7  ;;  %v2829_v55 = vadd.f32 %v2828_v50, %v2165_v60  ;;  %v2836_v53 = vadd.f32 %v3809_v16, %v2056_v49 }
 0x1b3   : > { %v2212_v25 = vmax.f32 %v2825_v52, 0.0  ;;  %v2833_v51 = vadd.f32 %v2832_v45, %v2167_v3 }
 0x1b4   : > { %v2213_v57 = vmax.f32 %v2829_v55, 0.0  ;;  %v2837_v27 = vadd.f32 %v2836_v53, %v2169_v2 }
 0x1b5   : > { %v2214_v9 = vmax.f32 %v2833_v51, 0.0 }
 0x1b6   : > { %v2736_v63 = vpack.c.bf16 %v2213_v57, %v2212_v25  ;;  %v2215_v61 = vmax.f32 %v2837_v27, 0.0  ;;  %v2060_v6 = vpop.f32.mrb[40].mxu1 }
 0x1b7   : > { %v2173_v12 = vpop.f32.mrb[40].mxu0  ;;  %v2840_v17 = vadd.f32 %v3825_v21, %v2060_v6  ;;  %v2062_v4 = vpop.f32.mrb[41].mxu1 }
 0x1b8   : > { %v2175_v42 = vpop.f32.mrb[41].mxu0  ;;  %2330 = vst [vmem:[%s3781_s4 + $0x50] sm:$0xff] %v2736_v63  ;;  %v2737_v24 = vpack.c.bf16 %v2215_v61, %v2214_v9  ;;  %v2844_v31 = vadd.f32 %v3829_v33, %v2062_v4  ;;  %v2064_v44 = vpop.f32.mrb[42].mxu1 }
 0x1b9   : > { %v2177_v16 = vpop.f32.mrb[42].mxu0  ;;  %v2841_v46 = vadd.f32 %v2840_v17, %v2173_v12  ;;  %v2848_v32 = vadd.f32 %v3832_v39, %v2064_v44  ;;  %v2066_v18 = vpop.f32.mrb[43].mxu1 }
 0x1ba   : > { %v2179_v54 = vpop.f32.mrb[43].mxu0  ;;  %2331 = vst [vmem:[%s3781_s4 + $0x58] sm:$0xff] %v2737_v24  ;;  %v2845_v36 = vadd.f32 %v2844_v31, %v2175_v42  ;;  %v2852_v47 = vadd.f32 %v3835_v1, %v2066_v18 }
 0x1bb   : > { %v2216_v5 = vmax.f32 %v2841_v46, 0.0  ;;  %v2849_v21 = vadd.f32 %v2848_v32, %v2177_v16 }
 0x1bc   : > { %v2217_v20 = vmax.f32 %v2845_v36, 0.0  ;;  %v2853_v62 = vadd.f32 %v2852_v47, %v2179_v54 }
 0x1bd   : > { %v2218_v56 = vmax.f32 %v2849_v21, 0.0 }
 0x1be   : > { %v2738_v15 = vpack.c.bf16 %v2217_v20, %v2216_v5  ;;  %v2219_v33 = vmax.f32 %v2853_v62, 0.0  ;;  %v2070_v0 = vpop.f32.mrb[44].mxu1 }
 0x1bf   : > { %v2183_v58 = vpop.f32.mrb[44].mxu0  ;;  %v2856_v38 = vadd.f32 %v3851_v22, %v2070_v0  ;;  %v2072_v39 = vpop.f32.mrb[45].mxu1 }
 0x1c0   : > { %v2185_v13 = vpop.f32.mrb[45].mxu0  ;;  %2332 = vst [vmem:[%s3781_s4 + $0x60] sm:$0xff] %v2738_v15  ;;  %v2739_v59 = vpack.c.bf16 %v2219_v33, %v2218_v56  ;;  %v2860_v10 = vadd.f32 %v3855_v29, %v2072_v39  ;;  %v2074_v8 = vpop.f32.mrb[46].mxu1 }
 0x1c1   : > { %v2187_v1 = vpop.f32.mrb[46].mxu0  ;;  %v2857_v11 = vadd.f32 %v2856_v38, %v2183_v58  ;;  %v2864_v14 = vadd.f32 %v3858_v30, %v2074_v8  ;;  %v2076_v40 = vpop.f32.mrb[47].mxu1 }
 0x1c2   : > { %v2189_v28 = vpop.f32.mrb[47].mxu0  ;;  %2333 = vst [vmem:[%s3781_s4 + $0x68] sm:$0xff] %v2739_v59  ;;  %v2861_v19 = vadd.f32 %v2860_v10, %v2185_v13  ;;  %v2868_v37 = vadd.f32 %v3861_v35, %v2076_v40 }
 0x1c3   : > { %v2220_v22 = vmax.f32 %v2857_v11, 0.0  ;;  %v2865_v41 = vadd.f32 %v2864_v14, %v2187_v1 }
 0x1c4   : > { %v2221_v34 = vmax.f32 %v2861_v19, 0.0  ;;  %v2869_v23 = vadd.f32 %v2868_v37, %v2189_v28 }
 0x1c5   : > { %v2222_v48 = vmax.f32 %v2865_v41, 0.0 }
 0x1c6   : > { %v2740_v26 = vpack.c.bf16 %v2221_v34, %v2220_v22  ;;  %v2223_v29 = vmax.f32 %v2869_v23, 0.0 }
 0x1c8   : > { %2334 = vst [vmem:[%s3781_s4 + $0x70] sm:$0xff] %v2740_v26  ;;  %v2741_v60 = vpack.c.bf16 %v2223_v29, %v2222_v48 }
 0x1ca   : > { %2335 = vst [vmem:[%s3781_s4 + $0x78] sm:$0xff] %v2741_v60 }
 0x1cb PF: > { %s13_s14 = sadd.s32 1, %s3303_s14   ;;  %s3902_s12 = smov %s3299_s13 }
 0x1cc   : > { %p10_p5 = scmp.ge.s32.totalorder %s13_s14, 4   ;;  %s3903_s13 = smov %s3905_s15 }
 0x1ce   :  { %12 = sbr.rel (!%p10_p5) target bundleno = 2 (0x2), region = 68 }

// kernel: ensemble_forward.14
= control target key start
LH: loop header
LB: loop body
LE: loop exit
PB: predicated region body
PF: predicated region fallthrough
CT: control target
= control target key end

     0   :  { %s3501_s12 = smov 0   ;;  %s3503_s13 = smov 0   ;;  %s3889_s0 = inlined_call_operand.vmem [shape: bf16[2,8,2304], index: 0, kind: input, shape index: {}]   ;;  %s3890_s1 = inlined_call_operand.vmem [shape: bf16[2,2304,256], index: 1, kind: input, shape index: {}]   ;;  %s3891_s2 = inlined_call_operand.vmem [shape: f32[2,1,256], index: 2, kind: input, shape index: {}]   ;;  %s3892_s3 = inlined_call_operand.vmem [shape: bf16[2,8,256], index: 3, kind: output, shape index: {}]  }
   0x1   :  { %s3505_s14 = smov 0  }
   0x2 LB: > { %s32_s15 = sadd.s32 1, %s3475_s13  ;;  %p2632_p0 = scmp.ge.s32.totalorder %s3479_s14, 1  ;;  %s3479_s14 = sphi %s3505_s14, %s13_s14   ;;  %s3475_s13 = sphi %s3503_s13, %s3894_s13   ;;  %s3471_s12 = sphi %s3501_s12, %s3893_s12  }
   0x3   : > { %p34_p1 = scmp.ge.s32.totalorder %s32_s15, 2  ;;  %p199_p2 = scmp.lt.s32.totalorder %s3479_s14, 3 }
   0x5   : > { %s3896_s15 = smov (%p34_p1, %s32_s15), 0  ;;  %p200_p3 = pnand %p2632_p0, %p199_p2 }
   0x6   : > { %p252_p4 = scmp.lt.s32.totalorder (!%p200_p3), %s3471_s12, 1 }
   0x7   : > { %203 = sbr.rel (%p200_p3) target bundleno = 560 (0x230), region = 32 }
   0xe   : > { %s3898_s12 = smov (!%p252_p4, %s3471_s12), 1 }
   0xf   : > { %s2982_s16 = smul.u32 2304, %s3898_s12  ;;  %s2635_s24 = sshll.u32 %s3898_s12, 1 }
  0x10   : > { %s2981_s20 = smul.u32 72, %s3898_s12  ;;  %s278_s27 = scalar_lea.vmem %s3891_s2, %s2635_s24 }
  0x11   : > { %s3525_s19 = scalar_lea.vmem %s3890_s1, %s2982_s16  ;;  %s2947_s28 = sshll.u32 %s3898_s12, 3 }
  0x12   : > { %v3007_v0 = vld [vmem:[%s3525_s19 + $0x4] ss:$8 sps:$4 sm:$0xff]   ;;  %v3011_v2 = vld [vmem:[%s3525_s19] ss:$8 sps:$4 sm:$0xff]   ;;  %v3013_v4 = vld [vmem:[%s3525_s19 + $0x14] ss:$8 sps:$4 sm:$0xff]   ;;  %s3575_s23 = scalar_lea.vmem %s3889_s0, %s2981_s20  ;;  %s292_s4 = scalar_lea.vmem %s3892_s3, %s2947_s28 }
  0x13   : > { %v3009_v1 = vld [vmem:[%s3525_s19 + $0x404] ss:$8 sps:$4 sm:$0xff]   ;;  %2106 = vmatprep.subr.bf16.mxu1 %v3007_v0  ;;  %v3012_v3 = vld [vmem:[%s3525_s19 + $0x400] ss:$8 sps:$4 sm:$0xff]   ;;  %v3015_v5 = vld [vmem:[%s3525_s19 + $0x414] ss:$8 sps:$4 sm:$0xff]  }
  0x14   : > { %2270 = vmatprep.subr.bf16.mxu0 %v3009_v1  ;;  %2107 = vmatpush1.bf16.msra.mxu1 %v3011_v2  ;;  %v3017_v6 = vld [vmem:[%s3525_s19 + $0x10] ss:$8 sps:$4 sm:$0xff]   ;;  %v3019_v8 = vld [vmem:[%s3525_s19 + $0x24] ss:$8 sps:$4 sm:$0xff]   ;;  %v3023_v10 = vld [vmem:[%s3525_s19 + $0x20] ss:$8 sps:$4 sm:$0xff]  }
  0x15   : > { %2271 = vmatpush1.bf16.msra.mxu0 %v3012_v3  ;;  %2108 = vmatprep.subr.bf16.mxu1 %v3013_v4  ;;  %v3018_v7 = vld [vmem:[%s3525_s19 + $0x410] ss:$8 sps:$4 sm:$0xff]   ;;  %v3021_v9 = vld [vmem:[%s3525_s19 + $0x424] ss:$8 sps:$4 sm:$0xff]   ;;  %v3024_v11 = vld [vmem:[%s3525_s19 + $0x420] ss:$8 sps:$4 sm:$0xff]  }
  0x16   : > { %2272 = vmatprep.subr.bf16.mxu0 %v3015_v5  ;;  %v3025_v12 = vld [vmem:[%s3525_s19 + $0x34] ss:$8 sps:$4 sm:$0xff]   ;;  %v3029_v14 = vld [vmem:[%s3525_s19 + $0x30] ss:$8 sps:$4 sm:$0xff]   ;;  %v3031_v16 = vld [vmem:[%s3525_s19 + $0x44] ss:$8 sps:$4 sm:$0xff]  }
  0x17   : > { %v3027_v13 = vld [vmem:[%s3525_s19 + $0x434] ss:$8 sps:$4 sm:$0xff]   ;;  %v3030_v15 = vld [vmem:[%s3525_s19 + $0x430] ss:$8 sps:$4 sm:$0xff]   ;;  %v3033_v17 = vld [vmem:[%s3525_s19 + $0x444] ss:$8 sps:$4 sm:$0xff]  }
  0x18   : > { %2109 = vmatpush1.bf16.msra.mxu1 %v3017_v6  ;;  %v3035_v18 = vld [vmem:[%s3525_s19 + $0x40] ss:$8 sps:$4 sm:$0xff]   ;;  %v3037_v20 = vld [vmem:[%s3525_s19 + $0x54] ss:$8 sps:$4 sm:$0xff]   ;;  %v3041_v22 = vld [vmem:[%s3525_s19 + $0x50] ss:$8 sps:$4 sm:$0xff]  }
  0x19   : > { %2273 = vmatpush1.bf16.msra.mxu0 %v3018_v7  ;;  %2110 = vmatprep.subr.bf16.mxu1 %v3019_v8  ;;  %v3036_v19 = vld [vmem:[%s3525_s19 + $0x440] ss:$8 sps:$4 sm:$0xff]   ;;  %v3039_v21 = vld [vmem:[%s3525_s19 + $0x454] ss:$8 sps:$4 sm:$0xff]   ;;  %v3042_v23 = vld [vmem:[%s3525_s19 + $0x450] ss:$8 sps:$4 sm:$0xff]  }
  0x1a   : > { %2274 = vmatprep.subr.bf16.mxu0 %v3021_v9  ;;  %v3043_v24 = vld [vmem:[%s3525_s19 + $0x64] ss:$8 sps:$4 sm:$0xff]   ;;  %v3047_v26 = vld [vmem:[%s3525_s19 + $0x60] ss:$8 sps:$4 sm:$0xff]   ;;  %v3049_v28 = vld [vmem:[%s3525_s19 + $0x74] ss:$8 sps:$4 sm:$0xff]  }
  0x1b   : > { %v3045_v25 = vld [vmem:[%s3525_s19 + $0x464] ss:$8 sps:$4 sm:$0xff]   ;;  %v3048_v27 = vld [vmem:[%s3525_s19 + $0x460] ss:$8 sps:$4 sm:$0xff]   ;;  %v3051_v29 = vld [vmem:[%s3525_s19 + $0x474] ss:$8 sps:$4 sm:$0xff]  }
  0x1c   : > { %2111 = vmatpush1.bf16.msra.mxu1 %v3023_v10  ;;  %v3053_v30 = vld [vmem:[%s3525_s19 + $0x70] ss:$8 sps:$4 sm:$0xff]   ;;  %v3055_v32 = vld [vmem:[%s3525_s19 + $0x84] ss:$8 sps:$4 sm:$0xff]   ;;  %v3059_v34 = vld [vmem:[%s3525_s19 + $0x80] ss:$8 sps:$4 sm:$0xff]  }
  0x1d   : > { %2275 = vmatpush1.bf16.msra.mxu0 %v3024_v11  ;;  %2112 = vmatprep.subr.bf16.mxu1 %v3025_v12  ;;  %v3054_v31 = vld [vmem:[%s3525_s19 + $0x470] ss:$8 sps:$4 sm:$0xff]   ;;  %v3057_v33 = vld [vmem:[%s3525_s19 + $0x484] ss:$8 sps:$4 sm:$0xff]   ;;  %v3060_v35 = vld [vmem:[%s3525_s19 + $0x480] ss:$8 sps:$4 sm:$0xff]  }
  0x1e   : > { %2276 = vmatprep.subr.bf16.mxu0 %v3027_v13  ;;  %v3061_v36 = vld [vmem:[%s3525_s19 + $0x94] ss:$8 sps:$4 sm:$0xff]   ;;  %v3065_v38 = vld [vmem:[%s3525_s19 + $0x90] ss:$8 sps:$4 sm:$0xff]   ;;  %v3067_v40 = vld [vmem:[%s3525_s19 + $0xa4] ss:$8 sps:$4 sm:$0xff]  }
  0x1f   : > { %v3063_v37 = vld [vmem:[%s3525_s19 + $0x494] ss:$8 sps:$4 sm:$0xff]   ;;  %v3066_v39 = vld [vmem:[%s3525_s19 + $0x490] ss:$8 sps:$4 sm:$0xff]   ;;  %v3069_v41 = vld [vmem:[%s3525_s19 + $0x4a4] ss:$8 sps:$4 sm:$0xff]  }
  0x20   : > { %2113 = vmatpush1.bf16.msra.mxu1 %v3029_v14  ;;  %v3071_v42 = vld [vmem:[%s3525_s19 + $0xa0] ss:$8 sps:$4 sm:$0xff]   ;;  %v3073_v44 = vld [vmem:[%s3525_s19 + $0xb4] ss:$8 sps:$4 sm:$0xff]   ;;  %v3077_v47 = vld [vmem:[%s3525_s19 + $0xb0] ss:$8 sps:$4 sm:$0xff]  }
  0x21   : > { %2277 = vmatpush1.bf16.msra.mxu0 %v3030_v15  ;;  %2114 = vmatprep.subr.bf16.mxu1 %v3031_v16  ;;  %v3072_v43 = vld [vmem:[%s3525_s19 + $0x4a0] ss:$8 sps:$4 sm:$0xff]   ;;  %v3075_v45 = vld [vmem:[%s3525_s19 + $0x4b4] ss:$8 sps:$4 sm:$0xff]   ;;  %v3078_v49 = vld [vmem:[%s3525_s19 + $0x4b0] ss:$8 sps:$4 sm:$0xff]  }
  0x22   : > { %2278 = vmatprep.subr.bf16.mxu0 %v3033_v17  ;;  %v294_v46 = vld [vmem:[%s3575_s23] sm:$0xff]  ;;  %v3085_v56 = vld [vmem:[%s3525_s19 + $0xd4] ss:$8 sps:$4 sm:$0xff]   ;;  %v3089_v58 = vld [vmem:[%s3525_s19 + $0xd0] ss:$8 sps:$4 sm:$0xff]  }
  0x23   : > { %v2639_v48 = vcombine.high %v294_v46, %v294_v46  ;;  %v298_v50 = vld [vmem:[%s3575_s23 + $0x20] sm:$0xff]  ;;  %v3087_v57 = vld [vmem:[%s3525_s19 + $0x4d4] ss:$8 sps:$4 sm:$0xff]   ;;  %v3090_v59 = vld [vmem:[%s3525_s19 + $0x4d0] ss:$8 sps:$4 sm:$0xff]   ;;  %v2638_v6 = vcombine.low %v294_v46, %v294_v46 }
  0x24   : > { %2115 = vmatpush1.bf16.msra.mxu1 %v3035_v18  ;;  %v3079_v51 = vld [vmem:[%s3525_s19 + $0xc4] ss:$8 sps:$4 sm:$0xff]   ;;  %v2647_v53 = vcombine.high %v298_v50, %v298_v50  ;;  %v3083_v54 = vld [vmem:[%s3525_s19 + $0xc0] ss:$8 sps:$4 sm:$0xff]   ;;  %v3097_v0 = vld [vmem:[%s3525_s19 + $0xf4] ss:$8 sps:$4 sm:$0xff]   ;;  %v2646_v7 = vcombine.low %v298_v50, %v298_v50 }
  0x25   : > { %2279 = vmatpush1.bf16.msra.mxu0 %v3036_v19  ;;  %2116 = vmatprep.subr.bf16.mxu1 %v3037_v20  ;;  %v3081_v52 = vld [vmem:[%s3525_s19 + $0x4c4] ss:$8 sps:$4 sm:$0xff]   ;;  %v3084_v55 = vld [vmem:[%s3525_s19 + $0x4c0] ss:$8 sps:$4 sm:$0xff]   ;;  %v3099_v1 = vld [vmem:[%s3525_s19 + $0x4f4] ss:$8 sps:$4 sm:$0xff]  }
  0x26   : > { %2280 = vmatprep.subr.bf16.mxu0 %v3039_v21  ;;  %2138 = vmatprep.mubr.bf16.mxu1 %v2639_v48  ;;  %v3091_v60 = vld [vmem:[%s3525_s19 + $0xe4] ss:$8 sps:$4 sm:$0xff]   ;;  %v3095_v62 = vld [vmem:[%s3525_s19 + $0xe0] ss:$8 sps:$4 sm:$0xff]   ;;  %v3101_v2 = vld [vmem:[%s3525_s19 + $0xf0] ss:$8 sps:$4 sm:$0xff]  }
  0x27   : > { %2302 = vmatprep.mubr.bf16.mxu0 %v2647_v53  ;;  %v3093_v61 = vld [vmem:[%s3525_s19 + $0x4e4] ss:$8 sps:$4 sm:$0xff]   ;;  %v3096_v63 = vld [vmem:[%s3525_s19 + $0x4e0] ss:$8 sps:$4 sm:$0xff]   ;;  %v3102_v3 = vld [vmem:[%s3525_s19 + $0x4f0] ss:$8 sps:$4 sm:$0xff]  }
  0x28   : > { %2117 = vmatpush1.bf16.msra.mxu1 %v3041_v22  ;;  %v3107_v4 = vld [vmem:[%s3525_s19 + $0x104] ss:$8 sps:$4 sm:$0xff]   ;;  %v3105_v8 = vld [vmem:[%s3525_s19 + $0x100] ss:$8 sps:$4 sm:$0xff]   ;;  %v3115_v10 = vld [vmem:[%s3525_s19 + $0x114] ss:$8 sps:$4 sm:$0xff]  }
  0x29   : > { %2281 = vmatpush1.bf16.msra.mxu0 %v3042_v23  ;;  %2118 = vmatprep.subr.bf16.mxu1 %v3043_v24  ;;  %v3112_v5 = vld [vmem:[%s3525_s19 + $0x504] ss:$8 sps:$4 sm:$0xff]   ;;  %v3110_v9 = vld [vmem:[%s3525_s19 + $0x500] ss:$8 sps:$4 sm:$0xff]   ;;  %v3118_v11 = vld [vmem:[%s3525_s19 + $0x514] ss:$8 sps:$4 sm:$0xff]  }
  0x2a   : > { %2282 = vmatprep.subr.bf16.mxu0 %v3045_v25  ;;  %v3113_v12 = vld [vmem:[%s3525_s19 + $0x110] ss:$8 sps:$4 sm:$0xff]   ;;  %v3121_v14 = vld [vmem:[%s3525_s19 + $0x124] ss:$8 sps:$4 sm:$0xff]   ;;  %v3119_v16 = vld [vmem:[%s3525_s19 + $0x120] ss:$8 sps:$4 sm:$0xff]  }
  0x2b   : > { %v3116_v13 = vld [vmem:[%s3525_s19 + $0x510] ss:$8 sps:$4 sm:$0xff]   ;;  %v3124_v15 = vld [vmem:[%s3525_s19 + $0x524] ss:$8 sps:$4 sm:$0xff]   ;;  %v3122_v17 = vld [vmem:[%s3525_s19 + $0x520] ss:$8 sps:$4 sm:$0xff]  }
  0x2c   : > { %2119 = vmatpush1.bf16.msra.mxu1 %v3047_v26  ;;  %v3127_v18 = vld [vmem:[%s3525_s19 + $0x134] ss:$8 sps:$4 sm:$0xff]   ;;  %v3125_v20 = vld [vmem:[%s3525_s19 + $0x130] ss:$8 sps:$4 sm:$0xff]   ;;  %v3133_v22 = vld [vmem:[%s3525_s19 + $0x144] ss:$8 sps:$4 sm:$0xff]  }
  0x2d   : > { %2283 = vmatpush1.bf16.msra.mxu0 %v3048_v27  ;;  %2120 = vmatprep.subr.bf16.mxu1 %v3049_v28  ;;  %v3130_v19 = vld [vmem:[%s3525_s19 + $0x534] ss:$8 sps:$4 sm:$0xff]   ;;  %v3128_v21 = vld [vmem:[%s3525_s19 + $0x530] ss:$8 sps:$4 sm:$0xff]   ;;  %v3136_v23 = vld [vmem:[%s3525_s19 + $0x544] ss:$8 sps:$4 sm:$0xff]  }
  0x2e   : > { %2284 = vmatprep.subr.bf16.mxu0 %v3051_v29  ;;  %v3131_v24 = vld [vmem:[%s3525_s19 + $0x140] ss:$8 sps:$4 sm:$0xff]   ;;  %v3139_v26 = vld [vmem:[%s3525_s19 + $0x154] ss:$8 sps:$4 sm:$0xff]   ;;  %v3137_v28 = vld [vmem:[%s3525_s19 + $0x150] ss:$8 sps:$4 sm:$0xff]  }
  0x2f   : > { %v3134_v25 = vld [vmem:[%s3525_s19 + $0x540] ss:$8 sps:$4 sm:$0xff]   ;;  %v3142_v27 = vld [vmem:[%s3525_s19 + $0x554] ss:$8 sps:$4 sm:$0xff]   ;;  %v3140_v29 = vld [vmem:[%s3525_s19 + $0x550] ss:$8 sps:$4 sm:$0xff]  }
  0x30   : > { %2121 = vmatpush1.bf16.msra.mxu1 %v3053_v30  ;;  %v3145_v30 = vld [vmem:[%s3525_s19 + $0x164] ss:$8 sps:$4 sm:$0xff]   ;;  %v3163_v46 = vld [vmem:[%s3525_s19 + $0x194] ss:$8 sps:$4 sm:$0xff]   ;;  %v3161_v48 = vld [vmem:[%s3525_s19 + $0x190] ss:$8 sps:$4 sm:$0xff]  }
  0x31   : > { %2285 = vmatpush1.bf16.msra.mxu0 %v3054_v31  ;;  %2122 = vmatprep.subr.bf16.mxu1 %v3055_v32  ;;  %v3148_v31 = vld [vmem:[%s3525_s19 + $0x564] ss:$8 sps:$4 sm:$0xff]   ;;  %v3170_v53 = vld [vmem:[%s3525_s19 + $0x5a0] ss:$8 sps:$4 sm:$0xff]  }
  0x32   : > { %2286 = vmatprep.subr.bf16.mxu0 %v3057_v33  ;;  %v3626_v32 = vld [vmem:[%s3575_s23 + $0x8] sm:$0xff] }
  0x33   : > { %v3143_v33 = vld [vmem:[%s3525_s19 + $0x160] ss:$8 sps:$4 sm:$0xff]   ;;  %v3169_v50 = vld [vmem:[%s3525_s19 + $0x1a4] ss:$8 sps:$4 sm:$0xff]  }
  0x34   : > { %2123 = vmatpush1.bf16.msra.mxu1 %v3059_v34  ;;  %v3146_v34 = vld [vmem:[%s3525_s19 + $0x560] ss:$8 sps:$4 sm:$0xff]  }
  0x35   : > { %2287 = vmatpush1.bf16.msra.mxu0 %v3060_v35  ;;  %2124 = vmatprep.subr.bf16.mxu1 %v3061_v36  ;;  %v2641_v35 = vcombine.high %v3626_v32, %v3626_v32  ;;  %v3633_v36 = vld [vmem:[%s3575_s23 + $0x28] sm:$0xff] }
  0x36   : > { %2288 = vmatprep.subr.bf16.mxu0 %v3063_v37  ;;  %v3151_v37 = vld [vmem:[%s3525_s19 + $0x174] ss:$8 sps:$4 sm:$0xff]  }
  0x38   : > { %2125 = vmatpush1.bf16.msra.mxu1 %v3065_v38  ;;  %v2649_v38 = vcombine.high %v3633_v36, %v3633_v36 }
  0x39   : > { %2289 = vmatpush1.bf16.msra.mxu0 %v3066_v39  ;;  %2126 = vmatprep.subr.bf16.mxu1 %v3067_v40  ;;  %v3154_v39 = vld [vmem:[%s3525_s19 + $0x574] ss:$8 sps:$4 sm:$0xff]   ;;  %v3149_v40 = vld [vmem:[%s3525_s19 + $0x170] ss:$8 sps:$4 sm:$0xff]  }
  0x3a   : > { %2290 = vmatprep.subr.bf16.mxu0 %v3069_v41  ;;  %v3152_v41 = vld [vmem:[%s3525_s19 + $0x570] ss:$8 sps:$4 sm:$0xff]  }
  0x3c   : > { %2127 = vmatpush1.bf16.msra.mxu1 %v3071_v42  ;;  %v3157_v42 = vld [vmem:[%s3525_s19 + $0x184] ss:$8 sps:$4 sm:$0xff]  }
  0x3d   : > { %2291 = vmatpush1.bf16.msra.mxu0 %v3072_v43  ;;  %2128 = vmatprep.subr.bf16.mxu1 %v3073_v44  ;;  %v3160_v43 = vld [vmem:[%s3525_s19 + $0x584] ss:$8 sps:$4 sm:$0xff]   ;;  %v3155_v44 = vld [vmem:[%s3525_s19 + $0x180] ss:$8 sps:$4 sm:$0xff]  }
  0x3e   : > { %2292 = vmatprep.subr.bf16.mxu0 %v3075_v45  ;;  %v3158_v45 = vld [vmem:[%s3525_s19 + $0x580] ss:$8 sps:$4 sm:$0xff]  }
  0x40   : > { %2129 = vmatpush1.bf16.msra.mxu1 %v3077_v47  ;;  %v3166_v47 = vld [vmem:[%s3525_s19 + $0x594] ss:$8 sps:$4 sm:$0xff]  }
  0x41   : > { %2293 = vmatpush1.bf16.msra.mxu0 %v3078_v49  ;;  %2130 = vmatprep.subr.bf16.mxu1 %v3079_v51  ;;  %v3164_v49 = vld [vmem:[%s3525_s19 + $0x590] ss:$8 sps:$4 sm:$0xff]   ;;  %v3172_v51 = vld [vmem:[%s3525_s19 + $0x5a4] ss:$8 sps:$4 sm:$0xff]  }
  0x42   : > { %2294 = vmatprep.subr.bf16.mxu0 %v3081_v52  ;;  %v3167_v52 = vld [vmem:[%s3525_s19 + $0x1a0] ss:$8 sps:$4 sm:$0xff]  }
  0x44   : > { %2131 = vmatpush1.bf16.msra.mxu1 %v3083_v54  ;;  %v3175_v54 = vld [vmem:[%s3525_s19 + $0x1b4] ss:$8 sps:$4 sm:$0xff]  }
  0x45   : > { %2295 = vmatpush1.bf16.msra.mxu0 %v3084_v55  ;;  %2132 = vmatprep.subr.bf16.mxu1 %v3085_v56  ;;  %v3178_v55 = vld [vmem:[%s3525_s19 + $0x5b4] ss:$8 sps:$4 sm:$0xff]   ;;  %v3173_v56 = vld [vmem:[%s3525_s19 + $0x1b0] ss:$8 sps:$4 sm:$0xff]  }
  0x46   : > { %2296 = vmatprep.subr.bf16.mxu0 %v3087_v57  ;;  %v3176_v57 = vld [vmem:[%s3525_s19 + $0x5b0] ss:$8 sps:$4 sm:$0xff]  }
  0x48   : > { %2133 = vmatpush1.bf16.msra.mxu1 %v3089_v58  ;;  %v3181_v58 = vld [vmem:[%s3525_s19 + $0x1c4] ss:$8 sps:$4 sm:$0xff]  }
  0x49   : > { %2297 = vmatpush1.bf16.msra.mxu0 %v3090_v59  ;;  %2134 = vmatprep.subr.bf16.mxu1 %v3091_v60  ;;  %v3184_v59 = vld [vmem:[%s3525_s19 + $0x5c4] ss:$8 sps:$4 sm:$0xff]   ;;  %v3179_v60 = vld [vmem:[%s3525_s19 + $0x1c0] ss:$8 sps:$4 sm:$0xff]  }
  0x4a   : > { %2298 = vmatprep.subr.bf16.mxu0 %v3093_v61  ;;  %v3182_v61 = vld [vmem:[%s3525_s19 + $0x5c0] ss:$8 sps:$4 sm:$0xff]  }
  0x4c   : > { %2135 = vmatpush1.bf16.msra.mxu1 %v3095_v62  ;;  %v3187_v62 = vld [vmem:[%s3525_s19 + $0x1d4] ss:$8 sps:$4 sm:$0xff]  }
  0x4d   : > { %2299 = vmatpush1.bf16.msra.mxu0 %v3096_v63  ;;  %2136 = vmatprep.subr.bf16.mxu1 %v3097_v0  ;;  %v3190_v63 = vld [vmem:[%s3525_s19 + $0x5d4] ss:$8 sps:$4 sm:$0xff]   ;;  %v3185_v0 = vld [vmem:[%s3525_s19 + $0x1d0] ss:$8 sps:$4 sm:$0xff]  }
  0x4e   : > { %2300 = vmatprep.subr.bf16.mxu0 %v3099_v1  ;;  %v3188_v1 = vld [vmem:[%s3525_s19 + $0x5d0] ss:$8 sps:$4 sm:$0xff]  }
  0x50   : > { %2137 = vmatpush1.bf16.msra.mxu1 %v3101_v2  ;;  %v3193_v2 = vld [vmem:[%s3525_s19 + $0x1e4] ss:$8 sps:$4 sm:$0xff]  }
  0x51   : > { %2301 = vmatpush1.bf16.msra.mxu0 %v3102_v3  ;;  %2147 = vmatprep.subr.bf16.mxu1 %v3107_v4  ;;  %v3196_v3 = vld [vmem:[%s3525_s19 + $0x5e4] ss:$8 sps:$4 sm:$0xff]   ;;  %v3191_v4 = vld [vmem:[%s3525_s19 + $0x1e0] ss:$8 sps:$4 sm:$0xff]  }
  0x52   : > { %2311 = vmatprep.subr.bf16.mxu0 %v3112_v5  ;;  %v3194_v5 = vld [vmem:[%s3525_s19 + $0x5e0] ss:$8 sps:$4 sm:$0xff]  }
  0x53   : > { %2139 = vmatmul.mubr.bf16.vlgmr.msra.gmra.mrb[0].mxu1 %v2638_v6  ;;  %v3199_v6 = vld [vmem:[%s3525_s19 + $0x1f4] ss:$8 sps:$4 sm:$0xff]  }
  0x54   : > { %2303 = vmatmul.mubr.bf16.vlgmr.msra.gmra.mrb[0].mxu0 %v2646_v7  ;;  %2148 = vmatpush1.bf16.msra.mxu1 %v3105_v8  ;;  %v3202_v7 = vld [vmem:[%s3525_s19 + $0x5f4] ss:$8 sps:$4 sm:$0xff]   ;;  %v3197_v8 = vld [vmem:[%s3525_s19 + $0x1f0] ss:$8 sps:$4 sm:$0xff]  }
  0x55   : > { %2312 = vmatpush1.bf16.msra.mxu0 %v3110_v9  ;;  %2149 = vmatprep.subr.bf16.mxu1 %v3115_v10  ;;  %v3200_v9 = vld [vmem:[%s3525_s19 + $0x5f0] ss:$8 sps:$4 sm:$0xff]   ;;  %v3207_v10 = vld [vmem:[%s3525_s19 + $0x204] ss:$8 sps:$4 sm:$0xff]  }
  0x56   : > { %2313 = vmatprep.subr.bf16.mxu0 %v3118_v11  ;;  %2179 = vmatprep.mubr.bf16.mxu1 %v2641_v35  ;;  %v3212_v11 = vld [vmem:[%s3525_s19 + $0x604] ss:$8 sps:$4 sm:$0xff]   ;;  %v3234_v35 = vld [vmem:[%s3525_s19 + $0x640] ss:$8 sps:$4 sm:$0xff]  }
  0x57   : > { %2343 = vmatprep.mubr.bf16.mxu0 %v2649_v38  ;;  %v3237_v38 = vld [vmem:[%s3525_s19 + $0x250] ss:$8 sps:$4 sm:$0xff]  }
  0x58   : > { %2150 = vmatpush1.bf16.msra.mxu1 %v3113_v12  ;;  %v2640_v12 = vcombine.low %v3626_v32, %v3626_v32  ;;  %v3233_v32 = vld [vmem:[%s3525_s19 + $0x244] ss:$8 sps:$4 sm:$0xff]  }
  0x59   : > { %2314 = vmatpush1.bf16.msra.mxu0 %v3116_v13  ;;  %2151 = vmatprep.subr.bf16.mxu1 %v3121_v14  ;;  %v3205_v13 = vld [vmem:[%s3525_s19 + $0x200] ss:$8 sps:$4 sm:$0xff]   ;;  %v2648_v14 = vcombine.low %v3633_v36, %v3633_v36  ;;  %v3239_v36 = vld [vmem:[%s3525_s19 + $0x254] ss:$8 sps:$4 sm:$0xff]  }
  0x5a   : > { %2315 = vmatprep.subr.bf16.mxu0 %v3124_v15  ;;  %v3210_v15 = vld [vmem:[%s3525_s19 + $0x600] ss:$8 sps:$4 sm:$0xff]  }
  0x5c   : > { %2152 = vmatpush1.bf16.msra.mxu1 %v3119_v16  ;;  %v3215_v16 = vld [vmem:[%s3525_s19 + $0x214] ss:$8 sps:$4 sm:$0xff]  }
  0x5d   : > { %2316 = vmatpush1.bf16.msra.mxu0 %v3122_v17  ;;  %2153 = vmatprep.subr.bf16.mxu1 %v3127_v18  ;;  %v3218_v17 = vld [vmem:[%s3525_s19 + $0x614] ss:$8 sps:$4 sm:$0xff]  }
  0x5e   : > { %2317 = vmatprep.subr.bf16.mxu0 %v3130_v19  ;;  %v3684_v18 = vld [vmem:[%s3575_s23 + $0x10] sm:$0xff] }
  0x5f   : > { %v2643_v19 = vcombine.high %v3684_v18, %v3684_v18 }
  0x60   : > { %2154 = vmatpush1.bf16.msra.mxu1 %v3125_v20  ;;  %v3689_v20 = vld [vmem:[%s3575_s23 + $0x30] sm:$0xff] }
  0x61   : > { %2318 = vmatpush1.bf16.msra.mxu0 %v3128_v21  ;;  %2155 = vmatprep.subr.bf16.mxu1 %v3133_v22  ;;  %v3213_v21 = vld [vmem:[%s3525_s19 + $0x210] ss:$8 sps:$4 sm:$0xff]  }
  0x62   : > { %2319 = vmatprep.subr.bf16.mxu0 %v3136_v23  ;;  %v3216_v22 = vld [vmem:[%s3525_s19 + $0x610] ss:$8 sps:$4 sm:$0xff]   ;;  %v2651_v23 = vcombine.high %v3689_v20, %v3689_v20 }
  0x64   : > { %2156 = vmatpush1.bf16.msra.mxu1 %v3131_v24  ;;  %v3221_v24 = vld [vmem:[%s3525_s19 + $0x224] ss:$8 sps:$4 sm:$0xff]  }
  0x65   : > { %2320 = vmatpush1.bf16.msra.mxu0 %v3134_v25  ;;  %2157 = vmatprep.subr.bf16.mxu1 %v3139_v26  ;;  %v3224_v25 = vld [vmem:[%s3525_s19 + $0x624] ss:$8 sps:$4 sm:$0xff]   ;;  %v3219_v26 = vld [vmem:[%s3525_s19 + $0x220] ss:$8 sps:$4 sm:$0xff]  }
  0x66   : > { %2321 = vmatprep.subr.bf16.mxu0 %v3142_v27  ;;  %v3222_v27 = vld [vmem:[%s3525_s19 + $0x620] ss:$8 sps:$4 sm:$0xff]  }
  0x68   : > { %2158 = vmatpush1.bf16.msra.mxu1 %v3137_v28  ;;  %v3227_v28 = vld [vmem:[%s3525_s19 + $0x234] ss:$8 sps:$4 sm:$0xff]  }
  0x69   : > { %2322 = vmatpush1.bf16.msra.mxu0 %v3140_v29  ;;  %2159 = vmatprep.subr.bf16.mxu1 %v3145_v30  ;;  %v3230_v29 = vld [vmem:[%s3525_s19 + $0x634] ss:$8 sps:$4 sm:$0xff]   ;;  %v3225_v30 = vld [vmem:[%s3525_s19 + $0x230] ss:$8 sps:$4 sm:$0xff]  }
  0x6a   : > { %2323 = vmatprep.subr.bf16.mxu0 %v3148_v31  ;;  %v3228_v31 = vld [vmem:[%s3525_s19 + $0x630] ss:$8 sps:$4 sm:$0xff]  }
  0x6c   : > { %2160 = vmatpush1.bf16.msra.mxu1 %v3143_v33  ;;  %v3236_v33 = vld [vmem:[%s3525_s19 + $0x644] ss:$8 sps:$4 sm:$0xff]  }
  0x6d   : > { %2324 = vmatpush1.bf16.msra.mxu0 %v3146_v34  ;;  %2161 = vmatprep.subr.bf16.mxu1 %v3151_v37  ;;  %v3231_v34 = vld [vmem:[%s3525_s19 + $0x240] ss:$8 sps:$4 sm:$0xff]   ;;  %v3242_v37 = vld [vmem:[%s3525_s19 + $0x654] ss:$8 sps:$4 sm:$0xff]  }
  0x6e   : > { %2325 = vmatprep.subr.bf16.mxu0 %v3154_v39  ;;  %v3240_v39 = vld [vmem:[%s3525_s19 + $0x650] ss:$8 sps:$4 sm:$0xff]  }
  0x70   : > { %2162 = vmatpush1.bf16.msra.mxu1 %v3149_v40  ;;  %v3245_v40 = vld [vmem:[%s3525_s19 + $0x264] ss:$8 sps:$4 sm:$0xff]  }
  0x71   : > { %2326 = vmatpush1.bf16.msra.mxu0 %v3152_v41  ;;  %2163 = vmatprep.subr.bf16.mxu1 %v3157_v42  ;;  %v3248_v41 = vld [vmem:[%s3525_s19 + $0x664] ss:$8 sps:$4 sm:$0xff]   ;;  %v3243_v42 = vld [vmem:[%s3525_s19 + $0x260] ss:$8 sps:$4 sm:$0xff]  }
  0x72   : > { %2327 = vmatprep.subr.bf16.mxu0 %v3160_v43  ;;  %v3246_v43 = vld [vmem:[%s3525_s19 + $0x660] ss:$8 sps:$4 sm:$0xff]  }
  0x74   : > { %2164 = vmatpush1.bf16.msra.mxu1 %v3155_v44  ;;  %v3251_v44 = vld [vmem:[%s3525_s19 + $0x274] ss:$8 sps:$4 sm:$0xff]  }
  0x75   : > { %2328 = vmatpush1.bf16.msra.mxu0 %v3158_v45  ;;  %2165 = vmatprep.subr.bf16.mxu1 %v3163_v46  ;;  %v3254_v45 = vld [vmem:[%s3525_s19 + $0x674] ss:$8 sps:$4 sm:$0xff]   ;;  %v3249_v46 = vld [vmem:[%s3525_s19 + $0x270] ss:$8 sps:$4 sm:$0xff]  }
  0x76   : > { %2329 = vmatprep.subr.bf16.mxu0 %v3166_v47  ;;  %v3252_v47 = vld [vmem:[%s3525_s19 + $0x670] ss:$8 sps:$4 sm:$0xff]  }
  0x78   : > { %2166 = vmatpush1.bf16.msra.mxu1 %v3161_v48  ;;  %v3257_v48 = vld [vmem:[%s3525_s19 + $0x284] ss:$8 sps:$4 sm:$0xff]  }
  0x79   : > { %2330 = vmatpush1.bf16.msra.mxu0 %v3164_v49  ;;  %2167 = vmatprep.subr.bf16.mxu1 %v3169_v50  ;;  %v3260_v49 = vld [vmem:[%s3525_s19 + $0x684] ss:$8 sps:$4 sm:$0xff]   ;;  %v3255_v50 = vld [vmem:[%s3525_s19 + $0x280] ss:$8 sps:$4 sm:$0xff]  }
  0x7a   : > { %2331 = vmatprep.subr.bf16.mxu0 %v3172_v51  ;;  %v3258_v51 = vld [vmem:[%s3525_s19 + $0x680] ss:$8 sps:$4 sm:$0xff]  }
  0x7c   : > { %2168 = vmatpush1.bf16.msra.mxu1 %v3167_v52  ;;  %v3263_v52 = vld [vmem:[%s3525_s19 + $0x294] ss:$8 sps:$4 sm:$0xff]  }
  0x7d   : > { %2332 = vmatpush1.bf16.msra.mxu0 %v3170_v53  ;;  %2169 = vmatprep.subr.bf16.mxu1 %v3175_v54  ;;  %v3266_v53 = vld [vmem:[%s3525_s19 + $0x694] ss:$8 sps:$4 sm:$0xff]   ;;  %v3261_v54 = vld [vmem:[%s3525_s19 + $0x290] ss:$8 sps:$4 sm:$0xff]  }
  0x7e   : > { %2333 = vmatprep.subr.bf16.mxu0 %v3178_v55  ;;  %v3264_v55 = vld [vmem:[%s3525_s19 + $0x690] ss:$8 sps:$4 sm:$0xff]  }
  0x80   : > { %2170 = vmatpush1.bf16.msra.mxu1 %v3173_v56  ;;  %v3269_v56 = vld [vmem:[%s3525_s19 + $0x2a4] ss:$8 sps:$4 sm:$0xff]  }
  0x81   : > { %2334 = vmatpush1.bf16.msra.mxu0 %v3176_v57  ;;  %2171 = vmatprep.subr.bf16.mxu1 %v3181_v58  ;;  %v3272_v57 = vld [vmem:[%s3525_s19 + $0x6a4] ss:$8 sps:$4 sm:$0xff]   ;;  %v3267_v58 = vld [vmem:[%s3525_s19 + $0x2a0] ss:$8 sps:$4 sm:$0xff]  }
  0x82   : > { %2335 = vmatprep.subr.bf16.mxu0 %v3184_v59  ;;  %v3270_v59 = vld [vmem:[%s3525_s19 + $0x6a0] ss:$8 sps:$4 sm:$0xff]  }
  0x84   : > { %2172 = vmatpush1.bf16.msra.mxu1 %v3179_v60  ;;  %v3275_v60 = vld [vmem:[%s3525_s19 + $0x2b4] ss:$8 sps:$4 sm:$0xff]  }
  0x85   : > { %2336 = vmatpush1.bf16.msra.mxu0 %v3182_v61  ;;  %2173 = vmatprep.subr.bf16.mxu1 %v3187_v62  ;;  %v3278_v61 = vld [vmem:[%s3525_s19 + $0x6b4] ss:$8 sps:$4 sm:$0xff]   ;;  %v3273_v62 = vld [vmem:[%s3525_s19 + $0x2b0] ss:$8 sps:$4 sm:$0xff]  }
  0x86   : > { %2337 = vmatprep.subr.bf16.mxu0 %v3190_v63  ;;  %v3276_v63 = vld [vmem:[%s3525_s19 + $0x6b0] ss:$8 sps:$4 sm:$0xff]  }
  0x88   : > { %2174 = vmatpush1.bf16.msra.mxu1 %v3185_v0  ;;  %v3281_v0 = vld [vmem:[%s3525_s19 + $0x2c4] ss:$8 sps:$4 sm:$0xff]  }
  0x89   : > { %2338 = vmatpush1.bf16.msra.mxu0 %v3188_v1  ;;  %2175 = vmatprep.subr.bf16.mxu1 %v3193_v2  ;;  %v3284_v1 = vld [vmem:[%s3525_s19 + $0x6c4] ss:$8 sps:$4 sm:$0xff]   ;;  %v3279_v2 = vld [vmem:[%s3525_s19 + $0x2c0] ss:$8 sps:$4 sm:$0xff]  }
  0x8a   : > { %2339 = vmatprep.subr.bf16.mxu0 %v3196_v3  ;;  %v3282_v3 = vld [vmem:[%s3525_s19 + $0x6c0] ss:$8 sps:$4 sm:$0xff]  }
  0x8c   : > { %2176 = vmatpush1.bf16.msra.mxu1 %v3191_v4  ;;  %v3287_v4 = vld [vmem:[%s3525_s19 + $0x2d4] ss:$8 sps:$4 sm:$0xff]  }
  0x8d   : > { %2340 = vmatpush1.bf16.msra.mxu0 %v3194_v5  ;;  %2177 = vmatprep.subr.bf16.mxu1 %v3199_v6  ;;  %v3290_v5 = vld [vmem:[%s3525_s19 + $0x6d4] ss:$8 sps:$4 sm:$0xff]   ;;  %v3285_v6 = vld [vmem:[%s3525_s19 + $0x2d0] ss:$8 sps:$4 sm:$0xff]  }
  0x8e   : > { %2341 = vmatprep.subr.bf16.mxu0 %v3202_v7  ;;  %v3288_v7 = vld [vmem:[%s3525_s19 + $0x6d0] ss:$8 sps:$4 sm:$0xff]  }
  0x90   : > { %2178 = vmatpush1.bf16.msra.mxu1 %v3197_v8  ;;  %v3293_v8 = vld [vmem:[%s3525_s19 + $0x2e4] ss:$8 sps:$4 sm:$0xff]  }
  0x91   : > { %2342 = vmatpush1.bf16.msra.mxu0 %v3200_v9  ;;  %2188 = vmatprep.subr.bf16.mxu1 %v3207_v10  ;;  %v3296_v9 = vld [vmem:[%s3525_s19 + $0x6e4] ss:$8 sps:$4 sm:$0xff]   ;;  %v3291_v10 = vld [vmem:[%s3525_s19 + $0x2e0] ss:$8 sps:$4 sm:$0xff]  }
  0x92   : > { %2352 = vmatprep.subr.bf16.mxu0 %v3212_v11  ;;  %v3294_v11 = vld [vmem:[%s3525_s19 + $0x6e0] ss:$8 sps:$4 sm:$0xff]  }
  0x93   : > { %2180 = vmatmul.mubr.bf16.vlgmr.msra.gmra.mrb[0].mxu1 %v2640_v12  ;;  %v3299_v12 = vld [vmem:[%s3525_s19 + $0x2f4] ss:$8 sps:$4 sm:$0xff]  }
  0x94   : > { %2344 = vmatmul.mubr.bf16.vlgmr.msra.gmra.mrb[0].mxu0 %v2648_v14  ;;  %2189 = vmatpush1.bf16.msra.mxu1 %v3205_v13  ;;  %v3302_v13 = vld [vmem:[%s3525_s19 + $0x6f4] ss:$8 sps:$4 sm:$0xff]   ;;  %v3297_v14 = vld [vmem:[%s3525_s19 + $0x2f0] ss:$8 sps:$4 sm:$0xff]  }
  0x95   : > { %2353 = vmatpush1.bf16.msra.mxu0 %v3210_v15  ;;  %2190 = vmatprep.subr.bf16.mxu1 %v3215_v16  ;;  %v3300_v15 = vld [vmem:[%s3525_s19 + $0x6f0] ss:$8 sps:$4 sm:$0xff]   ;;  %v3307_v16 = vld [vmem:[%s3525_s19 + $0x304] ss:$8 sps:$4 sm:$0xff]  }
  0x96   : > { %2354 = vmatprep.subr.bf16.mxu0 %v3218_v17  ;;  %2220 = vmatprep.mubr.bf16.mxu1 %v2643_v19  ;;  %v3312_v17 = vld [vmem:[%s3525_s19 + $0x704] ss:$8 sps:$4 sm:$0xff]   ;;  %v3305_v19 = vld [vmem:[%s3525_s19 + $0x300] ss:$8 sps:$4 sm:$0xff]  }
  0x97   : > { %2384 = vmatprep.mubr.bf16.mxu0 %v2651_v23  ;;  %v2650_v23 = vcombine.low %v3689_v20, %v3689_v20 }
  0x98   : > { %2191 = vmatpush1.bf16.msra.mxu1 %v3213_v21  ;;  %v3310_v21 = vld [vmem:[%s3525_s19 + $0x700] ss:$8 sps:$4 sm:$0xff]  }
  0x99   : > { %2355 = vmatpush1.bf16.msra.mxu0 %v3216_v22  ;;  %2192 = vmatprep.subr.bf16.mxu1 %v3221_v24  ;;  %v2642_v22 = vcombine.low %v3684_v18, %v3684_v18  ;;  %v3760_v24 = vld [vmem:[%s3575_s23 + $0x18] sm:$0xff] }
  0x9a   : > { %2356 = vmatprep.subr.bf16.mxu0 %v3224_v25  ;;  %v3763_v25 = vld [vmem:[%s3575_s23 + $0x38] sm:$0xff]  ;;  %v2645_v18 = vcombine.high %v3760_v24, %v3760_v24 }
  0x9b   : > { %v2653_v20 = vcombine.high %v3763_v25, %v3763_v25 }
  0x9c   : > { %2193 = vmatpush1.bf16.msra.mxu1 %v3219_v26  ;;  %v3315_v26 = vld [vmem:[%s3525_s19 + $0x314] ss:$8 sps:$4 sm:$0xff]  }
  0x9d   : > { %2357 = vmatpush1.bf16.msra.mxu0 %v3222_v27  ;;  %2194 = vmatprep.subr.bf16.mxu1 %v3227_v28  ;;  %v3318_v27 = vld [vmem:[%s3525_s19 + $0x714] ss:$8 sps:$4 sm:$0xff]   ;;  %v3313_v28 = vld [vmem:[%s3525_s19 + $0x310] ss:$8 sps:$4 sm:$0xff]  }
  0x9e   : > { %2358 = vmatprep.subr.bf16.mxu0 %v3230_v29  ;;  %v3316_v29 = vld [vmem:[%s3525_s19 + $0x710] ss:$8 sps:$4 sm:$0xff]  }
  0xa0   : > { %2195 = vmatpush1.bf16.msra.mxu1 %v3225_v30  ;;  %v3321_v30 = vld [vmem:[%s3525_s19 + $0x324] ss:$8 sps:$4 sm:$0xff]  }
  0xa1   : > { %2359 = vmatpush1.bf16.msra.mxu0 %v3228_v31  ;;  %2196 = vmatprep.subr.bf16.mxu1 %v3233_v32  ;;  %v3324_v31 = vld [vmem:[%s3525_s19 + $0x724] ss:$8 sps:$4 sm:$0xff]   ;;  %v3319_v32 = vld [vmem:[%s3525_s19 + $0x320] ss:$8 sps:$4 sm:$0xff]  }
  0xa2   : > { %2360 = vmatprep.subr.bf16.mxu0 %v3236_v33  ;;  %v3322_v33 = vld [vmem:[%s3525_s19 + $0x720] ss:$8 sps:$4 sm:$0xff]  }
  0xa4   : > { %2197 = vmatpush1.bf16.msra.mxu1 %v3231_v34  ;;  %v3327_v34 = vld [vmem:[%s3525_s19 + $0x334] ss:$8 sps:$4 sm:$0xff]  }
  0xa5   : > { %2361 = vmatpush1.bf16.msra.mxu0 %v3234_v35  ;;  %2198 = vmatprep.subr.bf16.mxu1 %v3239_v36  ;;  %v3330_v35 = vld [vmem:[%s3525_s19 + $0x734] ss:$8 sps:$4 sm:$0xff]   ;;  %v3325_v36 = vld [vmem:[%s3525_s19 + $0x330] ss:$8 sps:$4 sm:$0xff]  }
  0xa6   : > { %2362 = vmatprep.subr.bf16.mxu0 %v3242_v37  ;;  %v3328_v37 = vld [vmem:[%s3525_s19 + $0x730] ss:$8 sps:$4 sm:$0xff]  }
  0xa8   : > { %2199 = vmatpush1.bf16.msra.mxu1 %v3237_v38  ;;  %v3333_v38 = vld [vmem:[%s3525_s19 + $0x344] ss:$8 sps:$4 sm:$0xff]  }
  0xa9   : > { %2363 = vmatpush1.bf16.msra.mxu0 %v3240_v39  ;;  %2200 = vmatprep.subr.bf16.mxu1 %v3245_v40  ;;  %v3336_v39 = vld [vmem:[%s3525_s19 + $0x744] ss:$8 sps:$4 sm:$0xff]   ;;  %v3331_v40 = vld [vmem:[%s3525_s19 + $0x340] ss:$8 sps:$4 sm:$0xff]  }
  0xaa   : > { %2364 = vmatprep.subr.bf16.mxu0 %v3248_v41  ;;  %v3334_v41 = vld [vmem:[%s3525_s19 + $0x740] ss:$8 sps:$4 sm:$0xff]  }
  0xac   : > { %2201 = vmatpush1.bf16.msra.mxu1 %v3243_v42  ;;  %v3339_v42 = vld [vmem:[%s3525_s19 + $0x354] ss:$8 sps:$4 sm:$0xff]  }
  0xad   : > { %2365 = vmatpush1.bf16.msra.mxu0 %v3246_v43  ;;  %2202 = vmatprep.subr.bf16.mxu1 %v3251_v44  ;;  %v3342_v43 = vld [vmem:[%s3525_s19 + $0x754] ss:$8 sps:$4 sm:$0xff]   ;;  %v3337_v44 = vld [vmem:[%s3525_s19 + $0x350] ss:$8 sps:$4 sm:$0xff]  }
  0xae   : > { %2366 = vmatprep.subr.bf16.mxu0 %v3254_v45  ;;  %v3340_v45 = vld [vmem:[%s3525_s19 + $0x750] ss:$8 sps:$4 sm:$0xff]  }
  0xb0   : > { %2203 = vmatpush1.bf16.msra.mxu1 %v3249_v46  ;;  %v3345_v46 = vld [vmem:[%s3525_s19 + $0x364] ss:$8 sps:$4 sm:$0xff]  }
  0xb1   : > { %2367 = vmatpush1.bf16.msra.mxu0 %v3252_v47  ;;  %2204 = vmatprep.subr.bf16.mxu1 %v3257_v48  ;;  %v3348_v47 = vld [vmem:[%s3525_s19 + $0x764] ss:$8 sps:$4 sm:$0xff]   ;;  %v3343_v48 = vld [vmem:[%s3525_s19 + $0x360] ss:$8 sps:$4 sm:$0xff]  }
  0xb2   : > { %2368 = vmatprep.subr.bf16.mxu0 %v3260_v49  ;;  %v3346_v49 = vld [vmem:[%s3525_s19 + $0x760] ss:$8 sps:$4 sm:$0xff]  }
  0xb4   : > { %2205 = vmatpush1.bf16.msra.mxu1 %v3255_v50  ;;  %v3351_v50 = vld [vmem:[%s3525_s19 + $0x374] ss:$8 sps:$4 sm:$0xff]  }
  0xb5   : > { %2369 = vmatpush1.bf16.msra.mxu0 %v3258_v51  ;;  %2206 = vmatprep.subr.bf16.mxu1 %v3263_v52  ;;  %v3354_v51 = vld [vmem:[%s3525_s19 + $0x774] ss:$8 sps:$4 sm:$0xff]   ;;  %v3349_v52 = vld [vmem:[%s3525_s19 + $0x370] ss:$8 sps:$4 sm:$0xff]  }
  0xb6   : > { %2370 = vmatprep.subr.bf16.mxu0 %v3266_v53  ;;  %v3352_v53 = vld [vmem:[%s3525_s19 + $0x770] ss:$8 sps:$4 sm:$0xff]  }
  0xb8   : > { %2207 = vmatpush1.bf16.msra.mxu1 %v3261_v54  ;;  %v3357_v54 = vld [vmem:[%s3525_s19 + $0x384] ss:$8 sps:$4 sm:$0xff]  }
  0xb9   : > { %2371 = vmatpush1.bf16.msra.mxu0 %v3264_v55  ;;  %2208 = vmatprep.subr.bf16.mxu1 %v3269_v56  ;;  %v3360_v55 = vld [vmem:[%s3525_s19 + $0x784] ss:$8 sps:$4 sm:$0xff]   ;;  %v3355_v56 = vld [vmem:[%s3525_s19 + $0x380] ss:$8 sps:$4 sm:$0xff]  }
  0xba   : > { %2372 = vmatprep.subr.bf16.mxu0 %v3272_v57  ;;  %v3358_v57 = vld [vmem:[%s3525_s19 + $0x780] ss:$8 sps:$4 sm:$0xff]  }
  0xbc   : > { %2209 = vmatpush1.bf16.msra.mxu1 %v3267_v58  ;;  %v3363_v58 = vld [vmem:[%s3525_s19 + $0x394] ss:$8 sps:$4 sm:$0xff]  }
  0xbd   : > { %2373 = vmatpush1.bf16.msra.mxu0 %v3270_v59  ;;  %2210 = vmatprep.subr.bf16.mxu1 %v3275_v60  ;;  %v3366_v59 = vld [vmem:[%s3525_s19 + $0x794] ss:$8 sps:$4 sm:$0xff]   ;;  %v3361_v60 = vld [vmem:[%s3525_s19 + $0x390] ss:$8 sps:$4 sm:$0xff]  }
  0xbe   : > { %2374 = vmatprep.subr.bf16.mxu0 %v3278_v61  ;;  %v3364_v61 = vld [vmem:[%s3525_s19 + $0x790] ss:$8 sps:$4 sm:$0xff]  }
  0xc0   : > { %2211 = vmatpush1.bf16.msra.mxu1 %v3273_v62  ;;  %v3369_v62 = vld [vmem:[%s3525_s19 + $0x3a4] ss:$8 sps:$4 sm:$0xff]  }
  0xc1   : > { %2375 = vmatpush1.bf16.msra.mxu0 %v3276_v63  ;;  %2212 = vmatprep.subr.bf16.mxu1 %v3281_v0  ;;  %v3372_v63 = vld [vmem:[%s3525_s19 + $0x7a4] ss:$8 sps:$4 sm:$0xff]   ;;  %v3367_v0 = vld [vmem:[%s3525_s19 + $0x3a0] ss:$8 sps:$4 sm:$0xff]  }
  0xc2   : > { %2376 = vmatprep.subr.bf16.mxu0 %v3284_v1  ;;  %v3370_v1 = vld [vmem:[%s3525_s19 + $0x7a0] ss:$8 sps:$4 sm:$0xff]  }
  0xc4   : > { %2213 = vmatpush1.bf16.msra.mxu1 %v3279_v2  ;;  %v3375_v2 = vld [vmem:[%s3525_s19 + $0x3b4] ss:$8 sps:$4 sm:$0xff]  }
  0xc5   : > { %2377 = vmatpush1.bf16.msra.mxu0 %v3282_v3  ;;  %2214 = vmatprep.subr.bf16.mxu1 %v3287_v4  ;;  %v3378_v3 = vld [vmem:[%s3525_s19 + $0x7b4] ss:$8 sps:$4 sm:$0xff]   ;;  %v3373_v4 = vld [vmem:[%s3525_s19 + $0x3b0] ss:$8 sps:$4 sm:$0xff]  }
  0xc6   : > { %2378 = vmatprep.subr.bf16.mxu0 %v3290_v5  ;;  %v3376_v5 = vld [vmem:[%s3525_s19 + $0x7b0] ss:$8 sps:$4 sm:$0xff]  }
  0xc8   : > { %2215 = vmatpush1.bf16.msra.mxu1 %v3285_v6  ;;  %v3381_v6 = vld [vmem:[%s3525_s19 + $0x3c4] ss:$8 sps:$4 sm:$0xff]  }
  0xc9   : > { %2379 = vmatpush1.bf16.msra.mxu0 %v3288_v7  ;;  %2216 = vmatprep.subr.bf16.mxu1 %v3293_v8  ;;  %v3384_v7 = vld [vmem:[%s3525_s19 + $0x7c4] ss:$8 sps:$4 sm:$0xff]   ;;  %v3379_v8 = vld [vmem:[%s3525_s19 + $0x3c0] ss:$8 sps:$4 sm:$0xff]  }
  0xca   : > { %2380 = vmatprep.subr.bf16.mxu0 %v3296_v9  ;;  %v3382_v9 = vld [vmem:[%s3525_s19 + $0x7c0] ss:$8 sps:$4 sm:$0xff]  }
  0xcc   : > { %2217 = vmatpush1.bf16.msra.mxu1 %v3291_v10  ;;  %v3387_v10 = vld [vmem:[%s3525_s19 + $0x3d4] ss:$8 sps:$4 sm:$0xff]  }
  0xcd   : > { %2381 = vmatpush1.bf16.msra.mxu0 %v3294_v11  ;;  %2218 = vmatprep.subr.bf16.mxu1 %v3299_v12  ;;  %v3390_v11 = vld [vmem:[%s3525_s19 + $0x7d4] ss:$8 sps:$4 sm:$0xff]   ;;  %v3385_v12 = vld [vmem:[%s3525_s19 + $0x3d0] ss:$8 sps:$4 sm:$0xff]  }
  0xce   : > { %2382 = vmatprep.subr.bf16.mxu0 %v3302_v13  ;;  %v3388_v13 = vld [vmem:[%s3525_s19 + $0x7d0] ss:$8 sps:$4 sm:$0xff]  }
  0xd0   : > { %2219 = vmatpush1.bf16.msra.mxu1 %v3297_v14  ;;  %v3393_v14 = vld [vmem:[%s3525_s19 + $0x3e4] ss:$8 sps:$4 sm:$0xff]  }
  0xd1   : > { %2383 = vmatpush1.bf16.msra.mxu0 %v3300_v15  ;;  %2229 = vmatprep.subr.bf16.mxu1 %v3307_v16  ;;  %v3396_v15 = vld [vmem:[%s3525_s19 + $0x7e4] ss:$8 sps:$4 sm:$0xff]   ;;  %v3391_v16 = vld [vmem:[%s3525_s19 + $0x3e0] ss:$8 sps:$4 sm:$0xff]  }
  0xd2   : > { %2393 = vmatprep.subr.bf16.mxu0 %v3312_v17  ;;  %v3394_v17 = vld [vmem:[%s3525_s19 + $0x7e0] ss:$8 sps:$4 sm:$0xff]  }
  0xd3   : > { %2221 = vmatmul.mubr.bf16.vlgmr.msra.gmra.mrb[0].mxu1 %v2642_v22  ;;  %v3397_v22 = vld [vmem:[%s3525_s19 + $0x3f0] ss:$8 sps:$4 sm:$0xff]  }
  0xd4   : > { %2385 = vmatmul.mubr.bf16.vlgmr.msra.gmra.mrb[0].mxu0 %v2650_v23  ;;  %2230 = vmatpush1.bf16.msra.mxu1 %v3305_v19  ;;  %v3399_v19 = vld [vmem:[%s3525_s19 + $0x3f4] ss:$8 sps:$4 sm:$0xff]   ;;  %v3400_v23 = vld [vmem:[%s3525_s19 + $0x7f0] ss:$8 sps:$4 sm:$0xff]  }
  0xd5   : > { %2394 = vmatpush1.bf16.msra.mxu0 %v3310_v21  ;;  %2231 = vmatprep.subr.bf16.mxu1 %v3315_v26  ;;  %v3402_v21 = vld [vmem:[%s3525_s19 + $0x7f4] ss:$8 sps:$4 sm:$0xff]   ;;  %v3409_v26 = vld [vmem:[%s3525_s19 + $0x804] ss:$8 sps:$4 sm:$0xff]  }
  0xd6   : > { %2395 = vmatprep.subr.bf16.mxu0 %v3318_v27  ;;  %2261 = vmatprep.mubr.bf16.mxu1 %v2645_v18  ;;  %v3831_v27 = vld [vmem:[%s3575_s23 + $0x40] sm:$0xff]  ;;  %v2644_v18 = vcombine.low %v3760_v24, %v3760_v24  ;;  %v3410_v24 = vld [vmem:[%s3525_s19 + $0x810] ss:$8 sps:$4 sm:$0xff]  }
  0xd7   : > { %2425 = vmatprep.mubr.bf16.mxu0 %v2653_v20  ;;  %v2652_v20 = vcombine.low %v3763_v25, %v3763_v25  ;;  %v3415_v25 = vld [vmem:[%s3525_s19 + $0x824] ss:$8 sps:$4 sm:$0xff]  }
  0xd8   : > { %2232 = vmatpush1.bf16.msra.mxu1 %v3313_v28  ;;  %v3407_v28 = vld [vmem:[%s3525_s19 + $0x800] ss:$8 sps:$4 sm:$0xff]  }
  0xd9   : > { %2396 = vmatpush1.bf16.msra.mxu0 %v3316_v29  ;;  %2233 = vmatprep.subr.bf16.mxu1 %v3321_v30  ;;  %v2655_v29 = vcombine.high %v3831_v27, %v3831_v27  ;;  %v3412_v30 = vld [vmem:[%s3525_s19 + $0x814] ss:$8 sps:$4 sm:$0xff]  }
  0xda   : > { %2397 = vmatprep.subr.bf16.mxu0 %v3324_v31  ;;  %v3413_v31 = vld [vmem:[%s3525_s19 + $0x820] ss:$8 sps:$4 sm:$0xff]  }
  0xdc   : > { %2234 = vmatpush1.bf16.msra.mxu1 %v3319_v32  ;;  %v3418_v32 = vld [vmem:[%s3525_s19 + $0x834] ss:$8 sps:$4 sm:$0xff]  }
  0xdd   : > { %2398 = vmatpush1.bf16.msra.mxu0 %v3322_v33  ;;  %2235 = vmatprep.subr.bf16.mxu1 %v3327_v34  ;;  %v3416_v33 = vld [vmem:[%s3525_s19 + $0x830] ss:$8 sps:$4 sm:$0xff]   ;;  %v3421_v34 = vld [vmem:[%s3525_s19 + $0x844] ss:$8 sps:$4 sm:$0xff]  }
  0xde   : > { %2399 = vmatprep.subr.bf16.mxu0 %v3330_v35  ;;  %v3419_v35 = vld [vmem:[%s3525_s19 + $0x840] ss:$8 sps:$4 sm:$0xff]  }
  0xe0   : > { %2236 = vmatpush1.bf16.msra.mxu1 %v3325_v36  ;;  %v3424_v36 = vld [vmem:[%s3525_s19 + $0x854] ss:$8 sps:$4 sm:$0xff]  }
  0xe1   : > { %2400 = vmatpush1.bf16.msra.mxu0 %v3328_v37  ;;  %2237 = vmatprep.subr.bf16.mxu1 %v3333_v38  ;;  %v3422_v37 = vld [vmem:[%s3525_s19 + $0x850] ss:$8 sps:$4 sm:$0xff]   ;;  %v3427_v38 = vld [vmem:[%s3525_s19 + $0x864] ss:$8 sps:$4 sm:$0xff]  }
  0xe2   : > { %2401 = vmatprep.subr.bf16.mxu0 %v3336_v39  ;;  %v3425_v39 = vld [vmem:[%s3525_s19 + $0x860] ss:$8 sps:$4 sm:$0xff]  }
  0xe4   : > { %2238 = vmatpush1.bf16.msra.mxu1 %v3331_v40  ;;  %v3430_v40 = vld [vmem:[%s3525_s19 + $0x874] ss:$8 sps:$4 sm:$0xff]  }
  0xe5   : > { %2402 = vmatpush1.bf16.msra.mxu0 %v3334_v41  ;;  %2239 = vmatprep.subr.bf16.mxu1 %v3339_v42  ;;  %v3428_v41 = vld [vmem:[%s3525_s19 + $0x870] ss:$8 sps:$4 sm:$0xff]   ;;  %v3433_v42 = vld [vmem:[%s3525_s19 + $0x884] ss:$8 sps:$4 sm:$0xff]  }
  0xe6   : > { %2403 = vmatprep.subr.bf16.mxu0 %v3342_v43  ;;  %v3431_v43 = vld [vmem:[%s3525_s19 + $0x880] ss:$8 sps:$4 sm:$0xff]  }
  0xe8   : > { %2240 = vmatpush1.bf16.msra.mxu1 %v3337_v44  ;;  %v3436_v44 = vld [vmem:[%s3525_s19 + $0x894] ss:$8 sps:$4 sm:$0xff]  }
  0xe9   : > { %2404 = vmatpush1.bf16.msra.mxu0 %v3340_v45  ;;  %2241 = vmatprep.subr.bf16.mxu1 %v3345_v46  ;;  %v3434_v45 = vld [vmem:[%s3525_s19 + $0x890] ss:$8 sps:$4 sm:$0xff]   ;;  %v3439_v46 = vld [vmem:[%s3525_s19 + $0x8a4] ss:$8 sps:$4 sm:$0xff]  }
  0xea   : > { %2405 = vmatprep.subr.bf16.mxu0 %v3348_v47  ;;  %v3437_v47 = vld [vmem:[%s3525_s19 + $0x8a0] ss:$8 sps:$4 sm:$0xff]  }
  0xec   : > { %2242 = vmatpush1.bf16.msra.mxu1 %v3343_v48  ;;  %v3442_v48 = vld [vmem:[%s3525_s19 + $0x8b4] ss:$8 sps:$4 sm:$0xff]  }
  0xed   : > { %2406 = vmatpush1.bf16.msra.mxu0 %v3346_v49  ;;  %2243 = vmatprep.subr.bf16.mxu1 %v3351_v50  ;;  %v3440_v49 = vld [vmem:[%s3525_s19 + $0x8b0] ss:$8 sps:$4 sm:$0xff]   ;;  %v3445_v50 = vld [vmem:[%s3525_s19 + $0x8c4] ss:$8 sps:$4 sm:$0xff]  }
  0xee   : > { %2407 = vmatprep.subr.bf16.mxu0 %v3354_v51  ;;  %v3443_v51 = vld [vmem:[%s3525_s19 + $0x8c0] ss:$8 sps:$4 sm:$0xff]  }
  0xf0   : > { %2244 = vmatpush1.bf16.msra.mxu1 %v3349_v52  ;;  %v3448_v52 = vld [vmem:[%s3525_s19 + $0x8d4] ss:$8 sps:$4 sm:$0xff]  }
  0xf1   : > { %2408 = vmatpush1.bf16.msra.mxu0 %v3352_v53  ;;  %2245 = vmatprep.subr.bf16.mxu1 %v3357_v54  ;;  %v3446_v53 = vld [vmem:[%s3525_s19 + $0x8d0] ss:$8 sps:$4 sm:$0xff]   ;;  %v3451_v54 = vld [vmem:[%s3525_s19 + $0x8e4] ss:$8 sps:$4 sm:$0xff]  }
  0xf2   : > { %2409 = vmatprep.subr.bf16.mxu0 %v3360_v55  ;;  %v3449_v55 = vld [vmem:[%s3525_s19 + $0x8e0] ss:$8 sps:$4 sm:$0xff]  }
  0xf4   : > { %2246 = vmatpush1.bf16.msra.mxu1 %v3355_v56  ;;  %v3454_v56 = vld [vmem:[%s3525_s19 + $0x8f4] ss:$8 sps:$4 sm:$0xff]  }
  0xf5   : > { %2410 = vmatpush1.bf16.msra.mxu0 %v3358_v57  ;;  %2247 = vmatprep.subr.bf16.mxu1 %v3363_v58  ;;  %v3452_v57 = vld [vmem:[%s3525_s19 + $0x8f0] ss:$8 sps:$4 sm:$0xff]   ;;  %v2654_v58 = vcombine.low %v3831_v27, %v3831_v27 }
  0xf6   : > { %2411 = vmatprep.subr.bf16.mxu0 %v3366_v59 }
  0xf8   : > { %2248 = vmatpush1.bf16.msra.mxu1 %v3361_v60 }
  0xf9   : > { %2412 = vmatpush1.bf16.msra.mxu0 %v3364_v61  ;;  %2249 = vmatprep.subr.bf16.mxu1 %v3369_v62 }
  0xfa   : > { %2413 = vmatprep.subr.bf16.mxu0 %v3372_v63  ;;  %v593_v63 = vlaneseq }
  0xfc   : > { %2250 = vmatpush1.bf16.msra.mxu1 %v3367_v0  ;;  %v594_v0 = vshrl.u32 %v593_v63, 7 }
  0xfd   : > { %2414 = vmatpush1.bf16.msra.mxu0 %v3370_v1  ;;  %2251 = vmatprep.subr.bf16.mxu1 %v3375_v2  ;;  %v591_v2 = vld [vmem:[%s278_s27] sm:$0x3] }
  0xfe   : > { %2415 = vmatprep.subr.bf16.mxu0 %v3378_v3  ;;  %v595_v1 = vsub.s32 0, %v594_v0  ;;  %v599_v3 = vsub.s32 1, %v594_v0 }
 0x100   : > { %2252 = vmatpush1.bf16.msra.mxu1 %v3373_v4  ;;  %v596_v4 = vrot.slane %v591_v2, %v595_v1 }
 0x101   : > { %2416 = vmatpush1.bf16.msra.mxu0 %v3376_v5  ;;  %2253 = vmatprep.subr.bf16.mxu1 %v3381_v6  ;;  %v600_v5 = vrot.slane %v591_v2, %v599_v3 }
 0x102   : > { %2417 = vmatprep.subr.bf16.mxu0 %v3384_v7 }
 0x104   : > { %2254 = vmatpush1.bf16.msra.mxu1 %v3379_v8 }
 0x105   : > { %2418 = vmatpush1.bf16.msra.mxu0 %v3382_v9  ;;  %2255 = vmatprep.subr.bf16.mxu1 %v3387_v10 }
 0x106   : > { %2419 = vmatprep.subr.bf16.mxu0 %v3390_v11 }
 0x108   : > { %2256 = vmatpush1.bf16.msra.mxu1 %v3385_v12 }
 0x109   : > { %2420 = vmatpush1.bf16.msra.mxu0 %v3388_v13  ;;  %2257 = vmatprep.subr.bf16.mxu1 %v3393_v14 }
 0x10a   : > { %2421 = vmatprep.subr.bf16.mxu0 %v3396_v15 }
 0x10c   : > { %2258 = vmatpush1.bf16.msra.mxu1 %v3391_v16 }
 0x10d   : > { %2422 = vmatpush1.bf16.msra.mxu0 %v3394_v17  ;;  %2259 = vmatprep.subr.bf16.mxu1 %v3399_v19 }
 0x10e   : > { %2423 = vmatprep.subr.bf16.mxu0 %v3402_v21 }
 0x110   : > { %2260 = vmatpush1.bf16.msra.mxu1 %v3397_v22 }
 0x111   : > { %2424 = vmatpush1.bf16.msra.mxu0 %v3400_v23 }
 0x112   : > { %2434 = vmatprep.subr.bf16.mxu0 %v3409_v26 }
 0x113   : > { %2262 = vmatmul.mubr.bf16.vlgmr.msra.gmra.mrb[0].mxu1 %v2644_v18 }
 0x114   : > { %2426 = vmatmul.mubr.bf16.vlgmr.msra.gmra.mrb[0].mxu0 %v2652_v20 }
 0x115   : > { %2435 = vmatpush1.bf16.msra.mxu0 %v3407_v28  ;;  %2466 = vmatprep.mubr.bf16.mxu0 %v2655_v29 }
 0x116   : > { %2436 = vmatprep.subr.bf16.mxu0 %v3412_v30 }
 0x119   : > { %2437 = vmatpush1.bf16.msra.mxu0 %v3410_v24 }
 0x11a   : > { %2438 = vmatprep.subr.bf16.mxu0 %v3415_v25 }
 0x11d   : > { %2439 = vmatpush1.bf16.msra.mxu0 %v3413_v31 }
 0x11e   : > { %2440 = vmatprep.subr.bf16.mxu0 %v3418_v32 }
 0x121   : > { %2441 = vmatpush1.bf16.msra.mxu0 %v3416_v33 }
 0x122   : > { %2442 = vmatprep.subr.bf16.mxu0 %v3421_v34 }
 0x125   : > { %2443 = vmatpush1.bf16.msra.mxu0 %v3419_v35 }
 0x126   : > { %2444 = vmatprep.subr.bf16.mxu0 %v3424_v36 }
 0x129   : > { %2445 = vmatpush1.bf16.msra.mxu0 %v3422_v37 }
 0x12a   : > { %2446 = vmatprep.subr.bf16.mxu0 %v3427_v38 }
 0x12d   : > { %2447 = vmatpush1.bf16.msra.mxu0 %v3425_v39 }
 0x12e   : > { %2448 = vmatprep.subr.bf16.mxu0 %v3430_v40 }
 0x131   : > { %2449 = vmatpush1.bf16.msra.mxu0 %v3428_v41 }
 0x132   : > { %2450 = vmatprep.subr.bf16.mxu0 %v3433_v42 }
 0x135   : > { %2451 = vmatpush1.bf16.msra.mxu0 %v3431_v43 }
 0x136   : > { %2452 = vmatprep.subr.bf16.mxu0 %v3436_v44 }
 0x139   : > { %2453 = vmatpush1.bf16.msra.mxu0 %v3434_v45 }
 0x13a   : > { %2454 = vmatprep.subr.bf16.mxu0 %v3439_v46 }
 0x13d   : > { %2455 = vmatpush1.bf16.msra.mxu0 %v3437_v47 }
 0x13e   : > { %2456 = vmatprep.subr.bf16.mxu0 %v3442_v48 }
 0x141   : > { %2457 = vmatpush1.bf16.msra.mxu0 %v3440_v49 }
 0x142   : > { %2458 = vmatprep.subr.bf16.mxu0 %v3445_v50 }
 0x145   : > { %2459 = vmatpush1.bf16.msra.mxu0 %v3443_v51 }
 0x146   : > { %2460 = vmatprep.subr.bf16.mxu0 %v3448_v52 }
 0x149   : > { %2461 = vmatpush1.bf16.msra.mxu0 %v3446_v53 }
 0x14a   : > { %2462 = vmatprep.subr.bf16.mxu0 %v3451_v54 }
 0x14d   : > { %2463 = vmatpush1.bf16.msra.mxu0 %v3449_v55 }
 0x14e   : > { %2464 = vmatprep.subr.bf16.mxu0 %v3454_v56 }
 0x151   : > { %2465 = vmatpush1.bf16.msra.mxu0 %v3452_v57 }
 0x154   : > { %2467 = vmatmul.mubr.bf16.vlgmr.msra.gmra.mrb[0].mxu0 %v2654_v58 }
 0x1e6   : > { %v2263_v59 = vpop.f32.mrb[0].mxu1 }
 0x1e7   : > { %v2265_v60 = vpop.f32.mrb[1].mxu1  ;;  %v2949_v6 = vadd.f32 %v2263_v59, %v596_v4 }
 0x1e8   : > { %v2267_v61 = vpop.f32.mrb[2].mxu1  ;;  %v2951_v7 = vadd.f32 %v2265_v60, %v600_v5 }
 0x1e9   : > { %v2268_v62 = vpop.f32.mrb[3].mxu1 }
 0x227   : > { %v2468_v8 = vpop.f32.mrb[0].mxu0 }
 0x228   : > { %v2950_v9 = vadd.f32 %v2949_v6, %v2468_v8  ;;  %v2470_v10 = vpop.f32.mrb[1].mxu0 }
 0x229   : > { %v2952_v11 = vadd.f32 %v2951_v7, %v2470_v10  ;;  %v2472_v12 = vpop.f32.mrb[2].mxu0 }
 0x22a   : > { %v2475_v13 = vmax.f32 %v2950_v9, 0.0  ;;  %v2473_v14 = vpop.f32.mrb[3].mxu0 }
 0x22b   : > { %v2476_v15 = vmax.f32 %v2952_v11, 0.0 }
 0x22d   : > { %v2948_v16 = vpack.c.bf16 %v2476_v15, %v2475_v13 }
 0x22f   : > { %2485 = vst [vmem:[%s292_s4] sm:$0xff] %v2948_v16 }
 0x230 PF: > { %s13_s14 = sadd.s32 1, %s3479_s14   ;;  %s3893_s12 = smov %s3475_s13 }
 0x231   : > { %p10_p5 = scmp.ge.s32.totalorder %s13_s14, 4   ;;  %s3894_s13 = smov %s3896_s15 }
 0x233   :  { %12 = sbr.rel (!%p10_p5) target bundleno = 2 (0x2), region = 68 }

// kernel: ensemble_forward.15
= control target key start
LH: loop header
LB: loop body
LE: loop exit
PB: predicated region body
PF: predicated region fallthrough
CT: control target
= control target key end

     0   :  { %s4747_s12 = smov 0   ;;  %s4749_s13 = smov 0   ;;  %s5770_s0 = inlined_call_operand.vmem [shape: bf16[2,8,2304], index: 0, kind: input, shape index: {}]   ;;  %s5771_s1 = inlined_call_operand.vmem [shape: bf16[2,2304,512], index: 1, kind: input, shape index: {}]   ;;  %s5772_s2 = inlined_call_operand.vmem [shape: f32[2,1,512], index: 2, kind: input, shape index: {}]   ;;  %s5773_s3 = inlined_call_operand.vmem [shape: bf16[2,8,512], index: 3, kind: output, shape index: {}]  }
   0x1   :  { %s4751_s14 = smov 0   ;;  %s4753_s15 = smov 0  }
   0x2   :  { %s4755_s16 = smov 0   ;;  %s4757_s17 = smov 0  }
   0x3   :  { %s4759_s18 = smov 0  }
   0x4 LB: > { %s25_s19 = sadd.s32 1, %s4717_s16  ;;  %s32_s20 = sadd.s32 1, %s4721_s17  ;;  %s4725_s18 = sphi %s4759_s18, %s13_s18   ;;  %s4721_s17 = sphi %s4757_s17, %s5779_s17   ;;  %s4717_s16 = sphi %s4755_s16, %s5778_s16   ;;  %s4713_s15 = sphi %s4753_s15, %s5777_s15   ;;  %s4709_s14 = sphi %s4751_s14, %s5776_s14   ;;  %s4705_s13 = sphi %s4749_s13, %s5775_s13   ;;  %s4701_s12 = sphi %s4747_s12, %s5774_s12  }
   0x5   : > { %p26_p0 = scmp.ge.s32.totalorder %s25_s19, 2  ;;  %p76_p1 = scmp.ne.s32.totalorder %s4705_s13, %s4701_s12 }
   0x6   : > { %p77_p2 = scmp.eq.s32.totalorder %s4725_s18, 0  ;;  %s69_s24 = sadd.s32 1, %s4705_s13 }
   0x7   : > { %s5781_s19 = smov (%p26_p0, %s25_s19), 0  ;;  %s5783_s20 = smov (!%p26_p0, %s32_s20), %s4721_s17 }
   0x8   : > { %p78_p3 = por %p77_p2, %p76_p1  ;;  %p34_p4 = scmp.ge.s32.totalorder %s5783_s20, 2 }
   0x9   : > { %s65_s21 = ssub.s32 %s4717_s16, %s5781_s19  ;;  %p3809_p6 = scmp.ge.s32.totalorder %s4725_s18, 4 }
   0xa   : > { %s5785_s20 = smov (%p34_p4, %s5783_s20), 0 }
   0xb   : > { %s64_s22 = ssub.s32 %s4721_s17, %s5785_s20  ;;  %160 = sbr.rel (%p3809_p6) target bundleno = 170 (0xaa), region = 16 }
   0xc   : > { %s66_s23 = sor.u32 %s65_s21, %s64_s22 }
   0xd   : > { %p67_p5 = scmp.eq.s32.totalorder %s66_s23, 0 }
   0xf   : > { %s4798_s25 = scalar_select %p67_p5, %s4705_s13, %s69_s24  }
  0x12   : > { %175 = sbr.rel (!%p78_p3) target bundleno = 170 (0xaa), region = 24  ;;  %s177_s26 = sand.u32 (%p78_p3), 1, %s4705_s13  }
  0x13   : > { %s4161_s27 = smul.u32 (%p78_p3), 2304, %s177_s26  ;;  %s3810_s28 = sshll.u32 (%p78_p3), %s4717_s16, 1 }
  0x14   : > { %s4162_s29 = smul.u32 (%p78_p3), 1152, %s4721_s17 }
  0x15   : > { %s4812_s8 = scalar_lea.vmem (%p78_p3), [#allocation2], %s4161_s27 }
  0x16   : > { %s182_s30 = sadd.s32 (%p78_p3), %s4162_s29, %s3810_s28 }
  0x17   : > { %s3811_s4 = sshll.u32 (%p78_p3), %s182_s30, 2 }
  0x18   : > { %s4807_s7 = scalar_lea.vmem (%p78_p3), %s5771_s1, %s3811_s4 }
  0x19   : > { %v786_v0 = vld [vmem:[%s4807_s7] sm:$0xff]  ;;  %v788_v1 = vld [vmem:[%s4807_s7 + $0x10] sm:$0xff] }
  0x1a   : > { %v790_v2 = vld [vmem:[%s4807_s7 + $0x20] sm:$0xff]  ;;  %787 = vst [vmem:[%s4812_s8] sm:$0xff] %v786_v0  ;;  %789 = vst [vmem:[%s4812_s8 + $0x8] sm:$0xff] %v788_v1  ;;  %v792_v3 = vld [vmem:[%s4807_s7 + $0x30] sm:$0xff] }
  0x1b   : > { %791 = vst [vmem:[%s4812_s8 + $0x10] sm:$0xff] %v790_v2  ;;  %v794_v4 = vld [vmem:[%s4807_s7 + $0x40] sm:$0xff]  ;;  %v796_v5 = vld [vmem:[%s4807_s7 + $0x50] sm:$0xff]  ;;  %793 = vst [vmem:[%s4812_s8 + $0x18] sm:$0xff] %v792_v3 }
  0x1c   : > { %795 = vst [vmem:[%s4812_s8 + $0x20] sm:$0xff] %v794_v4  ;;  %797 = vst [vmem:[%s4812_s8 + $0x28] sm:$0xff] %v796_v5  ;;  %v798_v6 = vld [vmem:[%s4807_s7 + $0x60] sm:$0xff]  ;;  %v800_v7 = vld [vmem:[%s4807_s7 + $0x70] sm:$0xff] }
  0x1d   : > { %v802_v8 = vld [vmem:[%s4807_s7 + $0x80] sm:$0xff]  ;;  %799 = vst [vmem:[%s4812_s8 + $0x30] sm:$0xff] %v798_v6  ;;  %801 = vst [vmem:[%s4812_s8 + $0x38] sm:$0xff] %v800_v7  ;;  %v804_v9 = vld [vmem:[%s4807_s7 + $0x90] sm:$0xff] }
  0x1e   : > { %803 = vst [vmem:[%s4812_s8 + $0x40] sm:$0xff] %v802_v8  ;;  %v806_v10 = vld [vmem:[%s4807_s7 + $0xa0] sm:$0xff]  ;;  %v808_v11 = vld [vmem:[%s4807_s7 + $0xb0] sm:$0xff]  ;;  %805 = vst [vmem:[%s4812_s8 + $0x48] sm:$0xff] %v804_v9 }
  0x1f   : > { %807 = vst [vmem:[%s4812_s8 + $0x50] sm:$0xff] %v806_v10  ;;  %809 = vst [vmem:[%s4812_s8 + $0x58] sm:$0xff] %v808_v11  ;;  %v810_v12 = vld [vmem:[%s4807_s7 + $0xc0] sm:$0xff]  ;;  %v812_v13 = vld [vmem:[%s4807_s7 + $0xd0] sm:$0xff] }
  0x20   : > { %v814_v14 = vld [vmem:[%s4807_s7 + $0xe0] sm:$0xff]  ;;  %811 = vst [vmem:[%s4812_s8 + $0x60] sm:$0xff] %v810_v12  ;;  %813 = vst [vmem:[%s4812_s8 + $0x68] sm:$0xff] %v812_v13  ;;  %v816_v15 = vld [vmem:[%s4807_s7 + $0xf0] sm:$0xff] }
  0x21   : > { %815 = vst [vmem:[%s4812_s8 + $0x70] sm:$0xff] %v814_v14  ;;  %v818_v16 = vld [vmem:[%s4807_s7 + $0x100] sm:$0xff]  ;;  %v820_v17 = vld [vmem:[%s4807_s7 + $0x110] sm:$0xff]  ;;  %817 = vst [vmem:[%s4812_s8 + $0x78] sm:$0xff] %v816_v15 }
  0x22   : > { %819 = vst [vmem:[%s4812_s8 + $0x80] sm:$0xff] %v818_v16  ;;  %821 = vst [vmem:[%s4812_s8 + $0x88] sm:$0xff] %v820_v17  ;;  %v822_v18 = vld [vmem:[%s4807_s7 + $0x120] sm:$0xff]  ;;  %v824_v19 = vld [vmem:[%s4807_s7 + $0x130] sm:$0xff] }
  0x23   : > { %v826_v20 = vld [vmem:[%s4807_s7 + $0x140] sm:$0xff]  ;;  %823 = vst [vmem:[%s4812_s8 + $0x90] sm:$0xff] %v822_v18  ;;  %825 = vst [vmem:[%s4812_s8 + $0x98] sm:$0xff] %v824_v19  ;;  %v828_v21 = vld [vmem:[%s4807_s7 + $0x150] sm:$0xff] }
  0x24   : > { %827 = vst [vmem:[%s4812_s8 + $0xa0] sm:$0xff] %v826_v20  ;;  %v830_v22 = vld [vmem:[%s4807_s7 + $0x160] sm:$0xff]  ;;  %v832_v23 = vld [vmem:[%s4807_s7 + $0x170] sm:$0xff]  ;;  %829 = vst [vmem:[%s4812_s8 + $0xa8] sm:$0xff] %v828_v21 }
  0x25   : > { %831 = vst [vmem:[%s4812_s8 + $0xb0] sm:$0xff] %v830_v22  ;;  %833 = vst [vmem:[%s4812_s8 + $0xb8] sm:$0xff] %v832_v23  ;;  %v834_v24 = vld [vmem:[%s4807_s7 + $0x180] sm:$0xff]  ;;  %v836_v25 = vld [vmem:[%s4807_s7 + $0x190] sm:$0xff] }
  0x26   : > { %v838_v26 = vld [vmem:[%s4807_s7 + $0x1a0] sm:$0xff]  ;;  %835 = vst [vmem:[%s4812_s8 + $0xc0] sm:$0xff] %v834_v24  ;;  %837 = vst [vmem:[%s4812_s8 + $0xc8] sm:$0xff] %v836_v25  ;;  %v840_v27 = vld [vmem:[%s4807_s7 + $0x1b0] sm:$0xff] }
  0x27   : > { %839 = vst [vmem:[%s4812_s8 + $0xd0] sm:$0xff] %v838_v26  ;;  %v842_v28 = vld [vmem:[%s4807_s7 + $0x1c0] sm:$0xff]  ;;  %v844_v29 = vld [vmem:[%s4807_s7 + $0x1d0] sm:$0xff]  ;;  %841 = vst [vmem:[%s4812_s8 + $0xd8] sm:$0xff] %v840_v27 }
  0x28   : > { %843 = vst [vmem:[%s4812_s8 + $0xe0] sm:$0xff] %v842_v28  ;;  %845 = vst [vmem:[%s4812_s8 + $0xe8] sm:$0xff] %v844_v29  ;;  %v846_v30 = vld [vmem:[%s4807_s7 + $0x1e0] sm:$0xff]  ;;  %v848_v31 = vld [vmem:[%s4807_s7 + $0x1f0] sm:$0xff] }
  0x29   : > { %v850_v32 = vld [vmem:[%s4807_s7 + $0x200] sm:$0xff]  ;;  %847 = vst [vmem:[%s4812_s8 + $0xf0] sm:$0xff] %v846_v30  ;;  %849 = vst [vmem:[%s4812_s8 + $0xf8] sm:$0xff] %v848_v31  ;;  %v852_v33 = vld [vmem:[%s4807_s7 + $0x210] sm:$0xff] }
  0x2a   : > { %851 = vst [vmem:[%s4812_s8 + $0x100] sm:$0xff] %v850_v32  ;;  %v854_v34 = vld [vmem:[%s4807_s7 + $0x220] sm:$0xff]  ;;  %v856_v35 = vld [vmem:[%s4807_s7 + $0x230] sm:$0xff]  ;;  %853 = vst [vmem:[%s4812_s8 + $0x108] sm:$0xff] %v852_v33 }
  0x2b   : > { %855 = vst [vmem:[%s4812_s8 + $0x110] sm:$0xff] %v854_v34  ;;  %857 = vst [vmem:[%s4812_s8 + $0x118] sm:$0xff] %v856_v35  ;;  %v858_v36 = vld [vmem:[%s4807_s7 + $0x240] sm:$0xff]  ;;  %v860_v37 = vld [vmem:[%s4807_s7 + $0x250] sm:$0xff] }
  0x2c   : > { %v862_v38 = vld [vmem:[%s4807_s7 + $0x260] sm:$0xff]  ;;  %859 = vst [vmem:[%s4812_s8 + $0x120] sm:$0xff] %v858_v36  ;;  %861 = vst [vmem:[%s4812_s8 + $0x128] sm:$0xff] %v860_v37  ;;  %v864_v39 = vld [vmem:[%s4807_s7 + $0x270] sm:$0xff] }
  0x2d   : > { %863 = vst [vmem:[%s4812_s8 + $0x130] sm:$0xff] %v862_v38  ;;  %v866_v40 = vld [vmem:[%s4807_s7 + $0x280] sm:$0xff]  ;;  %v868_v41 = vld [vmem:[%s4807_s7 + $0x290] sm:$0xff]  ;;  %865 = vst [vmem:[%s4812_s8 + $0x138] sm:$0xff] %v864_v39 }
  0x2e   : > { %867 = vst [vmem:[%s4812_s8 + $0x140] sm:$0xff] %v866_v40  ;;  %869 = vst [vmem:[%s4812_s8 + $0x148] sm:$0xff] %v868_v41  ;;  %v870_v42 = vld [vmem:[%s4807_s7 + $0x2a0] sm:$0xff]  ;;  %v872_v43 = vld [vmem:[%s4807_s7 + $0x2b0] sm:$0xff] }
  0x2f   : > { %v874_v44 = vld [vmem:[%s4807_s7 + $0x2c0] sm:$0xff]  ;;  %871 = vst [vmem:[%s4812_s8 + $0x150] sm:$0xff] %v870_v42  ;;  %873 = vst [vmem:[%s4812_s8 + $0x158] sm:$0xff] %v872_v43  ;;  %v876_v45 = vld [vmem:[%s4807_s7 + $0x2d0] sm:$0xff] }
  0x30   : > { %875 = vst [vmem:[%s4812_s8 + $0x160] sm:$0xff] %v874_v44  ;;  %v878_v46 = vld [vmem:[%s4807_s7 + $0x2e0] sm:$0xff]  ;;  %v880_v47 = vld [vmem:[%s4807_s7 + $0x2f0] sm:$0xff]  ;;  %877 = vst [vmem:[%s4812_s8 + $0x168] sm:$0xff] %v876_v45 }
  0x31   : > { %879 = vst [vmem:[%s4812_s8 + $0x170] sm:$0xff] %v878_v46  ;;  %881 = vst [vmem:[%s4812_s8 + $0x178] sm:$0xff] %v880_v47  ;;  %v882_v48 = vld [vmem:[%s4807_s7 + $0x300] sm:$0xff]  ;;  %v884_v49 = vld [vmem:[%s4807_s7 + $0x310] sm:$0xff] }
  0x32   : > { %v886_v50 = vld [vmem:[%s4807_s7 + $0x320] sm:$0xff]  ;;  %883 = vst [vmem:[%s4812_s8 + $0x180] sm:$0xff] %v882_v48  ;;  %885 = vst [vmem:[%s4812_s8 + $0x188] sm:$0xff] %v884_v49  ;;  %v888_v51 = vld [vmem:[%s4807_s7 + $0x330] sm:$0xff] }
  0x33   : > { %887 = vst [vmem:[%s4812_s8 + $0x190] sm:$0xff] %v886_v50  ;;  %v890_v52 = vld [vmem:[%s4807_s7 + $0x340] sm:$0xff]  ;;  %v892_v53 = vld [vmem:[%s4807_s7 + $0x350] sm:$0xff]  ;;  %889 = vst [vmem:[%s4812_s8 + $0x198] sm:$0xff] %v888_v51 }
  0x34   : > { %891 = vst [vmem:[%s4812_s8 + $0x1a0] sm:$0xff] %v890_v52  ;;  %893 = vst [vmem:[%s4812_s8 + $0x1a8] sm:$0xff] %v892_v53  ;;  %v894_v54 = vld [vmem:[%s4807_s7 + $0x360] sm:$0xff]  ;;  %v896_v55 = vld [vmem:[%s4807_s7 + $0x370] sm:$0xff] }
  0x35   : > { %v898_v56 = vld [vmem:[%s4807_s7 + $0x380] sm:$0xff]  ;;  %895 = vst [vmem:[%s4812_s8 + $0x1b0] sm:$0xff] %v894_v54  ;;  %897 = vst [vmem:[%s4812_s8 + $0x1b8] sm:$0xff] %v896_v55  ;;  %v900_v57 = vld [vmem:[%s4807_s7 + $0x390] sm:$0xff] }
  0x36   : > { %899 = vst [vmem:[%s4812_s8 + $0x1c0] sm:$0xff] %v898_v56  ;;  %v902_v58 = vld [vmem:[%s4807_s7 + $0x3a0] sm:$0xff]  ;;  %v904_v59 = vld [vmem:[%s4807_s7 + $0x3b0] sm:$0xff]  ;;  %901 = vst [vmem:[%s4812_s8 + $0x1c8] sm:$0xff] %v900_v57 }
  0x37   : > { %903 = vst [vmem:[%s4812_s8 + $0x1d0] sm:$0xff] %v902_v58  ;;  %905 = vst [vmem:[%s4812_s8 + $0x1d8] sm:$0xff] %v904_v59  ;;  %v906_v60 = vld [vmem:[%s4807_s7 + $0x3c0] sm:$0xff]  ;;  %v908_v61 = vld [vmem:[%s4807_s7 + $0x3d0] sm:$0xff] }
  0x38   : > { %v910_v62 = vld [vmem:[%s4807_s7 + $0x3e0] sm:$0xff]  ;;  %907 = vst [vmem:[%s4812_s8 + $0x1e0] sm:$0xff] %v906_v60  ;;  %909 = vst [vmem:[%s4812_s8 + $0x1e8] sm:$0xff] %v908_v61  ;;  %v912_v63 = vld [vmem:[%s4807_s7 + $0x3f0] sm:$0xff] }
  0x39   : > { %911 = vst [vmem:[%s4812_s8 + $0x1f0] sm:$0xff] %v910_v62  ;;  %v914_v0 = vld [vmem:[%s4807_s7 + $0x400] sm:$0xff]  ;;  %v916_v1 = vld [vmem:[%s4807_s7 + $0x410] sm:$0xff]  ;;  %913 = vst [vmem:[%s4812_s8 + $0x1f8] sm:$0xff] %v912_v63 }
  0x3a   : > { %915 = vst [vmem:[%s4812_s8 + $0x200] sm:$0xff] %v914_v0  ;;  %917 = vst [vmem:[%s4812_s8 + $0x208] sm:$0xff] %v916_v1  ;;  %v918_v2 = vld [vmem:[%s4807_s7 + $0x420] sm:$0xff]  ;;  %v920_v3 = vld [vmem:[%s4807_s7 + $0x430] sm:$0xff] }
  0x3b   : > { %v922_v4 = vld [vmem:[%s4807_s7 + $0x440] sm:$0xff]  ;;  %919 = vst [vmem:[%s4812_s8 + $0x210] sm:$0xff] %v918_v2  ;;  %921 = vst [vmem:[%s4812_s8 + $0x218] sm:$0xff] %v920_v3  ;;  %v924_v5 = vld [vmem:[%s4807_s7 + $0x450] sm:$0xff] }
  0x3c   : > { %923 = vst [vmem:[%s4812_s8 + $0x220] sm:$0xff] %v922_v4  ;;  %v926_v6 = vld [vmem:[%s4807_s7 + $0x460] sm:$0xff]  ;;  %v928_v7 = vld [vmem:[%s4807_s7 + $0x470] sm:$0xff]  ;;  %925 = vst [vmem:[%s4812_s8 + $0x228] sm:$0xff] %v924_v5 }
  0x3d   : > { %927 = vst [vmem:[%s4812_s8 + $0x230] sm:$0xff] %v926_v6  ;;  %929 = vst [vmem:[%s4812_s8 + $0x238] sm:$0xff] %v928_v7  ;;  %v930_v8 = vld [vmem:[%s4807_s7 + $0x480] sm:$0xff]  ;;  %v932_v9 = vld [vmem:[%s4807_s7 + $0x490] sm:$0xff] }
  0x3e   : > { %v934_v10 = vld [vmem:[%s4807_s7 + $0x4a0] sm:$0xff]  ;;  %931 = vst [vmem:[%s4812_s8 + $0x240] sm:$0xff] %v930_v8  ;;  %933 = vst [vmem:[%s4812_s8 + $0x248] sm:$0xff] %v932_v9  ;;  %v936_v11 = vld [vmem:[%s4807_s7 + $0x4b0] sm:$0xff] }
  0x3f   : > { %935 = vst [vmem:[%s4812_s8 + $0x250] sm:$0xff] %v934_v10  ;;  %v938_v12 = vld [vmem:[%s4807_s7 + $0x4c0] sm:$0xff]  ;;  %v940_v13 = vld [vmem:[%s4807_s7 + $0x4d0] sm:$0xff]  ;;  %937 = vst [vmem:[%s4812_s8 + $0x258] sm:$0xff] %v936_v11 }
  0x40   : > { %939 = vst [vmem:[%s4812_s8 + $0x260] sm:$0xff] %v938_v12  ;;  %941 = vst [vmem:[%s4812_s8 + $0x268] sm:$0xff] %v940_v13  ;;  %v942_v14 = vld [vmem:[%s4807_s7 + $0x4e0] sm:$0xff]  ;;  %v944_v15 = vld [vmem:[%s4807_s7 + $0x4f0] sm:$0xff] }
  0x41   : > { %v946_v16 = vld [vmem:[%s4807_s7 + $0x500] sm:$0xff]  ;;  %943 = vst [vmem:[%s4812_s8 + $0x270] sm:$0xff] %v942_v14  ;;  %945 = vst [vmem:[%s4812_s8 + $0x278] sm:$0xff] %v944_v15  ;;  %v948_v17 = vld [vmem:[%s4807_s7 + $0x510] sm:$0xff] }
  0x42   : > { %947 = vst [vmem:[%s4812_s8 + $0x280] sm:$0xff] %v946_v16  ;;  %v950_v18 = vld [vmem:[%s4807_s7 + $0x520] sm:$0xff]  ;;  %v952_v19 = vld [vmem:[%s4807_s7 + $0x530] sm:$0xff]  ;;  %949 = vst [vmem:[%s4812_s8 + $0x288] sm:$0xff] %v948_v17 }
  0x43   : > { %951 = vst [vmem:[%s4812_s8 + $0x290] sm:$0xff] %v950_v18  ;;  %953 = vst [vmem:[%s4812_s8 + $0x298] sm:$0xff] %v952_v19  ;;  %v954_v20 = vld [vmem:[%s4807_s7 + $0x540] sm:$0xff]  ;;  %v956_v21 = vld [vmem:[%s4807_s7 + $0x550] sm:$0xff] }
  0x44   : > { %v958_v22 = vld [vmem:[%s4807_s7 + $0x560] sm:$0xff]  ;;  %955 = vst [vmem:[%s4812_s8 + $0x2a0] sm:$0xff] %v954_v20  ;;  %957 = vst [vmem:[%s4812_s8 + $0x2a8] sm:$0xff] %v956_v21  ;;  %v960_v23 = vld [vmem:[%s4807_s7 + $0x570] sm:$0xff] }
  0x45   : > { %959 = vst [vmem:[%s4812_s8 + $0x2b0] sm:$0xff] %v958_v22  ;;  %v962_v24 = vld [vmem:[%s4807_s7 + $0x580] sm:$0xff]  ;;  %v964_v25 = vld [vmem:[%s4807_s7 + $0x590] sm:$0xff]  ;;  %961 = vst [vmem:[%s4812_s8 + $0x2b8] sm:$0xff] %v960_v23 }
  0x46   : > { %963 = vst [vmem:[%s4812_s8 + $0x2c0] sm:$0xff] %v962_v24  ;;  %965 = vst [vmem:[%s4812_s8 + $0x2c8] sm:$0xff] %v964_v25  ;;  %v966_v26 = vld [vmem:[%s4807_s7 + $0x5a0] sm:$0xff]  ;;  %v968_v27 = vld [vmem:[%s4807_s7 + $0x5b0] sm:$0xff] }
  0x47   : > { %v970_v28 = vld [vmem:[%s4807_s7 + $0x5c0] sm:$0xff]  ;;  %967 = vst [vmem:[%s4812_s8 + $0x2d0] sm:$0xff] %v966_v26  ;;  %969 = vst [vmem:[%s4812_s8 + $0x2d8] sm:$0xff] %v968_v27  ;;  %v972_v29 = vld [vmem:[%s4807_s7 + $0x5d0] sm:$0xff] }
  0x48   : > { %971 = vst [vmem:[%s4812_s8 + $0x2e0] sm:$0xff] %v970_v28  ;;  %v974_v30 = vld [vmem:[%s4807_s7 + $0x5e0] sm:$0xff]  ;;  %v976_v31 = vld [vmem:[%s4807_s7 + $0x5f0] sm:$0xff]  ;;  %973 = vst [vmem:[%s4812_s8 + $0x2e8] sm:$0xff] %v972_v29 }
  0x49   : > { %975 = vst [vmem:[%s4812_s8 + $0x2f0] sm:$0xff] %v974_v30  ;;  %977 = vst [vmem:[%s4812_s8 + $0x2f8] sm:$0xff] %v976_v31  ;;  %v978_v32 = vld [vmem:[%s4807_s7 + $0x600] sm:$0xff]  ;;  %v980_v33 = vld [vmem:[%s4807_s7 + $0x610] sm:$0xff] }
  0x4a   : > { %v982_v34 = vld [vmem:[%s4807_s7 + $0x620] sm:$0xff]  ;;  %979 = vst [vmem:[%s4812_s8 + $0x300] sm:$0xff] %v978_v32  ;;  %981 = vst [vmem:[%s4812_s8 + $0x308] sm:$0xff] %v980_v33  ;;  %v984_v35 = vld [vmem:[%s4807_s7 + $0x630] sm:$0xff] }
  0x4b   : > { %983 = vst [vmem:[%s4812_s8 + $0x310] sm:$0xff] %v982_v34  ;;  %v986_v36 = vld [vmem:[%s4807_s7 + $0x640] sm:$0xff]  ;;  %v988_v37 = vld [vmem:[%s4807_s7 + $0x650] sm:$0xff]  ;;  %985 = vst [vmem:[%s4812_s8 + $0x318] sm:$0xff] %v984_v35 }
  0x4c   : > { %987 = vst [vmem:[%s4812_s8 + $0x320] sm:$0xff] %v986_v36  ;;  %989 = vst [vmem:[%s4812_s8 + $0x328] sm:$0xff] %v988_v37  ;;  %v990_v38 = vld [vmem:[%s4807_s7 + $0x660] sm:$0xff]  ;;  %v992_v39 = vld [vmem:[%s4807_s7 + $0x670] sm:$0xff] }
  0x4d   : > { %v994_v40 = vld [vmem:[%s4807_s7 + $0x680] sm:$0xff]  ;;  %991 = vst [vmem:[%s4812_s8 + $0x330] sm:$0xff] %v990_v38  ;;  %993 = vst [vmem:[%s4812_s8 + $0x338] sm:$0xff] %v992_v39  ;;  %v996_v41 = vld [vmem:[%s4807_s7 + $0x690] sm:$0xff] }
  0x4e   : > { %995 = vst [vmem:[%s4812_s8 + $0x340] sm:$0xff] %v994_v40  ;;  %v998_v42 = vld [vmem:[%s4807_s7 + $0x6a0] sm:$0xff]  ;;  %v1000_v43 = vld [vmem:[%s4807_s7 + $0x6b0] sm:$0xff]  ;;  %997 = vst [vmem:[%s4812_s8 + $0x348] sm:$0xff] %v996_v41 }
  0x4f   : > { %999 = vst [vmem:[%s4812_s8 + $0x350] sm:$0xff] %v998_v42  ;;  %1001 = vst [vmem:[%s4812_s8 + $0x358] sm:$0xff] %v1000_v43  ;;  %v1002_v44 = vld [vmem:[%s4807_s7 + $0x6c0] sm:$0xff]  ;;  %v1004_v45 = vld [vmem:[%s4807_s7 + $0x6d0] sm:$0xff] }
  0x50   : > { %v1006_v46 = vld [vmem:[%s4807_s7 + $0x6e0] sm:$0xff]  ;;  %1003 = vst [vmem:[%s4812_s8 + $0x360] sm:$0xff] %v1002_v44  ;;  %1005 = vst [vmem:[%s4812_s8 + $0x368] sm:$0xff] %v1004_v45  ;;  %v1008_v47 = vld [vmem:[%s4807_s7 + $0x6f0] sm:$0xff] }
  0x51   : > { %1007 = vst [vmem:[%s4812_s8 + $0x370] sm:$0xff] %v1006_v46  ;;  %v1010_v48 = vld [vmem:[%s4807_s7 + $0x700] sm:$0xff]  ;;  %v1012_v49 = vld [vmem:[%s4807_s7 + $0x710] sm:$0xff]  ;;  %1009 = vst [vmem:[%s4812_s8 + $0x378] sm:$0xff] %v1008_v47 }
  0x52   : > { %1011 = vst [vmem:[%s4812_s8 + $0x380] sm:$0xff] %v1010_v48  ;;  %1013 = vst [vmem:[%s4812_s8 + $0x388] sm:$0xff] %v1012_v49  ;;  %v1014_v50 = vld [vmem:[%s4807_s7 + $0x720] sm:$0xff]  ;;  %v1016_v51 = vld [vmem:[%s4807_s7 + $0x730] sm:$0xff] }
  0x53   : > { %v1018_v52 = vld [vmem:[%s4807_s7 + $0x740] sm:$0xff]  ;;  %1015 = vst [vmem:[%s4812_s8 + $0x390] sm:$0xff] %v1014_v50  ;;  %1017 = vst [vmem:[%s4812_s8 + $0x398] sm:$0xff] %v1016_v51  ;;  %v1020_v53 = vld [vmem:[%s4807_s7 + $0x750] sm:$0xff] }
  0x54   : > { %1019 = vst [vmem:[%s4812_s8 + $0x3a0] sm:$0xff] %v1018_v52  ;;  %v1022_v54 = vld [vmem:[%s4807_s7 + $0x760] sm:$0xff]  ;;  %v1024_v55 = vld [vmem:[%s4807_s7 + $0x770] sm:$0xff]  ;;  %1021 = vst [vmem:[%s4812_s8 + $0x3a8] sm:$0xff] %v1020_v53 }
  0x55   : > { %1023 = vst [vmem:[%s4812_s8 + $0x3b0] sm:$0xff] %v1022_v54  ;;  %1025 = vst [vmem:[%s4812_s8 + $0x3b8] sm:$0xff] %v1024_v55  ;;  %v1026_v56 = vld [vmem:[%s4807_s7 + $0x780] sm:$0xff]  ;;  %v1028_v57 = vld [vmem:[%s4807_s7 + $0x790] sm:$0xff] }
  0x56   : > { %v1030_v58 = vld [vmem:[%s4807_s7 + $0x7a0] sm:$0xff]  ;;  %1027 = vst [vmem:[%s4812_s8 + $0x3c0] sm:$0xff] %v1026_v56  ;;  %1029 = vst [vmem:[%s4812_s8 + $0x3c8] sm:$0xff] %v1028_v57  ;;  %v1032_v59 = vld [vmem:[%s4807_s7 + $0x7b0] sm:$0xff] }
  0x57   : > { %1031 = vst [vmem:[%s4812_s8 + $0x3d0] sm:$0xff] %v1030_v58  ;;  %v1034_v60 = vld [vmem:[%s4807_s7 + $0x7c0] sm:$0xff]  ;;  %v1036_v61 = vld [vmem:[%s4807_s7 + $0x7d0] sm:$0xff]  ;;  %1033 = vst [vmem:[%s4812_s8 + $0x3d8] sm:$0xff] %v1032_v59 }
  0x58   : > { %1035 = vst [vmem:[%s4812_s8 + $0x3e0] sm:$0xff] %v1034_v60  ;;  %1037 = vst [vmem:[%s4812_s8 + $0x3e8] sm:$0xff] %v1036_v61  ;;  %v1038_v62 = vld [vmem:[%s4807_s7 + $0x7e0] sm:$0xff]  ;;  %v1040_v63 = vld [vmem:[%s4807_s7 + $0x7f0] sm:$0xff] }
  0x59   : > { %v1042_v0 = vld [vmem:[%s4807_s7 + $0x800] sm:$0xff]  ;;  %1039 = vst [vmem:[%s4812_s8 + $0x3f0] sm:$0xff] %v1038_v62  ;;  %1041 = vst [vmem:[%s4812_s8 + $0x3f8] sm:$0xff] %v1040_v63  ;;  %v1044_v1 = vld [vmem:[%s4807_s7 + $0x810] sm:$0xff] }
  0x5a   : > { %1043 = vst [vmem:[%s4812_s8 + $0x400] sm:$0xff] %v1042_v0  ;;  %v1046_v2 = vld [vmem:[%s4807_s7 + $0x820] sm:$0xff]  ;;  %v1048_v3 = vld [vmem:[%s4807_s7 + $0x830] sm:$0xff]  ;;  %1045 = vst [vmem:[%s4812_s8 + $0x408] sm:$0xff] %v1044_v1 }
  0x5b   : > { %1047 = vst [vmem:[%s4812_s8 + $0x410] sm:$0xff] %v1046_v2  ;;  %1049 = vst [vmem:[%s4812_s8 + $0x418] sm:$0xff] %v1048_v3  ;;  %v1050_v4 = vld [vmem:[%s4807_s7 + $0x840] sm:$0xff]  ;;  %v1052_v5 = vld [vmem:[%s4807_s7 + $0x850] sm:$0xff] }
  0x5c   : > { %v1054_v6 = vld [vmem:[%s4807_s7 + $0x860] sm:$0xff]  ;;  %1051 = vst [vmem:[%s4812_s8 + $0x420] sm:$0xff] %v1050_v4  ;;  %1053 = vst [vmem:[%s4812_s8 + $0x428] sm:$0xff] %v1052_v5  ;;  %v1056_v7 = vld [vmem:[%s4807_s7 + $0x870] sm:$0xff] }
  0x5d   : > { %1055 = vst [vmem:[%s4812_s8 + $0x430] sm:$0xff] %v1054_v6  ;;  %v1058_v8 = vld [vmem:[%s4807_s7 + $0x880] sm:$0xff]  ;;  %v1060_v9 = vld [vmem:[%s4807_s7 + $0x890] sm:$0xff]  ;;  %1057 = vst [vmem:[%s4812_s8 + $0x438] sm:$0xff] %v1056_v7 }
  0x5e   : > { %1059 = vst [vmem:[%s4812_s8 + $0x440] sm:$0xff] %v1058_v8  ;;  %1061 = vst [vmem:[%s4812_s8 + $0x448] sm:$0xff] %v1060_v9  ;;  %v1062_v10 = vld [vmem:[%s4807_s7 + $0x8a0] sm:$0xff]  ;;  %v1064_v11 = vld [vmem:[%s4807_s7 + $0x8b0] sm:$0xff] }
  0x5f   : > { %v1066_v12 = vld [vmem:[%s4807_s7 + $0x8c0] sm:$0xff]  ;;  %1063 = vst [vmem:[%s4812_s8 + $0x450] sm:$0xff] %v1062_v10  ;;  %1065 = vst [vmem:[%s4812_s8 + $0x458] sm:$0xff] %v1064_v11  ;;  %v1068_v13 = vld [vmem:[%s4807_s7 + $0x8d0] sm:$0xff] }
  0x60   : > { %1067 = vst [vmem:[%s4812_s8 + $0x460] sm:$0xff] %v1066_v12  ;;  %v1070_v14 = vld [vmem:[%s4807_s7 + $0x8e0] sm:$0xff]  ;;  %v1072_v15 = vld [vmem:[%s4807_s7 + $0x8f0] sm:$0xff]  ;;  %1069 = vst [vmem:[%s4812_s8 + $0x468] sm:$0xff] %v1068_v13 }
  0x61   : > { %1071 = vst [vmem:[%s4812_s8 + $0x470] sm:$0xff] %v1070_v14  ;;  %1073 = vst [vmem:[%s4812_s8 + $0x478] sm:$0xff] %v1072_v15  ;;  %v1074_v16 = vld [vmem:[%s4807_s7 + $0x900] sm:$0xff]  ;;  %v1076_v17 = vld [vmem:[%s4807_s7 + $0x910] sm:$0xff] }
  0x62   : > { %v1078_v18 = vld [vmem:[%s4807_s7 + $0x920] sm:$0xff]  ;;  %1075 = vst [vmem:[%s4812_s8 + $0x480] sm:$0xff] %v1074_v16  ;;  %1077 = vst [vmem:[%s4812_s8 + $0x488] sm:$0xff] %v1076_v17  ;;  %v1080_v19 = vld [vmem:[%s4807_s7 + $0x930] sm:$0xff] }
  0x63   : > { %1079 = vst [vmem:[%s4812_s8 + $0x490] sm:$0xff] %v1078_v18  ;;  %v1082_v20 = vld [vmem:[%s4807_s7 + $0x940] sm:$0xff]  ;;  %v1084_v21 = vld [vmem:[%s4807_s7 + $0x950] sm:$0xff]  ;;  %1081 = vst [vmem:[%s4812_s8 + $0x498] sm:$0xff] %v1080_v19 }
  0x64   : > { %1083 = vst [vmem:[%s4812_s8 + $0x4a0] sm:$0xff] %v1082_v20  ;;  %1085 = vst [vmem:[%s4812_s8 + $0x4a8] sm:$0xff] %v1084_v21  ;;  %v1086_v22 = vld [vmem:[%s4807_s7 + $0x960] sm:$0xff]  ;;  %v1088_v23 = vld [vmem:[%s4807_s7 + $0x970] sm:$0xff] }
  0x65   : > { %v1090_v24 = vld [vmem:[%s4807_s7 + $0x980] sm:$0xff]  ;;  %1087 = vst [vmem:[%s4812_s8 + $0x4b0] sm:$0xff] %v1086_v22  ;;  %1089 = vst [vmem:[%s4812_s8 + $0x4b8] sm:$0xff] %v1088_v23  ;;  %v1092_v25 = vld [vmem:[%s4807_s7 + $0x990] sm:$0xff] }
  0x66   : > { %1091 = vst [vmem:[%s4812_s8 + $0x4c0] sm:$0xff] %v1090_v24  ;;  %v1094_v26 = vld [vmem:[%s4807_s7 + $0x9a0] sm:$0xff]  ;;  %v1096_v27 = vld [vmem:[%s4807_s7 + $0x9b0] sm:$0xff]  ;;  %1093 = vst [vmem:[%s4812_s8 + $0x4c8] sm:$0xff] %v1092_v25 }
  0x67   : > { %1095 = vst [vmem:[%s4812_s8 + $0x4d0] sm:$0xff] %v1094_v26  ;;  %1097 = vst [vmem:[%s4812_s8 + $0x4d8] sm:$0xff] %v1096_v27  ;;  %v1098_v28 = vld [vmem:[%s4807_s7 + $0x9c0] sm:$0xff]  ;;  %v1100_v29 = vld [vmem:[%s4807_s7 + $0x9d0] sm:$0xff] }
  0x68   : > { %v1102_v30 = vld [vmem:[%s4807_s7 + $0x9e0] sm:$0xff]  ;;  %1099 = vst [vmem:[%s4812_s8 + $0x4e0] sm:$0xff] %v1098_v28  ;;  %1101 = vst [vmem:[%s4812_s8 + $0x4e8] sm:$0xff] %v1100_v29  ;;  %v1104_v31 = vld [vmem:[%s4807_s7 + $0x9f0] sm:$0xff] }
  0x69   : > { %1103 = vst [vmem:[%s4812_s8 + $0x4f0] sm:$0xff] %v1102_v30  ;;  %v1106_v32 = vld [vmem:[%s4807_s7 + $0xa00] sm:$0xff]  ;;  %v1108_v33 = vld [vmem:[%s4807_s7 + $0xa10] sm:$0xff]  ;;  %1105 = vst [vmem:[%s4812_s8 + $0x4f8] sm:$0xff] %v1104_v31 }
  0x6a   : > { %1107 = vst [vmem:[%s4812_s8 + $0x500] sm:$0xff] %v1106_v32  ;;  %1109 = vst [vmem:[%s4812_s8 + $0x508] sm:$0xff] %v1108_v33  ;;  %v1110_v34 = vld [vmem:[%s4807_s7 + $0xa20] sm:$0xff]  ;;  %v1112_v35 = vld [vmem:[%s4807_s7 + $0xa30] sm:$0xff] }
  0x6b   : > { %v1114_v36 = vld [vmem:[%s4807_s7 + $0xa40] sm:$0xff]  ;;  %1111 = vst [vmem:[%s4812_s8 + $0x510] sm:$0xff] %v1110_v34  ;;  %1113 = vst [vmem:[%s4812_s8 + $0x518] sm:$0xff] %v1112_v35  ;;  %v1116_v37 = vld [vmem:[%s4807_s7 + $0xa50] sm:$0xff] }
  0x6c   : > { %1115 = vst [vmem:[%s4812_s8 + $0x520] sm:$0xff] %v1114_v36  ;;  %v1118_v38 = vld [vmem:[%s4807_s7 + $0xa60] sm:$0xff]  ;;  %v1120_v39 = vld [vmem:[%s4807_s7 + $0xa70] sm:$0xff]  ;;  %1117 = vst [vmem:[%s4812_s8 + $0x528] sm:$0xff] %v1116_v37 }
  0x6d   : > { %1119 = vst [vmem:[%s4812_s8 + $0x530] sm:$0xff] %v1118_v38  ;;  %1121 = vst [vmem:[%s4812_s8 + $0x538] sm:$0xff] %v1120_v39  ;;  %v1122_v40 = vld [vmem:[%s4807_s7 + $0xa80] sm:$0xff]  ;;  %v1124_v41 = vld [vmem:[%s4807_s7 + $0xa90] sm:$0xff] }
  0x6e   : > { %v1126_v42 = vld [vmem:[%s4807_s7 + $0xaa0] sm:$0xff]  ;;  %1123 = vst [vmem:[%s4812_s8 + $0x540] sm:$0xff] %v1122_v40  ;;  %1125 = vst [vmem:[%s4812_s8 + $0x548] sm:$0xff] %v1124_v41  ;;  %v1128_v43 = vld [vmem:[%s4807_s7 + $0xab0] sm:$0xff] }
  0x6f   : > { %1127 = vst [vmem:[%s4812_s8 + $0x550] sm:$0xff] %v1126_v42  ;;  %v1130_v44 = vld [vmem:[%s4807_s7 + $0xac0] sm:$0xff]  ;;  %v1132_v45 = vld [vmem:[%s4807_s7 + $0xad0] sm:$0xff]  ;;  %1129 = vst [vmem:[%s4812_s8 + $0x558] sm:$0xff] %v1128_v43 }
  0x70   : > { %1131 = vst [vmem:[%s4812_s8 + $0x560] sm:$0xff] %v1130_v44  ;;  %1133 = vst [vmem:[%s4812_s8 + $0x568] sm:$0xff] %v1132_v45  ;;  %v1134_v46 = vld [vmem:[%s4807_s7 + $0xae0] sm:$0xff]  ;;  %v1136_v47 = vld [vmem:[%s4807_s7 + $0xaf0] sm:$0xff] }
  0x71   : > { %v1138_v48 = vld [vmem:[%s4807_s7 + $0xb00] sm:$0xff]  ;;  %1135 = vst [vmem:[%s4812_s8 + $0x570] sm:$0xff] %v1134_v46  ;;  %1137 = vst [vmem:[%s4812_s8 + $0x578] sm:$0xff] %v1136_v47  ;;  %v1140_v49 = vld [vmem:[%s4807_s7 + $0xb10] sm:$0xff] }
  0x72   : > { %1139 = vst [vmem:[%s4812_s8 + $0x580] sm:$0xff] %v1138_v48  ;;  %v1142_v50 = vld [vmem:[%s4807_s7 + $0xb20] sm:$0xff]  ;;  %v1144_v51 = vld [vmem:[%s4807_s7 + $0xb30] sm:$0xff]  ;;  %1141 = vst [vmem:[%s4812_s8 + $0x588] sm:$0xff] %v1140_v49 }
  0x73   : > { %1143 = vst [vmem:[%s4812_s8 + $0x590] sm:$0xff] %v1142_v50  ;;  %1145 = vst [vmem:[%s4812_s8 + $0x598] sm:$0xff] %v1144_v51  ;;  %v1146_v52 = vld [vmem:[%s4807_s7 + $0xb40] sm:$0xff]  ;;  %v1148_v53 = vld [vmem:[%s4807_s7 + $0xb50] sm:$0xff] }
  0x74   : > { %v1150_v54 = vld [vmem:[%s4807_s7 + $0xb60] sm:$0xff]  ;;  %1147 = vst [vmem:[%s4812_s8 + $0x5a0] sm:$0xff] %v1146_v52  ;;  %1149 = vst [vmem:[%s4812_s8 + $0x5a8] sm:$0xff] %v1148_v53  ;;  %v1152_v55 = vld [vmem:[%s4807_s7 + $0xb70] sm:$0xff] }
  0x75   : > { %1151 = vst [vmem:[%s4812_s8 + $0x5b0] sm:$0xff] %v1150_v54  ;;  %v1154_v56 = vld [vmem:[%s4807_s7 + $0xb80] sm:$0xff]  ;;  %v1156_v57 = vld [vmem:[%s4807_s7 + $0xb90] sm:$0xff]  ;;  %1153 = vst [vmem:[%s4812_s8 + $0x5b8] sm:$0xff] %v1152_v55 }
  0x76   : > { %1155 = vst [vmem:[%s4812_s8 + $0x5c0] sm:$0xff] %v1154_v56  ;;  %1157 = vst [vmem:[%s4812_s8 + $0x5c8] sm:$0xff] %v1156_v57  ;;  %v1158_v58 = vld [vmem:[%s4807_s7 + $0xba0] sm:$0xff]  ;;  %v1160_v59 = vld [vmem:[%s4807_s7 + $0xbb0] sm:$0xff] }
  0x77   : > { %v1162_v60 = vld [vmem:[%s4807_s7 + $0xbc0] sm:$0xff]  ;;  %1159 = vst [vmem:[%s4812_s8 + $0x5d0] sm:$0xff] %v1158_v58  ;;  %1161 = vst [vmem:[%s4812_s8 + $0x5d8] sm:$0xff] %v1160_v59  ;;  %v1164_v61 = vld [vmem:[%s4807_s7 + $0xbd0] sm:$0xff] }
  0x78   : > { %1163 = vst [vmem:[%s4812_s8 + $0x5e0] sm:$0xff] %v1162_v60  ;;  %v1166_v62 = vld [vmem:[%s4807_s7 + $0xbe0] sm:$0xff]  ;;  %v1168_v63 = vld [vmem:[%s4807_s7 + $0xbf0] sm:$0xff]  ;;  %1165 = vst [vmem:[%s4812_s8 + $0x5e8] sm:$0xff] %v1164_v61 }
  0x79   : > { %1167 = vst [vmem:[%s4812_s8 + $0x5f0] sm:$0xff] %v1166_v62  ;;  %1169 = vst [vmem:[%s4812_s8 + $0x5f8] sm:$0xff] %v1168_v63  ;;  %v1170_v0 = vld [vmem:[%s4807_s7 + $0xc00] sm:$0xff]  ;;  %v1172_v1 = vld [vmem:[%s4807_s7 + $0xc10] sm:$0xff] }
  0x7a   : > { %v1174_v2 = vld [vmem:[%s4807_s7 + $0xc20] sm:$0xff]  ;;  %1171 = vst [vmem:[%s4812_s8 + $0x600] sm:$0xff] %v1170_v0  ;;  %1173 = vst [vmem:[%s4812_s8 + $0x608] sm:$0xff] %v1172_v1  ;;  %v1176_v3 = vld [vmem:[%s4807_s7 + $0xc30] sm:$0xff] }
  0x7b   : > { %1175 = vst [vmem:[%s4812_s8 + $0x610] sm:$0xff] %v1174_v2  ;;  %v1178_v4 = vld [vmem:[%s4807_s7 + $0xc40] sm:$0xff]  ;;  %v1180_v5 = vld [vmem:[%s4807_s7 + $0xc50] sm:$0xff]  ;;  %1177 = vst [vmem:[%s4812_s8 + $0x618] sm:$0xff] %v1176_v3 }
  0x7c   : > { %1179 = vst [vmem:[%s4812_s8 + $0x620] sm:$0xff] %v1178_v4  ;;  %1181 = vst [vmem:[%s4812_s8 + $0x628] sm:$0xff] %v1180_v5  ;;  %v1182_v6 = vld [vmem:[%s4807_s7 + $0xc60] sm:$0xff]  ;;  %v1184_v7 = vld [vmem:[%s4807_s7 + $0xc70] sm:$0xff] }
  0x7d   : > { %v1186_v8 = vld [vmem:[%s4807_s7 + $0xc80] sm:$0xff]  ;;  %1183 = vst [vmem:[%s4812_s8 + $0x630] sm:$0xff] %v1182_v6  ;;  %1185 = vst [vmem:[%s4812_s8 + $0x638] sm:$0xff] %v1184_v7  ;;  %v1188_v9 = vld [vmem:[%s4807_s7 + $0xc90] sm:$0xff] }
  0x7e   : > { %1187 = vst [vmem:[%s4812_s8 + $0x640] sm:$0xff] %v1186_v8  ;;  %v1190_v10 = vld [vmem:[%s4807_s7 + $0xca0] sm:$0xff]  ;;  %v1192_v11 = vld [vmem:[%s4807_s7 + $0xcb0] sm:$0xff]  ;;  %1189 = vst [vmem:[%s4812_s8 + $0x648] sm:$0xff] %v1188_v9 }
  0x7f   : > { %1191 = vst [vmem:[%s4812_s8 + $0x650] sm:$0xff] %v1190_v10  ;;  %1193 = vst [vmem:[%s4812_s8 + $0x658] sm:$0xff] %v1192_v11  ;;  %v1194_v12 = vld [vmem:[%s4807_s7 + $0xcc0] sm:$0xff]  ;;  %v1196_v13 = vld [vmem:[%s4807_s7 + $0xcd0] sm:$0xff] }
  0x80   : > { %v1198_v14 = vld [vmem:[%s4807_s7 + $0xce0] sm:$0xff]  ;;  %1195 = vst [vmem:[%s4812_s8 + $0x660] sm:$0xff] %v1194_v12  ;;  %1197 = vst [vmem:[%s4812_s8 + $0x668] sm:$0xff] %v1196_v13  ;;  %v1200_v15 = vld [vmem:[%s4807_s7 + $0xcf0] sm:$0xff] }
  0x81   : > { %1199 = vst [vmem:[%s4812_s8 + $0x670] sm:$0xff] %v1198_v14  ;;  %v1202_v16 = vld [vmem:[%s4807_s7 + $0xd00] sm:$0xff]  ;;  %v1204_v17 = vld [vmem:[%s4807_s7 + $0xd10] sm:$0xff]  ;;  %1201 = vst [vmem:[%s4812_s8 + $0x678] sm:$0xff] %v1200_v15 }
  0x82   : > { %1203 = vst [vmem:[%s4812_s8 + $0x680] sm:$0xff] %v1202_v16  ;;  %1205 = vst [vmem:[%s4812_s8 + $0x688] sm:$0xff] %v1204_v17  ;;  %v1206_v18 = vld [vmem:[%s4807_s7 + $0xd20] sm:$0xff]  ;;  %v1208_v19 = vld [vmem:[%s4807_s7 + $0xd30] sm:$0xff] }
  0x83   : > { %v1210_v20 = vld [vmem:[%s4807_s7 + $0xd40] sm:$0xff]  ;;  %1207 = vst [vmem:[%s4812_s8 + $0x690] sm:$0xff] %v1206_v18  ;;  %1209 = vst [vmem:[%s4812_s8 + $0x698] sm:$0xff] %v1208_v19  ;;  %v1212_v21 = vld [vmem:[%s4807_s7 + $0xd50] sm:$0xff] }
  0x84   : > { %1211 = vst [vmem:[%s4812_s8 + $0x6a0] sm:$0xff] %v1210_v20  ;;  %v1214_v22 = vld [vmem:[%s4807_s7 + $0xd60] sm:$0xff]  ;;  %v1216_v23 = vld [vmem:[%s4807_s7 + $0xd70] sm:$0xff]  ;;  %1213 = vst [vmem:[%s4812_s8 + $0x6a8] sm:$0xff] %v1212_v21 }
  0x85   : > { %1215 = vst [vmem:[%s4812_s8 + $0x6b0] sm:$0xff] %v1214_v22  ;;  %1217 = vst [vmem:[%s4812_s8 + $0x6b8] sm:$0xff] %v1216_v23  ;;  %v1218_v24 = vld [vmem:[%s4807_s7 + $0xd80] sm:$0xff]  ;;  %v1220_v25 = vld [vmem:[%s4807_s7 + $0xd90] sm:$0xff] }
  0x86   : > { %v1222_v26 = vld [vmem:[%s4807_s7 + $0xda0] sm:$0xff]  ;;  %1219 = vst [vmem:[%s4812_s8 + $0x6c0] sm:$0xff] %v1218_v24  ;;  %1221 = vst [vmem:[%s4812_s8 + $0x6c8] sm:$0xff] %v1220_v25  ;;  %v1224_v27 = vld [vmem:[%s4807_s7 + $0xdb0] sm:$0xff] }
  0x87   : > { %1223 = vst [vmem:[%s4812_s8 + $0x6d0] sm:$0xff] %v1222_v26  ;;  %v1226_v28 = vld [vmem:[%s4807_s7 + $0xdc0] sm:$0xff]  ;;  %v1228_v29 = vld [vmem:[%s4807_s7 + $0xdd0] sm:$0xff]  ;;  %1225 = vst [vmem:[%s4812_s8 + $0x6d8] sm:$0xff] %v1224_v27 }
  0x88   : > { %1227 = vst [vmem:[%s4812_s8 + $0x6e0] sm:$0xff] %v1226_v28  ;;  %1229 = vst [vmem:[%s4812_s8 + $0x6e8] sm:$0xff] %v1228_v29  ;;  %v1230_v30 = vld [vmem:[%s4807_s7 + $0xde0] sm:$0xff]  ;;  %v1232_v31 = vld [vmem:[%s4807_s7 + $0xdf0] sm:$0xff] }
  0x89   : > { %v1234_v32 = vld [vmem:[%s4807_s7 + $0xe00] sm:$0xff]  ;;  %1231 = vst [vmem:[%s4812_s8 + $0x6f0] sm:$0xff] %v1230_v30  ;;  %1233 = vst [vmem:[%s4812_s8 + $0x6f8] sm:$0xff] %v1232_v31  ;;  %v1236_v33 = vld [vmem:[%s4807_s7 + $0xe10] sm:$0xff] }
  0x8a   : > { %1235 = vst [vmem:[%s4812_s8 + $0x700] sm:$0xff] %v1234_v32  ;;  %v1238_v34 = vld [vmem:[%s4807_s7 + $0xe20] sm:$0xff]  ;;  %v1240_v35 = vld [vmem:[%s4807_s7 + $0xe30] sm:$0xff]  ;;  %1237 = vst [vmem:[%s4812_s8 + $0x708] sm:$0xff] %v1236_v33 }
  0x8b   : > { %1239 = vst [vmem:[%s4812_s8 + $0x710] sm:$0xff] %v1238_v34  ;;  %1241 = vst [vmem:[%s4812_s8 + $0x718] sm:$0xff] %v1240_v35  ;;  %v1242_v36 = vld [vmem:[%s4807_s7 + $0xe40] sm:$0xff]  ;;  %v1244_v37 = vld [vmem:[%s4807_s7 + $0xe50] sm:$0xff] }
  0x8c   : > { %v1246_v38 = vld [vmem:[%s4807_s7 + $0xe60] sm:$0xff]  ;;  %1243 = vst [vmem:[%s4812_s8 + $0x720] sm:$0xff] %v1242_v36  ;;  %1245 = vst [vmem:[%s4812_s8 + $0x728] sm:$0xff] %v1244_v37  ;;  %v1248_v39 = vld [vmem:[%s4807_s7 + $0xe70] sm:$0xff] }
  0x8d   : > { %1247 = vst [vmem:[%s4812_s8 + $0x730] sm:$0xff] %v1246_v38  ;;  %v1250_v40 = vld [vmem:[%s4807_s7 + $0xe80] sm:$0xff]  ;;  %v1252_v41 = vld [vmem:[%s4807_s7 + $0xe90] sm:$0xff]  ;;  %1249 = vst [vmem:[%s4812_s8 + $0x738] sm:$0xff] %v1248_v39 }
  0x8e   : > { %1251 = vst [vmem:[%s4812_s8 + $0x740] sm:$0xff] %v1250_v40  ;;  %1253 = vst [vmem:[%s4812_s8 + $0x748] sm:$0xff] %v1252_v41  ;;  %v1254_v42 = vld [vmem:[%s4807_s7 + $0xea0] sm:$0xff]  ;;  %v1256_v43 = vld [vmem:[%s4807_s7 + $0xeb0] sm:$0xff] }
  0x8f   : > { %v1258_v44 = vld [vmem:[%s4807_s7 + $0xec0] sm:$0xff]  ;;  %1255 = vst [vmem:[%s4812_s8 + $0x750] sm:$0xff] %v1254_v42  ;;  %1257 = vst [vmem:[%s4812_s8 + $0x758] sm:$0xff] %v1256_v43  ;;  %v1260_v45 = vld [vmem:[%s4807_s7 + $0xed0] sm:$0xff] }
  0x90   : > { %1259 = vst [vmem:[%s4812_s8 + $0x760] sm:$0xff] %v1258_v44  ;;  %v1262_v46 = vld [vmem:[%s4807_s7 + $0xee0] sm:$0xff]  ;;  %v1264_v47 = vld [vmem:[%s4807_s7 + $0xef0] sm:$0xff]  ;;  %1261 = vst [vmem:[%s4812_s8 + $0x768] sm:$0xff] %v1260_v45 }
  0x91   : > { %1263 = vst [vmem:[%s4812_s8 + $0x770] sm:$0xff] %v1262_v46  ;;  %1265 = vst [vmem:[%s4812_s8 + $0x778] sm:$0xff] %v1264_v47  ;;  %v1266_v48 = vld [vmem:[%s4807_s7 + $0xf00] sm:$0xff]  ;;  %v1268_v49 = vld [vmem:[%s4807_s7 + $0xf10] sm:$0xff] }
  0x92   : > { %v1270_v50 = vld [vmem:[%s4807_s7 + $0xf20] sm:$0xff]  ;;  %1267 = vst [vmem:[%s4812_s8 + $0x780] sm:$0xff] %v1266_v48  ;;  %1269 = vst [vmem:[%s4812_s8 + $0x788] sm:$0xff] %v1268_v49  ;;  %v1272_v51 = vld [vmem:[%s4807_s7 + $0xf30] sm:$0xff] }
  0x93   : > { %1271 = vst [vmem:[%s4812_s8 + $0x790] sm:$0xff] %v1270_v50  ;;  %v1274_v52 = vld [vmem:[%s4807_s7 + $0xf40] sm:$0xff]  ;;  %v1276_v53 = vld [vmem:[%s4807_s7 + $0xf50] sm:$0xff]  ;;  %1273 = vst [vmem:[%s4812_s8 + $0x798] sm:$0xff] %v1272_v51 }
  0x94   : > { %1275 = vst [vmem:[%s4812_s8 + $0x7a0] sm:$0xff] %v1274_v52  ;;  %1277 = vst [vmem:[%s4812_s8 + $0x7a8] sm:$0xff] %v1276_v53  ;;  %v1278_v54 = vld [vmem:[%s4807_s7 + $0xf60] sm:$0xff]  ;;  %v1280_v55 = vld [vmem:[%s4807_s7 + $0xf70] sm:$0xff] }
  0x95   : > { %v1282_v56 = vld [vmem:[%s4807_s7 + $0xf80] sm:$0xff]  ;;  %1279 = vst [vmem:[%s4812_s8 + $0x7b0] sm:$0xff] %v1278_v54  ;;  %1281 = vst [vmem:[%s4812_s8 + $0x7b8] sm:$0xff] %v1280_v55  ;;  %v1284_v57 = vld [vmem:[%s4807_s7 + $0xf90] sm:$0xff] }
  0x96   : > { %1283 = vst [vmem:[%s4812_s8 + $0x7c0] sm:$0xff] %v1282_v56  ;;  %v1286_v58 = vld [vmem:[%s4807_s7 + $0xfa0] sm:$0xff]  ;;  %v1288_v59 = vld [vmem:[%s4807_s7 + $0xfb0] sm:$0xff]  ;;  %1285 = vst [vmem:[%s4812_s8 + $0x7c8] sm:$0xff] %v1284_v57 }
  0x97   : > { %1287 = vst [vmem:[%s4812_s8 + $0x7d0] sm:$0xff] %v1286_v58  ;;  %1289 = vst [vmem:[%s4812_s8 + $0x7d8] sm:$0xff] %v1288_v59  ;;  %v1290_v60 = vld [vmem:[%s4807_s7 + $0xfc0] sm:$0xff]  ;;  %v1292_v61 = vld [vmem:[%s4807_s7 + $0xfd0] sm:$0xff] }
  0x98   : > { %v1294_v62 = vld [vmem:[%s4807_s7 + $0xfe0] sm:$0xff]  ;;  %1291 = vst [vmem:[%s4812_s8 + $0x7e0] sm:$0xff] %v1290_v60  ;;  %1293 = vst [vmem:[%s4812_s8 + $0x7e8] sm:$0xff] %v1292_v61  ;;  %v1296_v63 = vld [vmem:[%s4807_s7 + $0xff0] sm:$0xff] }
  0x99   : > { %1295 = vst [vmem:[%s4812_s8 + $0x7f0] sm:$0xff] %v1294_v62  ;;  %v1298_v0 = vld [vmem:[%s4807_s7 + $0x1000] sm:$0xff]  ;;  %v1300_v1 = vld [vmem:[%s4807_s7 + $0x1010] sm:$0xff]  ;;  %1297 = vst [vmem:[%s4812_s8 + $0x7f8] sm:$0xff] %v1296_v63 }
  0x9a   : > { %1299 = vst [vmem:[%s4812_s8 + $0x800] sm:$0xff] %v1298_v0  ;;  %1301 = vst [vmem:[%s4812_s8 + $0x808] sm:$0xff] %v1300_v1  ;;  %v1302_v2 = vld [vmem:[%s4807_s7 + $0x1020] sm:$0xff]  ;;  %v1304_v3 = vld [vmem:[%s4807_s7 + $0x1030] sm:$0xff] }
  0x9b   : > { %v1306_v4 = vld [vmem:[%s4807_s7 + $0x1040] sm:$0xff]  ;;  %1303 = vst [vmem:[%s4812_s8 + $0x810] sm:$0xff] %v1302_v2  ;;  %1305 = vst [vmem:[%s4812_s8 + $0x818] sm:$0xff] %v1304_v3  ;;  %v1308_v5 = vld [vmem:[%s4807_s7 + $0x1050] sm:$0xff] }
  0x9c   : > { %1307 = vst [vmem:[%s4812_s8 + $0x820] sm:$0xff] %v1306_v4  ;;  %v1310_v6 = vld [vmem:[%s4807_s7 + $0x1060] sm:$0xff]  ;;  %v1312_v7 = vld [vmem:[%s4807_s7 + $0x1070] sm:$0xff]  ;;  %1309 = vst [vmem:[%s4812_s8 + $0x828] sm:$0xff] %v1308_v5 }
  0x9d   : > { %1311 = vst [vmem:[%s4812_s8 + $0x830] sm:$0xff] %v1310_v6  ;;  %1313 = vst [vmem:[%s4812_s8 + $0x838] sm:$0xff] %v1312_v7  ;;  %v1314_v8 = vld [vmem:[%s4807_s7 + $0x1080] sm:$0xff]  ;;  %v1316_v9 = vld [vmem:[%s4807_s7 + $0x1090] sm:$0xff] }
  0x9e   : > { %v1318_v10 = vld [vmem:[%s4807_s7 + $0x10a0] sm:$0xff]  ;;  %1315 = vst [vmem:[%s4812_s8 + $0x840] sm:$0xff] %v1314_v8  ;;  %1317 = vst [vmem:[%s4812_s8 + $0x848] sm:$0xff] %v1316_v9  ;;  %v1320_v11 = vld [vmem:[%s4807_s7 + $0x10b0] sm:$0xff] }
  0x9f   : > { %1319 = vst [vmem:[%s4812_s8 + $0x850] sm:$0xff] %v1318_v10  ;;  %v1322_v12 = vld [vmem:[%s4807_s7 + $0x10c0] sm:$0xff]  ;;  %v1324_v13 = vld [vmem:[%s4807_s7 + $0x10d0] sm:$0xff]  ;;  %1321 = vst [vmem:[%s4812_s8 + $0x858] sm:$0xff] %v1320_v11 }
  0xa0   : > { %1323 = vst [vmem:[%s4812_s8 + $0x860] sm:$0xff] %v1322_v12  ;;  %1325 = vst [vmem:[%s4812_s8 + $0x868] sm:$0xff] %v1324_v13  ;;  %v1326_v14 = vld [vmem:[%s4807_s7 + $0x10e0] sm:$0xff]  ;;  %v1328_v15 = vld [vmem:[%s4807_s7 + $0x10f0] sm:$0xff] }
  0xa1   : > { %v1330_v16 = vld [vmem:[%s4807_s7 + $0x1100] sm:$0xff]  ;;  %1327 = vst [vmem:[%s4812_s8 + $0x870] sm:$0xff] %v1326_v14  ;;  %1329 = vst [vmem:[%s4812_s8 + $0x878] sm:$0xff] %v1328_v15  ;;  %v1332_v17 = vld [vmem:[%s4807_s7 + $0x1110] sm:$0xff] }
  0xa2   : > { %1331 = vst [vmem:[%s4812_s8 + $0x880] sm:$0xff] %v1330_v16  ;;  %v1334_v18 = vld [vmem:[%s4807_s7 + $0x1120] sm:$0xff]  ;;  %v1336_v19 = vld [vmem:[%s4807_s7 + $0x1130] sm:$0xff]  ;;  %1333 = vst [vmem:[%s4812_s8 + $0x888] sm:$0xff] %v1332_v17 }
  0xa3   : > { %1335 = vst [vmem:[%s4812_s8 + $0x890] sm:$0xff] %v1334_v18  ;;  %1337 = vst [vmem:[%s4812_s8 + $0x898] sm:$0xff] %v1336_v19  ;;  %v1338_v20 = vld [vmem:[%s4807_s7 + $0x1140] sm:$0xff]  ;;  %v1340_v21 = vld [vmem:[%s4807_s7 + $0x1150] sm:$0xff] }
  0xa4   : > { %v1342_v22 = vld [vmem:[%s4807_s7 + $0x1160] sm:$0xff]  ;;  %1339 = vst [vmem:[%s4812_s8 + $0x8a0] sm:$0xff] %v1338_v20  ;;  %1341 = vst [vmem:[%s4812_s8 + $0x8a8] sm:$0xff] %v1340_v21  ;;  %v1344_v23 = vld [vmem:[%s4807_s7 + $0x1170] sm:$0xff] }
  0xa5   : > { %1343 = vst [vmem:[%s4812_s8 + $0x8b0] sm:$0xff] %v1342_v22  ;;  %v1346_v24 = vld [vmem:[%s4807_s7 + $0x1180] sm:$0xff]  ;;  %v1348_v25 = vld [vmem:[%s4807_s7 + $0x1190] sm:$0xff]  ;;  %1345 = vst [vmem:[%s4812_s8 + $0x8b8] sm:$0xff] %v1344_v23 }
  0xa6   : > { %1347 = vst [vmem:[%s4812_s8 + $0x8c0] sm:$0xff] %v1346_v24  ;;  %1349 = vst [vmem:[%s4812_s8 + $0x8c8] sm:$0xff] %v1348_v25  ;;  %v1350_v26 = vld [vmem:[%s4807_s7 + $0x11a0] sm:$0xff]  ;;  %v1352_v27 = vld [vmem:[%s4807_s7 + $0x11b0] sm:$0xff] }
  0xa7   : > { %v1354_v28 = vld [vmem:[%s4807_s7 + $0x11c0] sm:$0xff]  ;;  %1351 = vst [vmem:[%s4812_s8 + $0x8d0] sm:$0xff] %v1350_v26  ;;  %1353 = vst [vmem:[%s4812_s8 + $0x8d8] sm:$0xff] %v1352_v27  ;;  %v1356_v29 = vld [vmem:[%s4807_s7 + $0x11d0] sm:$0xff] }
  0xa8   : > { %1355 = vst [vmem:[%s4812_s8 + $0x8e0] sm:$0xff] %v1354_v28  ;;  %v1358_v30 = vld [vmem:[%s4807_s7 + $0x11e0] sm:$0xff]  ;;  %v1360_v31 = vld [vmem:[%s4807_s7 + $0x11f0] sm:$0xff]  ;;  %1357 = vst [vmem:[%s4812_s8 + $0x8e8] sm:$0xff] %v1356_v29 }
  0xa9   : > { %1359 = vst [vmem:[%s4812_s8 + $0x8f0] sm:$0xff] %v1358_v30  ;;  %1361 = vst [vmem:[%s4812_s8 + $0x8f8] sm:$0xff] %v1360_v31 }
  0xaa PF: > { %p3812_p7 = scmp.ge.s32.totalorder %s4725_s18, 1  ;;  %p1378_p8 = scmp.lt.s32.totalorder %s4725_s18, 5 }
  0xac   : > { %p1379_p9 = pnand %p3812_p7, %p1378_p8 }
  0xad   : > { %s1385_s9 = sand.u32 (!%p1379_p9), 1, %s4701_s12   ;;  %p1433_p10 = scmp.lt.s32.totalorder (!%p1379_p9), %s4713_s15, 1 }
  0xae   : > { %1382 = sbr.rel (%p1379_p9) target bundleno = 720 (0x2d0), region = 66  ;;  %s3814_s24 = sshll.u32 (!%p1379_p9), %s4709_s14, 1 }
  0xaf   : > { %s4163_s10 = smul.u32 (!%p1379_p9), 2304, %s1385_s9  ;;  %p1446_p11 = scmp.lt.s32.totalorder (!%p1379_p9), %s3814_s24, 3 }
  0xb1   : > { %s5390_s11 = scalar_lea.vmem (!%p1379_p9), [#allocation2], %s4163_s10 }
  0xb2   : > { %v4221_v32 = vld [vmem:[%s5390_s11 + $0x4] ss:$8 sps:$4 sm:$0xff] (!%p1379_p9)   ;;  %v4225_v34 = vld [vmem:[%s5390_s11] ss:$8 sps:$4 sm:$0xff] (!%p1379_p9)   ;;  %v4227_v36 = vld [vmem:[%s5390_s11 + $0x14] ss:$8 sps:$4 sm:$0xff] (!%p1379_p9)  }
  0xb3   : > { %v4223_v33 = vld [vmem:[%s5390_s11 + $0x404] ss:$8 sps:$4 sm:$0xff] (!%p1379_p9)   ;;  %3278 = vmatprep.subr.bf16.mxu1 (!%p1379_p9), %v4221_v32  ;;  %v4226_v35 = vld [vmem:[%s5390_s11 + $0x400] ss:$8 sps:$4 sm:$0xff] (!%p1379_p9)   ;;  %v4229_v37 = vld [vmem:[%s5390_s11 + $0x414] ss:$8 sps:$4 sm:$0xff] (!%p1379_p9)  }
  0xb4   : > { %3442 = vmatprep.subr.bf16.mxu0 (!%p1379_p9), %v4223_v33  ;;  %3279 = vmatpush1.bf16.msra.mxu1 (!%p1379_p9), %v4225_v34  ;;  %v4231_v38 = vld [vmem:[%s5390_s11 + $0x10] ss:$8 sps:$4 sm:$0xff] (!%p1379_p9)   ;;  %v4233_v40 = vld [vmem:[%s5390_s11 + $0x24] ss:$8 sps:$4 sm:$0xff] (!%p1379_p9)   ;;  %v4237_v42 = vld [vmem:[%s5390_s11 + $0x20] ss:$8 sps:$4 sm:$0xff] (!%p1379_p9)  }
  0xb5   : > { %3443 = vmatpush1.bf16.msra.mxu0 %v4226_v35  ;;  %3280 = vmatprep.subr.bf16.mxu1 %v4227_v36  ;;  %v4232_v39 = vld [vmem:[%s5390_s11 + $0x410] ss:$8 sps:$4 sm:$0xff]   ;;  %v4235_v41 = vld [vmem:[%s5390_s11 + $0x424] ss:$8 sps:$4 sm:$0xff]   ;;  %v4238_v43 = vld [vmem:[%s5390_s11 + $0x420] ss:$8 sps:$4 sm:$0xff]  }
  0xb6   : > { %3444 = vmatprep.subr.bf16.mxu0 %v4229_v37  ;;  %v4239_v44 = vld [vmem:[%s5390_s11 + $0x34] ss:$8 sps:$4 sm:$0xff]   ;;  %v4243_v46 = vld [vmem:[%s5390_s11 + $0x30] ss:$8 sps:$4 sm:$0xff]   ;;  %v4245_v48 = vld [vmem:[%s5390_s11 + $0x44] ss:$8 sps:$4 sm:$0xff]  }
  0xb7   : > { %v4241_v45 = vld [vmem:[%s5390_s11 + $0x434] ss:$8 sps:$4 sm:$0xff]   ;;  %v4244_v47 = vld [vmem:[%s5390_s11 + $0x430] ss:$8 sps:$4 sm:$0xff]   ;;  %v4247_v49 = vld [vmem:[%s5390_s11 + $0x444] ss:$8 sps:$4 sm:$0xff]  }
  0xb8   : > { %3281 = vmatpush1.bf16.msra.mxu1 %v4231_v38  ;;  %v4249_v50 = vld [vmem:[%s5390_s11 + $0x40] ss:$8 sps:$4 sm:$0xff]   ;;  %v4251_v52 = vld [vmem:[%s5390_s11 + $0x54] ss:$8 sps:$4 sm:$0xff]   ;;  %v4255_v54 = vld [vmem:[%s5390_s11 + $0x50] ss:$8 sps:$4 sm:$0xff]  }
  0xb9   : > { %3445 = vmatpush1.bf16.msra.mxu0 %v4232_v39  ;;  %3282 = vmatprep.subr.bf16.mxu1 %v4233_v40  ;;  %v4250_v51 = vld [vmem:[%s5390_s11 + $0x440] ss:$8 sps:$4 sm:$0xff]   ;;  %v4253_v53 = vld [vmem:[%s5390_s11 + $0x454] ss:$8 sps:$4 sm:$0xff]   ;;  %v4256_v55 = vld [vmem:[%s5390_s11 + $0x450] ss:$8 sps:$4 sm:$0xff]  }
  0xba   : > { %3446 = vmatprep.subr.bf16.mxu0 %v4235_v41  ;;  %v4257_v56 = vld [vmem:[%s5390_s11 + $0x64] ss:$8 sps:$4 sm:$0xff]   ;;  %v4261_v58 = vld [vmem:[%s5390_s11 + $0x60] ss:$8 sps:$4 sm:$0xff]   ;;  %v4263_v60 = vld [vmem:[%s5390_s11 + $0x74] ss:$8 sps:$4 sm:$0xff]  }
  0xbb   : > { %v4259_v57 = vld [vmem:[%s5390_s11 + $0x464] ss:$8 sps:$4 sm:$0xff]   ;;  %v4262_v59 = vld [vmem:[%s5390_s11 + $0x460] ss:$8 sps:$4 sm:$0xff]   ;;  %v4265_v61 = vld [vmem:[%s5390_s11 + $0x474] ss:$8 sps:$4 sm:$0xff]  }
  0xbc   : > { %3283 = vmatpush1.bf16.msra.mxu1 %v4237_v42  ;;  %v4267_v62 = vld [vmem:[%s5390_s11 + $0x70] ss:$8 sps:$4 sm:$0xff]   ;;  %v4269_v0 = vld [vmem:[%s5390_s11 + $0x84] ss:$8 sps:$4 sm:$0xff]   ;;  %v4273_v2 = vld [vmem:[%s5390_s11 + $0x80] ss:$8 sps:$4 sm:$0xff]  }
  0xbd   : > { %3447 = vmatpush1.bf16.msra.mxu0 %v4238_v43  ;;  %3284 = vmatprep.subr.bf16.mxu1 %v4239_v44  ;;  %v4268_v63 = vld [vmem:[%s5390_s11 + $0x470] ss:$8 sps:$4 sm:$0xff]   ;;  %v4271_v1 = vld [vmem:[%s5390_s11 + $0x484] ss:$8 sps:$4 sm:$0xff]   ;;  %v4274_v3 = vld [vmem:[%s5390_s11 + $0x480] ss:$8 sps:$4 sm:$0xff]  }
  0xbe   : > { %3448 = vmatprep.subr.bf16.mxu0 %v4241_v45  ;;  %s5787_s15 = smov (!%p1433_p10, %s4713_s15), 1  ;;  %v4275_v4 = vld [vmem:[%s5390_s11 + $0x94] ss:$8 sps:$4 sm:$0xff]   ;;  %v4279_v6 = vld [vmem:[%s5390_s11 + $0x90] ss:$8 sps:$4 sm:$0xff]   ;;  %s5789_s24 = smov (!%p1446_p11, %s3814_s24), 3 }
  0xbf   : > { %v4277_v5 = vld [vmem:[%s5390_s11 + $0x494] ss:$8 sps:$4 sm:$0xff]   ;;  %s4164_s12 = smul.u32 72, %s5787_s15  ;;  %v4280_v7 = vld [vmem:[%s5390_s11 + $0x490] ss:$8 sps:$4 sm:$0xff]   ;;  %s3815_s26 = sshll.u32 %s5787_s15, 2 }
  0xc0   : > { %3285 = vmatpush1.bf16.msra.mxu1 %v4243_v46  ;;  %v4281_v8 = vld [vmem:[%s5390_s11 + $0xa4] ss:$8 sps:$4 sm:$0xff]   ;;  %v4285_v10 = vld [vmem:[%s5390_s11 + $0xa0] ss:$8 sps:$4 sm:$0xff]   ;;  %v4287_v12 = vld [vmem:[%s5390_s11 + $0xb4] ss:$8 sps:$4 sm:$0xff]   ;;  %s1449_s27 = sadd.s32 %s3815_s26, %s5789_s24 }
  0xc1   : > { %3449 = vmatpush1.bf16.msra.mxu0 %v4244_v47  ;;  %3286 = vmatprep.subr.bf16.mxu1 %v4245_v48  ;;  %v4283_v9 = vld [vmem:[%s5390_s11 + $0x4a4] ss:$8 sps:$4 sm:$0xff]   ;;  %v4286_v11 = vld [vmem:[%s5390_s11 + $0x4a0] ss:$8 sps:$4 sm:$0xff]   ;;  %s5444_s23 = scalar_lea.vmem %s5770_s0, %s4164_s12  ;;  %v4289_v13 = vld [vmem:[%s5390_s11 + $0x4b4] ss:$8 sps:$4 sm:$0xff]   ;;  %s1450_s30 = scalar_lea.vmem %s5772_s2, %s1449_s27 }
  0xc2   : > { %3450 = vmatprep.subr.bf16.mxu0 %v4247_v49  ;;  %v1466_v14 = vld [vmem:[%s5444_s23] sm:$0xff]  ;;  %v4291_v15 = vld [vmem:[%s5390_s11 + $0xb0] ss:$8 sps:$4 sm:$0xff]   ;;  %v4299_v24 = vld [vmem:[%s5390_s11 + $0xd4] ss:$8 sps:$4 sm:$0xff]   ;;  %s3818_s14 = sshll.u32 %s1449_s27, 2 }
  0xc3   : > { %v3820_v16 = vcombine.high %v1466_v14, %v1466_v14  ;;  %v4292_v17 = vld [vmem:[%s5390_s11 + $0x4b0] ss:$8 sps:$4 sm:$0xff]   ;;  %v1470_v18 = vld [vmem:[%s5444_s23 + $0x20] sm:$0xff]  ;;  %v4301_v25 = vld [vmem:[%s5390_s11 + $0x4d4] ss:$8 sps:$4 sm:$0xff]   ;;  %v3819_v38 = vcombine.low %v1466_v14, %v1466_v14  ;;  %s1464_s5 = scalar_lea.vmem %s5773_s3, %s3818_s14 }
  0xc4   : > { %3287 = vmatpush1.bf16.msra.mxu1 %v4249_v50  ;;  %v4293_v19 = vld [vmem:[%s5390_s11 + $0xc4] ss:$8 sps:$4 sm:$0xff]   ;;  %v3828_v21 = vcombine.high %v1470_v18, %v1470_v18  ;;  %v4297_v22 = vld [vmem:[%s5390_s11 + $0xc0] ss:$8 sps:$4 sm:$0xff]   ;;  %v4303_v26 = vld [vmem:[%s5390_s11 + $0xd0] ss:$8 sps:$4 sm:$0xff]   ;;  %v3827_v39 = vcombine.low %v1470_v18, %v1470_v18 }
  0xc5   : > { %3451 = vmatpush1.bf16.msra.mxu0 %v4250_v51  ;;  %3288 = vmatprep.subr.bf16.mxu1 %v4251_v52  ;;  %v4295_v20 = vld [vmem:[%s5390_s11 + $0x4c4] ss:$8 sps:$4 sm:$0xff]   ;;  %v4298_v23 = vld [vmem:[%s5390_s11 + $0x4c0] ss:$8 sps:$4 sm:$0xff]   ;;  %v4304_v27 = vld [vmem:[%s5390_s11 + $0x4d0] ss:$8 sps:$4 sm:$0xff]  }
  0xc6   : > { %3452 = vmatprep.subr.bf16.mxu0 %v4253_v53  ;;  %3310 = vmatprep.mubr.bf16.mxu1 %v3820_v16  ;;  %v4305_v28 = vld [vmem:[%s5390_s11 + $0xe4] ss:$8 sps:$4 sm:$0xff]   ;;  %v4309_v30 = vld [vmem:[%s5390_s11 + $0xe0] ss:$8 sps:$4 sm:$0xff]   ;;  %v4311_v32 = vld [vmem:[%s5390_s11 + $0xf4] ss:$8 sps:$4 sm:$0xff]  }
  0xc7   : > { %3474 = vmatprep.mubr.bf16.mxu0 %v3828_v21  ;;  %v4307_v29 = vld [vmem:[%s5390_s11 + $0x4e4] ss:$8 sps:$4 sm:$0xff]   ;;  %v4310_v31 = vld [vmem:[%s5390_s11 + $0x4e0] ss:$8 sps:$4 sm:$0xff]   ;;  %v4313_v33 = vld [vmem:[%s5390_s11 + $0x4f4] ss:$8 sps:$4 sm:$0xff]  }
  0xc8   : > { %3289 = vmatpush1.bf16.msra.mxu1 %v4255_v54  ;;  %v4315_v34 = vld [vmem:[%s5390_s11 + $0xf0] ss:$8 sps:$4 sm:$0xff]   ;;  %v4321_v36 = vld [vmem:[%s5390_s11 + $0x104] ss:$8 sps:$4 sm:$0xff]   ;;  %v4319_v40 = vld [vmem:[%s5390_s11 + $0x100] ss:$8 sps:$4 sm:$0xff]  }
  0xc9   : > { %3453 = vmatpush1.bf16.msra.mxu0 %v4256_v55  ;;  %3290 = vmatprep.subr.bf16.mxu1 %v4257_v56  ;;  %v4316_v35 = vld [vmem:[%s5390_s11 + $0x4f0] ss:$8 sps:$4 sm:$0xff]   ;;  %v4326_v37 = vld [vmem:[%s5390_s11 + $0x504] ss:$8 sps:$4 sm:$0xff]   ;;  %v4324_v41 = vld [vmem:[%s5390_s11 + $0x500] ss:$8 sps:$4 sm:$0xff]  }
  0xca   : > { %3454 = vmatprep.subr.bf16.mxu0 %v4259_v57  ;;  %v4329_v42 = vld [vmem:[%s5390_s11 + $0x114] ss:$8 sps:$4 sm:$0xff]   ;;  %v4327_v44 = vld [vmem:[%s5390_s11 + $0x110] ss:$8 sps:$4 sm:$0xff]   ;;  %v4335_v46 = vld [vmem:[%s5390_s11 + $0x124] ss:$8 sps:$4 sm:$0xff]  }
  0xcb   : > { %v4332_v43 = vld [vmem:[%s5390_s11 + $0x514] ss:$8 sps:$4 sm:$0xff]   ;;  %v4330_v45 = vld [vmem:[%s5390_s11 + $0x510] ss:$8 sps:$4 sm:$0xff]   ;;  %v4338_v47 = vld [vmem:[%s5390_s11 + $0x524] ss:$8 sps:$4 sm:$0xff]  }
  0xcc   : > { %3291 = vmatpush1.bf16.msra.mxu1 %v4261_v58  ;;  %v4333_v48 = vld [vmem:[%s5390_s11 + $0x120] ss:$8 sps:$4 sm:$0xff]   ;;  %v4341_v50 = vld [vmem:[%s5390_s11 + $0x134] ss:$8 sps:$4 sm:$0xff]   ;;  %v4339_v52 = vld [vmem:[%s5390_s11 + $0x130] ss:$8 sps:$4 sm:$0xff]  }
  0xcd   : > { %3455 = vmatpush1.bf16.msra.mxu0 %v4262_v59  ;;  %3292 = vmatprep.subr.bf16.mxu1 %v4263_v60  ;;  %v4336_v49 = vld [vmem:[%s5390_s11 + $0x520] ss:$8 sps:$4 sm:$0xff]   ;;  %v4344_v51 = vld [vmem:[%s5390_s11 + $0x534] ss:$8 sps:$4 sm:$0xff]   ;;  %v4342_v53 = vld [vmem:[%s5390_s11 + $0x530] ss:$8 sps:$4 sm:$0xff]  }
  0xce   : > { %3456 = vmatprep.subr.bf16.mxu0 %v4265_v61  ;;  %v4347_v54 = vld [vmem:[%s5390_s11 + $0x144] ss:$8 sps:$4 sm:$0xff]   ;;  %v4345_v56 = vld [vmem:[%s5390_s11 + $0x140] ss:$8 sps:$4 sm:$0xff]   ;;  %v4353_v58 = vld [vmem:[%s5390_s11 + $0x154] ss:$8 sps:$4 sm:$0xff]  }
  0xcf   : > { %v4350_v55 = vld [vmem:[%s5390_s11 + $0x544] ss:$8 sps:$4 sm:$0xff]   ;;  %v4348_v57 = vld [vmem:[%s5390_s11 + $0x540] ss:$8 sps:$4 sm:$0xff]   ;;  %v4356_v59 = vld [vmem:[%s5390_s11 + $0x554] ss:$8 sps:$4 sm:$0xff]  }
  0xd0   : > { %3293 = vmatpush1.bf16.msra.mxu1 %v4267_v62  ;;  %v4351_v60 = vld [vmem:[%s5390_s11 + $0x150] ss:$8 sps:$4 sm:$0xff]   ;;  %v4359_v62 = vld [vmem:[%s5390_s11 + $0x164] ss:$8 sps:$4 sm:$0xff]   ;;  %v4377_v14 = vld [vmem:[%s5390_s11 + $0x194] ss:$8 sps:$4 sm:$0xff]  }
  0xd1   : > { %3457 = vmatpush1.bf16.msra.mxu0 %v4268_v63  ;;  %3294 = vmatprep.subr.bf16.mxu1 %v4269_v0  ;;  %v4354_v61 = vld [vmem:[%s5390_s11 + $0x550] ss:$8 sps:$4 sm:$0xff]   ;;  %v4362_v63 = vld [vmem:[%s5390_s11 + $0x564] ss:$8 sps:$4 sm:$0xff]   ;;  %v4384_v21 = vld [vmem:[%s5390_s11 + $0x5a0] ss:$8 sps:$4 sm:$0xff]  }
  0xd2   : > { %3458 = vmatprep.subr.bf16.mxu0 %v4271_v1  ;;  %v5495_v0 = vld [vmem:[%s5444_s23 + $0x8] sm:$0xff]  ;;  %v4375_v16 = vld [vmem:[%s5390_s11 + $0x190] ss:$8 sps:$4 sm:$0xff]  }
  0xd3   : > { %v4357_v1 = vld [vmem:[%s5390_s11 + $0x160] ss:$8 sps:$4 sm:$0xff]   ;;  %v4383_v18 = vld [vmem:[%s5390_s11 + $0x1a4] ss:$8 sps:$4 sm:$0xff]  }
  0xd4   : > { %3295 = vmatpush1.bf16.msra.mxu1 %v4273_v2  ;;  %v4360_v2 = vld [vmem:[%s5390_s11 + $0x560] ss:$8 sps:$4 sm:$0xff]  }
  0xd5   : > { %3459 = vmatpush1.bf16.msra.mxu0 %v4274_v3  ;;  %3296 = vmatprep.subr.bf16.mxu1 %v4275_v4  ;;  %v3822_v3 = vcombine.high %v5495_v0, %v5495_v0  ;;  %v5502_v4 = vld [vmem:[%s5444_s23 + $0x28] sm:$0xff] }
  0xd6   : > { %3460 = vmatprep.subr.bf16.mxu0 %v4277_v5  ;;  %v4365_v5 = vld [vmem:[%s5390_s11 + $0x174] ss:$8 sps:$4 sm:$0xff]  }
  0xd8   : > { %3297 = vmatpush1.bf16.msra.mxu1 %v4279_v6  ;;  %v3830_v6 = vcombine.high %v5502_v4, %v5502_v4 }
  0xd9   : > { %3461 = vmatpush1.bf16.msra.mxu0 %v4280_v7  ;;  %3298 = vmatprep.subr.bf16.mxu1 %v4281_v8  ;;  %v4368_v7 = vld [vmem:[%s5390_s11 + $0x574] ss:$8 sps:$4 sm:$0xff]   ;;  %v4363_v8 = vld [vmem:[%s5390_s11 + $0x170] ss:$8 sps:$4 sm:$0xff]  }
  0xda   : > { %3462 = vmatprep.subr.bf16.mxu0 %v4283_v9  ;;  %v4366_v9 = vld [vmem:[%s5390_s11 + $0x570] ss:$8 sps:$4 sm:$0xff]  }
  0xdc   : > { %3299 = vmatpush1.bf16.msra.mxu1 %v4285_v10  ;;  %v4371_v10 = vld [vmem:[%s5390_s11 + $0x184] ss:$8 sps:$4 sm:$0xff]  }
  0xdd   : > { %3463 = vmatpush1.bf16.msra.mxu0 %v4286_v11  ;;  %3300 = vmatprep.subr.bf16.mxu1 %v4287_v12  ;;  %v4374_v11 = vld [vmem:[%s5390_s11 + $0x584] ss:$8 sps:$4 sm:$0xff]   ;;  %v4369_v12 = vld [vmem:[%s5390_s11 + $0x180] ss:$8 sps:$4 sm:$0xff]  }
  0xde   : > { %3464 = vmatprep.subr.bf16.mxu0 %v4289_v13  ;;  %v4372_v13 = vld [vmem:[%s5390_s11 + $0x580] ss:$8 sps:$4 sm:$0xff]  }
  0xe0   : > { %3301 = vmatpush1.bf16.msra.mxu1 %v4291_v15  ;;  %v4380_v15 = vld [vmem:[%s5390_s11 + $0x594] ss:$8 sps:$4 sm:$0xff]  }
  0xe1   : > { %3465 = vmatpush1.bf16.msra.mxu0 %v4292_v17  ;;  %3302 = vmatprep.subr.bf16.mxu1 %v4293_v19  ;;  %v4378_v17 = vld [vmem:[%s5390_s11 + $0x590] ss:$8 sps:$4 sm:$0xff]   ;;  %v4386_v19 = vld [vmem:[%s5390_s11 + $0x5a4] ss:$8 sps:$4 sm:$0xff]  }
  0xe2   : > { %3466 = vmatprep.subr.bf16.mxu0 %v4295_v20  ;;  %v4381_v20 = vld [vmem:[%s5390_s11 + $0x1a0] ss:$8 sps:$4 sm:$0xff]  }
  0xe4   : > { %3303 = vmatpush1.bf16.msra.mxu1 %v4297_v22  ;;  %v4389_v22 = vld [vmem:[%s5390_s11 + $0x1b4] ss:$8 sps:$4 sm:$0xff]  }
  0xe5   : > { %3467 = vmatpush1.bf16.msra.mxu0 %v4298_v23  ;;  %3304 = vmatprep.subr.bf16.mxu1 %v4299_v24  ;;  %v4392_v23 = vld [vmem:[%s5390_s11 + $0x5b4] ss:$8 sps:$4 sm:$0xff]   ;;  %v4387_v24 = vld [vmem:[%s5390_s11 + $0x1b0] ss:$8 sps:$4 sm:$0xff]  }
  0xe6   : > { %3468 = vmatprep.subr.bf16.mxu0 %v4301_v25  ;;  %v4390_v25 = vld [vmem:[%s5390_s11 + $0x5b0] ss:$8 sps:$4 sm:$0xff]  }
  0xe8   : > { %3305 = vmatpush1.bf16.msra.mxu1 %v4303_v26  ;;  %v4395_v26 = vld [vmem:[%s5390_s11 + $0x1c4] ss:$8 sps:$4 sm:$0xff]  }
  0xe9   : > { %3469 = vmatpush1.bf16.msra.mxu0 %v4304_v27  ;;  %3306 = vmatprep.subr.bf16.mxu1 %v4305_v28  ;;  %v4398_v27 = vld [vmem:[%s5390_s11 + $0x5c4] ss:$8 sps:$4 sm:$0xff]   ;;  %v4393_v28 = vld [vmem:[%s5390_s11 + $0x1c0] ss:$8 sps:$4 sm:$0xff]  }
  0xea   : > { %3470 = vmatprep.subr.bf16.mxu0 %v4307_v29  ;;  %v4396_v29 = vld [vmem:[%s5390_s11 + $0x5c0] ss:$8 sps:$4 sm:$0xff]  }
  0xec   : > { %3307 = vmatpush1.bf16.msra.mxu1 %v4309_v30  ;;  %v4401_v30 = vld [vmem:[%s5390_s11 + $0x1d4] ss:$8 sps:$4 sm:$0xff]  }
  0xed   : > { %3471 = vmatpush1.bf16.msra.mxu0 %v4310_v31  ;;  %3308 = vmatprep.subr.bf16.mxu1 %v4311_v32  ;;  %v4404_v31 = vld [vmem:[%s5390_s11 + $0x5d4] ss:$8 sps:$4 sm:$0xff]   ;;  %v4399_v32 = vld [vmem:[%s5390_s11 + $0x1d0] ss:$8 sps:$4 sm:$0xff]  }
  0xee   : > { %3472 = vmatprep.subr.bf16.mxu0 %v4313_v33  ;;  %v4402_v33 = vld [vmem:[%s5390_s11 + $0x5d0] ss:$8 sps:$4 sm:$0xff]  }
  0xf0   : > { %3309 = vmatpush1.bf16.msra.mxu1 %v4315_v34  ;;  %v4407_v34 = vld [vmem:[%s5390_s11 + $0x1e4] ss:$8 sps:$4 sm:$0xff]  }
  0xf1   : > { %3473 = vmatpush1.bf16.msra.mxu0 %v4316_v35  ;;  %3319 = vmatprep.subr.bf16.mxu1 %v4321_v36  ;;  %v4410_v35 = vld [vmem:[%s5390_s11 + $0x5e4] ss:$8 sps:$4 sm:$0xff]   ;;  %v4405_v36 = vld [vmem:[%s5390_s11 + $0x1e0] ss:$8 sps:$4 sm:$0xff]  }
  0xf2   : > { %3483 = vmatprep.subr.bf16.mxu0 %v4326_v37  ;;  %v4408_v37 = vld [vmem:[%s5390_s11 + $0x5e0] ss:$8 sps:$4 sm:$0xff]  }
  0xf3   : > { %3311 = vmatmul.mubr.bf16.vlgmr.msra.gmra.mrb[0].mxu1 %v3819_v38  ;;  %v4413_v38 = vld [vmem:[%s5390_s11 + $0x1f4] ss:$8 sps:$4 sm:$0xff]  }
  0xf4   : > { %3475 = vmatmul.mubr.bf16.vlgmr.msra.gmra.mrb[0].mxu0 %v3827_v39  ;;  %3320 = vmatpush1.bf16.msra.mxu1 %v4319_v40  ;;  %v4416_v39 = vld [vmem:[%s5390_s11 + $0x5f4] ss:$8 sps:$4 sm:$0xff]   ;;  %v4411_v40 = vld [vmem:[%s5390_s11 + $0x1f0] ss:$8 sps:$4 sm:$0xff]  }
  0xf5   : > { %3484 = vmatpush1.bf16.msra.mxu0 %v4324_v41  ;;  %3321 = vmatprep.subr.bf16.mxu1 %v4329_v42  ;;  %v4414_v41 = vld [vmem:[%s5390_s11 + $0x5f0] ss:$8 sps:$4 sm:$0xff]   ;;  %v4421_v42 = vld [vmem:[%s5390_s11 + $0x204] ss:$8 sps:$4 sm:$0xff]  }
  0xf6   : > { %3485 = vmatprep.subr.bf16.mxu0 %v4332_v43  ;;  %3351 = vmatprep.mubr.bf16.mxu1 %v3822_v3  ;;  %v4426_v43 = vld [vmem:[%s5390_s11 + $0x604] ss:$8 sps:$4 sm:$0xff]   ;;  %v4448_v3 = vld [vmem:[%s5390_s11 + $0x640] ss:$8 sps:$4 sm:$0xff]  }
  0xf7   : > { %3515 = vmatprep.mubr.bf16.mxu0 %v3830_v6  ;;  %v4451_v6 = vld [vmem:[%s5390_s11 + $0x250] ss:$8 sps:$4 sm:$0xff]  }
  0xf8   : > { %3322 = vmatpush1.bf16.msra.mxu1 %v4327_v44  ;;  %v3821_v44 = vcombine.low %v5495_v0, %v5495_v0  ;;  %v4447_v0 = vld [vmem:[%s5390_s11 + $0x244] ss:$8 sps:$4 sm:$0xff]  }
  0xf9   : > { %3486 = vmatpush1.bf16.msra.mxu0 %v4330_v45  ;;  %3323 = vmatprep.subr.bf16.mxu1 %v4335_v46  ;;  %v4419_v45 = vld [vmem:[%s5390_s11 + $0x200] ss:$8 sps:$4 sm:$0xff]   ;;  %v3829_v46 = vcombine.low %v5502_v4, %v5502_v4  ;;  %v4453_v4 = vld [vmem:[%s5390_s11 + $0x254] ss:$8 sps:$4 sm:$0xff]  }
  0xfa   : > { %3487 = vmatprep.subr.bf16.mxu0 %v4338_v47  ;;  %v4424_v47 = vld [vmem:[%s5390_s11 + $0x600] ss:$8 sps:$4 sm:$0xff]  }
  0xfc   : > { %3324 = vmatpush1.bf16.msra.mxu1 %v4333_v48  ;;  %v4429_v48 = vld [vmem:[%s5390_s11 + $0x214] ss:$8 sps:$4 sm:$0xff]  }
  0xfd   : > { %3488 = vmatpush1.bf16.msra.mxu0 %v4336_v49  ;;  %3325 = vmatprep.subr.bf16.mxu1 %v4341_v50  ;;  %v4432_v49 = vld [vmem:[%s5390_s11 + $0x614] ss:$8 sps:$4 sm:$0xff]  }
  0xfe   : > { %3489 = vmatprep.subr.bf16.mxu0 %v4344_v51  ;;  %v5553_v50 = vld [vmem:[%s5444_s23 + $0x10] sm:$0xff] }
  0xff   : > { %v3824_v51 = vcombine.high %v5553_v50, %v5553_v50 }
 0x100   : > { %3326 = vmatpush1.bf16.msra.mxu1 %v4339_v52  ;;  %v5558_v52 = vld [vmem:[%s5444_s23 + $0x30] sm:$0xff] }
 0x101   : > { %3490 = vmatpush1.bf16.msra.mxu0 %v4342_v53  ;;  %3327 = vmatprep.subr.bf16.mxu1 %v4347_v54  ;;  %v4427_v53 = vld [vmem:[%s5390_s11 + $0x210] ss:$8 sps:$4 sm:$0xff]  }
 0x102   : > { %3491 = vmatprep.subr.bf16.mxu0 %v4350_v55  ;;  %v4430_v54 = vld [vmem:[%s5390_s11 + $0x610] ss:$8 sps:$4 sm:$0xff]   ;;  %v3832_v55 = vcombine.high %v5558_v52, %v5558_v52 }
 0x104   : > { %3328 = vmatpush1.bf16.msra.mxu1 %v4345_v56  ;;  %v4435_v56 = vld [vmem:[%s5390_s11 + $0x224] ss:$8 sps:$4 sm:$0xff]  }
 0x105   : > { %3492 = vmatpush1.bf16.msra.mxu0 %v4348_v57  ;;  %3329 = vmatprep.subr.bf16.mxu1 %v4353_v58  ;;  %v4438_v57 = vld [vmem:[%s5390_s11 + $0x624] ss:$8 sps:$4 sm:$0xff]   ;;  %v4433_v58 = vld [vmem:[%s5390_s11 + $0x220] ss:$8 sps:$4 sm:$0xff]  }
 0x106   : > { %3493 = vmatprep.subr.bf16.mxu0 %v4356_v59  ;;  %v4436_v59 = vld [vmem:[%s5390_s11 + $0x620] ss:$8 sps:$4 sm:$0xff]  }
 0x108   : > { %3330 = vmatpush1.bf16.msra.mxu1 %v4351_v60  ;;  %v4441_v60 = vld [vmem:[%s5390_s11 + $0x234] ss:$8 sps:$4 sm:$0xff]  }
 0x109   : > { %3494 = vmatpush1.bf16.msra.mxu0 %v4354_v61  ;;  %3331 = vmatprep.subr.bf16.mxu1 %v4359_v62  ;;  %v4444_v61 = vld [vmem:[%s5390_s11 + $0x634] ss:$8 sps:$4 sm:$0xff]   ;;  %v4439_v62 = vld [vmem:[%s5390_s11 + $0x230] ss:$8 sps:$4 sm:$0xff]  }
 0x10a   : > { %3495 = vmatprep.subr.bf16.mxu0 %v4362_v63  ;;  %v4442_v63 = vld [vmem:[%s5390_s11 + $0x630] ss:$8 sps:$4 sm:$0xff]  }
 0x10c   : > { %3332 = vmatpush1.bf16.msra.mxu1 %v4357_v1  ;;  %v4450_v1 = vld [vmem:[%s5390_s11 + $0x644] ss:$8 sps:$4 sm:$0xff]  }
 0x10d   : > { %3496 = vmatpush1.bf16.msra.mxu0 %v4360_v2  ;;  %3333 = vmatprep.subr.bf16.mxu1 %v4365_v5  ;;  %v4445_v2 = vld [vmem:[%s5390_s11 + $0x240] ss:$8 sps:$4 sm:$0xff]   ;;  %v4456_v5 = vld [vmem:[%s5390_s11 + $0x654] ss:$8 sps:$4 sm:$0xff]  }
 0x10e   : > { %3497 = vmatprep.subr.bf16.mxu0 %v4368_v7  ;;  %v4454_v7 = vld [vmem:[%s5390_s11 + $0x650] ss:$8 sps:$4 sm:$0xff]  }
 0x110   : > { %3334 = vmatpush1.bf16.msra.mxu1 %v4363_v8  ;;  %v4459_v8 = vld [vmem:[%s5390_s11 + $0x264] ss:$8 sps:$4 sm:$0xff]  }
 0x111   : > { %3498 = vmatpush1.bf16.msra.mxu0 %v4366_v9  ;;  %3335 = vmatprep.subr.bf16.mxu1 %v4371_v10  ;;  %v4462_v9 = vld [vmem:[%s5390_s11 + $0x664] ss:$8 sps:$4 sm:$0xff]   ;;  %v4457_v10 = vld [vmem:[%s5390_s11 + $0x260] ss:$8 sps:$4 sm:$0xff]  }
 0x112   : > { %3499 = vmatprep.subr.bf16.mxu0 %v4374_v11  ;;  %v4460_v11 = vld [vmem:[%s5390_s11 + $0x660] ss:$8 sps:$4 sm:$0xff]  }
 0x114   : > { %3336 = vmatpush1.bf16.msra.mxu1 %v4369_v12  ;;  %v4465_v12 = vld [vmem:[%s5390_s11 + $0x274] ss:$8 sps:$4 sm:$0xff]  }
 0x115   : > { %3500 = vmatpush1.bf16.msra.mxu0 %v4372_v13  ;;  %3337 = vmatprep.subr.bf16.mxu1 %v4377_v14  ;;  %v4468_v13 = vld [vmem:[%s5390_s11 + $0x674] ss:$8 sps:$4 sm:$0xff]   ;;  %v4463_v14 = vld [vmem:[%s5390_s11 + $0x270] ss:$8 sps:$4 sm:$0xff]  }
 0x116   : > { %3501 = vmatprep.subr.bf16.mxu0 %v4380_v15  ;;  %v4466_v15 = vld [vmem:[%s5390_s11 + $0x670] ss:$8 sps:$4 sm:$0xff]  }
 0x118   : > { %3338 = vmatpush1.bf16.msra.mxu1 %v4375_v16  ;;  %v4471_v16 = vld [vmem:[%s5390_s11 + $0x284] ss:$8 sps:$4 sm:$0xff]  }
 0x119   : > { %3502 = vmatpush1.bf16.msra.mxu0 %v4378_v17  ;;  %3339 = vmatprep.subr.bf16.mxu1 %v4383_v18  ;;  %v4474_v17 = vld [vmem:[%s5390_s11 + $0x684] ss:$8 sps:$4 sm:$0xff]   ;;  %v4469_v18 = vld [vmem:[%s5390_s11 + $0x280] ss:$8 sps:$4 sm:$0xff]  }
 0x11a   : > { %3503 = vmatprep.subr.bf16.mxu0 %v4386_v19  ;;  %v4472_v19 = vld [vmem:[%s5390_s11 + $0x680] ss:$8 sps:$4 sm:$0xff]  }
 0x11c   : > { %3340 = vmatpush1.bf16.msra.mxu1 %v4381_v20  ;;  %v4477_v20 = vld [vmem:[%s5390_s11 + $0x294] ss:$8 sps:$4 sm:$0xff]  }
 0x11d   : > { %3504 = vmatpush1.bf16.msra.mxu0 %v4384_v21  ;;  %3341 = vmatprep.subr.bf16.mxu1 %v4389_v22  ;;  %v4480_v21 = vld [vmem:[%s5390_s11 + $0x694] ss:$8 sps:$4 sm:$0xff]   ;;  %v4475_v22 = vld [vmem:[%s5390_s11 + $0x290] ss:$8 sps:$4 sm:$0xff]  }
 0x11e   : > { %3505 = vmatprep.subr.bf16.mxu0 %v4392_v23  ;;  %v4478_v23 = vld [vmem:[%s5390_s11 + $0x690] ss:$8 sps:$4 sm:$0xff]  }
 0x120   : > { %3342 = vmatpush1.bf16.msra.mxu1 %v4387_v24  ;;  %v4483_v24 = vld [vmem:[%s5390_s11 + $0x2a4] ss:$8 sps:$4 sm:$0xff]  }
 0x121   : > { %3506 = vmatpush1.bf16.msra.mxu0 %v4390_v25  ;;  %3343 = vmatprep.subr.bf16.mxu1 %v4395_v26  ;;  %v4486_v25 = vld [vmem:[%s5390_s11 + $0x6a4] ss:$8 sps:$4 sm:$0xff]   ;;  %v4481_v26 = vld [vmem:[%s5390_s11 + $0x2a0] ss:$8 sps:$4 sm:$0xff]  }
 0x122   : > { %3507 = vmatprep.subr.bf16.mxu0 %v4398_v27  ;;  %v4484_v27 = vld [vmem:[%s5390_s11 + $0x6a0] ss:$8 sps:$4 sm:$0xff]  }
 0x124   : > { %3344 = vmatpush1.bf16.msra.mxu1 %v4393_v28  ;;  %v4489_v28 = vld [vmem:[%s5390_s11 + $0x2b4] ss:$8 sps:$4 sm:$0xff]  }
 0x125   : > { %3508 = vmatpush1.bf16.msra.mxu0 %v4396_v29  ;;  %3345 = vmatprep.subr.bf16.mxu1 %v4401_v30  ;;  %v4492_v29 = vld [vmem:[%s5390_s11 + $0x6b4] ss:$8 sps:$4 sm:$0xff]   ;;  %v4487_v30 = vld [vmem:[%s5390_s11 + $0x2b0] ss:$8 sps:$4 sm:$0xff]  }
 0x126   : > { %3509 = vmatprep.subr.bf16.mxu0 %v4404_v31  ;;  %v4490_v31 = vld [vmem:[%s5390_s11 + $0x6b0] ss:$8 sps:$4 sm:$0xff]  }
 0x128   : > { %3346 = vmatpush1.bf16.msra.mxu1 %v4399_v32  ;;  %v4495_v32 = vld [vmem:[%s5390_s11 + $0x2c4] ss:$8 sps:$4 sm:$0xff]  }
 0x129   : > { %3510 = vmatpush1.bf16.msra.mxu0 %v4402_v33  ;;  %3347 = vmatprep.subr.bf16.mxu1 %v4407_v34  ;;  %v4498_v33 = vld [vmem:[%s5390_s11 + $0x6c4] ss:$8 sps:$4 sm:$0xff]   ;;  %v4493_v34 = vld [vmem:[%s5390_s11 + $0x2c0] ss:$8 sps:$4 sm:$0xff]  }
 0x12a   : > { %3511 = vmatprep.subr.bf16.mxu0 %v4410_v35  ;;  %v4496_v35 = vld [vmem:[%s5390_s11 + $0x6c0] ss:$8 sps:$4 sm:$0xff]  }
 0x12c   : > { %3348 = vmatpush1.bf16.msra.mxu1 %v4405_v36  ;;  %v4501_v36 = vld [vmem:[%s5390_s11 + $0x2d4] ss:$8 sps:$4 sm:$0xff]  }
 0x12d   : > { %3512 = vmatpush1.bf16.msra.mxu0 %v4408_v37  ;;  %3349 = vmatprep.subr.bf16.mxu1 %v4413_v38  ;;  %v4504_v37 = vld [vmem:[%s5390_s11 + $0x6d4] ss:$8 sps:$4 sm:$0xff]   ;;  %v4499_v38 = vld [vmem:[%s5390_s11 + $0x2d0] ss:$8 sps:$4 sm:$0xff]  }
 0x12e   : > { %3513 = vmatprep.subr.bf16.mxu0 %v4416_v39  ;;  %v4502_v39 = vld [vmem:[%s5390_s11 + $0x6d0] ss:$8 sps:$4 sm:$0xff]  }
 0x130   : > { %3350 = vmatpush1.bf16.msra.mxu1 %v4411_v40  ;;  %v4507_v40 = vld [vmem:[%s5390_s11 + $0x2e4] ss:$8 sps:$4 sm:$0xff]  }
 0x131   : > { %3514 = vmatpush1.bf16.msra.mxu0 %v4414_v41  ;;  %3360 = vmatprep.subr.bf16.mxu1 %v4421_v42  ;;  %v4510_v41 = vld [vmem:[%s5390_s11 + $0x6e4] ss:$8 sps:$4 sm:$0xff]   ;;  %v4505_v42 = vld [vmem:[%s5390_s11 + $0x2e0] ss:$8 sps:$4 sm:$0xff]  }
 0x132   : > { %3524 = vmatprep.subr.bf16.mxu0 %v4426_v43  ;;  %v4508_v43 = vld [vmem:[%s5390_s11 + $0x6e0] ss:$8 sps:$4 sm:$0xff]  }
 0x133   : > { %3352 = vmatmul.mubr.bf16.vlgmr.msra.gmra.mrb[0].mxu1 %v3821_v44  ;;  %v4513_v44 = vld [vmem:[%s5390_s11 + $0x2f4] ss:$8 sps:$4 sm:$0xff]  }
 0x134   : > { %3516 = vmatmul.mubr.bf16.vlgmr.msra.gmra.mrb[0].mxu0 %v3829_v46  ;;  %3361 = vmatpush1.bf16.msra.mxu1 %v4419_v45  ;;  %v4516_v45 = vld [vmem:[%s5390_s11 + $0x6f4] ss:$8 sps:$4 sm:$0xff]   ;;  %v4511_v46 = vld [vmem:[%s5390_s11 + $0x2f0] ss:$8 sps:$4 sm:$0xff]  }
 0x135   : > { %3525 = vmatpush1.bf16.msra.mxu0 %v4424_v47  ;;  %3362 = vmatprep.subr.bf16.mxu1 %v4429_v48  ;;  %v4514_v47 = vld [vmem:[%s5390_s11 + $0x6f0] ss:$8 sps:$4 sm:$0xff]   ;;  %v4521_v48 = vld [vmem:[%s5390_s11 + $0x304] ss:$8 sps:$4 sm:$0xff]  }
 0x136   : > { %3526 = vmatprep.subr.bf16.mxu0 %v4432_v49  ;;  %3392 = vmatprep.mubr.bf16.mxu1 %v3824_v51  ;;  %v4526_v49 = vld [vmem:[%s5390_s11 + $0x704] ss:$8 sps:$4 sm:$0xff]   ;;  %v4519_v51 = vld [vmem:[%s5390_s11 + $0x300] ss:$8 sps:$4 sm:$0xff]  }
 0x137   : > { %3556 = vmatprep.mubr.bf16.mxu0 %v3832_v55  ;;  %v3831_v55 = vcombine.low %v5558_v52, %v5558_v52 }
 0x138   : > { %3363 = vmatpush1.bf16.msra.mxu1 %v4427_v53  ;;  %v4524_v53 = vld [vmem:[%s5390_s11 + $0x700] ss:$8 sps:$4 sm:$0xff]  }
 0x139   : > { %3527 = vmatpush1.bf16.msra.mxu0 %v4430_v54  ;;  %3364 = vmatprep.subr.bf16.mxu1 %v4435_v56  ;;  %v3823_v54 = vcombine.low %v5553_v50, %v5553_v50  ;;  %v5629_v56 = vld [vmem:[%s5444_s23 + $0x18] sm:$0xff] }
 0x13a   : > { %3528 = vmatprep.subr.bf16.mxu0 %v4438_v57  ;;  %v5632_v57 = vld [vmem:[%s5444_s23 + $0x38] sm:$0xff]  ;;  %v3826_v50 = vcombine.high %v5629_v56, %v5629_v56 }
 0x13b   : > { %v3834_v52 = vcombine.high %v5632_v57, %v5632_v57 }
 0x13c   : > { %3365 = vmatpush1.bf16.msra.mxu1 %v4433_v58  ;;  %v4529_v58 = vld [vmem:[%s5390_s11 + $0x314] ss:$8 sps:$4 sm:$0xff]  }
 0x13d   : > { %3529 = vmatpush1.bf16.msra.mxu0 %v4436_v59  ;;  %3366 = vmatprep.subr.bf16.mxu1 %v4441_v60  ;;  %v4532_v59 = vld [vmem:[%s5390_s11 + $0x714] ss:$8 sps:$4 sm:$0xff]   ;;  %v4527_v60 = vld [vmem:[%s5390_s11 + $0x310] ss:$8 sps:$4 sm:$0xff]  }
 0x13e   : > { %3530 = vmatprep.subr.bf16.mxu0 %v4444_v61  ;;  %v4530_v61 = vld [vmem:[%s5390_s11 + $0x710] ss:$8 sps:$4 sm:$0xff]  }
 0x140   : > { %3367 = vmatpush1.bf16.msra.mxu1 %v4439_v62  ;;  %v4535_v62 = vld [vmem:[%s5390_s11 + $0x324] ss:$8 sps:$4 sm:$0xff]  }
 0x141   : > { %3531 = vmatpush1.bf16.msra.mxu0 %v4442_v63  ;;  %3368 = vmatprep.subr.bf16.mxu1 %v4447_v0  ;;  %v4538_v63 = vld [vmem:[%s5390_s11 + $0x724] ss:$8 sps:$4 sm:$0xff]   ;;  %v4533_v0 = vld [vmem:[%s5390_s11 + $0x320] ss:$8 sps:$4 sm:$0xff]  }
 0x142   : > { %3532 = vmatprep.subr.bf16.mxu0 %v4450_v1  ;;  %v4536_v1 = vld [vmem:[%s5390_s11 + $0x720] ss:$8 sps:$4 sm:$0xff]  }
 0x144   : > { %3369 = vmatpush1.bf16.msra.mxu1 %v4445_v2  ;;  %v4541_v2 = vld [vmem:[%s5390_s11 + $0x334] ss:$8 sps:$4 sm:$0xff]  }
 0x145   : > { %3533 = vmatpush1.bf16.msra.mxu0 %v4448_v3  ;;  %3370 = vmatprep.subr.bf16.mxu1 %v4453_v4  ;;  %v4544_v3 = vld [vmem:[%s5390_s11 + $0x734] ss:$8 sps:$4 sm:$0xff]   ;;  %v4539_v4 = vld [vmem:[%s5390_s11 + $0x330] ss:$8 sps:$4 sm:$0xff]  }
 0x146   : > { %3534 = vmatprep.subr.bf16.mxu0 %v4456_v5  ;;  %v4542_v5 = vld [vmem:[%s5390_s11 + $0x730] ss:$8 sps:$4 sm:$0xff]  }
 0x148   : > { %3371 = vmatpush1.bf16.msra.mxu1 %v4451_v6  ;;  %v4547_v6 = vld [vmem:[%s5390_s11 + $0x344] ss:$8 sps:$4 sm:$0xff]  }
 0x149   : > { %3535 = vmatpush1.bf16.msra.mxu0 %v4454_v7  ;;  %3372 = vmatprep.subr.bf16.mxu1 %v4459_v8  ;;  %v4550_v7 = vld [vmem:[%s5390_s11 + $0x744] ss:$8 sps:$4 sm:$0xff]   ;;  %v4545_v8 = vld [vmem:[%s5390_s11 + $0x340] ss:$8 sps:$4 sm:$0xff]  }
 0x14a   : > { %3536 = vmatprep.subr.bf16.mxu0 %v4462_v9  ;;  %v4548_v9 = vld [vmem:[%s5390_s11 + $0x740] ss:$8 sps:$4 sm:$0xff]  }
 0x14c   : > { %3373 = vmatpush1.bf16.msra.mxu1 %v4457_v10  ;;  %v4553_v10 = vld [vmem:[%s5390_s11 + $0x354] ss:$8 sps:$4 sm:$0xff]  }
 0x14d   : > { %3537 = vmatpush1.bf16.msra.mxu0 %v4460_v11  ;;  %3374 = vmatprep.subr.bf16.mxu1 %v4465_v12  ;;  %v4556_v11 = vld [vmem:[%s5390_s11 + $0x754] ss:$8 sps:$4 sm:$0xff]   ;;  %v4551_v12 = vld [vmem:[%s5390_s11 + $0x350] ss:$8 sps:$4 sm:$0xff]  }
 0x14e   : > { %3538 = vmatprep.subr.bf16.mxu0 %v4468_v13  ;;  %v4554_v13 = vld [vmem:[%s5390_s11 + $0x750] ss:$8 sps:$4 sm:$0xff]  }
 0x150   : > { %3375 = vmatpush1.bf16.msra.mxu1 %v4463_v14  ;;  %v4559_v14 = vld [vmem:[%s5390_s11 + $0x364] ss:$8 sps:$4 sm:$0xff]  }
 0x151   : > { %3539 = vmatpush1.bf16.msra.mxu0 %v4466_v15  ;;  %3376 = vmatprep.subr.bf16.mxu1 %v4471_v16  ;;  %v4562_v15 = vld [vmem:[%s5390_s11 + $0x764] ss:$8 sps:$4 sm:$0xff]   ;;  %v4557_v16 = vld [vmem:[%s5390_s11 + $0x360] ss:$8 sps:$4 sm:$0xff]  }
 0x152   : > { %3540 = vmatprep.subr.bf16.mxu0 %v4474_v17  ;;  %v4560_v17 = vld [vmem:[%s5390_s11 + $0x760] ss:$8 sps:$4 sm:$0xff]  }
 0x154   : > { %3377 = vmatpush1.bf16.msra.mxu1 %v4469_v18  ;;  %v4565_v18 = vld [vmem:[%s5390_s11 + $0x374] ss:$8 sps:$4 sm:$0xff]  }
 0x155   : > { %3541 = vmatpush1.bf16.msra.mxu0 %v4472_v19  ;;  %3378 = vmatprep.subr.bf16.mxu1 %v4477_v20  ;;  %v4568_v19 = vld [vmem:[%s5390_s11 + $0x774] ss:$8 sps:$4 sm:$0xff]   ;;  %v4563_v20 = vld [vmem:[%s5390_s11 + $0x370] ss:$8 sps:$4 sm:$0xff]  }
 0x156   : > { %3542 = vmatprep.subr.bf16.mxu0 %v4480_v21  ;;  %v4566_v21 = vld [vmem:[%s5390_s11 + $0x770] ss:$8 sps:$4 sm:$0xff]  }
 0x158   : > { %3379 = vmatpush1.bf16.msra.mxu1 %v4475_v22  ;;  %v4571_v22 = vld [vmem:[%s5390_s11 + $0x384] ss:$8 sps:$4 sm:$0xff]  }
 0x159   : > { %3543 = vmatpush1.bf16.msra.mxu0 %v4478_v23  ;;  %3380 = vmatprep.subr.bf16.mxu1 %v4483_v24  ;;  %v4574_v23 = vld [vmem:[%s5390_s11 + $0x784] ss:$8 sps:$4 sm:$0xff]   ;;  %v4569_v24 = vld [vmem:[%s5390_s11 + $0x380] ss:$8 sps:$4 sm:$0xff]  }
 0x15a   : > { %3544 = vmatprep.subr.bf16.mxu0 %v4486_v25  ;;  %v4572_v25 = vld [vmem:[%s5390_s11 + $0x780] ss:$8 sps:$4 sm:$0xff]  }
 0x15c   : > { %3381 = vmatpush1.bf16.msra.mxu1 %v4481_v26  ;;  %v4577_v26 = vld [vmem:[%s5390_s11 + $0x394] ss:$8 sps:$4 sm:$0xff]  }
 0x15d   : > { %3545 = vmatpush1.bf16.msra.mxu0 %v4484_v27  ;;  %3382 = vmatprep.subr.bf16.mxu1 %v4489_v28  ;;  %v4580_v27 = vld [vmem:[%s5390_s11 + $0x794] ss:$8 sps:$4 sm:$0xff]   ;;  %v4575_v28 = vld [vmem:[%s5390_s11 + $0x390] ss:$8 sps:$4 sm:$0xff]  }
 0x15e   : > { %3546 = vmatprep.subr.bf16.mxu0 %v4492_v29  ;;  %v4578_v29 = vld [vmem:[%s5390_s11 + $0x790] ss:$8 sps:$4 sm:$0xff]  }
 0x160   : > { %3383 = vmatpush1.bf16.msra.mxu1 %v4487_v30  ;;  %v4583_v30 = vld [vmem:[%s5390_s11 + $0x3a4] ss:$8 sps:$4 sm:$0xff]  }
 0x161   : > { %3547 = vmatpush1.bf16.msra.mxu0 %v4490_v31  ;;  %3384 = vmatprep.subr.bf16.mxu1 %v4495_v32  ;;  %v4586_v31 = vld [vmem:[%s5390_s11 + $0x7a4] ss:$8 sps:$4 sm:$0xff]   ;;  %v4581_v32 = vld [vmem:[%s5390_s11 + $0x3a0] ss:$8 sps:$4 sm:$0xff]  }
 0x162   : > { %3548 = vmatprep.subr.bf16.mxu0 %v4498_v33  ;;  %v4584_v33 = vld [vmem:[%s5390_s11 + $0x7a0] ss:$8 sps:$4 sm:$0xff]  }
 0x164   : > { %3385 = vmatpush1.bf16.msra.mxu1 %v4493_v34  ;;  %v4589_v34 = vld [vmem:[%s5390_s11 + $0x3b4] ss:$8 sps:$4 sm:$0xff]  }
 0x165   : > { %3549 = vmatpush1.bf16.msra.mxu0 %v4496_v35  ;;  %3386 = vmatprep.subr.bf16.mxu1 %v4501_v36  ;;  %v4592_v35 = vld [vmem:[%s5390_s11 + $0x7b4] ss:$8 sps:$4 sm:$0xff]   ;;  %v4587_v36 = vld [vmem:[%s5390_s11 + $0x3b0] ss:$8 sps:$4 sm:$0xff]  }
 0x166   : > { %3550 = vmatprep.subr.bf16.mxu0 %v4504_v37  ;;  %v4590_v37 = vld [vmem:[%s5390_s11 + $0x7b0] ss:$8 sps:$4 sm:$0xff]  }
 0x168   : > { %3387 = vmatpush1.bf16.msra.mxu1 %v4499_v38  ;;  %v4595_v38 = vld [vmem:[%s5390_s11 + $0x3c4] ss:$8 sps:$4 sm:$0xff]  }
 0x169   : > { %3551 = vmatpush1.bf16.msra.mxu0 %v4502_v39  ;;  %3388 = vmatprep.subr.bf16.mxu1 %v4507_v40  ;;  %v4598_v39 = vld [vmem:[%s5390_s11 + $0x7c4] ss:$8 sps:$4 sm:$0xff]   ;;  %v4593_v40 = vld [vmem:[%s5390_s11 + $0x3c0] ss:$8 sps:$4 sm:$0xff]  }
 0x16a   : > { %3552 = vmatprep.subr.bf16.mxu0 %v4510_v41  ;;  %v4596_v41 = vld [vmem:[%s5390_s11 + $0x7c0] ss:$8 sps:$4 sm:$0xff]  }
 0x16c   : > { %3389 = vmatpush1.bf16.msra.mxu1 %v4505_v42  ;;  %v4601_v42 = vld [vmem:[%s5390_s11 + $0x3d4] ss:$8 sps:$4 sm:$0xff]  }
 0x16d   : > { %3553 = vmatpush1.bf16.msra.mxu0 %v4508_v43  ;;  %3390 = vmatprep.subr.bf16.mxu1 %v4513_v44  ;;  %v4604_v43 = vld [vmem:[%s5390_s11 + $0x7d4] ss:$8 sps:$4 sm:$0xff]   ;;  %v4599_v44 = vld [vmem:[%s5390_s11 + $0x3d0] ss:$8 sps:$4 sm:$0xff]  }
 0x16e   : > { %3554 = vmatprep.subr.bf16.mxu0 %v4516_v45  ;;  %v4602_v45 = vld [vmem:[%s5390_s11 + $0x7d0] ss:$8 sps:$4 sm:$0xff]  }
 0x170   : > { %3391 = vmatpush1.bf16.msra.mxu1 %v4511_v46  ;;  %v4607_v46 = vld [vmem:[%s5390_s11 + $0x3e4] ss:$8 sps:$4 sm:$0xff]  }
 0x171   : > { %3555 = vmatpush1.bf16.msra.mxu0 %v4514_v47  ;;  %3401 = vmatprep.subr.bf16.mxu1 %v4521_v48  ;;  %v4610_v47 = vld [vmem:[%s5390_s11 + $0x7e4] ss:$8 sps:$4 sm:$0xff]   ;;  %v4605_v48 = vld [vmem:[%s5390_s11 + $0x3e0] ss:$8 sps:$4 sm:$0xff]  }
 0x172   : > { %3565 = vmatprep.subr.bf16.mxu0 %v4526_v49  ;;  %v4608_v49 = vld [vmem:[%s5390_s11 + $0x7e0] ss:$8 sps:$4 sm:$0xff]  }
 0x173   : > { %3393 = vmatmul.mubr.bf16.vlgmr.msra.gmra.mrb[0].mxu1 %v3823_v54  ;;  %v4611_v54 = vld [vmem:[%s5390_s11 + $0x3f0] ss:$8 sps:$4 sm:$0xff]  }
 0x174   : > { %3557 = vmatmul.mubr.bf16.vlgmr.msra.gmra.mrb[0].mxu0 %v3831_v55  ;;  %3402 = vmatpush1.bf16.msra.mxu1 %v4519_v51  ;;  %v4613_v51 = vld [vmem:[%s5390_s11 + $0x3f4] ss:$8 sps:$4 sm:$0xff]   ;;  %v4614_v55 = vld [vmem:[%s5390_s11 + $0x7f0] ss:$8 sps:$4 sm:$0xff]  }
 0x175   : > { %3566 = vmatpush1.bf16.msra.mxu0 %v4524_v53  ;;  %3403 = vmatprep.subr.bf16.mxu1 %v4529_v58  ;;  %v4616_v53 = vld [vmem:[%s5390_s11 + $0x7f4] ss:$8 sps:$4 sm:$0xff]   ;;  %v4623_v58 = vld [vmem:[%s5390_s11 + $0x804] ss:$8 sps:$4 sm:$0xff]  }
 0x176   : > { %3567 = vmatprep.subr.bf16.mxu0 %v4532_v59  ;;  %3433 = vmatprep.mubr.bf16.mxu1 %v3826_v50  ;;  %v5700_v59 = vld [vmem:[%s5444_s23 + $0x40] sm:$0xff]  ;;  %v3825_v50 = vcombine.low %v5629_v56, %v5629_v56  ;;  %v4624_v56 = vld [vmem:[%s5390_s11 + $0x810] ss:$8 sps:$4 sm:$0xff]  }
 0x177   : > { %3597 = vmatprep.mubr.bf16.mxu0 %v3834_v52  ;;  %v3833_v52 = vcombine.low %v5632_v57, %v5632_v57  ;;  %v4629_v57 = vld [vmem:[%s5390_s11 + $0x824] ss:$8 sps:$4 sm:$0xff]  }
 0x178   : > { %3404 = vmatpush1.bf16.msra.mxu1 %v4527_v60  ;;  %v4621_v60 = vld [vmem:[%s5390_s11 + $0x800] ss:$8 sps:$4 sm:$0xff]  }
 0x179   : > { %3568 = vmatpush1.bf16.msra.mxu0 %v4530_v61  ;;  %3405 = vmatprep.subr.bf16.mxu1 %v4535_v62  ;;  %v3836_v61 = vcombine.high %v5700_v59, %v5700_v59  ;;  %v4626_v62 = vld [vmem:[%s5390_s11 + $0x814] ss:$8 sps:$4 sm:$0xff]  }
 0x17a   : > { %3569 = vmatprep.subr.bf16.mxu0 %v4538_v63  ;;  %v4627_v63 = vld [vmem:[%s5390_s11 + $0x820] ss:$8 sps:$4 sm:$0xff]  }
 0x17c   : > { %3406 = vmatpush1.bf16.msra.mxu1 %v4533_v0  ;;  %v4632_v0 = vld [vmem:[%s5390_s11 + $0x834] ss:$8 sps:$4 sm:$0xff]  }
 0x17d   : > { %3570 = vmatpush1.bf16.msra.mxu0 %v4536_v1  ;;  %3407 = vmatprep.subr.bf16.mxu1 %v4541_v2  ;;  %v4630_v1 = vld [vmem:[%s5390_s11 + $0x830] ss:$8 sps:$4 sm:$0xff]   ;;  %v4635_v2 = vld [vmem:[%s5390_s11 + $0x844] ss:$8 sps:$4 sm:$0xff]  }
 0x17e   : > { %3571 = vmatprep.subr.bf16.mxu0 %v4544_v3  ;;  %v4633_v3 = vld [vmem:[%s5390_s11 + $0x840] ss:$8 sps:$4 sm:$0xff]  }
 0x180   : > { %3408 = vmatpush1.bf16.msra.mxu1 %v4539_v4  ;;  %v4638_v4 = vld [vmem:[%s5390_s11 + $0x854] ss:$8 sps:$4 sm:$0xff]  }
 0x181   : > { %3572 = vmatpush1.bf16.msra.mxu0 %v4542_v5  ;;  %3409 = vmatprep.subr.bf16.mxu1 %v4547_v6  ;;  %v4636_v5 = vld [vmem:[%s5390_s11 + $0x850] ss:$8 sps:$4 sm:$0xff]   ;;  %v4641_v6 = vld [vmem:[%s5390_s11 + $0x864] ss:$8 sps:$4 sm:$0xff]  }
 0x182   : > { %3573 = vmatprep.subr.bf16.mxu0 %v4550_v7  ;;  %v4639_v7 = vld [vmem:[%s5390_s11 + $0x860] ss:$8 sps:$4 sm:$0xff]  }
 0x184   : > { %3410 = vmatpush1.bf16.msra.mxu1 %v4545_v8  ;;  %v4644_v8 = vld [vmem:[%s5390_s11 + $0x874] ss:$8 sps:$4 sm:$0xff]  }
 0x185   : > { %3574 = vmatpush1.bf16.msra.mxu0 %v4548_v9  ;;  %3411 = vmatprep.subr.bf16.mxu1 %v4553_v10  ;;  %v4642_v9 = vld [vmem:[%s5390_s11 + $0x870] ss:$8 sps:$4 sm:$0xff]   ;;  %v4647_v10 = vld [vmem:[%s5390_s11 + $0x884] ss:$8 sps:$4 sm:$0xff]  }
 0x186   : > { %3575 = vmatprep.subr.bf16.mxu0 %v4556_v11  ;;  %v4645_v11 = vld [vmem:[%s5390_s11 + $0x880] ss:$8 sps:$4 sm:$0xff]  }
 0x188   : > { %3412 = vmatpush1.bf16.msra.mxu1 %v4551_v12  ;;  %v4650_v12 = vld [vmem:[%s5390_s11 + $0x894] ss:$8 sps:$4 sm:$0xff]  }
 0x189   : > { %3576 = vmatpush1.bf16.msra.mxu0 %v4554_v13  ;;  %3413 = vmatprep.subr.bf16.mxu1 %v4559_v14  ;;  %v4648_v13 = vld [vmem:[%s5390_s11 + $0x890] ss:$8 sps:$4 sm:$0xff]   ;;  %v4653_v14 = vld [vmem:[%s5390_s11 + $0x8a4] ss:$8 sps:$4 sm:$0xff]  }
 0x18a   : > { %3577 = vmatprep.subr.bf16.mxu0 %v4562_v15  ;;  %v4651_v15 = vld [vmem:[%s5390_s11 + $0x8a0] ss:$8 sps:$4 sm:$0xff]  }
 0x18c   : > { %3414 = vmatpush1.bf16.msra.mxu1 %v4557_v16  ;;  %v4656_v16 = vld [vmem:[%s5390_s11 + $0x8b4] ss:$8 sps:$4 sm:$0xff]  }
 0x18d   : > { %3578 = vmatpush1.bf16.msra.mxu0 %v4560_v17  ;;  %3415 = vmatprep.subr.bf16.mxu1 %v4565_v18  ;;  %v4654_v17 = vld [vmem:[%s5390_s11 + $0x8b0] ss:$8 sps:$4 sm:$0xff]   ;;  %v4659_v18 = vld [vmem:[%s5390_s11 + $0x8c4] ss:$8 sps:$4 sm:$0xff]  }
 0x18e   : > { %3579 = vmatprep.subr.bf16.mxu0 %v4568_v19  ;;  %v4657_v19 = vld [vmem:[%s5390_s11 + $0x8c0] ss:$8 sps:$4 sm:$0xff]  }
 0x190   : > { %3416 = vmatpush1.bf16.msra.mxu1 %v4563_v20  ;;  %v4662_v20 = vld [vmem:[%s5390_s11 + $0x8d4] ss:$8 sps:$4 sm:$0xff]  }
 0x191   : > { %3580 = vmatpush1.bf16.msra.mxu0 %v4566_v21  ;;  %3417 = vmatprep.subr.bf16.mxu1 %v4571_v22  ;;  %v4660_v21 = vld [vmem:[%s5390_s11 + $0x8d0] ss:$8 sps:$4 sm:$0xff]   ;;  %v4665_v22 = vld [vmem:[%s5390_s11 + $0x8e4] ss:$8 sps:$4 sm:$0xff]  }
 0x192   : > { %3581 = vmatprep.subr.bf16.mxu0 %v4574_v23  ;;  %v4663_v23 = vld [vmem:[%s5390_s11 + $0x8e0] ss:$8 sps:$4 sm:$0xff]  }
 0x194   : > { %3418 = vmatpush1.bf16.msra.mxu1 %v4569_v24  ;;  %v4668_v24 = vld [vmem:[%s5390_s11 + $0x8f4] ss:$8 sps:$4 sm:$0xff]  }
 0x195   : > { %3582 = vmatpush1.bf16.msra.mxu0 %v4572_v25  ;;  %3419 = vmatprep.subr.bf16.mxu1 %v4577_v26  ;;  %v4666_v25 = vld [vmem:[%s5390_s11 + $0x8f0] ss:$8 sps:$4 sm:$0xff]   ;;  %v3835_v26 = vcombine.low %v5700_v59, %v5700_v59 }
 0x196   : > { %3583 = vmatprep.subr.bf16.mxu0 %v4580_v27 }
 0x198   : > { %3420 = vmatpush1.bf16.msra.mxu1 %v4575_v28 }
 0x199   : > { %3584 = vmatpush1.bf16.msra.mxu0 %v4578_v29  ;;  %3421 = vmatprep.subr.bf16.mxu1 %v4583_v30 }
 0x19a   : > { %3585 = vmatprep.subr.bf16.mxu0 %v4586_v31  ;;  %v1765_v31 = vlaneseq }
 0x19c   : > { %3422 = vmatpush1.bf16.msra.mxu1 %v4581_v32  ;;  %v1766_v32 = vshrl.u32 %v1765_v31, 7 }
 0x19d   : > { %3586 = vmatpush1.bf16.msra.mxu0 %v4584_v33  ;;  %3423 = vmatprep.subr.bf16.mxu1 %v4589_v34  ;;  %v1763_v34 = vld [vmem:[%s1450_s30] sm:$0x3] }
 0x19e   : > { %3587 = vmatprep.subr.bf16.mxu0 %v4592_v35  ;;  %v1767_v33 = vsub.s32 0, %v1766_v32  ;;  %v1771_v35 = vsub.s32 1, %v1766_v32 }
 0x1a0   : > { %3424 = vmatpush1.bf16.msra.mxu1 %v4587_v36  ;;  %v1768_v36 = vrot.slane %v1763_v34, %v1767_v33 }
 0x1a1   : > { %3588 = vmatpush1.bf16.msra.mxu0 %v4590_v37  ;;  %3425 = vmatprep.subr.bf16.mxu1 %v4595_v38  ;;  %v1772_v37 = vrot.slane %v1763_v34, %v1771_v35 }
 0x1a2   : > { %3589 = vmatprep.subr.bf16.mxu0 %v4598_v39 }
 0x1a4   : > { %3426 = vmatpush1.bf16.msra.mxu1 %v4593_v40 }
 0x1a5   : > { %3590 = vmatpush1.bf16.msra.mxu0 %v4596_v41  ;;  %3427 = vmatprep.subr.bf16.mxu1 %v4601_v42 }
 0x1a6   : > { %3591 = vmatprep.subr.bf16.mxu0 %v4604_v43 }
 0x1a8   : > { %3428 = vmatpush1.bf16.msra.mxu1 %v4599_v44 }
 0x1a9   : > { %3592 = vmatpush1.bf16.msra.mxu0 %v4602_v45  ;;  %3429 = vmatprep.subr.bf16.mxu1 %v4607_v46 }
 0x1aa   : > { %3593 = vmatprep.subr.bf16.mxu0 %v4610_v47 }
 0x1ac   : > { %3430 = vmatpush1.bf16.msra.mxu1 %v4605_v48 }
 0x1ad   : > { %3594 = vmatpush1.bf16.msra.mxu0 %v4608_v49  ;;  %3431 = vmatprep.subr.bf16.mxu1 %v4613_v51 }
 0x1ae   : > { %3595 = vmatprep.subr.bf16.mxu0 %v4616_v53 }
 0x1b0   : > { %3432 = vmatpush1.bf16.msra.mxu1 %v4611_v54 }
 0x1b1   : > { %3596 = vmatpush1.bf16.msra.mxu0 %v4614_v55 }
 0x1b2   : > { %3606 = vmatprep.subr.bf16.mxu0 %v4623_v58 }
 0x1b3   : > { %3434 = vmatmul.mubr.bf16.vlgmr.msra.gmra.mrb[0].mxu1 %v3825_v50 }
 0x1b4   : > { %3598 = vmatmul.mubr.bf16.vlgmr.msra.gmra.mrb[0].mxu0 %v3833_v52 }
 0x1b5   : > { %3607 = vmatpush1.bf16.msra.mxu0 %v4621_v60  ;;  %3638 = vmatprep.mubr.bf16.mxu0 %v3836_v61 }
 0x1b6   : > { %3608 = vmatprep.subr.bf16.mxu0 %v4626_v62 }
 0x1b9   : > { %3609 = vmatpush1.bf16.msra.mxu0 %v4624_v56 }
 0x1ba   : > { %3610 = vmatprep.subr.bf16.mxu0 %v4629_v57 }
 0x1bd   : > { %3611 = vmatpush1.bf16.msra.mxu0 %v4627_v63 }
 0x1be   : > { %3612 = vmatprep.subr.bf16.mxu0 %v4632_v0 }
 0x1c1   : > { %3613 = vmatpush1.bf16.msra.mxu0 %v4630_v1 }
 0x1c2   : > { %3614 = vmatprep.subr.bf16.mxu0 %v4635_v2 }
 0x1c5   : > { %3615 = vmatpush1.bf16.msra.mxu0 %v4633_v3 }
 0x1c6   : > { %3616 = vmatprep.subr.bf16.mxu0 %v4638_v4 }
 0x1c9   : > { %3617 = vmatpush1.bf16.msra.mxu0 %v4636_v5 }
 0x1ca   : > { %3618 = vmatprep.subr.bf16.mxu0 %v4641_v6 }
 0x1cd   : > { %3619 = vmatpush1.bf16.msra.mxu0 %v4639_v7 }
 0x1ce   : > { %3620 = vmatprep.subr.bf16.mxu0 %v4644_v8 }
 0x1d1   : > { %3621 = vmatpush1.bf16.msra.mxu0 %v4642_v9 }
 0x1d2   : > { %3622 = vmatprep.subr.bf16.mxu0 %v4647_v10 }
 0x1d5   : > { %3623 = vmatpush1.bf16.msra.mxu0 %v4645_v11 }
 0x1d6   : > { %3624 = vmatprep.subr.bf16.mxu0 %v4650_v12 }
 0x1d9   : > { %3625 = vmatpush1.bf16.msra.mxu0 %v4648_v13 }
 0x1da   : > { %3626 = vmatprep.subr.bf16.mxu0 %v4653_v14 }
 0x1dd   : > { %3627 = vmatpush1.bf16.msra.mxu0 %v4651_v15 }
 0x1de   : > { %3628 = vmatprep.subr.bf16.mxu0 %v4656_v16 }
 0x1e1   : > { %3629 = vmatpush1.bf16.msra.mxu0 %v4654_v17 }
 0x1e2   : > { %3630 = vmatprep.subr.bf16.mxu0 %v4659_v18 }
 0x1e5   : > { %3631 = vmatpush1.bf16.msra.mxu0 %v4657_v19 }
 0x1e6   : > { %3632 = vmatprep.subr.bf16.mxu0 %v4662_v20 }
 0x1e9   : > { %3633 = vmatpush1.bf16.msra.mxu0 %v4660_v21 }
 0x1ea   : > { %3634 = vmatprep.subr.bf16.mxu0 %v4665_v22 }
 0x1ed   : > { %3635 = vmatpush1.bf16.msra.mxu0 %v4663_v23 }
 0x1ee   : > { %3636 = vmatprep.subr.bf16.mxu0 %v4668_v24 }
 0x1f1   : > { %3637 = vmatpush1.bf16.msra.mxu0 %v4666_v25 }
 0x1f4   : > { %3639 = vmatmul.mubr.bf16.vlgmr.msra.gmra.mrb[0].mxu0 %v3835_v26 }
 0x286   : > { %v3435_v27 = vpop.f32.mrb[0].mxu1 }
 0x287   : > { %v3437_v28 = vpop.f32.mrb[1].mxu1  ;;  %v4129_v38 = vadd.f32 %v3435_v27, %v1768_v36 }
 0x288   : > { %v3439_v29 = vpop.f32.mrb[2].mxu1  ;;  %v4131_v39 = vadd.f32 %v3437_v28, %v1772_v37 }
 0x289   : > { %v3440_v30 = vpop.f32.mrb[3].mxu1 }
 0x2c7   : > { %v3640_v40 = vpop.f32.mrb[0].mxu0 }
 0x2c8   : > { %v4130_v41 = vadd.f32 %v4129_v38, %v3640_v40  ;;  %v3642_v42 = vpop.f32.mrb[1].mxu0 }
 0x2c9   : > { %v4132_v43 = vadd.f32 %v4131_v39, %v3642_v42  ;;  %v3644_v44 = vpop.f32.mrb[2].mxu0 }
 0x2ca   : > { %v3647_v45 = vmax.f32 %v4130_v41, 0.0  ;;  %v3645_v46 = vpop.f32.mrb[3].mxu0 }
 0x2cb   : > { %v3648_v47 = vmax.f32 %v4132_v43, 0.0 }
 0x2cd   : > { %v4128_v48 = vpack.c.bf16 %v3648_v47, %v3647_v45 }
 0x2cf   : > { %3657 = vst [vmem:[%s1464_s5] sm:$0xff] %v4128_v48 }
 0x2d0 PF: > { %s13_s18 = sadd.s32 1, %s4725_s18   ;;  %s5774_s12 = smov %s4705_s13 }
 0x2d1   : > { %p10_p12 = scmp.ge.s32.totalorder %s13_s18, 6   ;;  %s5775_s13 = smov %s4798_s25 }
 0x2d2   : > { %s5776_s14 = smov %s4717_s16  ;;  %s5777_s15 = smov %s4721_s17 }
 0x2d3   : > { %s5778_s16 = smov %s5781_s19  ;;  %s5779_s17 = smov %s5785_s20 }
 0x2d4   :  { %12 = sbr.rel (!%p10_p12) target bundleno = 4 (0x4), region = 111 }

</bundles_post_ra>
